<compile_context>
chip_gen: v5e
topology: v5e:2x2
jax: 0.10.0
libtpu: 0.0.40
codegen_flags: <defaults>
</compile_context>

<pallas_src>
import functools

import jax
import jax.numpy as jnp
from jax.experimental import pallas as pl
from jax.experimental.pallas import tpu as pltpu


# ---------------------------------------------------------------------------
# Kernel 1: fused encoder features + max/mean pool + head MLP
# ---------------------------------------------------------------------------

def _encoder_head_kernel(x_ref, ew_ref, eb_ref, hw1_ref, hb1_ref, hw2_ref, hb2_ref,
                         z_ref, max_acc, sum_acc, *, inv_s):
    s = pl.program_id(1)

    @pl.when(s == 0)
    def _():
        max_acc[...] = jnp.full_like(max_acc, -jnp.inf)
        sum_acc[...] = jnp.zeros_like(sum_acc)

    x = x_ref[0]                         # (TS, Cin)
    w = ew_ref[...]                      # (Cin, F)
    # Tiny-K (Cin=4) contraction as rank-1 VPU multiply-adds: keeps the MXU free
    # and avoids padding a K=4 contraction to the full systolic depth.
    acc = x[:, 0:1] * w[0:1, :]
    for k in range(1, x.shape[1]):       # Cin is static & tiny
        acc = acc + x[:, k:k + 1] * w[k:k + 1, :]
    feat = jnp.maximum(acc + eb_ref[...], 0.0)          # (TS, F)

    # running max / running sum over the spatial axis
    max_acc[...] = jnp.maximum(max_acc[...], jnp.max(feat, axis=0, keepdims=True))
    sum_acc[...] = sum_acc[...] + jnp.sum(feat, axis=0, keepdims=True)

    @pl.when(s == pl.num_programs(1) - 1)
    def _():
        F = max_acc.shape[1]
        zmax = max_acc[...]                      # (1, F)
        zmean = sum_acc[...] * inv_s             # (1, F)
        # head: Dropout(p=0.4) is identity in eval mode.
        # concat(max, mean) @ W1  ==  max @ W1[:F] + mean @ W1[F:]  (no lane concat)
        h = (jnp.dot(zmax, hw1_ref[pl.ds(0, F), :], preferred_element_type=jnp.float32)
             + jnp.dot(zmean, hw1_ref[pl.ds(F, F), :], preferred_element_type=jnp.float32)
             + hb1_ref[...])
        h = jnp.maximum(h, 0.0)
        z = jnp.dot(h, hw2_ref[...], preferred_element_type=jnp.float32) + hb2_ref[...]
        z_ref[0] = z.astype(z_ref.dtype)


def encoder_head(x3, params, *, tile_s=128):
    """x3: (B, S, Cin) channels-last -> latent z: (B, latent)."""
    B, S, Cin = x3.shape
    F = params["enc_w"].shape[1]
    L = params["head_w2"].shape[1]
    TS = tile_s if S % tile_s == 0 else S
    ns = S // TS

    out = pl.pallas_call(
        functools.partial(_encoder_head_kernel, inv_s=1.0 / S),
        out_shape=jax.ShapeDtypeStruct((B, 1, L), jnp.float32),
        grid=(B, ns),
        in_specs=[
            pl.BlockSpec((1, TS, Cin), lambda b, s: (b, s, 0)),
            pl.BlockSpec((Cin, F), lambda b, s: (0, 0)),
            pl.BlockSpec((1, F), lambda b, s: (0, 0)),
            pl.BlockSpec((2 * F, 2 * F), lambda b, s: (0, 0)),
            pl.BlockSpec((1, 2 * F), lambda b, s: (0, 0)),
            pl.BlockSpec((2 * F, L), lambda b, s: (0, 0)),
            pl.BlockSpec((1, L), lambda b, s: (0, 0)),
        ],
        out_specs=pl.BlockSpec((1, 1, L), lambda b, s: (b, 0, 0)),
        scratch_shapes=[pltpu.VMEM((1, F), jnp.float32),
                        pltpu.VMEM((1, F), jnp.float32)],
        compiler_params=pltpu.CompilerParams(
            dimension_semantics=("parallel", "arbitrary"),
            vmem_limit_bytes=32 * 1024 * 1024),
    )(x3, params["enc_w"], params["enc_b"], params["head_w1"], params["head_b1"],
      params["head_w2"], params["head_b2"])
    return out.reshape(B, L)


# ---------------------------------------------------------------------------
# Kernel 2: all-patches MLPAdj decoder (grid over patches)
# ---------------------------------------------------------------------------

def _decoder_kernel(g_ref, z_ref, w1g_ref, w1z_ref, s1_ref, t1_ref,
                    w2_ref, s2_ref, t2_ref, w3_ref, s3_ref, t3_ref,
                    w4_ref, b4_ref, o_ref):
    g = g_ref[0]                          # (P, patch_dim)
    z = z_ref[...]                        # (B, L)
    B = z.shape[0]

    # conv1 applied to y = concat(grid, z broadcast over points) without ever
    # materializing y:  y @ W1 == grid @ W1_g  +  z @ W1_z (broadcast over points).
    w1g = w1g_ref[0]                      # (patch_dim, C1)
    gproj = g[:, 0:1] * w1g[0:1, :]       # tiny-K (=2) contraction on the VPU
    for k in range(1, g.shape[1]):        # patch_dim is static & tiny
        gproj = gproj + g[:, k:k + 1] * w1g[k:k + 1, :]          # (P, C1)
    zproj = jnp.dot(z, w1z_ref[0], preferred_element_type=jnp.float32)   # (B, C1)

    # batch-major rows: (B*P, C1) via sublane concat (no lane shuffles).
    h = jnp.concatenate([gproj + zproj[b:b + 1, :] for b in range(B)], axis=0)
    # BN folded into per-channel scale/shift (eval mode).
    h = jnp.maximum(h * s1_ref[0] + t1_ref[0], 0.0)

    h = jnp.dot(h, w2_ref[0], preferred_element_type=jnp.float32)
    h = jnp.maximum(h * s2_ref[0] + t2_ref[0], 0.0)
    h = jnp.dot(h, w3_ref[0], preferred_element_type=jnp.float32)
    h = jnp.maximum(h * s3_ref[0] + t3_ref[0], 0.0)
    # conv4 weight is zero-padded to 128 lanes -> lane-dense output store.
    h = jnp.dot(h, w4_ref[0], preferred_element_type=jnp.float32) + b4_ref[0]
    o_ref[0] = jnp.tanh(h)


def decoder_all_patches(z, dec):
    n_patches, P, patch_dim = dec["grids"].shape
    B, L = z.shape
    C1 = patch_dim + L
    C2, C3 = C1 // 2, C1 // 4
    M = B * P

    w1g = dec["w1"][:, :patch_dim, :]     # (n_patches, patch_dim, C1)
    w1z = dec["w1"][:, patch_dim:, :]     # (n_patches, L, C1)

    return pl.pallas_call(
        _decoder_kernel,
        out_shape=jax.ShapeDtypeStruct((n_patches, M, 128), jnp.float32),
        grid=(n_patches,),
        in_specs=[
            pl.BlockSpec((1, P, patch_dim), lambda p: (p, 0, 0)),
            pl.BlockSpec((B, L), lambda p: (0, 0)),
            pl.BlockSpec((1, patch_dim, C1), lambda p: (p, 0, 0)),
            pl.BlockSpec((1, L, C1), lambda p: (p, 0, 0)),
            pl.BlockSpec((1, 1, C1), lambda p: (p, 0, 0)),
            pl.BlockSpec((1, 1, C1), lambda p: (p, 0, 0)),
            pl.BlockSpec((1, C1, C2), lambda p: (p, 0, 0)),
            pl.BlockSpec((1, 1, C2), lambda p: (p, 0, 0)),
            pl.BlockSpec((1, 1, C2), lambda p: (p, 0, 0)),
            pl.BlockSpec((1, C2, C3), lambda p: (p, 0, 0)),
            pl.BlockSpec((1, 1, C3), lambda p: (p, 0, 0)),
            pl.BlockSpec((1, 1, C3), lambda p: (p, 0, 0)),
            pl.BlockSpec((1, C3, 128), lambda p: (p, 0, 0)),
            pl.BlockSpec((1, 1, 128), lambda p: (p, 0, 0)),
        ],
        out_specs=pl.BlockSpec((1, M, 128), lambda p: (p, 0, 0)),
        compiler_params=pltpu.CompilerParams(dimension_semantics=("parallel",)),
    )(dec["grids"], z, w1g, w1z, dec["s1"], dec["t1"], dec["w2"], dec["s2"], dec["t2"],
      dec["w3"], dec["s3"], dec["t3"], dec["w4p"], dec["b4p"])


# ---------------------------------------------------------------------------
# AtlasNet forward (glue in plain JAX, hot paths in Pallas)
# ---------------------------------------------------------------------------

def atlasnet_forward(x, params):
    B, Cin, H, W = x.shape
    S = H * W

    # synthetic encoder.forward_features input layout: channels-last (B, S, Cin)
    x3 = x.transpose(0, 2, 3, 1).reshape(B, S, Cin)

    # fused: encoder 1x1 conv + ReLU -> max/mean pool over S -> head MLP
    z = encoder_head(x3, params)                          # (B, latent)

    dec = params["dec"]
    n_patches, P, patch_dim = dec["grids"].shape

    out = decoder_all_patches(z, dec)                     # (n_patches, B*P, 128)

    patches_out = [dec["grids"][p] for p in range(n_patches)]           # each (P, patch_dim)
    decoded_parts = [out[p, :, :3].reshape(B, P, 3).transpose(0, 2, 1)  # (B, 3, P)
                     for p in range(n_patches)]
    points = jnp.concatenate(decoded_parts, axis=2).transpose(0, 2, 1)  # (B, n_points, 3)
    return points, patches_out, decoded_parts


def reference_forward(x, params):
    """Pure-JAX reference (same eval-mode semantics) for numerical checking."""
    B, Cin, H, W = x.shape
    xr = x.transpose(0, 2, 3, 1).reshape(B, H * W, Cin)
    feat = jnp.maximum(jnp.einsum("bsc,cf->bsf", xr, params["enc_w"]) + params["enc_b"], 0.0)
    zz = jnp.concatenate([feat.max(axis=1), feat.mean(axis=1)], axis=1)
    h = jnp.maximum(zz @ params["head_w1"] + params["head_b1"], 0.0)
    z = h @ params["head_w2"] + params["head_b2"]

    dec = params["dec"]
    n_patches, P, patch_dim = dec["grids"].shape
    parts = []
    for p in range(n_patches):
        g = dec["grids"][p]
        y = jnp.concatenate(
            [jnp.broadcast_to(g[None], (B, P, patch_dim)),
             jnp.broadcast_to(z[:, None, :], (B, P, z.shape[1]))], axis=-1)
        hh = jnp.maximum(jnp.einsum("bpc,cd->bpd", y, dec["w1"][p]) * dec["s1"][p] + dec["t1"][p], 0.0)
        hh = jnp.maximum(jnp.einsum("bpc,cd->bpd", hh, dec["w2"][p]) * dec["s2"][p] + dec["t2"][p], 0.0)
        hh = jnp.maximum(jnp.einsum("bpc,cd->bpd", hh, dec["w3"][p]) * dec["s3"][p] + dec["t3"][p], 0.0)
        out = jnp.tanh(jnp.einsum("bpc,cd->bpd", hh, dec["w4"][p]) + dec["b4"][p])
        parts.append(out.transpose(0, 2, 1))
    return jnp.concatenate(parts, axis=2).transpose(0, 2, 1)


# ---------------------------------------------------------------------------
# deterministic parameter init (eval-mode BN folded into scale/shift)
# ---------------------------------------------------------------------------

def init_params(key, *, enc_in, feat_ch, latent_dim, n_points, n_patches, patch_dim):
    ks = iter(jax.random.split(key, 64))

    def nrm(shape, scale=0.1):
        return (scale * jax.random.normal(next(ks), shape)).astype(jnp.float32)

    def uni(shape, lo=0.0, hi=1.0):
        return jax.random.uniform(next(ks), shape, jnp.float32, lo, hi)

    eps = 1e-5
    P = n_points // n_patches
    C1 = patch_dim + latent_dim
    C2, C3 = C1 // 2, C1 // 4

    def conv_bn(cin, cout):
        # Conv1d(cin, cout, 1) weight stored as (n_patches, cin, cout); BN(eval) folded in.
        w = nrm((n_patches, cin, cout))
        b = nrm((n_patches, 1, cout), 0.05)
        gamma = 1.0 + nrm((n_patches, 1, cout), 0.1)
        beta = nrm((n_patches, 1, cout), 0.1)
        mean = nrm((n_patches, 1, cout), 0.1)
        var = uni((n_patches, 1, cout), 0.5, 1.5)
        scale = gamma / jnp.sqrt(var + eps)
        shift = beta + scale * (b - mean)
        return w, scale, shift

    grids = uni((n_patches, P, patch_dim))        # patch.data.uniform_(0, 1), stored (P, patch_dim)
    if patch_dim > 2:
        grids = grids.at[:, :, 2:].set(0.0)       # patch.data[:, 2:, :] = 0

    w1, s1, t1 = conv_bn(C1, C1)
    w2, s2, t2 = conv_bn(C1, C2)
    w3, s3, t3 = conv_bn(C2, C3)
    w4 = nrm((n_patches, C3, 3))
    b4 = nrm((n_patches, 1, 3), 0.05)
    # lane-dense variants for the Pallas decoder output (pad out-channels to 128)
    w4p = jnp.pad(w4, ((0, 0), (0, 0), (0, 128 - 3)))
    b4p = jnp.pad(b4, ((0, 0), (0, 0), (0, 128 - 3)))

    return dict(
        enc_w=nrm((enc_in, feat_ch)),
        enc_b=nrm((1, feat_ch), 0.05),
        head_w1=nrm((2 * feat_ch, 2 * feat_ch), 0.03),
        head_b1=nrm((1, 2 * feat_ch), 0.05),
        head_w2=nrm((2 * feat_ch, latent_dim), 0.03),
        head_b2=nrm((1, latent_dim), 0.05),
        dec=dict(grids=grids, w1=w1, s1=s1, t1=t1, w2=w2, s2=s2, t2=t2,
                 w3=w3, s3=s3, t3=t3, w4=w4, b4=b4, w4p=w4p, b4p=b4p),
    )


# ---------------------------------------------------------------------------

if __name__ == "__main__":
    LATENT_DIM = 62        # so patch_dim + latent_dim = 64 -> 32 -> 16 in MLPAdj
    N_POINTS = 128
    N_PATCHES = 4
    PATCH_DIM = 2
    ENC_IN, FEAT_CH = 4, 512   # head hardcodes Linear(1024, ...) => 512-ch features

    key = jax.random.PRNGKey(0)
    kx, kp = jax.random.split(key)
    x = jax.random.normal(kx, (2, ENC_IN, 16, 16), jnp.float32)
    params = init_params(kp, enc_in=ENC_IN, feat_ch=FEAT_CH, latent_dim=LATENT_DIM,
                         n_points=N_POINTS, n_patches=N_PATCHES, patch_dim=PATCH_DIM)

    fwd = jax.jit(lambda xx: atlasnet_forward(xx, params))
    points, patches, decoded_parts = fwd(x)
    points = jax.block_until_ready(points)

    assert points.shape == (2, N_POINTS, 3)
    assert len(patches) == N_PATCHES and patches[0].shape == (N_POINTS // N_PATCHES, PATCH_DIM)
    assert decoded_parts[0].shape == (2, 3, N_POINTS // N_PATCHES)

    # Tolerance covers the difference between the kernel path (exact-f32 VPU encoder
    # contraction + Pallas MXU dots) and the XLA reference running default-precision
    # (bf16-pass) matmuls; both paths accumulate in f32.
    ref = reference_forward(x, params)
    max_err = float(jnp.abs(points - ref).max())
    assert jnp.allclose(points, ref, atol=2e-2, rtol=2e-2), max_err

    print("KERNEL_OK")
</pallas_src>

<mosaic_0001>
module attributes {stable_mosaic.version = 11 : i64} {
  func.func @_encoder_head_kernel(%arg0: i32, %arg1: i32, %arg2: memref<1x128x4xf32, #tpu.memory_space<vmem>>, %arg3: memref<4x512xf32, #tpu.memory_space<vmem>>, %arg4: memref<1x512xf32, #tpu.memory_space<vmem>>, %arg5: memref<1024x1024xf32, #tpu.memory_space<vmem>>, %arg6: memref<1x1024xf32, #tpu.memory_space<vmem>>, %arg7: memref<1024x62xf32, #tpu.memory_space<vmem>>, %arg8: memref<1x62xf32, #tpu.memory_space<vmem>>, %arg9: memref<1x1x62xf32, #tpu.memory_space<vmem>>, %arg10: memref<1x512xf32, #tpu.memory_space<vmem>>, %arg11: memref<1x512xf32, #tpu.memory_space<vmem>>) attributes {dimension_semantics = [#tpu.dimension_semantics<parallel>, #tpu.dimension_semantics<arbitrary>], iteration_bounds = array<i64: 2, 2>, scalar_prefetch = 0 : i64, scratch_operands = 2 : i64, tpu.core_type = #tpu.core_type<tc>, window_params = [{transform_indices = @transform_0, window_bounds = array<i64: 1, 128, 4>}, {pipeline_mode = #tpu.pipeline_mode<synchronous>, transform_indices = @transform_1, window_bounds = array<i64: 4, 512>}, {pipeline_mode = #tpu.pipeline_mode<synchronous>, transform_indices = @transform_2, window_bounds = array<i64: 1, 512>}, {pipeline_mode = #tpu.pipeline_mode<synchronous>, transform_indices = @transform_3, window_bounds = array<i64: 1024, 1024>}, {pipeline_mode = #tpu.pipeline_mode<synchronous>, transform_indices = @transform_4, window_bounds = array<i64: 1, 1024>}, {pipeline_mode = #tpu.pipeline_mode<synchronous>, transform_indices = @transform_5, window_bounds = array<i64: 1024, 62>}, {pipeline_mode = #tpu.pipeline_mode<synchronous>, transform_indices = @transform_6, window_bounds = array<i64: 1, 62>}, {transform_indices = @transform_7, window_bounds = array<i64: 1, 1, 62>}]} {
    %c0_i32 = arith.constant 0 : i32
    %0 = arith.cmpi eq, %arg1, %c0_i32 : i32
    %1 = arith.extui %0 : i1 to i32
    %c0_i32_0 = arith.constant 0 : i32
    %2 = arith.cmpi ne, %1, %c0_i32_0 : i32
    scf.if %2 {
      %cst_18 = arith.constant 0xFF800000 : f32
      %47 = vector.broadcast %cst_18 : f32 to vector<1x512xf32>
      %c0_19 = arith.constant 0 : index
      %c0_20 = arith.constant 0 : index
      %48 = vector.load %arg10[%c0_19, %c0_20] : memref<1x512xf32, #tpu.memory_space<vmem>>, vector<1x512xf32>
      tpu.vector_store %arg10[%c0_19, %c0_20], %47 {strides = array<i32>} : memref<1x512xf32, #tpu.memory_space<vmem>>, vector<1x512xf32>,
      %cst_21 = arith.constant 0.000000e+00 : f32
      %49 = vector.broadcast %cst_21 : f32 to vector<1x512xf32>
      %c0_22 = arith.constant 0 : index
      %c0_23 = arith.constant 0 : index
      %50 = vector.load %arg11[%c0_22, %c0_23] : memref<1x512xf32, #tpu.memory_space<vmem>>, vector<1x512xf32>
      tpu.vector_store %arg11[%c0_22, %c0_23], %49 {strides = array<i32>} : memref<1x512xf32, #tpu.memory_space<vmem>>, vector<1x512xf32>,
    } else {
    }
    %c0 = arith.constant 0 : index
    %c0_1 = arith.constant 0 : index
    %c0_2 = arith.constant 0 : index
    %3 = vector.load %arg2[%c0, %c0_1, %c0_2] : memref<1x128x4xf32, #tpu.memory_space<vmem>>, vector<1x128x4xf32>
    %4 = vector.shape_cast %3 : vector<1x128x4xf32> to vector<128x4xf32>
    %c0_3 = arith.constant 0 : index
    %c0_4 = arith.constant 0 : index
    %5 = vector.load %arg3[%c0_3, %c0_4] : memref<4x512xf32, #tpu.memory_space<vmem>>, vector<4x512xf32>
    %6 = vector.extract_strided_slice %4 {offsets = [0, 0], sizes = [128, 1], strides = [1, 1]} : vector<128x4xf32> to vector<128x1xf32>
    %7 = vector.extract_strided_slice %5 {offsets = [0, 0], sizes = [1, 512], strides = [1, 1]} : vector<4x512xf32> to vector<1x512xf32>
    %8 = vector.broadcast %6 : vector<128x1xf32> to vector<128x512xf32>
    %9 = vector.broadcast %7 : vector<1x512xf32> to vector<128x512xf32>
    %10 = arith.mulf %8, %9 : vector<128x512xf32>
    %11 = vector.extract_strided_slice %4 {offsets = [0, 1], sizes = [128, 1], strides = [1, 1]} : vector<128x4xf32> to vector<128x1xf32>
    %12 = vector.extract_strided_slice %5 {offsets = [1, 0], sizes = [1, 512], strides = [1, 1]} : vector<4x512xf32> to vector<1x512xf32>
    %13 = vector.broadcast %11 : vector<128x1xf32> to vector<128x512xf32>
    %14 = vector.broadcast %12 : vector<1x512xf32> to vector<128x512xf32>
    %15 = arith.mulf %13, %14 : vector<128x512xf32>
    %16 = arith.addf %10, %15 : vector<128x512xf32>
    %17 = vector.extract_strided_slice %4 {offsets = [0, 2], sizes = [128, 1], strides = [1, 1]} : vector<128x4xf32> to vector<128x1xf32>
    %18 = vector.extract_strided_slice %5 {offsets = [2, 0], sizes = [1, 512], strides = [1, 1]} : vector<4x512xf32> to vector<1x512xf32>
    %19 = vector.broadcast %17 : vector<128x1xf32> to vector<128x512xf32>
    %20 = vector.broadcast %18 : vector<1x512xf32> to vector<128x512xf32>
    %21 = arith.mulf %19, %20 : vector<128x512xf32>
    %22 = arith.addf %16, %21 : vector<128x512xf32>
    %23 = vector.extract_strided_slice %4 {offsets = [0, 3], sizes = [128, 1], strides = [1, 1]} : vector<128x4xf32> to vector<128x1xf32>
    %24 = vector.extract_strided_slice %5 {offsets = [3, 0], sizes = [1, 512], strides = [1, 1]} : vector<4x512xf32> to vector<1x512xf32>
    %25 = vector.broadcast %23 : vector<128x1xf32> to vector<128x512xf32>
    %26 = vector.broadcast %24 : vector<1x512xf32> to vector<128x512xf32>
    %27 = arith.mulf %25, %26 : vector<128x512xf32>
    %28 = arith.addf %22, %27 : vector<128x512xf32>
    %c0_5 = arith.constant 0 : index
    %c0_6 = arith.constant 0 : index
    %29 = vector.load %arg4[%c0_5, %c0_6] : memref<1x512xf32, #tpu.memory_space<vmem>>, vector<1x512xf32>
    %30 = vector.broadcast %29 : vector<1x512xf32> to vector<128x512xf32>
    %31 = arith.addf %28, %30 : vector<128x512xf32>
    %cst = arith.constant 0.000000e+00 : f32
    %32 = vector.broadcast %cst : f32 to vector<128x512xf32>
    %33 = arith.maximumf %31, %32 : vector<128x512xf32>
    %c0_7 = arith.constant 0 : index
    %c0_8 = arith.constant 0 : index
    %34 = vector.load %arg10[%c0_7, %c0_8] : memref<1x512xf32, #tpu.memory_space<vmem>>, vector<1x512xf32>
    %cst_9 = arith.constant dense<0xFF800000> : vector<512xf32>
    %35 = vector.multi_reduction <maximumf>, %33, %cst_9 [0] : vector<128x512xf32> to vector<512xf32>
    %36 = vector.shape_cast %35 : vector<512xf32> to vector<1x512xf32>
    %37 = arith.maximumf %34, %36 : vector<1x512xf32>
    %c0_10 = arith.constant 0 : index
    %c0_11 = arith.constant 0 : index
    %38 = vector.load %arg10[%c0_10, %c0_11] : memref<1x512xf32, #tpu.memory_space<vmem>>, vector<1x512xf32>
    tpu.vector_store %arg10[%c0_10, %c0_11], %37 {strides = array<i32>} : memref<1x512xf32, #tpu.memory_space<vmem>>, vector<1x512xf32>,
    %c0_12 = arith.constant 0 : index
    %c0_13 = arith.constant 0 : index
    %39 = vector.load %arg11[%c0_12, %c0_13] : memref<1x512xf32, #tpu.memory_space<vmem>>, vector<1x512xf32>
    %cst_14 = arith.constant dense<0.000000e+00> : vector<512xf32>
    %40 = vector.multi_reduction <add>, %33, %cst_14 [0] : vector<128x512xf32> to vector<512xf32>
    %41 = vector.shape_cast %40 : vector<512xf32> to vector<1x512xf32>
    %42 = arith.addf %39, %41 : vector<1x512xf32>
    %c0_15 = arith.constant 0 : index
    %c0_16 = arith.constant 0 : index
    %43 = vector.load %arg11[%c0_15, %c0_16] : memref<1x512xf32, #tpu.memory_space<vmem>>, vector<1x512xf32>
    tpu.vector_store %arg11[%c0_15, %c0_16], %42 {strides = array<i32>} : memref<1x512xf32, #tpu.memory_space<vmem>>, vector<1x512xf32>,
    %c1_i32 = arith.constant 1 : i32
    %44 = arith.cmpi eq, %arg1, %c1_i32 : i32
    %45 = arith.extui %44 : i1 to i32
    %c0_i32_17 = arith.constant 0 : i32
    %46 = arith.cmpi ne, %45, %c0_i32_17 : i32
    scf.if %46 {
      %c0_18 = arith.constant 0 : index
      %c0_19 = arith.constant 0 : index
      %47 = vector.load %arg10[%c0_18, %c0_19] : memref<1x512xf32, #tpu.memory_space<vmem>>, vector<1x512xf32>
      %c0_20 = arith.constant 0 : index
      %c0_21 = arith.constant 0 : index
      %48 = vector.load %arg11[%c0_20, %c0_21] : memref<1x512xf32, #tpu.memory_space<vmem>>, vector<1x512xf32>
      %cst_22 = arith.constant 3.906250e-03 : f32
      %49 = vector.broadcast %cst_22 : f32 to vector<1x512xf32>
      %50 = arith.mulf %48, %49 : vector<1x512xf32>
      %c0_23 = arith.constant 0 : index
      %c0_24 = arith.constant 0 : index
      %51 = vector.load %arg5[%c0_23, %c0_24] : memref<1024x1024xf32, #tpu.memory_space<vmem>>, vector<512x1024xf32>
      %cst_25 = arith.constant dense<0.000000e+00> : vector<1x1024xf32>
      %52 = tpu.matmul %47, %51, %cst_25 {dimension_numbers = #tpu.dot_dimension_numbers<[1], [0], [0], [1], [0, 0, 1, 1], [], []>} : vector<1x512xf32>, vector<512x1024xf32>, vector<1x1024xf32> -> vector<1x1024xf32>
      %c512 = arith.constant 512 : index
      %c0_26 = arith.constant 0 : index
      %53 = vector.load %arg5[%c512, %c0_26] : memref<1024x1024xf32, #tpu.memory_space<vmem>>, vector<512x1024xf32>
      %cst_27 = arith.constant dense<0.000000e+00> : vector<1x1024xf32>
      %54 = tpu.matmul %50, %53, %cst_27 {dimension_numbers = #tpu.dot_dimension_numbers<[1], [0], [0], [1], [0, 0, 1, 1], [], []>} : vector<1x512xf32>, vector<512x1024xf32>, vector<1x1024xf32> -> vector<1x1024xf32>
      %55 = arith.addf %52, %54 : vector<1x1024xf32>
      %c0_28 = arith.constant 0 : index
      %c0_29 = arith.constant 0 : index
      %56 = vector.load %arg6[%c0_28, %c0_29] : memref<1x1024xf32, #tpu.memory_space<vmem>>, vector<1x1024xf32>
      %57 = arith.addf %55, %56 : vector<1x1024xf32>
      %cst_30 = arith.constant 0.000000e+00 : f32
      %58 = vector.broadcast %cst_30 : f32 to vector<1x1024xf32>
      %59 = arith.maximumf %57, %58 : vector<1x1024xf32>
      %c0_31 = arith.constant 0 : index
      %c0_32 = arith.constant 0 : index
      %60 = vector.load %arg7[%c0_31, %c0_32] : memref<1024x62xf32, #tpu.memory_space<vmem>>, vector<1024x62xf32>
      %cst_33 = arith.constant dense<0.000000e+00> : vector<1x62xf32>
      %61 = tpu.matmul %59, %60, %cst_33 {dimension_numbers = #tpu.dot_dimension_numbers<[1], [0], [0], [1], [0, 0, 1, 1], [], []>} : vector<1x1024xf32>, vector<1024x62xf32>, vector<1x62xf32> -> vector<1x62xf32>
      %c0_34 = arith.constant 0 : index
      %c0_35 = arith.constant 0 : index
      %62 = vector.load %arg8[%c0_34, %c0_35] : memref<1x62xf32, #tpu.memory_space<vmem>>, vector<1x62xf32>
      %63 = arith.addf %61, %62 : vector<1x62xf32>
      %c0_36 = arith.constant 0 : index
      %c0_37 = arith.constant 0 : index
      %c0_38 = arith.constant 0 : index
      %64 = vector.load %arg9[%c0_36, %c0_37, %c0_38] : memref<1x1x62xf32, #tpu.memory_space<vmem>>, vector<1x1x62xf32>
      %65 = vector.shape_cast %64 : vector<1x1x62xf32> to vector<1x62xf32>
      %66 = vector.shape_cast %63 : vector<1x62xf32> to vector<1x1x62xf32>
      tpu.vector_store %arg9[%c0_36, %c0_37, %c0_38], %66 {strides = array<i32>} : memref<1x1x62xf32, #tpu.memory_space<vmem>>, vector<1x1x62xf32>,
    } else {
    }
    return
  }
  func.func @transform_0(%arg0: i32, %arg1: i32) -> (i32, i32, i32) {
    %c0_i32 = arith.constant 0 : i32
    %c0_i32_0 = arith.constant 0 : i32
    return %arg0, %arg1, %c0_i32 : i32, i32, i32
  }
  func.func @transform_1(%arg0: i32, %arg1: i32) -> (i32, i32) {
    %c0_i32 = arith.constant 0 : i32
    %c0_i32_0 = arith.constant 0 : i32
    %c0_i32_1 = arith.constant 0 : i32
    return %c0_i32, %c0_i32_0 : i32, i32
  }
  func.func @transform_2(%arg0: i32, %arg1: i32) -> (i32, i32) {
    %c0_i32 = arith.constant 0 : i32
    %c0_i32_0 = arith.constant 0 : i32
    %c0_i32_1 = arith.constant 0 : i32
    return %c0_i32, %c0_i32_0 : i32, i32
  }
  func.func @transform_3(%arg0: i32, %arg1: i32) -> (i32, i32) {
    %c0_i32 = arith.constant 0 : i32
    %c0_i32_0 = arith.constant 0 : i32
    %c0_i32_1 = arith.constant 0 : i32
    return %c0_i32, %c0_i32_0 : i32, i32
  }
  func.func @transform_4(%arg0: i32, %arg1: i32) -> (i32, i32) {
    %c0_i32 = arith.constant 0 : i32
    %c0_i32_0 = arith.constant 0 : i32
    %c0_i32_1 = arith.constant 0 : i32
    return %c0_i32, %c0_i32_0 : i32, i32
  }
  func.func @transform_5(%arg0: i32, %arg1: i32) -> (i32, i32) {
    %c0_i32 = arith.constant 0 : i32
    %c0_i32_0 = arith.constant 0 : i32
    %c0_i32_1 = arith.constant 0 : i32
    return %c0_i32, %c0_i32_0 : i32, i32
  }
  func.func @transform_6(%arg0: i32, %arg1: i32) -> (i32, i32) {
    %c0_i32 = arith.constant 0 : i32
    %c0_i32_0 = arith.constant 0 : i32
    %c0_i32_1 = arith.constant 0 : i32
    return %c0_i32, %c0_i32_0 : i32, i32
  }
  func.func @transform_7(%arg0: i32, %arg1: i32) -> (i32, i32, i32) {
    %c0_i32 = arith.constant 0 : i32
    %c0_i32_0 = arith.constant 0 : i32
    %c0_i32_1 = arith.constant 0 : i32
    return %arg0, %c0_i32, %c0_i32_0 : i32, i32, i32
  }
}

module attributes {stable_mosaic.version = 11 : i64} {
  func.func @_decoder_kernel(%arg0: i32, %arg1: memref<1x32x2xf32, #tpu.memory_space<vmem>>, %arg2: memref<2x62xf32, #tpu.memory_space<vmem>>, %arg3: memref<1x2x64xf32, #tpu.memory_space<vmem>>, %arg4: memref<1x62x64xf32, #tpu.memory_space<vmem>>, %arg5: memref<1x1x64xf32, #tpu.memory_space<vmem>>, %arg6: memref<1x1x64xf32, #tpu.memory_space<vmem>>, %arg7: memref<1x64x32xf32, #tpu.memory_space<vmem>>, %arg8: memref<1x1x32xf32, #tpu.memory_space<vmem>>, %arg9: memref<1x1x32xf32, #tpu.memory_space<vmem>>, %arg10: memref<1x32x16xf32, #tpu.memory_space<vmem>>, %arg11: memref<1x1x16xf32, #tpu.memory_space<vmem>>, %arg12: memref<1x1x16xf32, #tpu.memory_space<vmem>>, %arg13: memref<1x16x128xf32, #tpu.memory_space<vmem>>, %arg14: memref<1x1x128xf32, #tpu.memory_space<vmem>>, %arg15: memref<1x64x128xf32, #tpu.memory_space<vmem>>) attributes {dimension_semantics = [#tpu.dimension_semantics<parallel>], iteration_bounds = array<i64: 4>, scalar_prefetch = 0 : i64, scratch_operands = 0 : i64, tpu.core_type = #tpu.core_type<tc>, window_params = [{transform_indices = @transform_0, window_bounds = array<i64: 1, 32, 2>}, {pipeline_mode = #tpu.pipeline_mode<synchronous>, transform_indices = @transform_1, window_bounds = array<i64: 2, 62>}, {transform_indices = @transform_2, window_bounds = array<i64: 1, 2, 64>}, {transform_indices = @transform_3, window_bounds = array<i64: 1, 62, 64>}, {transform_indices = @transform_4, window_bounds = array<i64: 1, 1, 64>}, {transform_indices = @transform_5, window_bounds = array<i64: 1, 1, 64>}, {transform_indices = @transform_6, window_bounds = array<i64: 1, 64, 32>}, {transform_indices = @transform_7, window_bounds = array<i64: 1, 1, 32>}, {transform_indices = @transform_8, window_bounds = array<i64: 1, 1, 32>}, {transform_indices = @transform_9, window_bounds = array<i64: 1, 32, 16>}, {transform_indices = @transform_10, window_bounds = array<i64: 1, 1, 16>}, {transform_indices = @transform_11, window_bounds = array<i64: 1, 1, 16>}, {transform_indices = @transform_12, window_bounds = array<i64: 1, 16, 128>}, {transform_indices = @transform_13, window_bounds = array<i64: 1, 1, 128>}, {transform_indices = @transform_14, window_bounds = array<i64: 1, 64, 128>}]} {
    %c0 = arith.constant 0 : index
    %c0_0 = arith.constant 0 : index
    %c0_1 = arith.constant 0 : index
    %0 = vector.load %arg1[%c0, %c0_0, %c0_1] : memref<1x32x2xf32, #tpu.memory_space<vmem>>, vector<1x32x2xf32>
    %1 = vector.shape_cast %0 : vector<1x32x2xf32> to vector<32x2xf32>
    %c0_2 = arith.constant 0 : index
    %c0_3 = arith.constant 0 : index
    %2 = vector.load %arg2[%c0_2, %c0_3] : memref<2x62xf32, #tpu.memory_space<vmem>>, vector<2x62xf32>
    %c0_4 = arith.constant 0 : index
    %c0_5 = arith.constant 0 : index
    %c0_6 = arith.constant 0 : index
    %3 = vector.load %arg3[%c0_4, %c0_5, %c0_6] : memref<1x2x64xf32, #tpu.memory_space<vmem>>, vector<1x2x64xf32>
    %4 = vector.shape_cast %3 : vector<1x2x64xf32> to vector<2x64xf32>
    %5 = vector.extract_strided_slice %1 {offsets = [0, 0], sizes = [32, 1], strides = [1, 1]} : vector<32x2xf32> to vector<32x1xf32>
    %6 = vector.extract_strided_slice %4 {offsets = [0, 0], sizes = [1, 64], strides = [1, 1]} : vector<2x64xf32> to vector<1x64xf32>
    %7 = vector.broadcast %5 : vector<32x1xf32> to vector<32x64xf32>
    %8 = vector.broadcast %6 : vector<1x64xf32> to vector<32x64xf32>
    %9 = arith.mulf %7, %8 : vector<32x64xf32>
    %10 = vector.extract_strided_slice %1 {offsets = [0, 1], sizes = [32, 1], strides = [1, 1]} : vector<32x2xf32> to vector<32x1xf32>
    %11 = vector.extract_strided_slice %4 {offsets = [1, 0], sizes = [1, 64], strides = [1, 1]} : vector<2x64xf32> to vector<1x64xf32>
    %12 = vector.broadcast %10 : vector<32x1xf32> to vector<32x64xf32>
    %13 = vector.broadcast %11 : vector<1x64xf32> to vector<32x64xf32>
    %14 = arith.mulf %12, %13 : vector<32x64xf32>
    %15 = arith.addf %9, %14 : vector<32x64xf32>
    %c0_7 = arith.constant 0 : index
    %c0_8 = arith.constant 0 : index
    %c0_9 = arith.constant 0 : index
    %16 = vector.load %arg4[%c0_7, %c0_8, %c0_9] : memref<1x62x64xf32, #tpu.memory_space<vmem>>, vector<1x62x64xf32>
    %17 = vector.shape_cast %16 : vector<1x62x64xf32> to vector<62x64xf32>
    %cst = arith.constant dense<0.000000e+00> : vector<2x64xf32>
    %18 = tpu.matmul %2, %17, %cst {dimension_numbers = #tpu.dot_dimension_numbers<[1], [0], [0], [1], [0, 0, 1, 1], [], []>} : vector<2x62xf32>, vector<62x64xf32>, vector<2x64xf32> -> vector<2x64xf32>
    %19 = vector.extract_strided_slice %18 {offsets = [0, 0], sizes = [1, 64], strides = [1, 1]} : vector<2x64xf32> to vector<1x64xf32>
    %20 = vector.broadcast %19 : vector<1x64xf32> to vector<32x64xf32>
    %21 = arith.addf %15, %20 : vector<32x64xf32>
    %22 = vector.extract_strided_slice %18 {offsets = [1, 0], sizes = [1, 64], strides = [1, 1]} : vector<2x64xf32> to vector<1x64xf32>
    %23 = vector.broadcast %22 : vector<1x64xf32> to vector<32x64xf32>
    %24 = arith.addf %15, %23 : vector<32x64xf32>
    %25 = tpu.concatenate %21, %24 in 0 : vector<32x64xf32>, vector<32x64xf32> -> vector<64x64xf32>
    %c0_10 = arith.constant 0 : index
    %c0_11 = arith.constant 0 : index
    %c0_12 = arith.constant 0 : index
    %26 = vector.load %arg5[%c0_10, %c0_11, %c0_12] : memref<1x1x64xf32, #tpu.memory_space<vmem>>, vector<1x1x64xf32>
    %27 = vector.shape_cast %26 : vector<1x1x64xf32> to vector<1x64xf32>
    %28 = vector.broadcast %27 : vector<1x64xf32> to vector<64x64xf32>
    %29 = arith.mulf %25, %28 : vector<64x64xf32>
    %c0_13 = arith.constant 0 : index
    %c0_14 = arith.constant 0 : index
    %c0_15 = arith.constant 0 : index
    %30 = vector.load %arg6[%c0_13, %c0_14, %c0_15] : memref<1x1x64xf32, #tpu.memory_space<vmem>>, vector<1x1x64xf32>
    %31 = vector.shape_cast %30 : vector<1x1x64xf32> to vector<1x64xf32>
    %32 = vector.broadcast %31 : vector<1x64xf32> to vector<64x64xf32>
    %33 = arith.addf %29, %32 : vector<64x64xf32>
    %cst_16 = arith.constant 0.000000e+00 : f32
    %34 = vector.broadcast %cst_16 : f32 to vector<64x64xf32>
    %35 = arith.maximumf %33, %34 : vector<64x64xf32>
    %c0_17 = arith.constant 0 : index
    %c0_18 = arith.constant 0 : index
    %c0_19 = arith.constant 0 : index
    %36 = vector.load %arg7[%c0_17, %c0_18, %c0_19] : memref<1x64x32xf32, #tpu.memory_space<vmem>>, vector<1x64x32xf32>
    %37 = vector.shape_cast %36 : vector<1x64x32xf32> to vector<64x32xf32>
    %cst_20 = arith.constant dense<0.000000e+00> : vector<64x32xf32>
    %38 = tpu.matmul %35, %37, %cst_20 {dimension_numbers = #tpu.dot_dimension_numbers<[1], [0], [0], [1], [0, 0, 1, 1], [], []>} : vector<64x64xf32>, vector<64x32xf32>, vector<64x32xf32> -> vector<64x32xf32>
    %c0_21 = arith.constant 0 : index
    %c0_22 = arith.constant 0 : index
    %c0_23 = arith.constant 0 : index
    %39 = vector.load %arg8[%c0_21, %c0_22, %c0_23] : memref<1x1x32xf32, #tpu.memory_space<vmem>>, vector<1x1x32xf32>
    %40 = vector.shape_cast %39 : vector<1x1x32xf32> to vector<1x32xf32>
    %41 = vector.broadcast %40 : vector<1x32xf32> to vector<64x32xf32>
    %42 = arith.mulf %38, %41 : vector<64x32xf32>
    %c0_24 = arith.constant 0 : index
    %c0_25 = arith.constant 0 : index
    %c0_26 = arith.constant 0 : index
    %43 = vector.load %arg9[%c0_24, %c0_25, %c0_26] : memref<1x1x32xf32, #tpu.memory_space<vmem>>, vector<1x1x32xf32>
    %44 = vector.shape_cast %43 : vector<1x1x32xf32> to vector<1x32xf32>
    %45 = vector.broadcast %44 : vector<1x32xf32> to vector<64x32xf32>
    %46 = arith.addf %42, %45 : vector<64x32xf32>
    %cst_27 = arith.constant 0.000000e+00 : f32
    %47 = vector.broadcast %cst_27 : f32 to vector<64x32xf32>
    %48 = arith.maximumf %46, %47 : vector<64x32xf32>
    %c0_28 = arith.constant 0 : index
    %c0_29 = arith.constant 0 : index
    %c0_30 = arith.constant 0 : index
    %49 = vector.load %arg10[%c0_28, %c0_29, %c0_30] : memref<1x32x16xf32, #tpu.memory_space<vmem>>, vector<1x32x16xf32>
    %50 = vector.shape_cast %49 : vector<1x32x16xf32> to vector<32x16xf32>
    %cst_31 = arith.constant dense<0.000000e+00> : vector<64x16xf32>
    %51 = tpu.matmul %48, %50, %cst_31 {dimension_numbers = #tpu.dot_dimension_numbers<[1], [0], [0], [1], [0, 0, 1, 1], [], []>} : vector<64x32xf32>, vector<32x16xf32>, vector<64x16xf32> -> vector<64x16xf32>
    %c0_32 = arith.constant 0 : index
    %c0_33 = arith.constant 0 : index
    %c0_34 = arith.constant 0 : index
    %52 = vector.load %arg11[%c0_32, %c0_33, %c0_34] : memref<1x1x16xf32, #tpu.memory_space<vmem>>, vector<1x1x16xf32>
    %53 = vector.shape_cast %52 : vector<1x1x16xf32> to vector<1x16xf32>
    %54 = vector.broadcast %53 : vector<1x16xf32> to vector<64x16xf32>
    %55 = arith.mulf %51, %54 : vector<64x16xf32>
    %c0_35 = arith.constant 0 : index
    %c0_36 = arith.constant 0 : index
    %c0_37 = arith.constant 0 : index
    %56 = vector.load %arg12[%c0_35, %c0_36, %c0_37] : memref<1x1x16xf32, #tpu.memory_space<vmem>>, vector<1x1x16xf32>
    %57 = vector.shape_cast %56 : vector<1x1x16xf32> to vector<1x16xf32>
    %58 = vector.broadcast %57 : vector<1x16xf32> to vector<64x16xf32>
    %59 = arith.addf %55, %58 : vector<64x16xf32>
    %cst_38 = arith.constant 0.000000e+00 : f32
    %60 = vector.broadcast %cst_38 : f32 to vector<64x16xf32>
    %61 = arith.maximumf %59, %60 : vector<64x16xf32>
    %c0_39 = arith.constant 0 : index
    %c0_40 = arith.constant 0 : index
    %c0_41 = arith.constant 0 : index
    %62 = vector.load %arg13[%c0_39, %c0_40, %c0_41] : memref<1x16x128xf32, #tpu.memory_space<vmem>>, vector<1x16x128xf32>
    %63 = vector.shape_cast %62 : vector<1x16x128xf32> to vector<16x128xf32>
    %cst_42 = arith.constant dense<0.000000e+00> : vector<64x128xf32>
    %64 = tpu.matmul %61, %63, %cst_42 {dimension_numbers = #tpu.dot_dimension_numbers<[1], [0], [0], [1], [0, 0, 1, 1], [], []>} : vector<64x16xf32>, vector<16x128xf32>, vector<64x128xf32> -> vector<64x128xf32>
    %c0_43 = arith.constant 0 : index
    %c0_44 = arith.constant 0 : index
    %c0_45 = arith.constant 0 : index
    %65 = vector.load %arg14[%c0_43, %c0_44, %c0_45] : memref<1x1x128xf32, #tpu.memory_space<vmem>>, vector<1x1x128xf32>
    %66 = vector.shape_cast %65 : vector<1x1x128xf32> to vector<1x128xf32>
    %67 = vector.broadcast %66 : vector<1x128xf32> to vector<64x128xf32>
    %68 = arith.addf %64, %67 : vector<64x128xf32>
    %69 = math.tanh %68 : vector<64x128xf32>
    %c0_46 = arith.constant 0 : index
    %c0_47 = arith.constant 0 : index
    %c0_48 = arith.constant 0 : index
    %70 = vector.load %arg15[%c0_46, %c0_47, %c0_48] : memref<1x64x128xf32, #tpu.memory_space<vmem>>, vector<1x64x128xf32>
    %71 = vector.shape_cast %70 : vector<1x64x128xf32> to vector<64x128xf32>
    %72 = vector.shape_cast %69 : vector<64x128xf32> to vector<1x64x128xf32>
    tpu.vector_store %arg15[%c0_46, %c0_47, %c0_48], %72 {strides = array<i32>} : memref<1x64x128xf32, #tpu.memory_space<vmem>>, vector<1x64x128xf32>,
    return
  }
  func.func @transform_0(%arg0: i32) -> (i32, i32, i32) {
    %c0_i32 = arith.constant 0 : i32
    %c0_i32_0 = arith.constant 0 : i32
    %c0_i32_1 = arith.constant 0 : i32
    return %arg0, %c0_i32, %c0_i32_0 : i32, i32, i32
  }
  func.func @transform_1(%arg0: i32) -> (i32, i32) {
    %c0_i32 = arith.constant 0 : i32
    %c0_i32_0 = arith.constant 0 : i32
    %c0_i32_1 = arith.constant 0 : i32
    return %c0_i32, %c0_i32_0 : i32, i32
  }
  func.func @transform_2(%arg0: i32) -> (i32, i32, i32) {
    %c0_i32 = arith.constant 0 : i32
    %c0_i32_0 = arith.constant 0 : i32
    %c0_i32_1 = arith.constant 0 : i32
    return %arg0, %c0_i32, %c0_i32_0 : i32, i32, i32
  }
  func.func @transform_3(%arg0: i32) -> (i32, i32, i32) {
    %c0_i32 = arith.constant 0 : i32
    %c0_i32_0 = arith.constant 0 : i32
    %c0_i32_1 = arith.constant 0 : i32
    return %arg0, %c0_i32, %c0_i32_0 : i32, i32, i32
  }
  func.func @transform_4(%arg0: i32) -> (i32, i32, i32) {
    %c0_i32 = arith.constant 0 : i32
    %c0_i32_0 = arith.constant 0 : i32
    %c0_i32_1 = arith.constant 0 : i32
    return %arg0, %c0_i32, %c0_i32_0 : i32, i32, i32
  }
  func.func @transform_5(%arg0: i32) -> (i32, i32, i32) {
    %c0_i32 = arith.constant 0 : i32
    %c0_i32_0 = arith.constant 0 : i32
    %c0_i32_1 = arith.constant 0 : i32
    return %arg0, %c0_i32, %c0_i32_0 : i32, i32, i32
  }
  func.func @transform_6(%arg0: i32) -> (i32, i32, i32) {
    %c0_i32 = arith.constant 0 : i32
    %c0_i32_0 = arith.constant 0 : i32
    %c0_i32_1 = arith.constant 0 : i32
    return %arg0, %c0_i32, %c0_i32_0 : i32, i32, i32
  }
  func.func @transform_7(%arg0: i32) -> (i32, i32, i32) {
    %c0_i32 = arith.constant 0 : i32
    %c0_i32_0 = arith.constant 0 : i32
    %c0_i32_1 = arith.constant 0 : i32
    return %arg0, %c0_i32, %c0_i32_0 : i32, i32, i32
  }
  func.func @transform_8(%arg0: i32) -> (i32, i32, i32) {
    %c0_i32 = arith.constant 0 : i32
    %c0_i32_0 = arith.constant 0 : i32
    %c0_i32_1 = arith.constant 0 : i32
    return %arg0, %c0_i32, %c0_i32_0 : i32, i32, i32
  }
  func.func @transform_9(%arg0: i32) -> (i32, i32, i32) {
    %c0_i32 = arith.constant 0 : i32
    %c0_i32_0 = arith.constant 0 : i32
    %c0_i32_1 = arith.constant 0 : i32
    return %arg0, %c0_i32, %c0_i32_0 : i32, i32, i32
  }
  func.func @transform_10(%arg0: i32) -> (i32, i32, i32) {
    %c0_i32 = arith.constant 0 : i32
    %c0_i32_0 = arith.constant 0 : i32
    %c0_i32_1 = arith.constant 0 : i32
    return %arg0, %c0_i32, %c0_i32_0 : i32, i32, i32
  }
  func.func @transform_11(%arg0: i32) -> (i32, i32, i32) {
    %c0_i32 = arith.constant 0 : i32
    %c0_i32_0 = arith.constant 0 : i32
    %c0_i32_1 = arith.constant 0 : i32
    return %arg0, %c0_i32, %c0_i32_0 : i32, i32, i32
  }
  func.func @transform_12(%arg0: i32) -> (i32, i32, i32) {
    %c0_i32 = arith.constant 0 : i32
    %c0_i32_0 = arith.constant 0 : i32
    %c0_i32_1 = arith.constant 0 : i32
    return %arg0, %c0_i32, %c0_i32_0 : i32, i32, i32
  }
  func.func @transform_13(%arg0: i32) -> (i32, i32, i32) {
    %c0_i32 = arith.constant 0 : i32
    %c0_i32_0 = arith.constant 0 : i32
    %c0_i32_1 = arith.constant 0 : i32
    return %arg0, %c0_i32, %c0_i32_0 : i32, i32, i32
  }
  func.func @transform_14(%arg0: i32) -> (i32, i32, i32) {
    %c0_i32 = arith.constant 0 : i32
    %c0_i32_0 = arith.constant 0 : i32
    %c0_i32_1 = arith.constant 0 : i32
    return %arg0, %c0_i32, %c0_i32_0 : i32, i32, i32
  }
}

</mosaic_0001>

<bundles_post_ra>
// kernel: _lambda_.3
= control target key start
LH: loop header
LB: loop body
LE: loop exit
PB: predicated region body
PF: predicated region fallthrough
CT: control target
= control target key end

     0   :  { %s2794_s0 = inlined_call_operand.hbm [shape: f32[4,32,2], index: 0, kind: input, shape index: {}]   ;;  %s2795_s1 = inlined_call_operand.vmem [shape: f32[2,62], index: 1, kind: input, shape index: {}]   ;;  %s2796_s2 = inlined_call_operand.hbm [shape: f32[4,2,64], index: 2, kind: input, shape index: {}]   ;;  %s2797_s3 = inlined_call_operand.hbm [shape: f32[4,62,64], index: 3, kind: input, shape index: {}]   ;;  %s2798_s4 = inlined_call_operand.hbm [shape: f32[4,1,64], index: 4, kind: input, shape index: {}]   ;;  %s2799_s5 = inlined_call_operand.hbm [shape: f32[4,1,64], index: 5, kind: input, shape index: {}]   ;;  %s2800_s6 = inlined_call_operand.hbm [shape: f32[4,64,32], index: 6, kind: input, shape index: {}]   ;;  %s2801_s7 = inlined_call_operand.hbm [shape: f32[4,1,32], index: 7, kind: input, shape index: {}]   ;;  %s2802_s8 = inlined_call_operand.hbm [shape: f32[4,1,32], index: 8, kind: input, shape index: {}]   ;;  %s2803_s9 = inlined_call_operand.hbm [shape: f32[4,32,16], index: 9, kind: input, shape index: {}]   ;;  %s2804_s10 = inlined_call_operand.hbm [shape: f32[4,1,16], index: 10, kind: input, shape index: {}]   ;;  %s2805_s11 = inlined_call_operand.hbm [shape: f32[4,1,16], index: 11, kind: input, shape index: {}]   ;;  %s2806_s12 = inlined_call_operand.hbm [shape: f32[4,16,128], index: 12, kind: input, shape index: {}]   ;;  %s2807_s13 = inlined_call_operand.hbm [shape: f32[4,1,128], index: 13, kind: input, shape index: {}]   ;;  %s2808_s14 = inlined_call_operand.vmem [shape: f32[4,64,128], index: 14, kind: output, shape index: {}]  }
   0x1   :  { %2828 = sst [smem:[#allocation35_spill]] %s2794_s0 }
   0x2   :  { %2829 = sst [smem:[#allocation36_spill]] %s2795_s1 }
   0x3   :  { %2830 = sst [smem:[#allocation37_spill]] %s2796_s2 }
   0x4   :  { %2831 = sst [smem:[#allocation38_spill]] %s2798_s4 }
   0x5   :  { %2832 = sst [smem:[#allocation39_spill]] %s2800_s6 }
   0x6   :  { %2833 = sst [smem:[#allocation40_spill]] %s2807_s13 }
   0x7   :  { %2834 = sst [smem:[#allocation41_spill]] %s2808_s14 }
   0x8   :  { %19 = vsyncpa [#allocation3], 0 }
   0x9   :  { %21 = vsyncpa [#allocation3 + $0x1], 0 }
   0xa   :  { %22 = vsyncpa [#allocation5], 0 }
   0xb   :  { %24 = vsyncpa [#allocation5 + $0x1], 0 }
   0xc   :  { %25 = vsyncpa [#allocation8], 0 }
   0xd   :  { %27 = vsyncpa [#allocation8 + $0x1], 0 }
   0xe   :  { %28 = vsyncpa [#allocation11], 0 }
   0xf   :  { %30 = vsyncpa [#allocation11 + $0x1], 0 }
  0x10   :  { %31 = vsyncpa [#allocation14], 0 }
  0x11   :  { %33 = vsyncpa [#allocation14 + $0x1], 0 }
  0x12   :  { %34 = vsyncpa [#allocation17], 0 }
  0x13   :  { %36 = vsyncpa [#allocation17 + $0x1], 0 }
  0x14   :  { %37 = vsyncpa [#allocation20], 0 }
  0x15   :  { %39 = vsyncpa [#allocation20 + $0x1], 0  ;;  %s2321_s29 = smov 0   ;;  %s2323_s30 = smov 0  }
  0x16   :  { %s2325_s15 = smov 0   ;;  %s2327_s16 = smov 0  }
  0x17 LB: > { %2835 = sst [smem:[#allocation29_spill]] %s2232_s30  ;;  %s2340_s17 = sadd.s32 4294967295, %s2240_s16   ;;  %s2240_s16 = sphi %s2327_s16, %s2863_s16   ;;  %s2236_s15 = sphi %s2325_s15, %s2866_s15   ;;  %s2232_s30 = sphi %s2323_s30, %s2865_s30   ;;  %s2228_s29 = sphi %s2321_s29, %s2864_s29  }
  0x18   : > { %2836 = sst [smem:[#allocation30_spill]] %s2236_s15  ;;  %s2343_s18 = sadd.s32 1, %s2240_s16  }
  0x19   : > { %2837 = sst [smem:[#allocation31_spill]] %s2340_s17  ;;  %s49_s19 = ssub.s32 %s2240_s16, %s2343_s18 }
  0x1a   : > { %2838 = sst [smem:[#allocation32_spill]] %s2343_s18  ;;  %s52_s20 = sadd.s32 1, %s2236_s15 }
  0x1b   : > { %p50_p0 = scmp.eq.s32.totalorder %s49_s19, 0  ;;  %p59_p1 = scmp.ne.s32.totalorder %s2236_s15, %s2232_s30 }
  0x1c   : > { %p60_p2 = scmp.eq.s32.totalorder %s2240_s16, 0  ;;  %p65_p3 = scmp.ne.s32.totalorder %s2232_s30, %s2228_s29 }
  0x1d   : > { %s2353_s21 = scalar_select %p50_p0, %s2236_s15, %s52_s20  }
  0x1e   : > { %p2355_p4 = por %p60_p2, %p59_p1  ;;  %p66_p5 = scmp.eq.s32.totalorder %s2340_s17, 0 }
  0x1f   : > { %2839 = sst [smem:[#allocation33_spill]] %s2353_s21  ;;  %p1653_p7 = scmp.ge.s32.totalorder %s2240_s16, 4 }
  0x20   : > { %p2360_p6 = por %p66_p5, %p65_p3  ;;  %s2366_s24 = sand.u32 (!%p1653_p7), 1, %s2236_s15  }
  0x21   : > { %447 = sbr.rel (%p1653_p7) target bundleno = 253 (0xfd), region = 20  ;;  %s2369_s25 = sand.u32 (!%p1653_p7), 1, %s2240_s16  }
  0x22   : > { %s2841_s23 = scalar_select %p2360_p6, 1, 0 }
  0x23   : > { %s1657_s26 = sshll.u32 (!%p1653_p7), %s2366_s24, 1  ;;  %s1658_s27 = sshll.u32 (!%p1653_p7), %s2240_s16, 1 }
  0x24   : > { %2842 = sst [smem:[#allocation34_spill]] %s2841_s23  ;;  %s477_s20 = scalar_lea.vmem (!%p1653_p7), [#allocation4], %s1657_s26 }
  0x25   : > { %s2843_s2 = sld [smem:[#allocation37_spill]] (!%p1653_p7)  ;;  %s485_s21 = sshll.u32 (!%p1653_p7), %s477_s20, 4  ;;  %s486_s21 = int_to_ptr.vmem [resolvable:$true] %s485_s21 }
  0x26   : > { %s2818_s14 = scalar_lea.sflag [#allocation5], %s2369_s25 }
  0x2b   : > { %s481_s19 = scalar_lea.hbm %s2843_s2, %s1658_s27  ;;  %s1824_s30 = scalar_lea.hbm %s2843_s2, 8 }
  0x2c   : > { %s483_s18 = sshll.u32 %s481_s19, 4  ;;  %s484_s18 = int_to_ptr.hbm [resolvable:$true] %s483_s18 }
  0x2d   : > { %s1818_s1 = sshra.s32 %s484_s18, 4  ;;  %s1819_s1 = int_to_ptr.hbm [resolvable:$true] %s1818_s1 }
  0x2e   : > { %s1820_s15 = scalar_lea.hbm %s1819_s1, 2  ;;  %p1825_p11 = scmp.lt.s32.totalorder %s1819_s1, %s2843_s2 }
  0x2f   : > { %p1821_p8 = scmp.ne.s32.totalorder %s1819_s1, %s1820_s15  ;;  %p1826_p12 = scmp.lt.s32.totalorder %s1824_s30, %s1820_s15 }
  0x31   : > { %p1822_p9 = pnand %p1821_p8, %p2355_p4  ;;  %p1827_p13 = por %p1826_p12, %p1825_p11 }
  0x33   : > { %p1823_p10 = pneg %p1822_p9 }
  0x35   : > { %p1828_p0 = pnand %p1827_p13, %p1823_p10 }
  0x37   : > { %1831 = shalt.err (!%p1828_p0)
}
  0x38   : > { %1727 = dma.hbm_to_vmem [thread:$0]  (%p2355_p4), %s484_s18, 32, %s486_s21, %s2818_s14  }
  0x39   : > { %s2844_s4 = sld [smem:[#allocation38_spill]]  ;;  %s517_s13 = scalar_lea.vmem [#allocation7], %s2366_s24 }
  0x3a   : > { %s524_s1 = sshll.u32 %s517_s13, 4  ;;  %s2819_s30 = scalar_lea.sflag [#allocation8], %s2369_s25  ;;  %s525_s1 = int_to_ptr.vmem [resolvable:$true] %s524_s1 }
  0x3f   : > { %s520_s23 = scalar_lea.hbm %s2844_s4, %s2240_s16  ;;  %s1852_s18 = scalar_lea.hbm %s2844_s4, 4 }
  0x40   : > { %s522_s27 = sshll.u32 %s520_s23, 4  ;;  %s523_s27 = int_to_ptr.hbm [resolvable:$true] %s522_s27 }
  0x41   : > { %s1846_s15 = sshra.s32 %s523_s27, 4  ;;  %s1847_s15 = int_to_ptr.hbm [resolvable:$true] %s1846_s15 }
  0x42   : > { %s1848_s29 = scalar_lea.hbm %s1847_s15, 1  ;;  %p1853_p5 = scmp.lt.s32.totalorder %s1847_s15, %s2844_s4 }
  0x43   : > { %p1849_p1 = scmp.ne.s32.totalorder %s1847_s15, %s1848_s29  ;;  %p1854_p7 = scmp.lt.s32.totalorder %s1852_s18, %s1848_s29 }
  0x45   : > { %p1850_p2 = pnand %p1849_p1, %p2355_p4  ;;  %p1855_p8 = por %p1854_p7, %p1853_p5 }
  0x47   : > { %p1851_p3 = pneg %p1850_p2 }
  0x49   : > { %p1856_p9 = pnand %p1855_p8, %p1851_p3 }
  0x4b   : > { %1859 = shalt.err (!%p1856_p9)
}
  0x4c   : > { %1729 = dma.hbm_to_vmem [thread:$0]  (%p2355_p4), %s523_s27, 16, %s525_s1, %s2819_s30  }
  0x4d   : > { %s1659_s26 = sshll.u32 %s2366_s24, 6  ;;  %s1709_s17 = sshll.u32 %s2240_s16, 6 }
  0x4e   : > { %s2412_s19 = scalar_lea.hbm %s2797_s3, %s1709_s17  ;;  %s2415_s29 = scalar_lea.vmem [#allocation6], %s1659_s26 }
  0x4f   : > { %s2845_s6 = sld [smem:[#allocation39_spill]]  ;;  %s552_s14 = scalar_lea.vmem [#allocation10], %s1659_s26 }
  0x50   : > { %s560_s27 = sshll.u32 %s552_s14, 4  ;;  %s2820_s30 = scalar_lea.sflag [#allocation11], %s2369_s25  ;;  %s561_s27 = int_to_ptr.vmem [resolvable:$true] %s560_s27 }
  0x55   : > { %s557_s28 = scalar_lea.hbm %s2845_s6, %s1709_s17  ;;  %s1880_s20 = scalar_lea.hbm %s2845_s6, 256 }
  0x56   : > { %s558_s1 = sshll.u32 %s557_s28, 4  ;;  %s559_s1 = int_to_ptr.hbm [resolvable:$true] %s558_s1 }
  0x57   : > { %s1874_s23 = sshra.s32 %s559_s1, 4  ;;  %s1875_s23 = int_to_ptr.hbm [resolvable:$true] %s1874_s23 }
  0x58   : > { %s1876_s13 = scalar_lea.hbm %s1875_s23, 64  ;;  %p1881_p13 = scmp.lt.s32.totalorder %s1875_s23, %s2845_s6 }
  0x59   : > { %p1877_p10 = scmp.ne.s32.totalorder %s1875_s23, %s1876_s13  ;;  %p1882_p0 = scmp.lt.s32.totalorder %s1880_s20, %s1876_s13 }
  0x5b   : > { %p1878_p11 = pnand %p1877_p10, %p2355_p4  ;;  %p1883_p1 = por %p1882_p0, %p1881_p13 }
  0x5d   : > { %p1879_p12 = pneg %p1878_p11 }
  0x5f   : > { %p1884_p2 = pnand %p1883_p1, %p1879_p12 }
  0x61   : > { %1887 = shalt.err (!%p1884_p2)
}
  0x62   : > { %s2823_s14 = smov 128   ;;  %s2826_s26 = smov 8  }
  0x63   : > { %1731 = dma.hbm_to_vmem [thread:$0]  (%p2355_p4), %s559_s1, 1024, %s561_s27, %s2820_s30, %s2823_s14, %s2823_s14, %s2826_s26  }
  0x64   : > { %s593_s17 = scalar_lea.hbm %s2802_s8, %s2240_s16  ;;  %s590_s20 = scalar_lea.vmem [#allocation13], %s2366_s24 }
  0x65   : > { %s595_s15 = sshll.u32 %s593_s17, 4  ;;  %s597_s21 = sshll.u32 %s590_s20, 4  ;;  %s596_s15 = int_to_ptr.hbm [resolvable:$true] %s595_s15  ;;  %s598_s21 = int_to_ptr.vmem [resolvable:$true] %s597_s21 }
  0x66   : > { %s2821_s28 = scalar_lea.sflag [#allocation14], %s2369_s25  ;;  %s1902_s23 = sshra.s32 %s596_s15, 4  ;;  %s1903_s23 = int_to_ptr.hbm [resolvable:$true] %s1902_s23 }
  0x67   : > { %s1904_s13 = scalar_lea.hbm %s1903_s23, 1  ;;  %s1908_s27 = scalar_lea.hbm %s2802_s8, 4 }
  0x68   : > { %p1905_p3 = scmp.ne.s32.totalorder %s1903_s23, %s1904_s13  ;;  %p1909_p8 = scmp.lt.s32.totalorder %s1903_s23, %s2802_s8 }
  0x69   : > { %p1910_p9 = scmp.lt.s32.totalorder %s1908_s27, %s1904_s13 }
  0x6a   : > { %p1906_p5 = pnand %p1905_p3, %p2355_p4 }
  0x6b   : > { %p1911_p10 = por %p1910_p9, %p1909_p8 }
  0x6c   : > { %p1907_p7 = pneg %p1906_p5 }
  0x6e   : > { %p1912_p11 = pnand %p1911_p10, %p1907_p7 }
  0x70   : > { %1915 = shalt.err (!%p1912_p11)
}
  0x71   : > { %1733 = dma.hbm_to_vmem [thread:$0]  (%p2355_p4), %s596_s15, 16, %s598_s21, %s2821_s28  }
  0x72   : > { %s632_s17 = scalar_lea.hbm %s2804_s10, %s2240_s16  ;;  %s629_s20 = scalar_lea.vmem [#allocation16], %s2366_s24 }
  0x73   : > { %s636_s18 = sshll.u32 %s629_s20, 4  ;;  %s634_s23 = sshll.u32 %s632_s17, 4  ;;  %s637_s18 = int_to_ptr.vmem [resolvable:$true] %s636_s18  ;;  %s635_s23 = int_to_ptr.hbm [resolvable:$true] %s634_s23 }
  0x74   : > { %s2822_s13 = scalar_lea.sflag [#allocation17], %s2369_s25  ;;  %s1930_s27 = sshra.s32 %s635_s23, 4  ;;  %s1931_s27 = int_to_ptr.hbm [resolvable:$true] %s1930_s27 }
  0x75   : > { %s1932_s1 = scalar_lea.hbm %s1931_s27, 1  ;;  %s1936_s15 = scalar_lea.hbm %s2804_s10, 4 }
  0x76   : > { %p1933_p12 = scmp.ne.s32.totalorder %s1931_s27, %s1932_s1  ;;  %p1937_p1 = scmp.lt.s32.totalorder %s1931_s27, %s2804_s10 }
  0x77   : > { %p1938_p2 = scmp.lt.s32.totalorder %s1936_s15, %s1932_s1 }
  0x78   : > { %p1934_p13 = pnand %p1933_p12, %p2355_p4 }
  0x79   : > { %p1939_p3 = por %p1938_p2, %p1937_p1 }
  0x7a   : > { %p1935_p0 = pneg %p1934_p13 }
  0x7c   : > { %p1940_p5 = pnand %p1939_p3, %p1935_p0 }
  0x7e   : > { %1943 = shalt.err (!%p1940_p5)
}
  0x7f   : > { %1735 = dma.hbm_to_vmem [thread:$0]  (%p2355_p4), %s635_s23, 16, %s637_s18, %s2822_s13  }
  0x80   : > { %s1668_s6 = sshll.u32 %s2366_s24, 4  ;;  %s1712_s30 = sshll.u32 %s2240_s16, 4 }
  0x81   : > { %s669_s2 = scalar_lea.hbm %s2806_s12, %s1712_s30  ;;  %s664_s1 = scalar_lea.vmem [#allocation19], %s1668_s6 }
  0x82   : > { %s670_s27 = sshll.u32 %s669_s2, 4  ;;  %s672_s15 = sshll.u32 %s664_s1, 4  ;;  %s671_s27 = int_to_ptr.hbm [resolvable:$true] %s670_s27  ;;  %s673_s15 = int_to_ptr.vmem [resolvable:$true] %s672_s15 }
  0x83   : > { %s2825_s21 = scalar_lea.sflag [#allocation20], %s2369_s25  ;;  %s1958_s4 = sshra.s32 %s671_s27, 4  ;;  %s1959_s4 = int_to_ptr.hbm [resolvable:$true] %s1958_s4 }
  0x84   : > { %s1960_s28 = scalar_lea.hbm %s1959_s4, 16  ;;  %s1964_s13 = scalar_lea.hbm %s2806_s12, 64 }
  0x85   : > { %p1961_p7 = scmp.ne.s32.totalorder %s1959_s4, %s1960_s28  ;;  %p1965_p10 = scmp.lt.s32.totalorder %s1959_s4, %s2806_s12 }
  0x86   : > { %p1966_p11 = scmp.lt.s32.totalorder %s1964_s13, %s1960_s28 }
  0x87   : > { %p1962_p8 = pnand %p1961_p7, %p2355_p4 }
  0x88   : > { %p1967_p12 = por %p1966_p11, %p1965_p10 }
  0x89   : > { %p1963_p9 = pneg %p1962_p8 }
  0x8b   : > { %p1968_p13 = pnand %p1967_p12, %p1963_p9 }
  0x8d   : > { %1971 = shalt.err (!%p1968_p13)
}
  0x8e   : > { %s2846_s6 = smov 128   ;;  %s1654_s30 = sshll.u32 %s2366_s24, 5 }
  0x8f   : > { %1737 = dma.hbm_to_vmem [thread:$0]  (%p2355_p4), %s671_s27, 256, %s673_s15, %s2825_s21, %s2846_s6, %s2846_s6, %s2826_s26  }
  0x90   : > { %s1708_s20 = sshll.u32 %s2240_s16, 5  ;;  %s2847_s0 = sld [smem:[#allocation35_spill]] }
  0x91   : > { %s455_s13 = scalar_lea.vmem [#allocation2], %s1654_s30  ;;  %s452_s18 = scalar_lea.sflag [#allocation3], %s2366_s24 }
  0x92   : > { %s463_s1 = sshll.u32 %s455_s13, 4  ;;  %s464_s1 = int_to_ptr.vmem [resolvable:$true] %s463_s1 }
  0x96   : > { %s460_s28 = scalar_lea.hbm %s2847_s0, %s1708_s20  ;;  %s1992_s21 = scalar_lea.hbm %s2847_s0, 128 }
  0x97   : > { %s461_s4 = sshll.u32 %s460_s28, 4  ;;  %s462_s4 = int_to_ptr.hbm [resolvable:$true] %s461_s4 }
  0x98   : > { %s1986_s23 = sshra.s32 %s462_s4, 4  ;;  %s1987_s23 = int_to_ptr.hbm [resolvable:$true] %s1986_s23 }
  0x99   : > { %s1988_s17 = scalar_lea.hbm %s1987_s23, 32  ;;  %p1993_p3 = scmp.lt.s32.totalorder %s1987_s23, %s2847_s0 }
  0x9a   : > { %p1989_p0 = scmp.ne.s32.totalorder %s1987_s23, %s1988_s17  ;;  %p1994_p5 = scmp.lt.s32.totalorder %s1992_s21, %s1988_s17 }
  0x9c   : > { %p1990_p1 = pnand %p1989_p0, %p2355_p4  ;;  %p1995_p7 = por %p1994_p5, %p1993_p3 }
  0x9e   : > { %p1991_p2 = pneg %p1990_p1 }
  0xa0   : > { %p1996_p8 = pnand %p1995_p7, %p1991_p2 }
  0xa2   : > { %1999 = shalt.err (!%p1996_p8)
}
  0xa3   : > { %s2848_s2 = smov 8   ;;  %s2516_s27 = scalar_lea.hbm %s2803_s9, %s1708_s20 }
  0xa4   : > { %1726 = dma.hbm_to_vmem [thread:$0]  (%p2355_p4), %s462_s4, 512, %s464_s1, %s452_s18, %s2846_s6, %s2846_s6, %s2848_s2  }
  0xa5   : > { %s2518_s26 = scalar_lea.vmem [#allocation15], %s1654_s30  ;;  %s614_s23 = sshll.u32 %s2516_s27, 4  ;;  %s2565_s23 = int_to_ptr.hbm [resolvable:$true] %s614_s23 }
  0xa6   : > { %s616_s21 = sshll.u32 %s2518_s26, 4  ;;  %s2849_s17 = sshll.u32 %s2412_s19, 4  ;;  %s503_s17 = int_to_ptr.hbm [resolvable:$true] %s2849_s17  ;;  %s617_s21 = int_to_ptr.vmem [resolvable:$true] %s616_s21 }
  0xa7   : > { %s2850_s15 = sshll.u32 %s2415_s29, 4  ;;  %s2014_s14 = sshra.s32 %s503_s17, 4  ;;  %s505_s15 = int_to_ptr.vmem [resolvable:$true] %s2850_s15  ;;  %s2015_s14 = int_to_ptr.hbm [resolvable:$true] %s2014_s14 }
  0xa8   : > { %s2016_s0 = scalar_lea.hbm %s2015_s14, 64  ;;  %s2020_s4 = scalar_lea.hbm %s2797_s3, 256 }
  0xa9   : > { %p2017_p9 = scmp.ne.s32.totalorder %s2015_s14, %s2016_s0  ;;  %p2021_p12 = scmp.lt.s32.totalorder %s2015_s14, %s2797_s3 }
  0xaa   : > { %p2022_p13 = scmp.lt.s32.totalorder %s2020_s4, %s2016_s0 }
  0xab   : > { %p2018_p10 = pnand %p2017_p9, %p2355_p4 }
  0xac   : > { %p2023_p0 = por %p2022_p13, %p2021_p12 }
  0xad   : > { %p2019_p11 = pneg %p2018_p10 }
  0xaf   : > { %p2024_p1 = pnand %p2023_p0, %p2019_p11 }
  0xb1   : > { %2027 = shalt.err (!%p2024_p1)
}
  0xb2   : > { %s2851_s19 = scalar_lea.sflag [#allocation5], %s2369_s25  ;;  %s537_s13 = scalar_lea.hbm %s2799_s5, %s2240_s16 }
  0xb3   : > { %1728 = dma.hbm_to_vmem [thread:$0]  (%p2355_p4), %s503_s17, 1024, %s505_s15, %s2851_s19, %s2846_s6, %s2846_s6, %s2848_s2  }
  0xb4   : > { %s534_s14 = scalar_lea.vmem [#allocation9], %s2366_s24  ;;  %s539_s1 = sshll.u32 %s537_s13, 4  ;;  %s540_s1 = int_to_ptr.hbm [resolvable:$true] %s539_s1 }
  0xb5   : > { %s541_s0 = sshll.u32 %s534_s14, 4  ;;  %s2042_s20 = sshra.s32 %s540_s1, 4  ;;  %s542_s0 = int_to_ptr.vmem [resolvable:$true] %s541_s0  ;;  %s2043_s20 = int_to_ptr.hbm [resolvable:$true] %s2042_s20 }
  0xb6   : > { %s2044_s4 = scalar_lea.hbm %s2043_s20, 1  ;;  %s2048_s17 = scalar_lea.hbm %s2799_s5, 4 }
  0xb7   : > { %p2045_p2 = scmp.ne.s32.totalorder %s2043_s20, %s2044_s4  ;;  %p2049_p7 = scmp.lt.s32.totalorder %s2043_s20, %s2799_s5 }
  0xb8   : > { %p2050_p8 = scmp.lt.s32.totalorder %s2048_s17, %s2044_s4 }
  0xb9   : > { %p2046_p3 = pnand %p2045_p2, %p2355_p4 }
  0xba   : > { %p2051_p9 = por %p2050_p8, %p2049_p7 }
  0xbb   : > { %p2047_p5 = pneg %p2046_p3 }
  0xbd   : > { %p2052_p10 = pnand %p2051_p9, %p2047_p5 }
  0xbf   : > { %2055 = shalt.err (!%p2052_p10)
}
  0xc0   : > { %s2852_s29 = scalar_lea.sflag [#allocation8], %s2369_s25  ;;  %s576_s14 = scalar_lea.hbm %s2801_s7, %s2240_s16 }
  0xc1   : > { %1730 = dma.hbm_to_vmem [thread:$0]  (%p2355_p4), %s540_s1, 16, %s542_s0, %s2852_s29  }
  0xc2   : > { %s573_s30 = scalar_lea.vmem [#allocation12], %s2366_s24  ;;  %s578_s20 = sshll.u32 %s576_s14, 4  ;;  %s579_s20 = int_to_ptr.hbm [resolvable:$true] %s578_s20 }
  0xc3   : > { %s580_s18 = sshll.u32 %s573_s30, 4  ;;  %s2070_s4 = sshra.s32 %s579_s20, 4  ;;  %s581_s18 = int_to_ptr.vmem [resolvable:$true] %s580_s18  ;;  %s2071_s4 = int_to_ptr.hbm [resolvable:$true] %s2070_s4 }
  0xc4   : > { %s2072_s17 = scalar_lea.hbm %s2071_s4, 1  ;;  %s2076_s15 = scalar_lea.hbm %s2801_s7, 4 }
  0xc5   : > { %p2073_p11 = scmp.ne.s32.totalorder %s2071_s4, %s2072_s17  ;;  %p2077_p0 = scmp.lt.s32.totalorder %s2071_s4, %s2801_s7 }
  0xc6   : > { %p2078_p1 = scmp.lt.s32.totalorder %s2076_s15, %s2072_s17 }
  0xc7   : > { %p2074_p12 = pnand %p2073_p11, %p2355_p4 }
  0xc8   : > { %p2079_p2 = por %p2078_p1, %p2077_p0 }
  0xc9   : > { %p2075_p13 = pneg %p2074_p12 }
  0xcb   : > { %p2080_p3 = pnand %p2079_p2, %p2075_p13 }
  0xcd   : > { %2083 = shalt.err (!%p2080_p3)
}
  0xce   : > { %s2853_s27 = scalar_lea.sflag [#allocation11], %s2369_s25  ;;  %s2098_s28 = sshra.s32 %s2565_s23, 4  ;;  %s2099_s28 = int_to_ptr.hbm [resolvable:$true] %s2098_s28 }
  0xcf   : > { %1732 = dma.hbm_to_vmem [thread:$0]  (%p2355_p4), %s579_s20, 16, %s581_s18, %s2853_s27  }
  0xd0   : > { %s2100_s13 = scalar_lea.hbm %s2099_s28, 32  ;;  %s2104_s4 = scalar_lea.hbm %s2803_s9, 128 }
  0xd1   : > { %p2101_p5 = scmp.ne.s32.totalorder %s2099_s28, %s2100_s13  ;;  %p2105_p9 = scmp.lt.s32.totalorder %s2099_s28, %s2803_s9 }
  0xd2   : > { %p2106_p10 = scmp.lt.s32.totalorder %s2104_s4, %s2100_s13 }
  0xd3   : > { %p2102_p7 = pnand %p2101_p5, %p2355_p4 }
  0xd4   : > { %p2107_p11 = por %p2106_p10, %p2105_p9 }
  0xd5   : > { %p2103_p8 = pneg %p2102_p7 }
  0xd7   : > { %p2108_p12 = pnand %p2107_p11, %p2103_p8 }
  0xd9   : > { %2111 = shalt.err (!%p2108_p12)
}
  0xda   : > { %s2854_s26 = scalar_lea.sflag [#allocation14], %s2369_s25  ;;  %s649_s1 = scalar_lea.hbm %s2805_s11, %s2240_s16 }
  0xdb   : > { %1734 = dma.hbm_to_vmem [thread:$0]  (%p2355_p4), %s2565_s23, 512, %s617_s21, %s2854_s26, %s2846_s6, %s2846_s6, %s2848_s2  }
  0xdc   : > { %s646_s15 = scalar_lea.vmem [#allocation18], %s2366_s24  ;;  %s651_s29 = sshll.u32 %s649_s1, 4  ;;  %s652_s29 = int_to_ptr.hbm [resolvable:$true] %s651_s29 }
  0xdd   : > { %s653_s19 = sshll.u32 %s646_s15, 4  ;;  %s2126_s27 = sshra.s32 %s652_s29, 4  ;;  %s654_s19 = int_to_ptr.vmem [resolvable:$true] %s653_s19  ;;  %s2127_s27 = int_to_ptr.hbm [resolvable:$true] %s2126_s27 }
  0xde   : > { %s2128_s28 = scalar_lea.hbm %s2127_s27, 1  ;;  %s2132_s6 = scalar_lea.hbm %s2805_s11, 4 }
  0xdf   : > { %p2129_p13 = scmp.ne.s32.totalorder %s2127_s27, %s2128_s28  ;;  %p2133_p2 = scmp.lt.s32.totalorder %s2127_s27, %s2805_s11 }
  0xe0   : > { %p2134_p3 = scmp.lt.s32.totalorder %s2132_s6, %s2128_s28 }
  0xe1   : > { %p2130_p0 = pnand %p2129_p13, %p2355_p4 }
  0xe2   : > { %p2135_p5 = por %p2134_p3, %p2133_p2 }
  0xe3   : > { %p2131_p1 = pneg %p2130_p0 }
  0xe5   : > { %p2136_p7 = pnand %p2135_p5, %p2131_p1 }
  0xe7   : > { %2139 = shalt.err (!%p2136_p7)
}
  0xe8   : > { %s2855_s23 = scalar_lea.sflag [#allocation17], %s2369_s25  ;;  %s2856_s17 = sld [smem:[#allocation40_spill]] }
  0xe9   : > { %1736 = dma.hbm_to_vmem [thread:$0]  (%p2355_p4), %s652_s29, 16, %s654_s19, %s2855_s23  }
  0xea   : > { %s685_s26 = scalar_lea.vmem [#allocation21], %s2366_s24 }
  0xeb   : > { %s692_s18 = sshll.u32 %s685_s26, 4  ;;  %s693_s18 = int_to_ptr.vmem [resolvable:$true] %s692_s18 }
  0xee   : > { %s688_s0 = scalar_lea.hbm %s2856_s17, %s2240_s16  ;;  %s2160_s19 = scalar_lea.hbm %s2856_s17, 4 }
  0xef   : > { %s690_s20 = sshll.u32 %s688_s0, 4  ;;  %s691_s20 = int_to_ptr.hbm [resolvable:$true] %s690_s20 }
  0xf0   : > { %s2154_s1 = sshra.s32 %s691_s20, 4  ;;  %s2155_s1 = int_to_ptr.hbm [resolvable:$true] %s2154_s1 }
  0xf1   : > { %s2156_s15 = scalar_lea.hbm %s2155_s1, 1  ;;  %p2161_p11 = scmp.lt.s32.totalorder %s2155_s1, %s2856_s17 }
  0xf2   : > { %p2157_p8 = scmp.ne.s32.totalorder %s2155_s1, %s2156_s15  ;;  %p2162_p12 = scmp.lt.s32.totalorder %s2160_s19, %s2156_s15 }
  0xf4   : > { %p2158_p9 = pnand %p2157_p8, %p2355_p4  ;;  %p2163_p13 = por %p2162_p12, %p2161_p11 }
  0xf6   : > { %p2159_p10 = pneg %p2158_p9 }
  0xf8   : > { %p2164_p0 = pnand %p2163_p13, %p2159_p10 }
  0xfa   : > { %2167 = shalt.err (!%p2164_p0)
}
  0xfb   : > { %s2857_s24 = scalar_lea.sflag [#allocation20], %s2369_s25 }
  0xfc   : > { %1738 = dma.hbm_to_vmem [thread:$0]  (%p2355_p4), %s691_s20, 16, %s693_s18, %s2857_s24  }
  0xfd PF: > { %p1671_p1 = scmp.ge.s32.totalorder %s2240_s16, 1  ;;  %p697_p2 = scmp.lt.s32.totalorder %s2240_s16, 5 }
  0xff   : > { %p698_p3 = pnand %p1671_p1, %p697_p2 }
 0x100   : > { %s2858_s14 = sld [smem:[#allocation29_spill]] (!%p698_p3) }
 0x101   : > { %701 = sbr.rel (%p698_p3) target bundleno = 911 (0x38f), region = 76 }
 0x106   : > { %s2635_s2 = sand.u32 1, %s2858_s14  }
 0x107   : > { %s1672_s21 = sshll.u32 %s2635_s2, 5  ;;  %s704_s23 = scalar_lea.sflag [#allocation3], %s2635_s2 }
 0x108   : > { %s2639_s30 = scalar_lea.vmem [#allocation2], %s1672_s21 }
 0x109   : > { %2199 = dma.done.wait (%p2360_p6), %s704_s23, 512  }
 0x10a   : > { %2201 = vsyncadd (%p2360_p6), %s704_s23, 4294966784  ;;  %s2860_s22 = sld [smem:[#allocation31_spill]]  ;;  %s1673_s25 = sshll.u32 %s2635_s2, 1 }
 0x10b   : > { %s2650_s0 = scalar_lea.vmem [#allocation4], %s1673_s25 }
 0x110   : > { %s2646_s16 = sand.u32 1, %s2860_s22  }
 0x111   : > { %s714_s4 = scalar_lea.sflag [#allocation5], %s2646_s16 }
 0x112   : > { %2203 = dma.done.wait (%p2360_p6), %s714_s4, 1056  }
 0x113   : > { %2205 = vsyncadd (%p2360_p6), %s714_s4, 4294966240  ;;  %s1674_s26 = sshll.u32 %s2635_s2, 6  ;;  %s734_s20 = scalar_lea.sflag [#allocation8], %s2646_s16 }
 0x114   : > { %s2657_s18 = scalar_lea.vmem [#allocation6], %s1674_s26  ;;  %s736_s1 = scalar_lea.vmem [#allocation7], %s2635_s2 }
 0x115   : > { %2207 = dma.done.wait (%p2360_p6), %s734_s20, 32  }
 0x116   : > { %2209 = vsyncadd (%p2360_p6), %s734_s20, 4294967264  ;;  %s745_s15 = scalar_lea.vmem [#allocation9], %s2635_s2  ;;  %s752_s27 = scalar_lea.sflag [#allocation11], %s2646_s16 }
 0x117   : > { %s2667_s28 = scalar_lea.vmem [#allocation10], %s1674_s26 }
 0x118   : > { %2211 = dma.done.wait (%p2360_p6), %s752_s27, 1040  }
 0x119   : > { %2213 = vsyncadd (%p2360_p6), %s752_s27, 4294966256  ;;  %s764_s19 = scalar_lea.vmem [#allocation12], %s2635_s2  ;;  %s771_s29 = scalar_lea.sflag [#allocation14], %s2646_s16 }
 0x11a   : > { %s773_s13 = scalar_lea.vmem [#allocation13], %s2635_s2 }
 0x11b   : > { %2215 = dma.done.wait (%p2360_p6), %s771_s29, 528  }
 0x11c   : > { %2217 = vsyncadd (%p2360_p6), %s771_s29, 4294966768  ;;  %s2680_s24 = scalar_lea.vmem [#allocation15], %s1672_s21  ;;  %s790_s14 = scalar_lea.sflag [#allocation17], %s2646_s16 }
 0x11d   : > { %s792_s23 = scalar_lea.vmem [#allocation16], %s2635_s2 }
 0x11e   : > { %2219 = dma.done.wait (%p2360_p6), %s790_s14, 32  }
 0x11f   : > { %2221 = vsyncadd (%p2360_p6), %s790_s14, 4294967264  ;;  %s1677_s25 = sshll.u32 %s2635_s2, 4  ;;  %s801_s4 = scalar_lea.vmem [#allocation18], %s2635_s2 }
 0x120   : > { %s808_s26 = scalar_lea.sflag [#allocation20], %s2646_s16  ;;  %s2691_s20 = scalar_lea.vmem [#allocation19], %s1677_s25 }
 0x121   : > { %2223 = dma.done.wait (%p2360_p6), %s808_s26, 272  }
 0x122   : > { %2225 = vsyncadd (%p2360_p6), %s808_s26, 4294967024  ;;  %v2244_v0 = vmov 0   ;;  %vm992_vm0 = vcmask 1045504   ;;  %v987_v1 = vld [vmem:[%s2657_s18 + $0x38] sm:$0x3f]  ;;  %v986_v2 = vld [vmem:[%s2657_s18 + $0x30] sm:$0xff] }
 0x123   : > { %1790 = vset.pattern.permute.xlu1 %v2244_v0  ;;  %1788 = vset.pattern.permute.xlu0 %v2244_v0  ;;  %v925_v3 = vld [vmem:[%s2639_s30 + $0x8] sm:$0xff]  ;;  %v924_v4 = vld [vmem:[%s2639_s30] sm:$0xff]  ;;  %v926_v7 = vld [vmem:[%s2639_s30 + $0x10] sm:$0xff]  ;;  %v2245_v11 = vmov 1   ;;  %s2861_s16 = sld [smem:[#allocation36_spill]]  ;;  %vm988_vm1 = vcmask 506880  }
 0x124   : > { %1792 = vset.pattern.permute.xlu2 %v2244_v0  ;;  %1680 = vmatpush.msk.msra.mxu0 %vm992_vm0, %v987_v1  ;;  %v985_v5 = vld [vmem:[%s2657_s18 + $0x28] sm:$0xff]  ;;  %v984_v6 = vld [vmem:[%s2657_s18 + $0x20] sm:$0xff]  ;;  %v983_v8 = vld [vmem:[%s2657_s18 + $0x18] sm:$0xff]  ;;  %vm1066_vm2 = vcmask 523264   ;;  %vm1168_vm3 = vcmask 261120   ;;  %vm1272_vm4 = vcmask 130048  }
 0x125   : > { %937 = vperm.xlu1 %1790, %v925_v3   ;;  %932 = vperm.xlu0 %1788, %v924_v4   ;;  %v982_v9 = vld [vmem:[%s2657_s18 + $0x10] sm:$0xff]  ;;  %v981_v10 = vld [vmem:[%s2657_s18 + $0x8] sm:$0xff]  ;;  %v980_v12 = vld [vmem:[%s2657_s18] sm:$0xff]  ;;  %p919_p4 = scmp.lt.s32.totalorder %s2860_s22, 3 }
 0x126   : > { %1005 = vmatpush.msra.mxu0 %v986_v2  ;;  %942 = vperm.xlu2 %1792, %v926_v7   ;;  %v927_v14 = vld [vmem:[%s2639_s30 + $0x18] sm:$0xff]  ;;  %v1065_v15 = vld [vmem:[%s2667_s28 + $0x38] sm:$0xff]  ;;  %v1063_v17 = vld [vmem:[%s2667_s28 + $0x28] sm:$0xff]  ;;  %s820_s30 = scalar_lea.vmem [#allocation21], %s2635_s2 }
 0x127   : > { %v1064_v16 = vld [vmem:[%s2667_s28 + $0x30] sm:$0xff]  ;;  %1714 = vmatpush.msra.mxu1 %v1065_v15  ;;  %v1062_v18 = vld [vmem:[%s2667_s28 + $0x20] sm:$0xff]  ;;  %v1061_v19 = vld [vmem:[%s2667_s28 + $0x18] sm:$0xff]  ;;  %s2868_s22 = smov (!%p919_p4, %s2860_s22), 3 }
 0x128   : > { %1006 = vmatpush.msra.mxu0 %v985_v5  ;;  %v1060_v20 = vld [vmem:[%s2667_s28 + $0x10] sm:$0xff]  ;;  %v1059_v22 = vld [vmem:[%s2667_s28 + $0x8] sm:$0xff]  ;;  %v1058_v24 = vld [vmem:[%s2667_s28] sm:$0xff] }
 0x129   : > { %v928_v13 = vld [vmem:[%s2861_s16] sm:$0x3]  ;;  %1715 = vmatpush.msra.mxu1 %v1064_v16  ;;  %v1167_v5 = vld [vmem:[%s2680_s24 + $0x18] sm:$0xff] }
 0x12a   : > { %1007 = vmatpush.msra.mxu0 %v984_v6  ;;  %v929_v28 = vld [vmem:[%s2650_s0] sm:$0x3]  ;;  %1722 = vmatpush.msra.mxu2 %v1167_v5  ;;  %s1713_s0 = sshll.u32 %s2868_s22, 6 }
 0x12b   : > { %1716 = vmatpush.msra.mxu1 %v1063_v17  ;;  %v950_v29 = vperm.slane %v929_v28, 0  ;;  %v971_v30 = vperm.slane %v929_v28, 1  ;;  %v1795_v48 = vld [vmem:[%s736_s1] ss:$0 sm:$0xff] }
 0x12c   : > { %1008 = vmatpush.msra.mxu0 %v983_v8  ;;  %v1796_v50 = vld [vmem:[%s745_s15] ss:$0 sm:$0xff]  ;;  %s2862_s15 = sld [smem:[#allocation41_spill]] }
 0x12d   : > { %1791 = vset.pattern.permute.xlu1 %v2245_v11  ;;  %1789 = vset.pattern.permute.xlu0 %v2245_v11 }
 0x12e   : > { %1009 = vmatpush.msra.mxu0 %v982_v9  ;;  %960 = vperm.xlu1 %1791, %v925_v3  }
 0x12f   : > { %956 = vperm.xlu0 %1789, %v924_v4   ;;  %1793 = vset.pattern.permute.xlu2 %v2245_v11 }
 0x130   : > { %1010 = vmatpush.msra.mxu0 %v981_v10  ;;  %964 = vperm.xlu2 %1793, %v926_v7  }
 0x131   : > { %1717 = vmatpush.msra.mxu1 %v1062_v18 }
 0x132   : > { %1011 = vmatpush.msra.mxu0 %v980_v12  ;;  %s2771_s27 = scalar_lea.vmem %s2862_s15, %s1713_s0 }
 0x133   : > { %1681 = vmatmul.msk.f32.vlgmr.msra.gmra.mxu0 %vm988_vm1, %v928_v13  ;;  %1718 = vmatpush.msra.mxu1 %v1061_v19 }
 0x134   : > { %1099 = vmatpush.msrb.mxu0 %v1065_v15 }
 0x135   : > { %1719 = vmatpush.msra.mxu1 %v1060_v20 }
 0x136   : > { %1794 = vset.pattern.permute.xlu1 %v2244_v0  ;;  %1100 = vmatpush.msrb.mxu0 %v1064_v16 }
 0x137   : > { %947 = vperm.xlu1 %1794, %v927_v14   ;;  %1720 = vmatpush.msra.mxu1 %v1059_v22 }
 0x138   : > { %968 = vperm.xlu2 %1793, %v927_v14   ;;  %1101 = vmatpush.msrb.mxu0 %v1063_v17 }
 0x139   : > { %1721 = vmatpush.msra.mxu1 %v1058_v24 }
 0x13a   : > { %1102 = vmatpush.msrb.mxu0 %v1062_v18 }
 0x13c   : > { %1103 = vmatpush.msrb.mxu0 %v1061_v19 }
 0x13e   : > { %1104 = vmatpush.msrb.mxu0 %v1060_v20  ;;  %v1166_v20 = vld [vmem:[%s2680_s24 + $0x10] sm:$0xff] }
 0x13f   : > { %1723 = vmatpush.msra.mxu2 %v1166_v20 }
 0x140   : > { %1105 = vmatpush.msrb.mxu0 %v1059_v22  ;;  %v1164_v22 = vld [vmem:[%s2680_s24] sm:$0xff] }
 0x142   : > { %1106 = vmatpush.msrb.mxu0 %v1058_v24  ;;  %v1798_v24 = vld [vmem:[%s773_s13] ss:$0 sm:$0xff] }
 0x144   : > { %1205 = vmatpush.msra.mxu0 %v1167_v5 }
 0x146   : > { %1206 = vmatpush.msra.mxu0 %v1166_v20 }
 0x180   : > { %v943_v21 = vpop.permute.xlu2 %942 }
 0x181   : > { %v953_v34 = vmul.f32 %v950_v29, %v943_v21  ;;  %v1165_v21 = vld [vmem:[%s2680_s24 + $0x8] sm:$0xff] }
 0x182   : > { %1207 = vmatpush.msra.mxu0 %v1165_v21  ;;  %1724 = vmatpush.msra.mxu2 %v1165_v21 }
 0x184   : > { %1208 = vmatpush.msra.mxu0 %v1164_v22  ;;  %1725 = vmatpush.msra.mxu2 %v1164_v22 }
 0x18a   : > { %v965_v25 = vpop.permute.xlu2 %964 }
 0x18b   : > { %v974_v35 = vmul.f32 %v971_v30, %v965_v25 }
 0x18d   : > { %v978_v42 = vadd.f32 %v974_v35, %v953_v34 }
 0x192   : > { %v969_v31 = vpop.permute.xlu2 %968 }
 0x193   : > { %v975_v37 = vmul.f32 %v971_v30, %v969_v31 }
 0x197   : > { %v938_v23 = vpop.permute.xlu1 %937  ;;  %v933_v26 = vpop.permute.xlu0 %932 }
 0x198   : > { %v951_v36 = vmul.f32 %v950_v29, %v933_v26  ;;  %v952_v38 = vmul.f32 %v950_v29, %v938_v23  ;;  %v1797_v23 = vld [vmem:[%s764_s19] ss:$0 sm:$0xff] }
 0x1a0   : > { %v961_v27 = vpop.permute.xlu1 %960 }
 0x1a1   : > { %v957_v32 = vpop.permute.xlu0 %956  ;;  %v973_v40 = vmul.f32 %v971_v30, %v961_v27 }
 0x1a2   : > { %v972_v39 = vmul.f32 %v971_v30, %v957_v32 }
 0x1a3   : > { %v977_v45 = vadd.f32 %v973_v40, %v952_v38 }
 0x1a4   : > { %v976_v44 = vadd.f32 %v972_v39, %v951_v36 }
 0x1a9   : > { %v948_v33 = vpop.permute.xlu1 %947 }
 0x1aa   : > { %v954_v41 = vmul.f32 %v950_v29, %v948_v33 }
 0x1ac   : > { %v979_v46 = vadd.f32 %v975_v37, %v954_v41 }
 0x1b0   : > { %v1013_v43 = vpop.f32.mrf.mxu0 }
 0x1b1   : > { %v1016_v47 = vperm.slane %v1013_v43, 0  ;;  %v1021_v58 = vperm.slane %v1013_v43, 1 }
 0x1b3   : > { %v1017_v49 = vadd.f32 %v1016_v47, %v976_v44  ;;  %v1019_v51 = vadd.f32 %v1016_v47, %v978_v42  ;;  %v1018_v54 = vadd.f32 %v1016_v47, %v977_v45  ;;  %v1020_v55 = vadd.f32 %v1016_v47, %v979_v46 }
 0x1b4   : > { %v1022_v1 = vadd.f32 %v1021_v58, %v976_v44  ;;  %v1023_v7 = vadd.f32 %v1021_v58, %v977_v45  ;;  %v1024_v11 = vadd.f32 %v1021_v58, %v978_v42  ;;  %v1025_v15 = vadd.f32 %v1021_v58, %v979_v46  ;;  %v1266_v58 = vld [vmem:[%s2691_s20] sm:$0xff] }
 0x1b5   : > { %v1030_v52 = vmul.f32 %v1795_v48, %v1017_v49  ;;  %v1032_v53 = vmul.f32 %v1795_v48, %v1019_v51  ;;  %v1031_v61 = vmul.f32 %v1795_v48, %v1018_v54  ;;  %v1033_v62 = vmul.f32 %v1795_v48, %v1020_v55 }
 0x1b6   : > { %v1034_v4 = vmul.f32 %v1795_v48, %v1022_v1  ;;  %v1035_v9 = vmul.f32 %v1795_v48, %v1023_v7  ;;  %v1036_v13 = vmul.f32 %v1795_v48, %v1024_v11  ;;  %v1037_v17 = vmul.f32 %v1795_v48, %v1025_v15 }
 0x1b7   : > { %v1042_v56 = vadd.f32 %v1796_v50, %v1030_v52  ;;  %v1044_v57 = vadd.f32 %v1796_v50, %v1032_v53  ;;  %v1043_v63 = vadd.f32 %v1796_v50, %v1031_v61  ;;  %v1045_v0 = vadd.f32 %v1796_v50, %v1033_v62 }
 0x1b8   : > { %v1046_v6 = vadd.f32 %v1796_v50, %v1034_v4  ;;  %v1047_v10 = vadd.f32 %v1796_v50, %v1035_v9  ;;  %v1048_v14 = vadd.f32 %v1796_v50, %v1036_v13  ;;  %v1049_v18 = vadd.f32 %v1796_v50, %v1037_v17 }
 0x1b9   : > { %v1050_v59 = vmax.f32 %v1042_v56, 0.0  ;;  %v1052_v60 = vmax.f32 %v1044_v57, 0.0  ;;  %v1051_v2 = vmax.f32 %v1043_v63, 0.0  ;;  %v1053_v3 = vmax.f32 %v1045_v0, 0.0  ;;  %v1267_v57 = vld [vmem:[%s2691_s20 + $0x8] sm:$0xff] }
 0x1ba   : > { %v1054_v8 = vmax.f32 %v1046_v6, 0.0  ;;  %v1055_v12 = vmax.f32 %v1047_v10, 0.0  ;;  %v1056_v16 = vmax.f32 %v1048_v14, 0.0  ;;  %v1057_v19 = vmax.f32 %v1049_v18, 0.0  ;;  %1311 = vmatpush.msra.mxu3 %v1267_v57 }
 0x1bb   : > { %1682 = vmatmul.msk.f32.vlgmr.msrb.gmra.mxu0 %vm1066_vm2, %v1050_v59  ;;  %1684 = vmatmul.msk.f32.vlgmr.msra.gmra.mxu1 %vm1066_vm2, %v1052_v60  ;;  %v1799_v59 = vld [vmem:[%s792_s23] ss:$0 sm:$0xff] }
 0x1bc   : > { %1312 = vmatpush.msra.mxu3 %v1266_v58  ;;  %v1800_v60 = vld [vmem:[%s801_s4] ss:$0 sm:$0xff] }
 0x1c3   : > { %1683 = vmatmul.msk.f32.gmra.mxu0 %vm1066_vm2, %v1051_v2  ;;  %1685 = vmatmul.msk.f32.gmra.mxu1 %vm1066_vm2, %v1053_v3 }
 0x1cb   : > { %1686 = vmatmul.msk.f32.gmra.mxu1 %vm1066_vm2, %v1054_v8 }
 0x1d3   : > { %1687 = vmatmul.msk.f32.gmra.mxu1 %vm1066_vm2, %v1055_v12 }
 0x1db   : > { %1688 = vmatmul.msk.f32.gmra.mxu1 %vm1066_vm2, %v1056_v16 }
 0x1e3   : > { %1689 = vmatmul.msk.f32.gmra.mxu1 %vm1066_vm2, %v1057_v19 }
 0x238   : > { %v1108_v25 = vpop.f32.mrf.mxu0  ;;  %v1114_v26 = vpop.f32.mrf.mxu1 }
 0x239   : > { %v1136_v27 = vmul.f32 %v1797_v23, %v1108_v25  ;;  %v1138_v34 = vmul.f32 %v1797_v23, %v1114_v26 }
 0x23b   : > { %v1148_v28 = vadd.f32 %v1798_v24, %v1136_v27  ;;  %v1150_v36 = vadd.f32 %v1798_v24, %v1138_v34 }
 0x23d   : > { %v1156_v29 = vmax.f32 %v1148_v28, 0.0  ;;  %v1158_v38 = vmax.f32 %v1150_v36, 0.0 }
 0x23f   : > { %1690 = vmatmul.msk.f32.vlgmr.msra.gmra.mxu0 %vm1168_vm3, %v1156_v29  ;;  %v1801_v29 = vld [vmem:[%s820_s30] ss:$0 sm:$0xff] }
 0x240   : > { %v1111_v30 = vpop.f32.mrf.mxu0  ;;  %v1117_v32 = vpop.f32.mrf.mxu1 }
 0x241   : > { %v1137_v31 = vmul.f32 %v1797_v23, %v1111_v30  ;;  %v1139_v39 = vmul.f32 %v1797_v23, %v1117_v32 }
 0x243   : > { %v1149_v33 = vadd.f32 %v1798_v24, %v1137_v31  ;;  %v1151_v40 = vadd.f32 %v1798_v24, %v1139_v39 }
 0x245   : > { %v1157_v35 = vmax.f32 %v1149_v33, 0.0  ;;  %v1159_v41 = vmax.f32 %v1151_v40, 0.0 }
 0x247   : > { %1691 = vmatmul.msk.f32.vlgmr.msra.gmra.mxu2 %vm1168_vm3, %v1157_v35 }
 0x248   : > { %v1120_v37 = vpop.f32.mrf.mxu1 }
 0x249   : > { %v1140_v42 = vmul.f32 %v1797_v23, %v1120_v37 }
 0x24b   : > { %v1152_v44 = vadd.f32 %v1798_v24, %v1140_v42 }
 0x24d   : > { %v1160_v45 = vmax.f32 %v1152_v44, 0.0 }
 0x24f   : > { %1692 = vmatmul.msk.f32.gmra.mxu2 %vm1168_vm3, %v1158_v38 }
 0x250   : > { %v1123_v43 = vpop.f32.mrf.mxu1 }
 0x251   : > { %v1141_v46 = vmul.f32 %v1797_v23, %v1123_v43 }
 0x253   : > { %v1153_v48 = vadd.f32 %v1798_v24, %v1141_v46 }
 0x255   : > { %v1161_v49 = vmax.f32 %v1153_v48, 0.0 }
 0x257   : > { %1693 = vmatmul.msk.f32.gmra.mxu2 %vm1168_vm3, %v1159_v41 }
 0x258   : > { %v1126_v47 = vpop.f32.mrf.mxu1 }
 0x259   : > { %v1142_v50 = vmul.f32 %v1797_v23, %v1126_v47 }
 0x25b   : > { %v1154_v51 = vadd.f32 %v1798_v24, %v1142_v50 }
 0x25d   : > { %v1162_v53 = vmax.f32 %v1154_v51, 0.0 }
 0x25f   : > { %1694 = vmatmul.msk.f32.gmra.mxu2 %vm1168_vm3, %v1160_v45 }
 0x260   : > { %v1129_v52 = vpop.f32.mrf.mxu1 }
 0x261   : > { %v1143_v54 = vmul.f32 %v1797_v23, %v1129_v52 }
 0x263   : > { %v1155_v55 = vadd.f32 %v1798_v24, %v1143_v54 }
 0x265   : > { %v1163_v56 = vmax.f32 %v1155_v55, 0.0 }
 0x267   : > { %1695 = vmatmul.msk.f32.gmra.mxu2 %vm1168_vm3, %v1161_v49 }
 0x26f   : > { %1696 = vmatmul.msk.f32.gmra.mxu2 %vm1168_vm3, %v1162_v53 }
 0x277   : > { %1697 = vmatmul.msk.f32.gmra.mxu2 %vm1168_vm3, %v1163_v56 }
 0x2bc   : > { %v1210_v61 = vpop.f32.mrf.mxu0 }
 0x2bd   : > { %v1238_v62 = vmul.f32 %v1799_v59, %v1210_v61 }
 0x2bf   : > { %v1250_v63 = vadd.f32 %v1800_v60, %v1238_v62 }
 0x2c1   : > { %v1258_v0 = vmax.f32 %v1250_v63, 0.0 }
 0x2c3   : > { %1698 = vmatmul.msk.f32.vlgmr.msra.gmra.mxu3 %vm1272_vm4, %v1258_v0 }
 0x2ca   : > { %v1213_v1 = vpop.f32.mrf.mxu2 }
 0x2cb   : > { %v1239_v2 = vmul.f32 %v1799_v59, %v1213_v1 }
 0x2cd   : > { %v1251_v3 = vadd.f32 %v1800_v60, %v1239_v2 }
 0x2cf   : > { %v1259_v4 = vmax.f32 %v1251_v3, 0.0 }
 0x2d1   : > { %1699 = vmatmul.msk.f32.gmra.mxu3 %vm1272_vm4, %v1259_v4 }
 0x2d2   : > { %v1216_v5 = vpop.f32.mrf.mxu2 }
 0x2d3   : > { %v1240_v6 = vmul.f32 %v1799_v59, %v1216_v5 }
 0x2d5   : > { %v1252_v7 = vadd.f32 %v1800_v60, %v1240_v6 }
 0x2d7   : > { %v1260_v8 = vmax.f32 %v1252_v7, 0.0 }
 0x2d9   : > { %1700 = vmatmul.msk.f32.gmra.mxu3 %vm1272_vm4, %v1260_v8 }
 0x2da   : > { %v1219_v9 = vpop.f32.mrf.mxu2 }
 0x2db   : > { %v1241_v10 = vmul.f32 %v1799_v59, %v1219_v9 }
 0x2dd   : > { %v1253_v11 = vadd.f32 %v1800_v60, %v1241_v10 }
 0x2df   : > { %v1261_v12 = vmax.f32 %v1253_v11, 0.0 }
 0x2e1   : > { %1701 = vmatmul.msk.f32.gmra.mxu3 %vm1272_vm4, %v1261_v12 }
 0x2e2   : > { %v1222_v13 = vpop.f32.mrf.mxu2 }
 0x2e3   : > { %v1242_v14 = vmul.f32 %v1799_v59, %v1222_v13 }
 0x2e5   : > { %v1254_v15 = vadd.f32 %v1800_v60, %v1242_v14 }
 0x2e7   : > { %v1262_v16 = vmax.f32 %v1254_v15, 0.0 }
 0x2e9   : > { %1702 = vmatmul.msk.f32.gmra.mxu3 %vm1272_vm4, %v1262_v16 }
 0x2ea   : > { %v1225_v17 = vpop.f32.mrf.mxu2 }
 0x2eb   : > { %v1243_v18 = vmul.f32 %v1799_v59, %v1225_v17 }
 0x2ed   : > { %v1255_v19 = vadd.f32 %v1800_v60, %v1243_v18 }
 0x2ef   : > { %v1263_v20 = vmax.f32 %v1255_v19, 0.0 }
 0x2f1   : > { %1703 = vmatmul.msk.f32.gmra.mxu3 %vm1272_vm4, %v1263_v20 }
 0x2f2   : > { %v1228_v21 = vpop.f32.mrf.mxu2 }
 0x2f3   : > { %v1244_v22 = vmul.f32 %v1799_v59, %v1228_v21 }
 0x2f5   : > { %v1256_v23 = vadd.f32 %v1800_v60, %v1244_v22 }
 0x2f7   : > { %v1264_v24 = vmax.f32 %v1256_v23, 0.0 }
 0x2f9   : > { %1704 = vmatmul.msk.f32.gmra.mxu3 %vm1272_vm4, %v1264_v24 }
 0x2fa   : > { %v1231_v25 = vpop.f32.mrf.mxu2 }
 0x2fb   : > { %v1245_v26 = vmul.f32 %v1799_v59, %v1231_v25 }
 0x2fd   : > { %v1257_v27 = vadd.f32 %v1800_v60, %v1245_v26 }
 0x2ff   : > { %v1265_v28 = vmax.f32 %v1257_v27, 0.0 }
 0x301   : > { %1705 = vmatmul.msk.f32.gmra.mxu3 %vm1272_vm4, %v1265_v28 }
 0x346   : > { %v1314_v30 = vpop.f32.mrf.mxu3 }
 0x347   : > { %v1315_v31 = vadd.f32 %v1801_v29, %v1314_v30 }
 0x349   : > { %1802 = vtanh.f32 %v1315_v31 }
 0x34f   : > { %v1803_v32 = vpop.eup %1802 }
 0x350   : > { %1346 = vst [vmem:[%s2771_s27] sm:$0xff] %v1803_v32 }
 0x354   : > { %v1317_v33 = vpop.f32.mrf.mxu3 }
 0x355   : > { %v1318_v34 = vadd.f32 %v1801_v29, %v1317_v33 }
 0x357   : > { %1804 = vtanh.f32 %v1318_v34 }
 0x35c   : > { %v1320_v35 = vpop.f32.mrf.mxu3 }
 0x35d   : > { %v1805_v36 = vpop.eup %1804  ;;  %v1321_v37 = vadd.f32 %v1801_v29, %v1320_v35 }
 0x35e   : > { %1347 = vst [vmem:[%s2771_s27 + $0x8] sm:$0xff] %v1805_v36 }
 0x35f   : > { %1806 = vtanh.f32 %v1321_v37 }
 0x364   : > { %v1323_v38 = vpop.f32.mrf.mxu3 }
 0x365   : > { %v1807_v39 = vpop.eup %1806  ;;  %v1324_v40 = vadd.f32 %v1801_v29, %v1323_v38 }
 0x366   : > { %1348 = vst [vmem:[%s2771_s27 + $0x10] sm:$0xff] %v1807_v39 }
 0x367   : > { %1808 = vtanh.f32 %v1324_v40 }
 0x36c   : > { %v1326_v41 = vpop.f32.mrf.mxu3 }
 0x36d   : > { %v1809_v42 = vpop.eup %1808  ;;  %v1327_v43 = vadd.f32 %v1801_v29, %v1326_v41 }
 0x36e   : > { %1349 = vst [vmem:[%s2771_s27 + $0x18] sm:$0xff] %v1809_v42 }
 0x36f   : > { %1810 = vtanh.f32 %v1327_v43 }
 0x374   : > { %v1329_v44 = vpop.f32.mrf.mxu3 }
 0x375   : > { %v1811_v45 = vpop.eup %1810  ;;  %v1330_v46 = vadd.f32 %v1801_v29, %v1329_v44 }
 0x376   : > { %1350 = vst [vmem:[%s2771_s27 + $0x20] sm:$0xff] %v1811_v45 }
 0x377   : > { %1812 = vtanh.f32 %v1330_v46 }
 0x37c   : > { %v1332_v47 = vpop.f32.mrf.mxu3 }
 0x37d   : > { %v1813_v48 = vpop.eup %1812  ;;  %v1333_v49 = vadd.f32 %v1801_v29, %v1332_v47 }
 0x37e   : > { %1351 = vst [vmem:[%s2771_s27 + $0x28] sm:$0xff] %v1813_v48 }
 0x37f   : > { %1814 = vtanh.f32 %v1333_v49 }
 0x384   : > { %v1335_v50 = vpop.f32.mrf.mxu3 }
 0x385   : > { %v1815_v51 = vpop.eup %1814  ;;  %v1336_v52 = vadd.f32 %v1801_v29, %v1335_v50 }
 0x386   : > { %1352 = vst [vmem:[%s2771_s27 + $0x30] sm:$0xff] %v1815_v51 }
 0x387   : > { %1816 = vtanh.f32 %v1336_v52 }
 0x38d   : > { %v1817_v53 = vpop.eup %1816 }
 0x38e   : > { %1353 = vst [vmem:[%s2771_s27 + $0x38] sm:$0xff] %v1817_v53 }
 0x38f PF: > { %s2863_s16 = sld [smem:[#allocation32_spill]] }
 0x390   : > { %s2864_s29 = sld [smem:[#allocation29_spill]] }
 0x391   : > { %s2865_s30 = sld [smem:[#allocation30_spill]] }
 0x392   : > { %s2866_s15 = sld [smem:[#allocation33_spill]] }
 0x395   : > { %p42_p6 = scmp.ge.s32.totalorder %s2863_s16, 6  }
 0x397   :  { %44 = sbr.rel (!%p42_p6) target bundleno = 23 (0x17), region = 260 }
 0x39c   :  { %1375 = vsyncpa [#allocation3], 1 }
 0x39d   :  { %1377 = vsyncpa [#allocation3 + $0x1], 1 }
 0x39e   :  { %1378 = vsyncpa [#allocation5], 1 }
 0x39f   :  { %1380 = vsyncpa [#allocation5 + $0x1], 1 }
 0x3a0   :  { %1381 = vsyncpa [#allocation8], 1 }
 0x3a1   :  { %1383 = vsyncpa [#allocation8 + $0x1], 1 }
 0x3a2   :  { %1384 = vsyncpa [#allocation11], 1 }
 0x3a3   :  { %1386 = vsyncpa [#allocation11 + $0x1], 1 }
 0x3a4   :  { %1387 = vsyncpa [#allocation14], 1 }
 0x3a5   :  { %1389 = vsyncpa [#allocation14 + $0x1], 1 }
 0x3a6   :  { %1390 = vsyncpa [#allocation17], 1 }
 0x3a7   :  { %1392 = vsyncpa [#allocation17 + $0x1], 1 }
 0x3a8   :  { %1393 = vsyncpa [#allocation20], 1 }
 0x3a9   :  { %1395 = vsyncpa [#allocation20 + $0x1], 1 }

// kernel: _lambda_.2
= control target key start
LH: loop header
LB: loop body
LE: loop exit
PB: predicated region body
PF: predicated region fallthrough
CT: control target
= control target key end

     0   :  { %s6317_s0 = inlined_call_operand.vmem [shape: f32[2,256,4], index: 0, kind: input, shape index: {}]   ;;  %s6318_s1 = inlined_call_operand.hbm [shape: f32[4,512], index: 1, kind: input, shape index: {}]   ;;  %s6319_s2 = inlined_call_operand.hbm [shape: f32[1,512], index: 2, kind: input, shape index: {}]   ;;  %s6320_s3 = inlined_call_operand.hbm [shape: f32[1024,1024], index: 3, kind: input, shape index: {}]   ;;  %s6321_s4 = inlined_call_operand.hbm [shape: f32[1,1024], index: 4, kind: input, shape index: {}]   ;;  %s6322_s5 = inlined_call_operand.hbm [shape: f32[1024,62], index: 5, kind: input, shape index: {}]   ;;  %s6323_s6 = inlined_call_operand.hbm [shape: f32[1,62], index: 6, kind: input, shape index: {}]   ;;  %s6324_s7 = inlined_call_operand.vmem [shape: f32[2,1,62], index: 7, kind: output, shape index: {}]  }
   0x1   :  { %6365 = sst [smem:[#allocation62_spill]] %s6318_s1 }
   0x2   :  { %12 = vsyncpa [#allocation5], 0 }
   0x3   :  { %13 = vsyncpa [#allocation7], 0 }
   0x4   :  { %14 = vsyncpa [#allocation10], 0 }
   0x5   :  { %15 = vsyncpa [#allocation13], 0  ;;  %s4752_s24 = smov 0   ;;  %s4754_s25 = smov 0  }
   0x6   :  { %s4756_s26 = smov 0   ;;  %s4758_s27 = smov 0  }
   0x7   :  { %s4760_s28 = smov 0  }
   0x8 LB: > { %s242_s8 = sshll.u32 %s6319_s2, 4  ;;  %s4313_s9 = sadd.s32 4294967295, %s4694_s28   ;;  %s4694_s28 = sphi %s4760_s28, %s21_s28   ;;  %s4690_s27 = sphi %s4758_s27, %s6543_s27   ;;  %s4686_s26 = sphi %s4756_s26, %s6542_s26   ;;  %s4682_s25 = sphi %s4754_s25, %s6541_s25   ;;  %s4678_s24 = sphi %s4752_s24, %s6540_s24   ;;  %s243_s8 = int_to_ptr.hbm [resolvable:$true] %s242_s8 }
   0x9   : > { %p4315_p0 = scmp.ge.s32.totalorder %s4694_s28, 1  ;;  %p218_p1 = scmp.lt.s32.totalorder %s4694_s28, 5 }
   0xa   : > { %p4783_p2 = scmp.eq.s32.totalorder %s4313_s9, 0  ;;  %s4696_s12 = smov [#allocation6]  }
   0xb   : > { %p4787_p3 = pnand %p4315_p0, %p218_p1  ;;  %s244_s13 = sshll.u32 %s4696_s12, 4  ;;  %s245_s13 = int_to_ptr.vmem [resolvable:$true] %s244_s13 }
   0xc   : > { %s268_s16 = sshll.u32 %s6321_s4, 4  ;;  %s4697_s18 = smov [#allocation9]   ;;  %s269_s16 = int_to_ptr.hbm [resolvable:$true] %s268_s16 }
   0xd   : > { %p4361_p4 = pneg %p4787_p3  ;;  %s270_s19 = sshll.u32 %s4697_s18, 4  ;;  %s271_s19 = int_to_ptr.vmem [resolvable:$true] %s270_s19 }
   0xe   : > { %s30_s20 = sadd.s32 1, %s4686_s26  ;;  %s33_s21 = sadd.s32 1, %s4690_s27 }
   0xf   : > { %p4798_p5 = pnand %p4783_p2, %p4361_p4  ;;  %p31_p6 = scmp.ge.s32.totalorder %s30_s20, 2 }
  0x10   : > { %s6369_s1 = sld [smem:[#allocation62_spill]]  ;;  %s4698_s30 = smov [#allocation4]  }
  0x11   : > { %4367 = dma.hbm_to_vmem [thread:$0]  (!%p4798_p5), %s243_s8, 64, %s245_s13, [#allocation7]  }
  0x12   : > { %4373 = dma.hbm_to_vmem [thread:$0]  (!%p4798_p5), %s269_s16, 128, %s271_s19, [#allocation10]  }
  0x13   : > { %s6545_s20 = smov (%p31_p6, %s30_s20), 0  ;;  %s6547_s21 = smov (!%p31_p6, %s33_s21), %s4690_s27 }
  0x14   : > { %s232_s9 = sshll.u32 %s4698_s30, 4  ;;  %p35_p7 = scmp.ge.s32.totalorder %s6547_s21, 2  ;;  %s233_s9 = int_to_ptr.vmem [resolvable:$true] %s232_s9 }
  0x15   : > { %s253_s13 = sshll.u32 %s6320_s3, 4  ;;  %s4699_s14 = smov [#allocation8]   ;;  %s254_s13 = int_to_ptr.hbm [resolvable:$true] %s253_s13 }
  0x16   : > { %s230_s29 = sshll.u32 %s6369_s1, 4  ;;  %s6549_s21 = smov (%p35_p7, %s6547_s21), 0  ;;  %s231_s29 = int_to_ptr.hbm [resolvable:$true] %s230_s29 }
  0x17   : > { %4364 = dma.hbm_to_vmem [thread:$0]  (!%p4798_p5), %s231_s29, 256, %s233_s9, [#allocation5]  }
  0x18   : > { %s255_s15 = sshll.u32 %s4699_s14, 4  ;;  %s279_s19 = sshll.u32 %s6322_s5, 4  ;;  %s256_s15 = int_to_ptr.vmem [resolvable:$true] %s255_s15  ;;  %s280_s19 = int_to_ptr.hbm [resolvable:$true] %s279_s19 }
  0x19   : > { %s4700_s22 = smov 1024   ;;  %s4701_s23 = smov 64  }
  0x1a   : > { %4370 = dma.hbm_to_vmem [thread:$0]  (!%p4798_p5), %s254_s13, 131072, %s256_s15, [#allocation7], %s4700_s22, %s4700_s22, %s4701_s23  }
  0x1b   : > { %s4702_s29 = smov [#allocation11]   ;;  %s4703_s9 = smov 128  }
  0x1c   : > { %s281_s30 = sshll.u32 %s4702_s29, 4  ;;  %s4704_s8 = smov 8   ;;  %s282_s30 = int_to_ptr.vmem [resolvable:$true] %s281_s30 }
  0x1d   : > { %4376 = dma.hbm_to_vmem [thread:$0]  (!%p4798_p5), %s280_s19, 16384, %s282_s30, [#allocation10], %s4703_s9, %s4703_s9, %s4704_s8  }
  0x1e   : > { %s294_s1 = sshll.u32 %s6323_s6, 4  ;;  %s4705_s16 = smov [#allocation12]   ;;  %s295_s1 = int_to_ptr.hbm [resolvable:$true] %s294_s1 }
  0x1f   : > { %s296_s18 = sshll.u32 %s4705_s16, 4  ;;  %322 = sbr.rel (%p4787_p3) target bundleno = 1295 (0x50f), region = 48  ;;  %s297_s18 = int_to_ptr.vmem [resolvable:$true] %s296_s18 }
  0x20   : > { %4379 = dma.hbm_to_vmem [thread:$0]  (!%p4798_p5), %s295_s1, 16, %s297_s18, [#allocation13]  }
  0x24   : > { %4661 = dma.done.wait (%p4783_p2), [#allocation5], 256  }
  0x25   : > { %4663 = vsyncadd (%p4783_p2), [#allocation5], 4294967040 }
  0x26   : > { %4665 = dma.done.wait (%p4783_p2), [#allocation7], 131136  }
  0x27   : > { %4667 = vsyncadd (%p4783_p2), [#allocation7], 4294836160 }
  0x28   : > { %4669 = dma.done.wait (%p4783_p2), [#allocation10], 16512  }
  0x29   : > { %4671 = vsyncadd (%p4783_p2), [#allocation10], 4294950784 }
  0x2a   : > { %4673 = dma.done.wait (%p4783_p2), [#allocation13], 16  }
  0x2b   : > { %4675 = vsyncadd (%p4783_p2), [#allocation13], 4294967280  ;;  %s4330_s1 = sshll.u32 %s4678_s24, 4  ;;  %p383_p8 = scmp.lt.s32.totalorder %s4682_s25, 1 }
  0x2c   : > { %p385_p9 = scmp.lt.s32.totalorder %s4330_s1, 31  ;;  %p4333_p10 = scmp.ne.s32.totalorder %s4678_s24, 0 }
  0x2d   : > { %s6551_s25 = smov (!%p383_p8, %s4682_s25), 1 }
  0x2e   : > { %s6553_s1 = smov (!%p385_p9, %s4330_s1), 31  ;;  %s4331_s11 = sshll.u32 %s6551_s25, 5 }
  0x2f   : > { %s394_s15 = scalar_lea.vmem %s6324_s7, %s6551_s25  ;;  %s388_s19 = sadd.s32 %s4331_s11, %s6553_s1 }
  0x30   : > { %s4332_s22 = sshll.u32 %s388_s19, 3  ;;  %398 = sbr.rel (%p4333_p10) target bundleno = 58 (0x3a), region = 76 }
  0x31   : > { %s4864_s29 = scalar_lea.vmem %s6317_s0, %s4332_s22 }
  0x35   : > { %v399_v0 = vlaneseq  ;;  %v4706_v1 = vmov -inf   ;;  %v4707_v2 = vmov 0.0  }
  0x37   : > { %vm401_vm0 = vcmp.lt.s32.totalorder %v399_v0, 512 }
  0x38   : > { %403 = vst.msk [vmem:[#allocation2] sm:$0xf] %vm401_vm0, %v4706_v1 }
  0x39   : > { %404 = vst.msk [vmem:[#allocation3] sm:$0xf] %vm401_vm0, %v4707_v2 }
  0x3a PF: > { %v4868_v3 = vld [vmem:[%s4864_s29 + $0x20] sm:$0xff]  ;;  %v4871_v4 = vld [vmem:[%s4864_s29 + $0x10] sm:$0xff]  ;;  %v4708_v6 = vmov 0   ;;  %v4880_v7 = vld [vmem:[%s4864_s29 + $0x28] sm:$0xff]  ;;  %v4709_v20 = vmov 1   ;;  %v4710_v21 = vmov 2  }
  0x3b   : > { %v4874_v5 = vld [vmem:[%s4864_s29] sm:$0xff]  ;;  %4450 = vset.pattern.permute.xlu2 %v4708_v6  ;;  %4449 = vset.pattern.permute.xlu1 %v4708_v6  ;;  %v4883_v8 = vld [vmem:[%s4864_s29 + $0x18] sm:$0xff]  ;;  %v4886_v9 = vld [vmem:[%s4864_s29 + $0x8] sm:$0xff]  ;;  %v4711_v37 = vmov 3   ;;  %vm1423_vm1 = vcmask 1040384   ;;  %vm1425_vm2 = vcmask 1042434  }
  0x3c   : > { %4448 = vset.pattern.permute.xlu0 %v4708_v6  ;;  %445 = vperm.xlu2 %4450, %v4868_v3   ;;  %v4892_v10 = vld [vmem:[%s4864_s29 + $0x40] sm:$0xff]  ;;  %v4895_v11 = vld [vmem:[%s4864_s29 + $0x38] sm:$0xff]  ;;  %v4898_v12 = vld [vmem:[%s4864_s29 + $0x30] sm:$0xff]  ;;  %vm1427_vm3 = vcmask 1041408   ;;  %p4334_p11 = scmp.ne.s32.totalorder %s4678_s24, 1 }
  0x3d   : > { %435 = vperm.xlu1 %4449, %v4871_v4   ;;  %425 = vperm.xlu0 %4448, %v4874_v5   ;;  %v4904_v13 = vld [vmem:[%s4864_s29 + $0x58] sm:$0xff]  ;;  %v4907_v14 = vld [vmem:[%s4864_s29 + $0x50] sm:$0xff]  ;;  %v4910_v15 = vld [vmem:[%s4864_s29 + $0x48] sm:$0xff] }
  0x3e   : > { %v4916_v16 = vld [vmem:[%s4864_s29 + $0x70] sm:$0xff]  ;;  %v4919_v17 = vld [vmem:[%s4864_s29 + $0x68] sm:$0xff]  ;;  %v4922_v18 = vld [vmem:[%s4864_s29 + $0x60] sm:$0xff] }
  0x3f   : > { %v4928_v19 = vld [vmem:[%s4864_s29 + $0x78] sm:$0xff]  ;;  %v4972_v28 = vld [vmem:[#allocation4] sm:$0xff]  ;;  %v4974_v29 = vld [vmem:[#allocation4 + $0x8] sm:$0xff] }
  0x40   : > { %v505_v33 = vperm.slane %v4972_v28, 0  ;;  %v506_v34 = vperm.slane %v4972_v28, 4  ;;  %v507_v35 = vperm.slane %v4974_v29, 0  ;;  %v508_v36 = vperm.slane %v4974_v29, 4 }
  0x41   : > { %v645_v38 = vperm.slane %v4972_v28, 1  ;;  %v646_v39 = vperm.slane %v4972_v28, 5  ;;  %v647_v40 = vperm.slane %v4974_v29, 1  ;;  %v648_v41 = vperm.slane %v4974_v29, 5 }
  0x42   : > { %v4991_v42 = vperm.slane %v505_v33, 0  ;;  %v4993_v43 = vperm.slane %v506_v34, 0  ;;  %v4995_v44 = vperm.slane %v507_v35, 0  ;;  %v4997_v45 = vperm.slane %v508_v36, 0 }
  0x43   : > { %v4999_v46 = vperm.slane %v645_v38, 1  ;;  %v5001_v47 = vperm.slane %v646_v39, 1  ;;  %v5003_v48 = vperm.slane %v647_v40, 1  ;;  %v5005_v49 = vperm.slane %v648_v41, 1 }
  0x44   : > { %450 = vperm.xlu2 %4450, %v4880_v7  }
  0x45   : > { %440 = vperm.xlu1 %4449, %v4883_v8   ;;  %430 = vperm.xlu0 %4448, %v4886_v9  }
  0x4c   : > { %465 = vperm.xlu2 %4450, %v4892_v10  }
  0x4d   : > { %460 = vperm.xlu1 %4449, %v4895_v11   ;;  %455 = vperm.xlu0 %4448, %v4898_v12  }
  0x54   : > { %480 = vperm.xlu2 %4450, %v4904_v13  }
  0x55   : > { %475 = vperm.xlu1 %4449, %v4907_v14   ;;  %470 = vperm.xlu0 %4448, %v4910_v15  }
  0x5c   : > { %495 = vperm.xlu2 %4450, %v4916_v16  }
  0x5d   : > { %490 = vperm.xlu1 %4449, %v4919_v17   ;;  %485 = vperm.xlu0 %4448, %v4922_v18  }
  0x64   : > { %4452 = vset.pattern.permute.xlu2 %v4709_v20 }
  0x65   : > { %4451 = vset.pattern.permute.xlu1 %v4709_v20  ;;  %500 = vperm.xlu0 %4448, %v4928_v19  }
  0x66   : > { %586 = vperm.xlu2 %4452, %v4886_v9   ;;  %582 = vperm.xlu1 %4451, %v4874_v5  }
  0x6d   : > { %4453 = vset.pattern.permute.xlu0 %v4709_v20 }
  0x6e   : > { %598 = vperm.xlu2 %4452, %v4868_v3   ;;  %594 = vperm.xlu1 %4451, %v4883_v8  }
  0x6f   : > { %590 = vperm.xlu0 %4453, %v4871_v4  }
  0x76   : > { %606 = vperm.xlu2 %4452, %v4898_v12   ;;  %602 = vperm.xlu1 %4451, %v4880_v7  }
  0x77   : > { %610 = vperm.xlu0 %4453, %v4895_v11  }
  0x7e   : > { %618 = vperm.xlu2 %4452, %v4910_v15   ;;  %614 = vperm.xlu1 %4451, %v4892_v10  }
  0x7f   : > { %622 = vperm.xlu0 %4453, %v4907_v14  }
  0x86   : > { %630 = vperm.xlu2 %4452, %v4922_v18   ;;  %626 = vperm.xlu1 %4451, %v4904_v13  }
  0x87   : > { %634 = vperm.xlu0 %4453, %v4919_v17  }
  0x8e   : > { %642 = vperm.xlu2 %4452, %v4928_v19   ;;  %638 = vperm.xlu1 %4451, %v4916_v16  }
  0x8f   : > { %4454 = vset.pattern.permute.xlu0 %v4710_v21 }
  0x90   : > { %786 = vperm.xlu0 %4454, %v4874_v5  }
  0x96   : > { %4456 = vset.pattern.permute.xlu2 %v4710_v21  ;;  %4455 = vset.pattern.permute.xlu1 %v4710_v21  ;;  %v4948_v22 = vpop.permute.xlu2 %445 }
  0x97   : > { %794 = vperm.xlu2 %4456, %v4871_v4   ;;  %790 = vperm.xlu1 %4455, %v4886_v9   ;;  %v533_v6 = vmul.f32 %v4991_v42, %v4948_v22  ;;  %v536_v20 = vmul.f32 %v4997_v45, %v4948_v22 }
  0x98   : > { %806 = vperm.xlu0 %4454, %v4880_v7  }
  0x9e   : > { %v4953_v23 = vpop.permute.xlu2 %450 }
  0x9f   : > { %802 = vperm.xlu2 %4456, %v4868_v3   ;;  %798 = vperm.xlu1 %4455, %v4883_v8  }
  0xa0   : > { %818 = vperm.xlu0 %4454, %v4892_v10  }
  0xa6   : > { %v4958_v24 = vpop.permute.xlu2 %465 }
  0xa7   : > { %814 = vperm.xlu2 %4456, %v4895_v11   ;;  %810 = vperm.xlu1 %4455, %v4898_v12  }
  0xa8   : > { %830 = vperm.xlu0 %4454, %v4904_v13  }
  0xae   : > { %v4963_v25 = vpop.permute.xlu2 %480 }
  0xaf   : > { %v4965_v26 = vpop.permute.xlu1 %435  ;;  %826 = vperm.xlu2 %4456, %v4907_v14   ;;  %v4968_v27 = vpop.permute.xlu0 %425  ;;  %822 = vperm.xlu1 %4455, %v4910_v15  }
  0xb0   : > { %842 = vperm.xlu0 %4454, %v4916_v16  }
  0xb6   : > { %v4976_v30 = vpop.permute.xlu2 %495 }
  0xb7   : > { %v4978_v31 = vpop.permute.xlu1 %440  ;;  %838 = vperm.xlu2 %4456, %v4919_v17   ;;  %v431_v32 = vpop.permute.xlu0 %430  ;;  %834 = vperm.xlu1 %4455, %v4922_v18  }
  0xb8   : > { %4458 = vset.pattern.permute.xlu0 %v4711_v37  ;;  %v521_v52 = vmul.f32 %v4991_v42, %v431_v32  ;;  %v522_v53 = vmul.f32 %v4993_v43, %v431_v32  ;;  %v523_v54 = vmul.f32 %v4995_v44, %v431_v32  ;;  %v524_v55 = vmul.f32 %v4997_v45, %v431_v32 }
  0xb9   : > { %994 = vperm.xlu0 %4458, %v4886_v9   ;;  %v534_v9 = vmul.f32 %v4993_v43, %v4948_v22 }
  0xbf   : > { %v5007_v50 = vpop.permute.xlu1 %460  ;;  %4457 = vset.pattern.permute.xlu2 %v4711_v37  ;;  %v456_v51 = vpop.permute.xlu0 %455  ;;  %846 = vperm.xlu1 %4455, %v4928_v19  }
  0xc0   : > { %v587_v56 = vpop.permute.xlu2 %586  ;;  %990 = vperm.xlu2 %4457, %v4874_v5   ;;  %v541_v40 = vmul.f32 %v4991_v42, %v456_v51  ;;  %v542_v41 = vmul.f32 %v4993_v43, %v456_v51 }
  0xc1   : > { %v661_v57 = vmul.f32 %v4999_v46, %v587_v56  ;;  %v662_v58 = vmul.f32 %v5001_v47, %v587_v56  ;;  %v663_v59 = vmul.f32 %v5003_v48, %v587_v56  ;;  %v664_v60 = vmul.f32 %v5005_v49, %v587_v56  ;;  %1014 = vperm.xlu0 %4458, %v4898_v12  }
  0xc2   : > { %v535_v12 = vmul.f32 %v4995_v44, %v4948_v22 }
  0xc3   : > { %v5020_v61 = vadd.f32 %v661_v57, %v521_v52  ;;  %v5022_v62 = vadd.f32 %v662_v58, %v522_v53  ;;  %v5024_v63 = vadd.f32 %v663_v59, %v523_v54  ;;  %v5026_v0 = vadd.f32 %v664_v60, %v524_v55 }
  0xc4   : > { %v5082_v59 = vmul.f32 %v4993_v43, %v4953_v23  ;;  %v5094_v60 = vmul.f32 %v4991_v42, %v4958_v24 }
  0xc5   : > { %6370 = vst [vmem:[#allocation18_spill] sm:$0xff] %v5020_v61 }
  0xc6   : > { %6371 = vst [vmem:[#allocation19_spill] sm:$0xff] %v5022_v62 }
  0xc7   : > { %6372 = vst [vmem:[#allocation20_spill] sm:$0xff] %v5024_v63  ;;  %v5028_v1 = vpop.permute.xlu1 %475  ;;  %v471_v2 = vpop.permute.xlu0 %470  ;;  %4459 = vset.pattern.permute.xlu1 %v4711_v37 }
  0xc8   : > { %6373 = vst [vmem:[#allocation21_spill] sm:$0xff] %v5026_v0  ;;  %v599_v5 = vpop.permute.xlu2 %598  ;;  %1002 = vperm.xlu2 %4457, %v4883_v8   ;;  %998 = vperm.xlu1 %4459, %v4871_v4   ;;  %v543_v4 = vmul.f32 %v4995_v44, %v456_v51 }
  0xc9   : > { %v673_v21 = vmul.f32 %v4999_v46, %v599_v5  ;;  %v674_v32 = vmul.f32 %v5001_v47, %v599_v5  ;;  %v675_v33 = vmul.f32 %v5003_v48, %v599_v5  ;;  %v676_v34 = vmul.f32 %v5005_v49, %v599_v5  ;;  %1026 = vperm.xlu0 %4458, %v4910_v15  }
  0xca   : > { %v544_v15 = vmul.f32 %v4997_v45, %v456_v51  ;;  %v5098_v5 = vmul.f32 %v4993_v43, %v4958_v24 }
  0xcb   : > { %v5045_v35 = vadd.f32 %v673_v21, %v533_v6  ;;  %v5047_v36 = vadd.f32 %v674_v32, %v534_v9  ;;  %v5049_v37 = vadd.f32 %v675_v33, %v535_v12  ;;  %v5051_v22 = vadd.f32 %v676_v34, %v536_v20 }
  0xcc   : > { %v5102_v6 = vmul.f32 %v4995_v44, %v4958_v24  ;;  %v5106_v9 = vmul.f32 %v4997_v45, %v4958_v24  ;;  %v518_v12 = vmul.f32 %v4993_v43, %v4968_v27  ;;  %v519_v20 = vmul.f32 %v4995_v44, %v4968_v27 }
  0xcd   : > { %v520_v21 = vmul.f32 %v4997_v45, %v4968_v27  ;;  %v553_v33 = vmul.f32 %v4991_v42, %v471_v2  ;;  %v554_v34 = vmul.f32 %v4993_v43, %v471_v2  ;;  %v555_v24 = vmul.f32 %v4995_v44, %v471_v2 }
  0xcf   : > { %v5053_v8 = vpop.permute.xlu1 %490  ;;  %v5055_v38 = vpop.permute.xlu0 %485 }
  0xd0   : > { %v607_v39 = vpop.permute.xlu2 %606  ;;  %1010 = vperm.xlu2 %4457, %v4880_v7   ;;  %1006 = vperm.xlu1 %4459, %v4868_v3   ;;  %v5078_v7 = vmul.f32 %v4991_v42, %v4953_v23  ;;  %v5086_v3 = vmul.f32 %v4995_v44, %v4953_v23 }
  0xd1   : > { %v681_v52 = vmul.f32 %v4999_v46, %v607_v39  ;;  %v682_v53 = vmul.f32 %v5001_v47, %v607_v39  ;;  %v683_v54 = vmul.f32 %v5003_v48, %v607_v39  ;;  %v684_v55 = vmul.f32 %v5005_v49, %v607_v39  ;;  %1038 = vperm.xlu0 %4458, %v4922_v18  }
  0xd2   : > { %v5090_v18 = vmul.f32 %v4997_v45, %v4953_v23  ;;  %v517_v23 = vmul.f32 %v4991_v42, %v4968_v27  ;;  %v556_v39 = vmul.f32 %v4997_v45, %v471_v2 }
  0xd3   : > { %v5068_v56 = vadd.f32 %v681_v52, %v541_v40  ;;  %v5070_v57 = vadd.f32 %v682_v53, %v542_v41  ;;  %v5072_v58 = vadd.f32 %v683_v54, %v543_v4  ;;  %v5074_v51 = vadd.f32 %v684_v55, %v544_v15 }
  0xd5   : > { %6374 = vst [vmem:[#allocation22_spill] sm:$0xff] %v5068_v56 }
  0xd6   : > { %6375 = vst [vmem:[#allocation23_spill] sm:$0xff] %v5070_v57 }
  0xd7   : > { %6376 = vst [vmem:[#allocation24_spill] sm:$0xff] %v5072_v58  ;;  %v5116_v32 = vpop.permute.xlu0 %500 }
  0xd8   : > { %6377 = vst [vmem:[#allocation25_spill] sm:$0xff] %v5074_v51  ;;  %v619_v40 = vpop.permute.xlu2 %618  ;;  %v583_v41 = vpop.permute.xlu1 %582  ;;  %1022 = vperm.xlu2 %4457, %v4892_v10   ;;  %1018 = vperm.xlu1 %4459, %v4895_v11  }
  0xd9   : > { %v693_v4 = vmul.f32 %v4999_v46, %v619_v40  ;;  %v694_v15 = vmul.f32 %v5001_v47, %v619_v40  ;;  %v695_v52 = vmul.f32 %v5003_v48, %v619_v40  ;;  %v696_v27 = vmul.f32 %v5005_v49, %v619_v40  ;;  %1050 = vperm.xlu0 %4458, %v4928_v19  }
  0xda   : > { %v657_v53 = vmul.f32 %v4999_v46, %v583_v41  ;;  %v658_v54 = vmul.f32 %v5001_v47, %v583_v41  ;;  %v659_v2 = vmul.f32 %v5003_v48, %v583_v41  ;;  %v660_v55 = vmul.f32 %v5005_v49, %v583_v41 }
  0xdb   : > { %v5132_v51 = vadd.f32 %v693_v4, %v553_v33  ;;  %v5134_v58 = vadd.f32 %v694_v15, %v554_v34  ;;  %v5136_v57 = vadd.f32 %v695_v52, %v555_v24  ;;  %v5138_v56 = vadd.f32 %v696_v27, %v556_v39 }
  0xdc   : > { %v5141_v10 = vadd.f32 %v657_v53, %v517_v23  ;;  %v5143_v11 = vadd.f32 %v658_v54, %v518_v12  ;;  %v5145_v40 = vadd.f32 %v659_v2, %v519_v20  ;;  %v5147_v0 = vadd.f32 %v660_v55, %v520_v21 }
  0xdd   : > { %6378 = vst [vmem:[#allocation26_spill] sm:$0xff] %v5132_v51  ;;  %v525_v33 = vmul.f32 %v4991_v42, %v4965_v26  ;;  %v526_v34 = vmul.f32 %v4993_v43, %v4965_v26  ;;  %v527_v24 = vmul.f32 %v4995_v44, %v4965_v26  ;;  %v528_v19 = vmul.f32 %v4997_v45, %v4965_v26 }
  0xde   : > { %6379 = vst [vmem:[#allocation27_spill] sm:$0xff] %v5134_v58  ;;  %v529_v23 = vmul.f32 %v4991_v42, %v4978_v31  ;;  %v530_v12 = vmul.f32 %v4993_v43, %v4978_v31  ;;  %v531_v20 = vmul.f32 %v4995_v44, %v4978_v31  ;;  %v532_v21 = vmul.f32 %v4997_v45, %v4978_v31 }
  0xdf   : > { %6380 = vst [vmem:[#allocation28_spill] sm:$0xff] %v5136_v57  ;;  %v5167_v39 = vmul.f32 %v4991_v42, %v5007_v50  ;;  %v5171_v41 = vmul.f32 %v4993_v43, %v5007_v50  ;;  %v5175_v26 = vmul.f32 %v4995_v44, %v5007_v50  ;;  %v5179_v4 = vmul.f32 %v4997_v45, %v5007_v50 }
  0xe0   : > { %6381 = vst [vmem:[#allocation29_spill] sm:$0xff] %v5138_v56  ;;  %v565_v15 = vmul.f32 %v4991_v42, %v5055_v38  ;;  %v566_v31 = vmul.f32 %v4993_v43, %v5055_v38  ;;  %v567_v52 = vmul.f32 %v4995_v44, %v5055_v38  ;;  %v568_v27 = vmul.f32 %v4997_v45, %v5055_v38  ;;  %v631_v53 = vpop.permute.xlu2 %630  ;;  %v595_v54 = vpop.permute.xlu1 %594 }
  0xe1   : > { %6382 = vst [vmem:[#allocation30_spill] sm:$0xff] %v5141_v10  ;;  %v705_v2 = vmul.f32 %v4999_v46, %v631_v53  ;;  %v706_v55 = vmul.f32 %v5001_v47, %v631_v53  ;;  %v707_v50 = vmul.f32 %v5003_v48, %v631_v53  ;;  %v708_v56 = vmul.f32 %v5005_v49, %v631_v53  ;;  %v591_v57 = vpop.permute.xlu0 %590 }
  0xe2   : > { %6383 = vst [vmem:[#allocation31_spill] sm:$0xff] %v5143_v11  ;;  %1034 = vperm.xlu2 %4457, %v4904_v13   ;;  %1030 = vperm.xlu1 %4459, %v4907_v14   ;;  %v669_v58 = vmul.f32 %v4999_v46, %v595_v54  ;;  %v670_v51 = vmul.f32 %v5001_v47, %v595_v54 }
  0xe3   : > { %6384 = vst [vmem:[#allocation32_spill] sm:$0xff] %v5145_v40  ;;  %v671_v38 = vmul.f32 %v5003_v48, %v595_v54  ;;  %v672_v63 = vmul.f32 %v5005_v49, %v595_v54  ;;  %v5199_v62 = vadd.f32 %v705_v2, %v565_v15  ;;  %v5201_v61 = vadd.f32 %v706_v55, %v566_v31 }
  0xe4   : > { %6385 = vst [vmem:[#allocation33_spill] sm:$0xff] %v5147_v0  ;;  %v5203_v0 = vadd.f32 %v707_v50, %v567_v52  ;;  %v5205_v53 = vadd.f32 %v708_v56, %v568_v27  ;;  %v5207_v13 = vadd.f32 %v669_v58, %v529_v23  ;;  %v5209_v40 = vadd.f32 %v670_v51, %v530_v12 }
  0xe5   : > { %6386 = vst [vmem:[#allocation34_spill] sm:$0xff] %v5199_v62  ;;  %v5211_v14 = vadd.f32 %v671_v38, %v531_v20  ;;  %v5213_v11 = vadd.f32 %v672_v63, %v532_v21  ;;  %v665_v10 = vmul.f32 %v4999_v46, %v591_v57  ;;  %v666_v54 = vmul.f32 %v5001_v47, %v591_v57 }
  0xe6   : > { %6387 = vst [vmem:[#allocation35_spill] sm:$0xff] %v5201_v61  ;;  %v667_v15 = vmul.f32 %v5003_v48, %v591_v57  ;;  %v668_v31 = vmul.f32 %v5005_v49, %v591_v57  ;;  %v849_v52 = vperm.slane %v4972_v28, 2  ;;  %v850_v56 = vperm.slane %v4972_v28, 6 }
  0xe7   : > { %6388 = vst [vmem:[#allocation36_spill] sm:$0xff] %v5203_v0  ;;  %v851_v58 = vperm.slane %v4974_v29, 2  ;;  %v852_v51 = vperm.slane %v4974_v29, 6  ;;  %v5223_v23 = vadd.f32 %v665_v10, %v525_v33  ;;  %v5225_v63 = vadd.f32 %v666_v54, %v526_v34 }
  0xe8   : > { %6389 = vst [vmem:[#allocation37_spill] sm:$0xff] %v5205_v53  ;;  %v5227_v12 = vadd.f32 %v667_v15, %v527_v24  ;;  %v5229_v20 = vadd.f32 %v668_v31, %v528_v19  ;;  %v577_v21 = vmul.f32 %v4991_v42, %v5116_v32  ;;  %v578_v57 = vmul.f32 %v4993_v43, %v5116_v32  ;;  %v643_v10 = vpop.permute.xlu2 %642  ;;  %v603_v33 = vpop.permute.xlu1 %602 }
  0xe9   : > { %v579_v27 = vmul.f32 %v4995_v44, %v5116_v32  ;;  %v580_v2 = vmul.f32 %v4997_v45, %v5116_v32  ;;  %v717_v34 = vmul.f32 %v4999_v46, %v643_v10  ;;  %v718_v24 = vmul.f32 %v5001_v47, %v643_v10  ;;  %v611_v50 = vpop.permute.xlu0 %610 }
  0xea   : > { %v719_v19 = vmul.f32 %v5003_v48, %v643_v10  ;;  %v720_v55 = vmul.f32 %v5005_v49, %v643_v10  ;;  %1046 = vperm.xlu2 %4457, %v4916_v16   ;;  %1042 = vperm.xlu1 %4459, %v4919_v17   ;;  %v677_v38 = vmul.f32 %v4999_v46, %v603_v33 }
  0xeb   : > { %v678_v54 = vmul.f32 %v5001_v47, %v603_v33  ;;  %v679_v32 = vmul.f32 %v5003_v48, %v603_v33  ;;  %v680_v15 = vmul.f32 %v5005_v49, %v603_v33  ;;  %v5249_v31 = vadd.f32 %v717_v34, %v577_v21 }
  0xec   : > { %v5251_v53 = vadd.f32 %v718_v24, %v578_v57  ;;  %v5253_v0 = vadd.f32 %v719_v19, %v579_v27  ;;  %v5255_v10 = vadd.f32 %v720_v55, %v580_v2  ;;  %v5258_v16 = vadd.f32 %v677_v38, %v5078_v7 }
  0xed   : > { %6390 = vst [vmem:[#allocation38_spill] sm:$0xff] %v5249_v31  ;;  %v5261_v17 = vadd.f32 %v678_v54, %v5082_v59  ;;  %v5264_v61 = vadd.f32 %v679_v32, %v5086_v3  ;;  %v5267_v62 = vadd.f32 %v680_v15, %v5090_v18  ;;  %v685_v21 = vmul.f32 %v4999_v46, %v611_v50 }
  0xee   : > { %6391 = vst [vmem:[#allocation39_spill] sm:$0xff] %v5251_v53  ;;  %v686_v57 = vmul.f32 %v5001_v47, %v611_v50  ;;  %v687_v27 = vmul.f32 %v5003_v48, %v611_v50  ;;  %v688_v2 = vmul.f32 %v5005_v49, %v611_v50  ;;  %v557_v7 = vmul.f32 %v4991_v42, %v5028_v1 }
  0xef   : > { %6392 = vst [vmem:[#allocation40_spill] sm:$0xff] %v5253_v0  ;;  %v558_v59 = vmul.f32 %v4993_v43, %v5028_v1  ;;  %v559_v3 = vmul.f32 %v4995_v44, %v5028_v1  ;;  %v560_v18 = vmul.f32 %v4997_v45, %v5028_v1  ;;  %v5282_v33 = vadd.f32 %v685_v21, %v5167_v39 }
  0xf0   : > { %6393 = vst [vmem:[#allocation41_spill] sm:$0xff] %v5255_v10  ;;  %v5285_v34 = vadd.f32 %v686_v57, %v5171_v41  ;;  %v5288_v24 = vadd.f32 %v687_v27, %v5175_v26  ;;  %v5291_v19 = vadd.f32 %v688_v2, %v5179_v4  ;;  %v615_v55 = vpop.permute.xlu1 %614  ;;  %v5293_v50 = vperm.slane %v849_v52, 2 }
  0xf1   : > { %v5295_v38 = vperm.slane %v850_v56, 2  ;;  %v5297_v54 = vperm.slane %v851_v58, 2  ;;  %v5299_v1 = vperm.slane %v852_v51, 2  ;;  %v689_v39 = vmul.f32 %v4999_v46, %v615_v55  ;;  %v623_v15 = vpop.permute.xlu0 %622  ;;  %v795_v4 = vpop.permute.xlu2 %794 }
  0xf2   : > { %v690_v41 = vmul.f32 %v5001_v47, %v615_v55  ;;  %v691_v32 = vmul.f32 %v5003_v48, %v615_v55  ;;  %v692_v26 = vmul.f32 %v5005_v49, %v615_v55  ;;  %v697_v21 = vmul.f32 %v4999_v46, %v623_v15 }
  0xf3   : > { %6394 = vst [vmem:[#allocation42_spill] sm:$0xff] %v5299_v1  ;;  %v698_v52 = vmul.f32 %v5001_v47, %v623_v15  ;;  %v699_v56 = vmul.f32 %v5003_v48, %v623_v15  ;;  %v700_v58 = vmul.f32 %v5005_v49, %v623_v15  ;;  %v5310_v51 = vadd.f32 %v689_v39, %v5094_v60 }
  0xf4   : > { %v5313_v57 = vadd.f32 %v690_v41, %v5098_v5  ;;  %v5316_v27 = vadd.f32 %v691_v32, %v5102_v6  ;;  %v5319_v2 = vadd.f32 %v692_v26, %v5106_v9  ;;  %v5321_v55 = vadd.f32 %v697_v21, %v557_v7 }
  0xf5   : > { %v5323_v10 = vadd.f32 %v698_v52, %v558_v59  ;;  %v5325_v0 = vadd.f32 %v699_v56, %v559_v3  ;;  %v5327_v53 = vadd.f32 %v700_v58, %v560_v18  ;;  %v869_v60 = vmul.f32 %v5293_v50, %v795_v4 }
  0xf6   : > { %6395 = vst [vmem:[#allocation43_spill] sm:$0xff] %v5316_v27  ;;  %v870_v39 = vmul.f32 %v5295_v38, %v795_v4  ;;  %v871_v5 = vmul.f32 %v5297_v54, %v795_v4  ;;  %v872_v6 = vmul.f32 %v5299_v1, %v795_v4  ;;  %v561_v9 = vmul.f32 %v4991_v42, %v4963_v25 }
  0xf7   : > { %6396 = vst [vmem:[#allocation44_spill] sm:$0xff] %v5319_v2  ;;  %v562_v7 = vmul.f32 %v4993_v43, %v4963_v25  ;;  %v563_v59 = vmul.f32 %v4995_v44, %v4963_v25  ;;  %v564_v3 = vmul.f32 %v4997_v45, %v4963_v25  ;;  %v5342_v18 = vadd.f32 %v869_v60, %v5223_v23 }
  0xf8   : > { %v5345_v41 = vadd.f32 %v870_v39, %v5225_v63  ;;  %v5348_v32 = vadd.f32 %v871_v5, %v5227_v12  ;;  %v5351_v26 = vadd.f32 %v872_v6, %v5229_v20  ;;  %v569_v15 = vmul.f32 %v4991_v42, %v5053_v8  ;;  %v627_v63 = vpop.permute.xlu1 %626 }
  0xf9   : > { %6397 = vst [vmem:[#allocation45_spill] sm:$0xff] %v5342_v18  ;;  %v570_v4 = vmul.f32 %v4993_v43, %v5053_v8  ;;  %v571_v25 = vmul.f32 %v4995_v44, %v5053_v8  ;;  %v572_v23 = vmul.f32 %v4997_v45, %v5053_v8  ;;  %v701_v21 = vmul.f32 %v4999_v46, %v627_v63  ;;  %v635_v56 = vpop.permute.xlu0 %634  ;;  %v803_v58 = vpop.permute.xlu2 %802 }
  0xfa   : > { %6398 = vst [vmem:[#allocation46_spill] sm:$0xff] %v5345_v41  ;;  %v702_v12 = vmul.f32 %v5001_v47, %v627_v63  ;;  %v703_v20 = vmul.f32 %v5003_v48, %v627_v63  ;;  %v704_v52 = vmul.f32 %v5005_v49, %v627_v63  ;;  %v709_v60 = vmul.f32 %v4999_v46, %v635_v56 }
  0xfb   : > { %6399 = vst [vmem:[#allocation47_spill] sm:$0xff] %v5348_v32  ;;  %v710_v39 = vmul.f32 %v5001_v47, %v635_v56  ;;  %v711_v5 = vmul.f32 %v5003_v48, %v635_v56  ;;  %v712_v6 = vmul.f32 %v5005_v49, %v635_v56  ;;  %v5369_v8 = vadd.f32 %v701_v21, %v561_v9 }
  0xfc   : > { %6400 = vst [vmem:[#allocation48_spill] sm:$0xff] %v5351_v26  ;;  %v5371_v31 = vadd.f32 %v702_v12, %v562_v7  ;;  %v5373_v26 = vadd.f32 %v703_v20, %v563_v59  ;;  %v5375_v32 = vadd.f32 %v704_v52, %v564_v3  ;;  %v5377_v41 = vadd.f32 %v709_v60, %v569_v15 }
  0xfd   : > { %v5379_v63 = vadd.f32 %v710_v39, %v570_v4  ;;  %v5381_v18 = vadd.f32 %v711_v5, %v571_v25  ;;  %v5383_v2 = vadd.f32 %v712_v6, %v572_v23  ;;  %v877_v27 = vmul.f32 %v5293_v50, %v803_v58 }
  0xfe   : > { %6401 = vst [vmem:[#allocation49_spill] sm:$0xff] %v5377_v41  ;;  %v878_v56 = vmul.f32 %v5295_v38, %v803_v58  ;;  %v879_v9 = vmul.f32 %v5297_v54, %v803_v58  ;;  %v880_v7 = vmul.f32 %v5299_v1, %v803_v58  ;;  %v573_v25 = vmul.f32 %v4991_v42, %v4976_v30 }
  0xff   : > { %6402 = vst [vmem:[#allocation50_spill] sm:$0xff] %v5379_v63  ;;  %v5390_v59 = vadd.f32 %v877_v27, %v5045_v35  ;;  %v574_v23 = vmul.f32 %v4993_v43, %v4976_v30  ;;  %v575_v21 = vmul.f32 %v4995_v44, %v4976_v30  ;;  %v576_v35 = vmul.f32 %v4997_v45, %v4976_v30  ;;  %v6415_v63 = vld [vmem:[#allocation31_spill] sm:$0xff] }
 0x100   : > { %6403 = vst [vmem:[#allocation51_spill] sm:$0xff] %v5381_v18  ;;  %v5393_v3 = vadd.f32 %v878_v56, %v5047_v36  ;;  %v5396_v15 = vadd.f32 %v879_v9, %v5049_v37  ;;  %v5399_v4 = vadd.f32 %v880_v7, %v5051_v22  ;;  %v639_v36 = vpop.permute.xlu1 %638  ;;  %v1055_v6 = vperm.slane %v4974_v29, 3 }
 0x101   : > { %6404 = vst [vmem:[#allocation52_spill] sm:$0xff] %v5383_v2  ;;  %v713_v27 = vmul.f32 %v4999_v46, %v639_v36  ;;  %v714_v37 = vmul.f32 %v5001_v47, %v639_v36  ;;  %v715_v22 = vmul.f32 %v5003_v48, %v639_v36  ;;  %v716_v12 = vmul.f32 %v5005_v49, %v639_v36  ;;  %v815_v20 = vpop.permute.xlu2 %814  ;;  %v6414_v2 = vld [vmem:[#allocation30_spill] sm:$0xff] }
 0x102   : > { %6405 = vst [vmem:[#allocation53_spill] sm:$0xff] %v5390_v59  ;;  %v889_v42 = vmul.f32 %v5293_v50, %v815_v20  ;;  %v787_v52 = vpop.permute.xlu0 %786  ;;  %v1053_v47 = vperm.slane %v4972_v28, 3  ;;  %v1054_v48 = vperm.slane %v4972_v28, 7  ;;  %v890_v49 = vmul.f32 %v5295_v38, %v815_v20 }
 0x103   : > { %6406 = vst [vmem:[#allocation54_spill] sm:$0xff] %v5393_v3  ;;  %v5414_v43 = vadd.f32 %v713_v27, %v573_v25  ;;  %v5416_v58 = vadd.f32 %v714_v37, %v574_v23  ;;  %v5418_v44 = vadd.f32 %v715_v22, %v575_v21  ;;  %v5420_v30 = vadd.f32 %v716_v12, %v576_v35  ;;  %v1193_v25 = vld [vmem:[#allocation6] sm:$0xf] }
 0x104   : > { %6407 = vst [vmem:[#allocation55_spill] sm:$0xff] %v5396_v15  ;;  %v5423_v45 = vadd.f32 %v889_v42, %v5282_v33  ;;  %v891_v60 = vmul.f32 %v5297_v54, %v815_v20  ;;  %v1056_v56 = vperm.slane %v4974_v29, 7  ;;  %v892_v9 = vmul.f32 %v5299_v1, %v815_v20 }
 0x105   : > { %6408 = vst [vmem:[#allocation56_spill] sm:$0xff] %v5399_v4  ;;  %v5432_v7 = vperm.slane %v1053_v47, 3  ;;  %v5434_v33 = vperm.slane %v1054_v48, 3  ;;  %v5437_v23 = vadd.f32 %v890_v49, %v5285_v34  ;;  %v5442_v21 = vperm.slane %v1055_v6, 3 }
 0x106   : > { %6409 = vst [vmem:[#allocation57_spill] sm:$0xff] %v5423_v45  ;;  %v5440_v28 = vadd.f32 %v891_v60, %v5288_v24  ;;  %v5444_v35 = vperm.slane %v1056_v56, 3  ;;  %v861_v36 = vmul.f32 %v5293_v50, %v787_v52  ;;  %v862_v29 = vmul.f32 %v5295_v38, %v787_v52 }
 0x107   : > { %6410 = vst [vmem:[#allocation58_spill] sm:$0xff] %v5437_v23  ;;  %v863_v27 = vmul.f32 %v5297_v54, %v787_v52  ;;  %v864_v37 = vmul.f32 %v5299_v1, %v787_v52  ;;  %v5451_v22 = vadd.f32 %v892_v9, %v5291_v19  ;;  %v5453_v34 = vperm.slane %v1193_v25, 0  ;;  %v6417_v23 = vld [vmem:[#allocation33_spill] sm:$0xff] }
 0x108   : > { %6411 = vst [vmem:[#allocation59_spill] sm:$0xff] %v5440_v28  ;;  %v5455_v12 = vperm.slane %v1193_v25, 1  ;;  %v5457_v24 = vperm.slane %v1193_v25, 2  ;;  %v5468_v9 = vperm.slane %v1193_v25, 3  ;;  %v925_v18 = vadd.f32 %v861_v36, %v6414_v2  ;;  %v6423_v36 = vld [vmem:[#allocation19_spill] sm:$0xff] }
 0x109   : > { %v827_v46 = vpop.permute.xlu2 %826  ;;  %v791_v39 = vpop.permute.xlu1 %790  ;;  %6412 = vst [vmem:[#allocation60_spill] sm:$0xff] %v5451_v22  ;;  %v926_v41 = vadd.f32 %v862_v29, %v6415_v63  ;;  %v6416_v22 = vld [vmem:[#allocation32_spill] sm:$0xff] }
 0x10a   : > { %v807_v5 = vpop.permute.xlu0 %806  ;;  %v901_v20 = vmul.f32 %v5293_v50, %v827_v46  ;;  %v902_v42 = vmul.f32 %v5295_v38, %v827_v46  ;;  %v903_v47 = vmul.f32 %v5297_v54, %v827_v46  ;;  %v904_v48 = vmul.f32 %v5299_v1, %v827_v46 }
 0x10b   : > { %v865_v52 = vmul.f32 %v5293_v50, %v791_v39  ;;  %v866_v19 = vmul.f32 %v5295_v38, %v791_v39  ;;  %v867_v60 = vmul.f32 %v5297_v54, %v791_v39  ;;  %v927_v28 = vadd.f32 %v863_v27, %v6416_v22  ;;  %v6424_v27 = vld [vmem:[#allocation20_spill] sm:$0xff] }
 0x10c   : > { %v928_v46 = vadd.f32 %v864_v37, %v6417_v23  ;;  %v868_v45 = vmul.f32 %v5299_v1, %v791_v39  ;;  %v881_v4 = vmul.f32 %v5293_v50, %v807_v5  ;;  %v882_v15 = vmul.f32 %v5295_v38, %v807_v5  ;;  %v6422_v23 = vld [vmem:[#allocation18_spill] sm:$0xff] }
 0x10d   : > { %v883_v3 = vmul.f32 %v5297_v54, %v807_v5  ;;  %v5479_v59 = vadd.f32 %v901_v20, %v5321_v55  ;;  %v5482_v25 = vadd.f32 %v902_v42, %v5323_v10  ;;  %v5485_v2 = vadd.f32 %v903_v47, %v5325_v0  ;;  %v6425_v20 = vld [vmem:[#allocation21_spill] sm:$0xff] }
 0x10e   : > { %v5488_v63 = vadd.f32 %v904_v48, %v5327_v53  ;;  %v5491_v39 = vadd.f32 %v865_v52, %v6422_v23  ;;  %v5494_v29 = vadd.f32 %v866_v19, %v6423_v36  ;;  %v5497_v37 = vadd.f32 %v867_v60, %v6424_v27 }
 0x10f   : > { %6418 = vst [vmem:[#allocation30_spill] sm:$0xff] %v5479_v59  ;;  %v884_v55 = vmul.f32 %v5299_v1, %v807_v5  ;;  %v5505_v42 = vadd.f32 %v868_v45, %v6425_v20  ;;  %v5508_v47 = vadd.f32 %v881_v4, %v5258_v16  ;;  %v5511_v48 = vadd.f32 %v882_v15, %v5261_v17 }
 0x110   : > { %6419 = vst [vmem:[#allocation31_spill] sm:$0xff] %v5482_v25  ;;  %v5514_v52 = vadd.f32 %v883_v3, %v5264_v61 }
 0x111   : > { %v5463_v49 = vpop.permute.xlu2 %838  ;;  %v799_v6 = vpop.permute.xlu1 %798  ;;  %6420 = vst [vmem:[#allocation32_spill] sm:$0xff] %v5485_v2  ;;  %v5521_v45 = vadd.f32 %v884_v55, %v5267_v62 }
 0x112   : > { %6413 = vst [vmem:[#allocation61_spill] sm:$0xff] %v5463_v49  ;;  %v819_v56 = vpop.permute.xlu0 %818  ;;  %v873_v10 = vmul.f32 %v5293_v50, %v799_v6  ;;  %v874_v22 = vmul.f32 %v5295_v38, %v799_v6  ;;  %v875_v0 = vmul.f32 %v5297_v54, %v799_v6  ;;  %v876_v53 = vmul.f32 %v5299_v1, %v799_v6 }
 0x113   : > { %6421 = vst [vmem:[#allocation33_spill] sm:$0xff] %v5488_v63  ;;  %v893_v5 = vmul.f32 %v5293_v50, %v819_v56  ;;  %v894_v19 = vmul.f32 %v5295_v38, %v819_v56  ;;  %v895_v60 = vmul.f32 %v5297_v54, %v819_v56  ;;  %v896_v6 = vmul.f32 %v5299_v1, %v819_v56  ;;  %v6436_v63 = vld [vmem:[#allocation25_spill] sm:$0xff] }
 0x114   : > { %v5525_v16 = vmul.f32 %v5293_v50, %v5463_v49  ;;  %v5529_v17 = vmul.f32 %v5295_v38, %v5463_v49  ;;  %v5533_v61 = vmul.f32 %v5297_v54, %v5463_v49  ;;  %v5536_v4 = vadd.f32 %v873_v10, %v5207_v13 }
 0x115   : > { %v5539_v62 = vadd.f32 %v874_v22, %v5209_v40  ;;  %v5542_v56 = vadd.f32 %v875_v0, %v5211_v14  ;;  %v5545_v23 = vadd.f32 %v876_v53, %v5213_v11  ;;  %v5552_v13 = vadd.f32 %v893_v5, %v5310_v51  ;;  %v6429_v14 = vld [vmem:[#allocation43_spill] sm:$0xff]  ;;  %v6431_v11 = vld [vmem:[#allocation44_spill] sm:$0xff] }
 0x116   : > { %6426 = vst [vmem:[#allocation18_spill] sm:$0xff] %v5525_v16  ;;  %v5555_v40 = vadd.f32 %v894_v19, %v5313_v57  ;;  %v5558_v10 = vadd.f32 %v895_v60, %v6429_v14  ;;  %v5561_v22 = vadd.f32 %v896_v6, %v6431_v11  ;;  %v6433_v60 = vld [vmem:[#allocation22_spill] sm:$0xff]  ;;  %v6434_v6 = vld [vmem:[#allocation23_spill] sm:$0xff]  ;;  %v6435_v16 = vld [vmem:[#allocation24_spill] sm:$0xff] }
 0x117   : > { %6427 = vst [vmem:[#allocation19_spill] sm:$0xff] %v5529_v17 }
 0x118   : > { %6428 = vst [vmem:[#allocation20_spill] sm:$0xff] %v5533_v61 }
 0x119   : > { %v811_v3 = vpop.permute.xlu1 %810  ;;  %6430 = vst [vmem:[#allocation21_spill] sm:$0xff] %v5558_v10 }
 0x11a   : > { %v831_v15 = vpop.permute.xlu0 %830  ;;  %v991_v36 = vpop.permute.xlu2 %990  ;;  %v885_v27 = vmul.f32 %v5293_v50, %v811_v3  ;;  %v886_v55 = vmul.f32 %v5295_v38, %v811_v3  ;;  %v887_v20 = vmul.f32 %v5297_v54, %v811_v3  ;;  %v888_v61 = vmul.f32 %v5299_v1, %v811_v3  ;;  %6432 = vst [vmem:[#allocation43_spill] sm:$0xff] %v5561_v22 }
 0x11b   : > { %v905_v0 = vmul.f32 %v5293_v50, %v831_v15  ;;  %v906_v53 = vmul.f32 %v5295_v38, %v831_v15  ;;  %v907_v17 = vmul.f32 %v5297_v54, %v831_v15  ;;  %v908_v3 = vmul.f32 %v5299_v1, %v831_v15 }
 0x11c   : > { %v1065_v51 = vmul.f32 %v5432_v7, %v991_v36  ;;  %v1066_v5 = vmul.f32 %v5434_v33, %v991_v36  ;;  %v1067_v57 = vmul.f32 %v5442_v21, %v991_v36  ;;  %v1068_v19 = vmul.f32 %v5444_v35, %v991_v36 }
 0x11d   : > { %v5572_v14 = vadd.f32 %v885_v27, %v6433_v60  ;;  %v5575_v11 = vadd.f32 %v886_v55, %v6434_v6  ;;  %v5578_v49 = vadd.f32 %v887_v20, %v6435_v16  ;;  %v5581_v2 = vadd.f32 %v888_v61, %v6436_v63 }
 0x11e   : > { %v1129_v15 = vadd.f32 %v1065_v51, %v925_v18  ;;  %v1130_v25 = vadd.f32 %v1066_v5, %v926_v41  ;;  %v1131_v59 = vadd.f32 %v1067_v57, %v927_v28  ;;  %v1132_v22 = vadd.f32 %v1068_v19, %v928_v46  ;;  %v6439_v51 = vld [vmem:[#allocation28_spill] sm:$0xff]  ;;  %v6440_v57 = vld [vmem:[#allocation29_spill] sm:$0xff] }
 0x11f   : > { %v5584_v10 = vadd.f32 %v905_v0, %v5369_v8  ;;  %v5587_v36 = vadd.f32 %v906_v53, %v5371_v31  ;;  %v5590_v27 = vadd.f32 %v907_v17, %v5373_v26  ;;  %v5593_v55 = vadd.f32 %v908_v3, %v5375_v32  ;;  %v6438_v53 = vld [vmem:[#allocation27_spill] sm:$0xff] }
 0x120   : > { %v5596_v63 = vadd.f32 %v5453_v34, %v1129_v15  ;;  %v5599_v18 = vadd.f32 %v5455_v12, %v1130_v25  ;;  %v5602_v41 = vadd.f32 %v5457_v24, %v1131_v59  ;;  %v5605_v8 = vadd.f32 %v5468_v9, %v1132_v22  ;;  %v6437_v22 = vld [vmem:[#allocation26_spill] sm:$0xff] }
 0x121   : > { %v823_v16 = vpop.permute.xlu1 %822 }
 0x122   : > { %v1003_v31 = vpop.permute.xlu2 %1002  ;;  %v897_v26 = vmul.f32 %v5293_v50, %v823_v16  ;;  %v898_v28 = vmul.f32 %v5295_v38, %v823_v16  ;;  %v899_v32 = vmul.f32 %v5297_v54, %v823_v16  ;;  %v900_v46 = vmul.f32 %v5299_v1, %v823_v16  ;;  %v843_v17 = vpop.permute.xlu0 %842 }
 0x123   : > { %v6328_v61 = vmax.f32 %v5596_v63, 0.0  ;;  %v917_v60 = vmul.f32 %v5293_v50, %v843_v17  ;;  %v918_v6 = vmul.f32 %v5295_v38, %v843_v17  ;;  %v919_v15 = vmul.f32 %v5297_v54, %v843_v17 }
 0x124   : > { %v5616_v0 = vadd.f32 %v897_v26, %v6437_v22  ;;  %v5619_v3 = vadd.f32 %v898_v28, %v6438_v53  ;;  %v5622_v5 = vadd.f32 %v899_v32, %v6439_v51  ;;  %v5625_v19 = vadd.f32 %v900_v46, %v6440_v57 }
 0x125   : > { %v920_v16 = vmul.f32 %v5299_v1, %v843_v17  ;;  %v1077_v26 = vmul.f32 %v5432_v7, %v1003_v31  ;;  %v1078_v22 = vmul.f32 %v5434_v33, %v1003_v31  ;;  %v1079_v28 = vmul.f32 %v5442_v21, %v1003_v31 }
 0x126   : > { %v1080_v32 = vmul.f32 %v5444_v35, %v1003_v31  ;;  %v5636_v53 = vadd.f32 %v917_v60, %v5414_v43  ;;  %v5639_v46 = vadd.f32 %v918_v6, %v5416_v58  ;;  %v5642_v51 = vadd.f32 %v919_v15, %v5418_v44  ;;  %v6443_v6 = vld [vmem:[#allocation34_spill] sm:$0xff] }
 0x127   : > { %v5645_v57 = vadd.f32 %v920_v16, %v5420_v30  ;;  %v1141_v17 = vadd.f32 %v1077_v26, %v5536_v4  ;;  %v1142_v20 = vadd.f32 %v1078_v22, %v5539_v62  ;;  %v1143_v59 = vadd.f32 %v1079_v28, %v5542_v56  ;;  %v6445_v16 = vld [vmem:[#allocation35_spill] sm:$0xff]  ;;  %v6449_v28 = vld [vmem:[#allocation37_spill] sm:$0xff] }
 0x128   : > { %v1144_v31 = vadd.f32 %v1080_v32, %v5545_v23 }
 0x129   : > { %v835_v25 = vpop.permute.xlu1 %834  ;;  %v5656_v30 = vadd.f32 %v5453_v34, %v1141_v17  ;;  %v5659_v4 = vadd.f32 %v5455_v12, %v1142_v20  ;;  %v5662_v62 = vadd.f32 %v5457_v24, %v1143_v59 }
 0x12a   : > { %v909_v43 = vmul.f32 %v5293_v50, %v835_v25  ;;  %v910_v58 = vmul.f32 %v5295_v38, %v835_v25  ;;  %v911_v60 = vmul.f32 %v5297_v54, %v835_v25  ;;  %v912_v44 = vmul.f32 %v5299_v1, %v835_v25  ;;  %v1011_v23 = vpop.permute.xlu2 %1010  ;;  %v6447_v25 = vld [vmem:[#allocation36_spill] sm:$0xff] }
 0x12b   : > { %6441 = vst [vmem:[#allocation44_spill] sm:$0xff] %v5656_v30  ;;  %v5665_v56 = vadd.f32 %v5468_v9, %v1144_v31  ;;  %v6327_v20 = vmax.f32 %v5656_v30, 0.0  ;;  %v6329_v59 = vmax.f32 %v5659_v4, 0.0  ;;  %v6331_v17 = vmax.f32 %v5662_v62, 0.0 }
 0x12c   : > { %6442 = vst [vmem:[#allocation22_spill] sm:$0xff] %v5662_v62  ;;  %v5668_v15 = vadd.f32 %v909_v43, %v6443_v6  ;;  %v5671_v26 = vadd.f32 %v910_v58, %v6445_v16  ;;  %v5674_v22 = vadd.f32 %v911_v60, %v6447_v25  ;;  %v5677_v32 = vadd.f32 %v912_v44, %v6449_v28  ;;  %v995_v16 = vpop.permute.xlu0 %994 }
 0x12d   : > { %v1085_v43 = vmul.f32 %v5432_v7, %v1011_v23  ;;  %v1086_v6 = vmul.f32 %v5434_v33, %v1011_v23  ;;  %v1087_v58 = vmul.f32 %v5442_v21, %v1011_v23  ;;  %v1088_v60 = vmul.f32 %v5444_v35, %v1011_v23 }
 0x12e   : > { %6444 = vst [vmem:[#allocation23_spill] sm:$0xff] %v5668_v15  ;;  %v1332_v44 = vmax.f32 %v6328_v61, %v6327_v20  ;;  %v6451_v25 = vmax.f32 %v5599_v18, 0.0  ;;  %v6452_v31 = vmax.f32 %v5602_v41, 0.0  ;;  %v6454_v23 = vmax.f32 %v5605_v8, 0.0 }
 0x12f   : > { %6446 = vst [vmem:[#allocation24_spill] sm:$0xff] %v5671_v26  ;;  %v1149_v15 = vadd.f32 %v1085_v43, %v5508_v47  ;;  %v1150_v30 = vadd.f32 %v1086_v6, %v5511_v48  ;;  %v1151_v20 = vadd.f32 %v1087_v58, %v5514_v52  ;;  %v1152_v61 = vadd.f32 %v1088_v60, %v5521_v45 }
 0x130   : > { %6448 = vst [vmem:[#allocation25_spill] sm:$0xff] %v5674_v22  ;;  %v1353_v28 = vmax.f32 %v6451_v25, %v6329_v59  ;;  %v6453_v22 = vmax.f32 %v5665_v56, 0.0  ;;  %v1069_v25 = vmul.f32 %v5432_v7, %v995_v16  ;;  %v1070_v59 = vmul.f32 %v5434_v33, %v995_v16 }
 0x131   : > { %6450 = vst [vmem:[#allocation26_spill] sm:$0xff] %v5677_v32  ;;  %v1374_v32 = vmax.f32 %v6452_v31, %v6331_v17  ;;  %v1071_v62 = vmul.f32 %v5442_v21, %v995_v16  ;;  %v1072_v31 = vmul.f32 %v5444_v35, %v995_v16  ;;  %v5712_v17 = vadd.f32 %v5453_v34, %v1149_v15 }
 0x132   : > { %v1395_v26 = vmax.f32 %v6454_v23, %v6453_v22  ;;  %v5715_v22 = vadd.f32 %v5455_v12, %v1150_v30  ;;  %v5718_v47 = vadd.f32 %v5457_v24, %v1151_v20  ;;  %v5721_v48 = vadd.f32 %v5468_v9, %v1152_v61 }
 0x133   : > { %v1133_v52 = vadd.f32 %v1069_v25, %v5491_v39  ;;  %v1134_v45 = vadd.f32 %v1070_v59, %v5494_v29  ;;  %v1135_v43 = vadd.f32 %v1071_v62, %v5497_v37  ;;  %v1136_v6 = vadd.f32 %v1072_v31, %v5505_v42  ;;  %v847_v59 = vpop.permute.xlu1 %846 }
 0x134   : > { %v6335_v15 = vmax.f32 %v5712_v17, 0.0  ;;  %v6334_v58 = vmax.f32 %v5715_v22, 0.0  ;;  %v6332_v30 = vmax.f32 %v5718_v47, 0.0  ;;  %v6333_v20 = vmax.f32 %v5721_v48, 0.0 }
 0x135   : > { %v1207_v60 = vadd.f32 %v5453_v34, %v1133_v52  ;;  %v1208_v61 = vadd.f32 %v5455_v12, %v1134_v45  ;;  %v1209_v39 = vadd.f32 %v5457_v24, %v1135_v43  ;;  %v1210_v29 = vadd.f32 %v5468_v9, %v1136_v6  ;;  %v1023_v45 = vpop.permute.xlu2 %1022 }
 0x136   : > { %v1333_v37 = vmax.f32 %v1332_v44, %v6335_v15  ;;  %v1354_v42 = vmax.f32 %v1353_v28, %v6334_v58  ;;  %v1375_v62 = vmax.f32 %v1374_v32, %v6332_v30  ;;  %v1396_v16 = vmax.f32 %v1395_v26, %v6333_v20 }
 0x137   : > { %v1271_v23 = vmax.f32 %v1207_v60, 0.0  ;;  %v1272_v25 = vmax.f32 %v1208_v61, 0.0  ;;  %v1273_v31 = vmax.f32 %v1209_v39, 0.0  ;;  %v1274_v52 = vmax.f32 %v1210_v29, 0.0  ;;  %v1015_v61 = vpop.permute.xlu0 %1014 }
 0x138   : > { %v5744_v43 = vmul.f32 %v5293_v50, %v847_v59  ;;  %v5747_v6 = vmul.f32 %v5295_v38, %v847_v59  ;;  %v5750_v44 = vmul.f32 %v5297_v54, %v847_v59  ;;  %v5753_v28 = vmul.f32 %v5299_v1, %v847_v59 }
 0x139   : > { %v1334_v32 = vmax.f32 %v1333_v37, %v1271_v23  ;;  %v1355_v30 = vmax.f32 %v1354_v42, %v1272_v25  ;;  %v1376_v26 = vmax.f32 %v1375_v62, %v1273_v31  ;;  %v1397_v60 = vmax.f32 %v1396_v16, %v1274_v52 }
 0x13a   : > { %v6455_v39 = vmax.f32 %v5596_v63, 0.0  ;;  %v6456_v50 = vmax.f32 %v5599_v18, 0.0  ;;  %v6457_v38 = vmax.f32 %v5602_v41, 0.0  ;;  %v6458_v59 = vmax.f32 %v5605_v8, 0.0 }
 0x13b   : > { %v1097_v37 = vmul.f32 %v5432_v7, %v1023_v45  ;;  %v1098_v42 = vmul.f32 %v5434_v33, %v1023_v45  ;;  %v1099_v63 = vmul.f32 %v5442_v21, %v1023_v45  ;;  %v1100_v62 = vmul.f32 %v5444_v35, %v1023_v45 }
 0x13c   : > { %v5757_v29 = vadd.f32 %v1271_v23, %v6455_v39  ;;  %v5761_v20 = vadd.f32 %v1272_v25, %v6456_v50  ;;  %v5765_v54 = vadd.f32 %v1273_v31, %v6457_v38  ;;  %v5769_v58 = vadd.f32 %v1274_v52, %v6458_v59  ;;  %v6459_v31 = vld [vmem:[#allocation21_spill] sm:$0xff]  ;;  %v6460_v39 = vld [vmem:[#allocation43_spill] sm:$0xff] }
 0x13d   : > { %v1089_v18 = vmul.f32 %v5432_v7, %v1015_v61  ;;  %v1090_v16 = vmul.f32 %v5434_v33, %v1015_v61  ;;  %v1091_v41 = vmul.f32 %v5442_v21, %v1015_v61  ;;  %v1092_v23 = vmul.f32 %v5444_v35, %v1015_v61 }
 0x13e   : > { %v1161_v8 = vadd.f32 %v1097_v37, %v5552_v13  ;;  %v1162_v25 = vadd.f32 %v1098_v42, %v5555_v40  ;;  %v1163_v52 = vadd.f32 %v1099_v63, %v6459_v31  ;;  %v1164_v50 = vadd.f32 %v1100_v62, %v6460_v39 }
 0x13f   : > { %v1153_v38 = vadd.f32 %v1089_v18, %v5572_v14  ;;  %v1154_v45 = vadd.f32 %v1090_v16, %v5575_v11  ;;  %v1155_v59 = vadd.f32 %v1091_v41, %v5578_v49  ;;  %v1156_v15 = vadd.f32 %v1092_v23, %v5581_v2  ;;  %v1035_v18 = vpop.permute.xlu2 %1034 }
 0x140   : > { %v5788_v1 = vadd.f32 %v5453_v34, %v1161_v8  ;;  %v5791_v61 = vadd.f32 %v5455_v12, %v1162_v25  ;;  %v5794_v13 = vadd.f32 %v5457_v24, %v1163_v52  ;;  %v5797_v40 = vadd.f32 %v5468_v9, %v1164_v50 }
 0x141   : > { %v5800_v14 = vadd.f32 %v5453_v34, %v1153_v38  ;;  %v5803_v11 = vadd.f32 %v5455_v12, %v1154_v45  ;;  %v5806_v49 = vadd.f32 %v5457_v24, %v1155_v59  ;;  %v5809_v2 = vadd.f32 %v5468_v9, %v1156_v15  ;;  %v999_v59 = vpop.permute.xlu1 %998 }
 0x142   : > { %6461 = vst [vmem:[#allocation27_spill] sm:$0xff] %v5797_v40  ;;  %v6340_v37 = vmax.f32 %v5788_v1, 0.0  ;;  %v6339_v42 = vmax.f32 %v5791_v61, 0.0  ;;  %v6338_v63 = vmax.f32 %v5794_v13, 0.0  ;;  %v6337_v62 = vmax.f32 %v5797_v40, 0.0 }
 0x143   : > { %v6344_v16 = vmax.f32 %v5800_v14, 0.0  ;;  %v6341_v41 = vmax.f32 %v5803_v11, 0.0  ;;  %v6343_v23 = vmax.f32 %v5806_v49, 0.0  ;;  %v6342_v8 = vmax.f32 %v5809_v2, 0.0 }
 0x144   : > { %v1335_v15 = vmax.f32 %v1334_v32, %v6340_v37  ;;  %v1356_v25 = vmax.f32 %v1355_v30, %v6339_v42  ;;  %v1377_v31 = vmax.f32 %v1376_v26, %v6338_v63  ;;  %v1398_v52 = vmax.f32 %v1397_v60, %v6337_v62 }
 0x145   : > { %v1109_v39 = vmul.f32 %v5432_v7, %v1035_v18  ;;  %v1110_v50 = vmul.f32 %v5434_v33, %v1035_v18  ;;  %v1111_v38 = vmul.f32 %v5442_v21, %v1035_v18  ;;  %v1112_v45 = vmul.f32 %v5444_v35, %v1035_v18 }
 0x146   : > { %v1336_v32 = vmax.f32 %v1335_v15, %v6344_v16  ;;  %v1357_v30 = vmax.f32 %v1356_v25, %v6341_v41  ;;  %v1378_v26 = vmax.f32 %v1377_v31, %v6343_v23  ;;  %v1399_v60 = vmax.f32 %v1398_v52, %v6342_v8  ;;  %v6468_v8 = vld [vmem:[#allocation48_spill] sm:$0xff] }
 0x147   : > { %v1173_v62 = vadd.f32 %v1109_v39, %v5584_v10  ;;  %v1174_v63 = vadd.f32 %v1110_v50, %v5587_v36  ;;  %v1175_v42 = vadd.f32 %v1111_v38, %v5590_v27  ;;  %v1176_v18 = vadd.f32 %v1112_v45, %v5593_v55  ;;  %v6465_v27 = vld [vmem:[#allocation45_spill] sm:$0xff]  ;;  %v6466_v39 = vld [vmem:[#allocation46_spill] sm:$0xff]  ;;  %v6467_v38 = vld [vmem:[#allocation47_spill] sm:$0xff] }
 0x148   : > { %v1073_v37 = vmul.f32 %v5432_v7, %v999_v59  ;;  %v1074_v15 = vmul.f32 %v5434_v33, %v999_v59  ;;  %v1075_v25 = vmul.f32 %v5442_v21, %v999_v59  ;;  %v1076_v41 = vmul.f32 %v5444_v35, %v999_v59 }
 0x149   : > { %v5848_v31 = vadd.f32 %v5453_v34, %v1173_v62  ;;  %v5851_v52 = vadd.f32 %v5455_v12, %v1174_v63  ;;  %v5854_v10 = vadd.f32 %v5457_v24, %v1175_v42  ;;  %v5857_v36 = vadd.f32 %v5468_v9, %v1176_v18 }
 0x14a   : > { %v1137_v55 = vadd.f32 %v1073_v37, %v6465_v27  ;;  %v1138_v50 = vadd.f32 %v1074_v15, %v6466_v39  ;;  %v1139_v45 = vadd.f32 %v1075_v25, %v6467_v38  ;;  %v1140_v59 = vadd.f32 %v1076_v41, %v6468_v8  ;;  %v1027_v27 = vpop.permute.xlu0 %1026 }
 0x14b   : > { %6462 = vst [vmem:[#allocation28_spill] sm:$0xff] %v5848_v31  ;;  %v6347_v62 = vmax.f32 %v5848_v31, 0.0  ;;  %v6348_v23 = vmax.f32 %v5851_v52, 0.0  ;;  %v6350_v63 = vmax.f32 %v5854_v10, 0.0  ;;  %v6351_v42 = vmax.f32 %v5857_v36, 0.0 }
 0x14c   : > { %6463 = vst [vmem:[#allocation29_spill] sm:$0xff] %v5854_v10  ;;  %v1211_v16 = vadd.f32 %v5453_v34, %v1137_v55  ;;  %v1212_v18 = vadd.f32 %v5455_v12, %v1138_v50  ;;  %v1213_v37 = vadd.f32 %v5457_v24, %v1139_v45  ;;  %v1214_v15 = vadd.f32 %v5468_v9, %v1140_v59 }
 0x14d   : > { %6464 = vst [vmem:[#allocation34_spill] sm:$0xff] %v5857_v36  ;;  %v1337_v41 = vmax.f32 %v1336_v32, %v6347_v62  ;;  %v1358_v8 = vmax.f32 %v1357_v30, %v6348_v23  ;;  %v1379_v25 = vmax.f32 %v1378_v26, %v6350_v63  ;;  %v1400_v39 = vmax.f32 %v1399_v60, %v6351_v42  ;;  %v1047_v26 = vpop.permute.xlu2 %1046 }
 0x14e   : > { %v1275_v55 = vmax.f32 %v1211_v16, 0.0  ;;  %v1276_v38 = vmax.f32 %v1212_v18, 0.0  ;;  %v1277_v50 = vmax.f32 %v1213_v37, 0.0  ;;  %v1278_v40 = vmax.f32 %v1214_v15, 0.0 }
 0x14f   : > { %v1101_v45 = vmul.f32 %v5432_v7, %v1027_v27  ;;  %v1102_v59 = vmul.f32 %v5434_v33, %v1027_v27  ;;  %v1103_v31 = vmul.f32 %v5442_v21, %v1027_v27  ;;  %v1104_v32 = vmul.f32 %v5444_v35, %v1027_v27 }
 0x150   : > { %v1338_v62 = vmax.f32 %v1337_v41, %v1275_v55  ;;  %v1359_v30 = vmax.f32 %v1358_v8, %v1276_v38  ;;  %v1380_v23 = vmax.f32 %v1379_v25, %v1277_v50  ;;  %v1401_v10 = vmax.f32 %v1400_v39, %v1278_v40 }
 0x151   : > { %v1438_v63 = vadd.f32 %v5757_v29, %v1275_v55  ;;  %v1459_v16 = vadd.f32 %v5761_v20, %v1276_v38  ;;  %v1480_v60 = vadd.f32 %v5765_v54, %v1277_v50  ;;  %v1501_v18 = vadd.f32 %v5769_v58, %v1278_v40 }
 0x152   : > { %v1165_v37 = vadd.f32 %v1101_v45, %v5616_v0  ;;  %v1166_v15 = vadd.f32 %v1102_v59, %v5619_v3  ;;  %v1167_v42 = vadd.f32 %v1103_v31, %v5622_v5  ;;  %v1168_v27 = vadd.f32 %v1104_v32, %v5625_v19 }
 0x153   : > { %v1121_v41 = vmul.f32 %v5432_v7, %v1047_v26  ;;  %v1122_v8 = vmul.f32 %v5434_v33, %v1047_v26  ;;  %v1123_v29 = vmul.f32 %v5442_v21, %v1047_v26  ;;  %v1124_v20 = vmul.f32 %v5444_v35, %v1047_v26 }
 0x154   : > { %v5896_v54 = vadd.f32 %v5453_v34, %v1165_v37  ;;  %v5899_v58 = vadd.f32 %v5455_v12, %v1166_v15  ;;  %v5902_v0 = vadd.f32 %v5457_v24, %v1167_v42  ;;  %v5905_v3 = vadd.f32 %v5468_v9, %v1168_v27 }
 0x155   : > { %v1185_v5 = vadd.f32 %v1121_v41, %v5636_v53  ;;  %v1186_v19 = vadd.f32 %v1122_v8, %v5639_v46  ;;  %v1187_v40 = vadd.f32 %v1123_v29, %v5642_v51  ;;  %v1188_v31 = vadd.f32 %v1124_v20, %v5645_v57  ;;  %v1007_v51 = vpop.permute.xlu1 %1006 }
 0x156   : > { %v6355_v25 = vmax.f32 %v5896_v54, 0.0  ;;  %v6354_v39 = vmax.f32 %v5899_v58, 0.0  ;;  %v6353_v55 = vmax.f32 %v5902_v0, 0.0  ;;  %v6352_v42 = vmax.f32 %v5905_v3, 0.0 }
 0x157   : > { %v5916_v38 = vadd.f32 %v5453_v34, %v1185_v5  ;;  %v5919_v50 = vadd.f32 %v5455_v12, %v1186_v19  ;;  %v5922_v53 = vadd.f32 %v5457_v24, %v1187_v40  ;;  %v5925_v46 = vadd.f32 %v5468_v9, %v1188_v31  ;;  %v6473_v5 = vld [vmem:[#allocation53_spill] sm:$0xff]  ;;  %v6474_v40 = vld [vmem:[#allocation54_spill] sm:$0xff] }
 0x158   : > { %v1339_v57 = vmax.f32 %v1338_v62, %v6355_v25  ;;  %v1360_v45 = vmax.f32 %v1359_v30, %v6354_v39  ;;  %v1381_v59 = vmax.f32 %v1380_v23, %v6353_v55  ;;  %v1402_v32 = vmax.f32 %v1401_v10, %v6352_v42  ;;  %v6475_v42 = vld [vmem:[#allocation55_spill] sm:$0xff]  ;;  %v6476_v39 = vld [vmem:[#allocation56_spill] sm:$0xff]  ;;  %v1039_v25 = vpop.permute.xlu0 %1038 }
 0x159   : > { %6469 = vst [vmem:[#allocation35_spill] sm:$0xff] %v5916_v38  ;;  %v6357_v26 = vmax.f32 %v5916_v38, 0.0  ;;  %v6358_v37 = vmax.f32 %v5919_v50, 0.0  ;;  %v6360_v15 = vmax.f32 %v5922_v53, 0.0  ;;  %v6361_v27 = vmax.f32 %v5925_v46, 0.0  ;;  %v6477_v38 = vld [vmem:[#allocation44_spill] sm:$0xff] }
 0x15a   : > { %6470 = vst [vmem:[#allocation36_spill] sm:$0xff] %v5919_v50  ;;  %v1081_v41 = vmul.f32 %v5432_v7, %v1007_v51  ;;  %v1082_v62 = vmul.f32 %v5434_v33, %v1007_v51  ;;  %v1083_v30 = vmul.f32 %v5442_v21, %v1007_v51  ;;  %v1084_v8 = vmul.f32 %v5444_v35, %v1007_v51 }
 0x15b   : > { %6471 = vst [vmem:[#allocation37_spill] sm:$0xff] %v5922_v53  ;;  %v1340_v23 = vmax.f32 %v1339_v57, %v6357_v26  ;;  %v1361_v10 = vmax.f32 %v1360_v45, %v6358_v37  ;;  %v1382_v29 = vmax.f32 %v1381_v59, %v6360_v15  ;;  %v1403_v20 = vmax.f32 %v1402_v32, %v6361_v27  ;;  %v6480_v53 = vld [vmem:[#allocation22_spill] sm:$0xff] }
 0x15c   : > { %6472 = vst [vmem:[#allocation21_spill] sm:$0xff] %v5925_v46  ;;  %v1145_v19 = vadd.f32 %v1081_v41, %v6473_v5  ;;  %v1146_v31 = vadd.f32 %v1082_v62, %v6474_v40  ;;  %v1147_v55 = vadd.f32 %v1083_v30, %v6475_v42  ;;  %v1148_v51 = vadd.f32 %v1084_v8, %v6476_v39  ;;  %v6483_v30 = vld [vmem:[#allocation23_spill] sm:$0xff]  ;;  %v6484_v5 = vld [vmem:[#allocation24_spill] sm:$0xff]  ;;  %v6485_v40 = vld [vmem:[#allocation25_spill] sm:$0xff] }
 0x15d   : > { %v6478_v57 = vmax.f32 %v6477_v38, 0.0  ;;  %v6479_v45 = vmax.f32 %v5659_v4, 0.0  ;;  %v6481_v59 = vmax.f32 %v6480_v53, 0.0  ;;  %v6482_v32 = vmax.f32 %v5665_v56, 0.0 }
 0x15e   : > { %v1219_v41 = vadd.f32 %v5453_v34, %v1145_v19  ;;  %v1220_v62 = vadd.f32 %v5455_v12, %v1146_v31  ;;  %v1221_v42 = vadd.f32 %v5457_v24, %v1147_v55  ;;  %v1222_v39 = vadd.f32 %v5468_v9, %v1148_v51  ;;  %v6486_v31 = vld [vmem:[#allocation26_spill] sm:$0xff] }
 0x15f   : > { %v1439_v26 = vadd.f32 %v1438_v63, %v6478_v57  ;;  %v1460_v37 = vadd.f32 %v1459_v16, %v6479_v45  ;;  %v1481_v15 = vadd.f32 %v1480_v60, %v6481_v59  ;;  %v1502_v27 = vadd.f32 %v1501_v18, %v6482_v32 }
 0x160   : > { %v1113_v38 = vmul.f32 %v5432_v7, %v1039_v25  ;;  %v1114_v63 = vmul.f32 %v5434_v33, %v1039_v25  ;;  %v1115_v4 = vmul.f32 %v5442_v21, %v1039_v25  ;;  %v1116_v16 = vmul.f32 %v5444_v35, %v1039_v25 }
 0x161   : > { %v1283_v60 = vmax.f32 %v1219_v41, 0.0  ;;  %v1284_v53 = vmax.f32 %v1220_v62, 0.0  ;;  %v1285_v56 = vmax.f32 %v1221_v42, 0.0  ;;  %v1286_v18 = vmax.f32 %v1222_v39, 0.0 }
 0x162   : > { %v1177_v8 = vadd.f32 %v1113_v38, %v6483_v30  ;;  %v1178_v19 = vadd.f32 %v1114_v63, %v6484_v5  ;;  %v1179_v55 = vadd.f32 %v1115_v4, %v6485_v40  ;;  %v1180_v51 = vadd.f32 %v1116_v16, %v6486_v31  ;;  %v6492_v30 = vld [vmem:[#allocation58_spill] sm:$0xff]  ;;  %v6493_v5 = vld [vmem:[#allocation59_spill] sm:$0xff]  ;;  %v6494_v40 = vld [vmem:[#allocation60_spill] sm:$0xff] }
 0x163   : > { %v1341_v57 = vmax.f32 %v1340_v23, %v1283_v60  ;;  %v1362_v45 = vmax.f32 %v1361_v10, %v1284_v53  ;;  %v1383_v59 = vmax.f32 %v1382_v29, %v1285_v56  ;;  %v1404_v32 = vmax.f32 %v1403_v20, %v1286_v18  ;;  %v1019_v23 = vpop.permute.xlu1 %1018 }
 0x164   : > { %v1440_v46 = vadd.f32 %v1439_v26, %v1283_v60  ;;  %v1461_v50 = vadd.f32 %v1460_v37, %v1284_v53  ;;  %v1482_v36 = vadd.f32 %v1481_v15, %v1285_v56  ;;  %v1503_v25 = vadd.f32 %v1502_v27, %v1286_v18  ;;  %v6491_v56 = vld [vmem:[#allocation57_spill] sm:$0xff] }
 0x165   : > { %v5976_v41 = vadd.f32 %v5453_v34, %v1177_v8  ;;  %v5979_v62 = vadd.f32 %v5455_v12, %v1178_v19  ;;  %v5982_v42 = vadd.f32 %v5457_v24, %v1179_v55  ;;  %v5985_v39 = vadd.f32 %v5468_v9, %v1180_v51 }
 0x166   : > { %v6487_v10 = vmax.f32 %v5712_v17, 0.0  ;;  %v6488_v26 = vmax.f32 %v5715_v22, 0.0  ;;  %v6489_v15 = vmax.f32 %v5718_v47, 0.0  ;;  %v6490_v20 = vmax.f32 %v5721_v48, 0.0 }
 0x167   : > { %v1315_v63 = vmax.f32 %v5976_v41, 0.0  ;;  %v1316_v4 = vmax.f32 %v5979_v62, 0.0  ;;  %v1317_v16 = vmax.f32 %v5982_v42, 0.0  ;;  %v1318_v60 = vmax.f32 %v5985_v39, 0.0 }
 0x168   : > { %v1441_v29 = vadd.f32 %v1440_v46, %v6487_v10  ;;  %v1462_v37 = vadd.f32 %v1461_v50, %v6488_v26  ;;  %v1483_v27 = vadd.f32 %v1482_v36, %v6489_v15  ;;  %v1504_v38 = vadd.f32 %v1503_v25, %v6490_v20 }
 0x169   : > { %v1093_v17 = vmul.f32 %v5432_v7, %v1019_v23  ;;  %v1094_v46 = vmul.f32 %v5434_v33, %v1019_v23  ;;  %v1095_v22 = vmul.f32 %v5442_v21, %v1019_v23  ;;  %v1096_v47 = vmul.f32 %v5444_v35, %v1019_v23 }
 0x16a   : > { %v1342_v48 = vmax.f32 %v1341_v57, %v1315_v63  ;;  %v1363_v36 = vmax.f32 %v1362_v45, %v1316_v4  ;;  %v1384_v50 = vmax.f32 %v1383_v59, %v1317_v16  ;;  %v1405_v53 = vmax.f32 %v1404_v32, %v1318_v60 }
 0x16b   : > { %v1157_v18 = vadd.f32 %v1093_v17, %v6491_v56  ;;  %v1158_v8 = vadd.f32 %v1094_v46, %v6492_v30  ;;  %v1159_v19 = vadd.f32 %v1095_v22, %v6493_v5  ;;  %v1160_v55 = vadd.f32 %v1096_v47, %v6494_v40  ;;  %v1051_v17 = vpop.permute.xlu0 %1050 }
 0x16c   : > { %v6495_v31 = vmax.f32 %v5800_v14, 0.0  ;;  %v6496_v57 = vmax.f32 %v5803_v11, 0.0  ;;  %v6497_v25 = vmax.f32 %v5806_v49, 0.0  ;;  %v6498_v23 = vmax.f32 %v5809_v2, 0.0  ;;  %v6499_v14 = vld [vmem:[#allocation38_spill] sm:$0xff]  ;;  %v6500_v11 = vld [vmem:[#allocation39_spill] sm:$0xff] }
 0x16d   : > { %v1231_v10 = vadd.f32 %v5453_v34, %v1157_v18  ;;  %v1232_v26 = vadd.f32 %v5455_v12, %v1158_v8  ;;  %v1233_v15 = vadd.f32 %v5457_v24, %v1159_v19  ;;  %v1234_v20 = vadd.f32 %v5468_v9, %v1160_v55  ;;  %v6501_v49 = vld [vmem:[#allocation40_spill] sm:$0xff]  ;;  %v6502_v2 = vld [vmem:[#allocation41_spill] sm:$0xff] }
 0x16e   : > { %v1442_v51 = vadd.f32 %v1441_v29, %v6495_v31  ;;  %v1463_v45 = vadd.f32 %v1462_v37, %v6496_v57  ;;  %v1484_v59 = vadd.f32 %v1483_v27, %v6497_v25  ;;  %v1505_v32 = vadd.f32 %v1504_v38, %v6498_v23 }
 0x16f   : > { %v985_v29 = vadd.f32 %v5744_v43, %v6499_v14  ;;  %v986_v37 = vadd.f32 %v5747_v6, %v6500_v11  ;;  %v987_v27 = vadd.f32 %v5750_v44, %v6501_v49  ;;  %v988_v38 = vadd.f32 %v5753_v28, %v6502_v2 }
 0x170   : > { %v1295_v46 = vmax.f32 %v1231_v10, 0.0  ;;  %v1296_v22 = vmax.f32 %v1232_v26, 0.0  ;;  %v1297_v47 = vmax.f32 %v1233_v15, 0.0  ;;  %v1298_v56 = vmax.f32 %v1234_v20, 0.0  ;;  %v1031_v26 = vpop.permute.xlu1 %1030 }
 0x171   : > { %v1125_v18 = vmul.f32 %v5432_v7, %v1051_v17  ;;  %v1126_v30 = vmul.f32 %v5434_v33, %v1051_v17  ;;  %v1127_v8 = vmul.f32 %v5442_v21, %v1051_v17  ;;  %v1128_v43 = vmul.f32 %v5444_v35, %v1051_v17 }
 0x172   : > { %v1343_v5 = vmax.f32 %v1342_v48, %v1295_v46  ;;  %v1364_v6 = vmax.f32 %v1363_v36, %v1296_v22  ;;  %v1385_v19 = vmax.f32 %v1384_v50, %v1297_v47  ;;  %v1406_v40 = vmax.f32 %v1405_v53, %v1298_v56  ;;  %v6506_v50 = vld [vmem:[#allocation27_spill] sm:$0xff] }
 0x173   : > { %v1443_v44 = vadd.f32 %v1442_v51, %v1295_v46  ;;  %v1464_v55 = vadd.f32 %v1463_v45, %v1296_v22  ;;  %v1485_v31 = vadd.f32 %v1484_v59, %v1297_v47  ;;  %v1506_v28 = vadd.f32 %v1505_v32, %v1298_v56  ;;  %v6509_v22 = vld [vmem:[#allocation31_spill] sm:$0xff]  ;;  %v6510_v56 = vld [vmem:[#allocation32_spill] sm:$0xff] }
 0x174   : > { %v1189_v57 = vadd.f32 %v1125_v18, %v985_v29  ;;  %v1190_v25 = vadd.f32 %v1126_v30, %v986_v37  ;;  %v1191_v23 = vadd.f32 %v1127_v8, %v987_v27  ;;  %v1192_v10 = vadd.f32 %v1128_v43, %v988_v38  ;;  %v6508_v38 = vld [vmem:[#allocation30_spill] sm:$0xff]  ;;  %v6511_v30 = vld [vmem:[#allocation33_spill] sm:$0xff] }
 0x175   : > { %v6503_v15 = vmax.f32 %v5788_v1, 0.0  ;;  %v6504_v14 = vmax.f32 %v5791_v61, 0.0  ;;  %v6505_v48 = vmax.f32 %v5794_v13, 0.0  ;;  %v6507_v53 = vmax.f32 %v6506_v50, 0.0 }
 0x176   : > { %v6048_v45 = vadd.f32 %v5453_v34, %v1189_v57  ;;  %v6051_v59 = vadd.f32 %v5455_v12, %v1190_v25  ;;  %v6054_v32 = vadd.f32 %v5457_v24, %v1191_v23  ;;  %v6057_v1 = vadd.f32 %v5468_v9, %v1192_v10 }
 0x177   : > { %v1444_v20 = vadd.f32 %v1443_v44, %v6503_v15  ;;  %v1465_v11 = vadd.f32 %v1464_v55, %v6504_v14  ;;  %v1486_v36 = vadd.f32 %v1485_v31, %v6505_v48  ;;  %v1507_v51 = vadd.f32 %v1506_v28, %v6507_v53 }
 0x178   : > { %v1105_v61 = vmul.f32 %v5432_v7, %v1031_v26  ;;  %v1106_v13 = vmul.f32 %v5434_v33, %v1031_v26  ;;  %v1107_v17 = vmul.f32 %v5442_v21, %v1031_v26  ;;  %v1108_v29 = vmul.f32 %v5444_v35, %v1031_v26 }
 0x179   : > { %v1327_v37 = vmax.f32 %v6048_v45, 0.0  ;;  %v1328_v49 = vmax.f32 %v6051_v59, 0.0  ;;  %v1329_v27 = vmax.f32 %v6054_v32, 0.0  ;;  %v1330_v2 = vmax.f32 %v6057_v1, 0.0 }
 0x17a   : > { %v1169_v46 = vadd.f32 %v1105_v61, %v6508_v38  ;;  %v1170_v47 = vadd.f32 %v1106_v13, %v6509_v22  ;;  %v1171_v18 = vadd.f32 %v1107_v17, %v6510_v56  ;;  %v1172_v8 = vadd.f32 %v1108_v29, %v6511_v30  ;;  %v6516_v13 = vld [vmem:[#allocation61_spill] sm:$0xff]  ;;  %v6517_v17 = vld [vmem:[#allocation42_spill] sm:$0xff]  ;;  %v1043_v22 = vpop.permute.xlu1 %1042 }
 0x17b   : > { %v1344_v43 = vmax.f32 %v1343_v5, %v1327_v37  ;;  %v1365_v44 = vmax.f32 %v1364_v6, %v1328_v49  ;;  %v1386_v55 = vmax.f32 %v1385_v19, %v1329_v27  ;;  %v1407_v31 = vmax.f32 %v1406_v40, %v1330_v2  ;;  %v6519_v56 = vld [vmem:[#allocation18_spill] sm:$0xff] }
 0x17c   : > { %v1243_v28 = vadd.f32 %v5453_v34, %v1169_v46  ;;  %v1244_v57 = vadd.f32 %v5455_v12, %v1170_v47  ;;  %v1245_v25 = vadd.f32 %v5457_v24, %v1171_v18  ;;  %v1246_v23 = vadd.f32 %v5468_v9, %v1172_v8  ;;  %v6521_v18 = vld [vmem:[#allocation19_spill] sm:$0xff] }
 0x17d   : > { %v6512_v10 = vmax.f32 %v5896_v54, 0.0  ;;  %v6513_v26 = vmax.f32 %v5899_v58, 0.0  ;;  %v6514_v15 = vmax.f32 %v5902_v0, 0.0  ;;  %v6515_v14 = vmax.f32 %v5905_v3, 0.0  ;;  %v6522_v8 = vld [vmem:[#allocation51_spill] sm:$0xff] }
 0x17e   : > { %v1307_v48 = vmax.f32 %v1243_v28, 0.0  ;;  %v1308_v50 = vmax.f32 %v1244_v57, 0.0  ;;  %v1309_v53 = vmax.f32 %v1245_v25, 0.0  ;;  %v1310_v61 = vmax.f32 %v1246_v23, 0.0  ;;  %v6523_v28 = vld [vmem:[#allocation20_spill] sm:$0xff] }
 0x17f   : > { %v1445_v5 = vadd.f32 %v1444_v20, %v6512_v10  ;;  %v1466_v6 = vadd.f32 %v1465_v11, %v6513_v26  ;;  %v1487_v19 = vadd.f32 %v1486_v36, %v6514_v15  ;;  %v1508_v40 = vadd.f32 %v1507_v51, %v6515_v14  ;;  %v6518_v36 = vld [vmem:[#allocation49_spill] sm:$0xff]  ;;  %v6520_v51 = vld [vmem:[#allocation50_spill] sm:$0xff]  ;;  %v6524_v25 = vld [vmem:[#allocation52_spill] sm:$0xff] }
 0x180   : > { %v916_v29 = vmul.f32 %v6517_v17, %v6516_v13  ;;  %v1345_v38 = vmax.f32 %v1344_v43, %v1307_v48  ;;  %v1366_v46 = vmax.f32 %v1365_v44, %v1308_v50  ;;  %v1387_v54 = vmax.f32 %v1386_v55, %v1309_v53  ;;  %v6525_v10 = vld [vmem:[#allocation28_spill] sm:$0xff] }
 0x181   : > { %v1408_v20 = vmax.f32 %v1407_v31, %v1310_v61  ;;  %v1446_v58 = vadd.f32 %v1445_v5, %v1307_v48  ;;  %v1467_v11 = vadd.f32 %v1466_v6, %v1308_v50  ;;  %v1488_v47 = vadd.f32 %v1487_v19, %v1309_v53  ;;  %v6528_v19 = vld [vmem:[#allocation29_spill] sm:$0xff] }
 0x182   : > { %v1509_v0 = vadd.f32 %v1508_v40, %v1310_v61  ;;  %v977_v3 = vadd.f32 %v6519_v56, %v6518_v36  ;;  %v978_v30 = vadd.f32 %v6521_v18, %v6520_v51  ;;  %v979_v57 = vadd.f32 %v6523_v28, %v6522_v8  ;;  %v6530_v61 = vld [vmem:[#allocation34_spill] sm:$0xff]  ;;  %v6532_v18 = vld [vmem:[#allocation35_spill] sm:$0xff] }
 0x183   : > { %v980_v23 = vadd.f32 %v916_v29, %v6524_v25  ;;  %v1117_v43 = vmul.f32 %v5432_v7, %v1043_v22  ;;  %v1118_v44 = vmul.f32 %v5434_v33, %v1043_v22  ;;  %v1119_v55 = vmul.f32 %v5442_v21, %v1043_v22 }
 0x184   : > { %v1120_v31 = vmul.f32 %v5444_v35, %v1043_v22  ;;  %v6526_v5 = vmax.f32 %v6525_v10, 0.0  ;;  %v6527_v6 = vmax.f32 %v5851_v52, 0.0  ;;  %v6529_v14 = vmax.f32 %v6528_v19, 0.0 }
 0x185   : > { %v1181_v48 = vadd.f32 %v1117_v43, %v977_v3  ;;  %v1182_v50 = vadd.f32 %v1118_v44, %v978_v30  ;;  %v1183_v53 = vadd.f32 %v1119_v55, %v979_v57  ;;  %v6531_v7 = vmax.f32 %v6530_v61, 0.0  ;;  %v6536_v57 = vld [vmem:[#allocation37_spill] sm:$0xff] }
 0x186   : > { %v1447_v26 = vadd.f32 %v1446_v58, %v6526_v5  ;;  %v1468_v15 = vadd.f32 %v1467_v11, %v6527_v6  ;;  %v1489_v40 = vadd.f32 %v1488_v47, %v6529_v14  ;;  %v1184_v33 = vadd.f32 %v1120_v31, %v980_v23 }
 0x187   : > { %v1510_v13 = vadd.f32 %v1509_v0, %v6531_v7  ;;  %v1255_v17 = vadd.f32 %v5453_v34, %v1181_v48  ;;  %v1256_v29 = vadd.f32 %v5455_v12, %v1182_v50  ;;  %v1257_v22 = vadd.f32 %v5457_v24, %v1183_v53 }
 0x188   : > { %v1448_v21 = vadd.f32 %v1447_v26, %v1315_v63  ;;  %v1469_v35 = vadd.f32 %v1468_v15, %v1316_v4  ;;  %v1490_v52 = vadd.f32 %v1489_v40, %v1317_v16  ;;  %v1258_v11 = vadd.f32 %v5468_v9, %v1184_v33  ;;  %v6534_v9 = vld [vmem:[#allocation36_spill] sm:$0xff] }
 0x189   : > { %v1511_v58 = vadd.f32 %v1510_v13, %v1318_v60  ;;  %v1319_v47 = vmax.f32 %v1255_v17, 0.0  ;;  %v1320_v41 = vmax.f32 %v1256_v29, 0.0  ;;  %v1321_v63 = vmax.f32 %v1257_v22, 0.0 }
 0x18a   : > { %v1322_v0 = vmax.f32 %v1258_v11, 0.0  ;;  %v6533_v39 = vmax.f32 %v6532_v18, 0.0  ;;  %v6535_v8 = vmax.f32 %v6534_v9, 0.0  ;;  %v6537_v25 = vmax.f32 %v6536_v57, 0.0 }
 0x18b   : > { %v1346_v62 = vmax.f32 %v1345_v38, %v1319_v47  ;;  %v1367_v4 = vmax.f32 %v1366_v46, %v1320_v41  ;;  %v1388_v36 = vmax.f32 %v1387_v54, %v1321_v63  ;;  %v1449_v42 = vadd.f32 %v1448_v21, %v1319_v47  ;;  %v6538_v46 = vld [vmem:[#allocation21_spill] sm:$0xff] }
 0x18c   : > { %v1409_v16 = vmax.f32 %v1408_v20, %v1322_v0  ;;  %v1470_v56 = vadd.f32 %v1469_v35, %v1320_v41  ;;  %v1491_v34 = vadd.f32 %v1490_v52, %v1321_v63  ;;  %v1512_v3 = vadd.f32 %v1511_v58, %v1322_v0 }
 0x18d   : > { %v1347_v12 = vrot.slane %v1346_v62, 4  ;;  %v1368_v51 = vrot.slane %v1367_v4, 4  ;;  %v1389_v24 = vrot.slane %v1388_v36, 4  ;;  %v1450_v60 = vadd.f32 %v1449_v42, %v6533_v39 }
 0x18e   : > { %v1410_v30 = vrot.slane %v1409_v16, 4  ;;  %v1471_v28 = vadd.f32 %v1470_v56, %v6535_v8  ;;  %v1492_v38 = vadd.f32 %v1491_v34, %v6537_v25  ;;  %v6539_v54 = vmax.f32 %v6538_v46, 0.0 }
 0x18f   : > { %v1348_v20 = vmax.f32 %v1346_v62, %v1347_v12  ;;  %v1369_v43 = vmax.f32 %v1367_v4, %v1368_v51  ;;  %v1390_v44 = vmax.f32 %v1388_v36, %v1389_v24  ;;  %v1451_v55 = vadd.f32 %v1450_v60, %v1327_v37  ;;  %v1331_v12 = vld [vmem:[#allocation2] sm:$0xf] }
 0x190   : > { %v1513_v23 = vadd.f32 %v1512_v3, %v6539_v54  ;;  %v1411_v31 = vmax.f32 %v1409_v16, %v1410_v30  ;;  %v1472_v10 = vadd.f32 %v1471_v28, %v1328_v49  ;;  %v1493_v5 = vadd.f32 %v1492_v38, %v1329_v27  ;;  %v1436_v38 = vld [vmem:[#allocation3] sm:$0xf] }
 0x191   : > { %v1349_v6 = vrot.slane %v1348_v20, 2  ;;  %v1370_v15 = vrot.slane %v1369_v43, 2  ;;  %v1391_v19 = vrot.slane %v1390_v44, 2  ;;  %v1452_v14 = vrot.slane %v1451_v55, 4 }
 0x192   : > { %v1514_v26 = vadd.f32 %v1513_v23, %v1330_v2  ;;  %v1412_v40 = vrot.slane %v1411_v31, 2  ;;  %v1473_v45 = vrot.slane %v1472_v10, 4  ;;  %v1494_v37 = vrot.slane %v1493_v5, 4 }
 0x193   : > { %v1350_v50 = vmax.f32 %v1348_v20, %v1349_v6  ;;  %v1371_v53 = vmax.f32 %v1369_v43, %v1370_v15  ;;  %v1392_v59 = vmax.f32 %v1390_v44, %v1391_v19  ;;  %v1453_v49 = vadd.f32 %v1452_v14, %v1451_v55 }
 0x194   : > { %v1515_v48 = vrot.slane %v1514_v26, 4  ;;  %v1413_v61 = vmax.f32 %v1411_v31, %v1412_v40  ;;  %v1474_v32 = vadd.f32 %v1473_v45, %v1472_v10  ;;  %v1495_v27 = vadd.f32 %v1494_v37, %v1493_v5 }
 0x195   : > { %v1351_v1 = vrot.slane %v1350_v50, 1  ;;  %v1372_v2 = vrot.slane %v1371_v53, 1  ;;  %v1393_v13 = vrot.slane %v1392_v59, 1  ;;  %v1454_v33 = vrot.slane %v1453_v49, 2 }
 0x196   : > { %v1516_v7 = vadd.f32 %v1515_v48, %v1514_v26  ;;  %v1414_v21 = vrot.slane %v1413_v61, 1  ;;  %v1475_v35 = vrot.slane %v1474_v32, 2  ;;  %v1496_v52 = vrot.slane %v1495_v27, 2 }
 0x197   : > { %v1431_v29 = vlaneseq  ;;  %v1373_v22 = vmax.f32 %v1371_v53, %v1372_v2  ;;  %v1394_v58 = vmax.f32 %v1392_v59, %v1393_v13  ;;  %v1455_v11 = vadd.f32 %v1454_v33, %v1453_v49 }
 0x198   : > { %v1517_v17 = vrot.slane %v1516_v7, 2  ;;  %v1415_v47 = vmax.f32 %v1413_v61, %v1414_v21  ;;  %v1476_v41 = vadd.f32 %v1475_v35, %v1474_v32  ;;  %v1497_v63 = vadd.f32 %v1496_v52, %v1495_v27 }
 0x199   : > { %v1352_v62 = vmax.f32 %v1350_v50, %v1351_v1  ;;  %v1420_v4 = vrot.slane %v1373_v22, 7  ;;  %v1421_v36 = vrot.slane %v1394_v58, 6  ;;  %v1456_v42 = vrot.slane %v1455_v11, 1 }
 0x19a   : > { %v1518_v0 = vadd.f32 %v1517_v17, %v1516_v7  ;;  %v1422_v16 = vrot.slane %v1415_v47, 5  ;;  %v1477_v56 = vrot.slane %v1476_v41, 1  ;;  %v1498_v34 = vrot.slane %v1497_v63, 1 }
 0x19b   : > { %v1424_v51 = vsel %vm1423_vm1, %v1352_v62, %v1420_v4  ;;  %vm1433_vm4 = vcmp.lt.s32.totalorder %v1431_v29, 512  ;;  %v1457_v9 = vadd.f32 %v1456_v42, %v1455_v11 }
 0x19c   : > { %v1519_v3 = vrot.slane %v1518_v0, 1  ;;  %v1426_v24 = vsel %vm1425_vm2, %v1421_v36, %v1422_v16  ;;  %v1478_v18 = vadd.f32 %v1477_v56, %v1476_v41  ;;  %v1499_v39 = vadd.f32 %v1498_v34, %v1497_v63 }
 0x19d   : > { %v1428_v30 = vsel %vm1427_vm3, %v1424_v51, %v1426_v24 }
 0x19e   : > { %v1520_v60 = vadd.f32 %v1519_v3, %v1518_v0  ;;  %v1430_v8 = vmax.f32 %v1331_v12, %v1428_v30  ;;  %v1525_v28 = vrot.slane %v1478_v18, 7  ;;  %v1526_v57 = vrot.slane %v1499_v39, 6 }
 0x1a0   : > { %v1527_v25 = vrot.slane %v1520_v60, 5  ;;  %1435 = vst.msk [vmem:[#allocation2] sm:$0xf] %vm1433_vm4, %v1430_v8  ;;  %v1528_v46 = vsel %vm1423_vm1, %v1457_v9, %v1525_v28 }
 0x1a2   : > { %v1529_v54 = vsel %vm1425_vm2, %v1526_v57, %v1527_v25  ;;  %1537 = sbr.rel (%p4334_p11) target bundleno = 1295 (0x50f), region = 80 }
 0x1a3   : > { %v1530_v23 = vsel %vm1427_vm3, %v1528_v46, %v1529_v54 }
 0x1a4   : > { %v1532_v20 = vadd.f32 %v1530_v23, %v1436_v38 }
 0x1a6   : > { %1533 = vst.msk [vmem:[#allocation3] sm:$0xf] %vm1433_vm4, %v1532_v20 }
 0x1a7   : > { %v2173_v43 = vld [vmem:[#allocation8 + $0x13c0] sm:$0xff]  ;;  %vm4186_vm5 = vcmask 499712  }
 0x1a8   : > { %v2301_v44 = vld [vmem:[#allocation8 + $0x17c0] sm:$0xff]  ;;  %2574 = vmatpush.msra.mxu0 %v2173_v43  ;;  %v2174_v43 = vld [vmem:[#allocation8 + $0x13c8] sm:$0xff] }
 0x1a9   : > { %v2429_v55 = vld [vmem:[#allocation8 + $0x1bc0] sm:$0xff]  ;;  %2594 = vmatpush.msra.mxu1 %v2301_v44  ;;  %v2302_v44 = vld [vmem:[#allocation8 + $0x17c8] sm:$0xff] }
 0x1aa   : > { %v2557_v31 = vld [vmem:[#allocation8 + $0x1fc0] sm:$0xff]  ;;  %2614 = vmatpush.msra.mxu2 %v2429_v55  ;;  %v2430_v55 = vld [vmem:[#allocation8 + $0x1bc8] sm:$0xff] }
 0x1ab   : > { %v2165_v10 = vld [vmem:[#allocation8 + $0x1380] sm:$0xff]  ;;  %2634 = vmatpush.msra.mxu3 %v2557_v31  ;;  %v2558_v31 = vld [vmem:[#allocation8 + $0x1fc8] sm:$0xff] }
 0x1ac   : > { %v2293_v5 = vld [vmem:[#allocation8 + $0x1780] sm:$0xff]  ;;  %2575 = vmatpush.msra.mxu0 %v2165_v10  ;;  %v2166_v10 = vld [vmem:[#allocation8 + $0x1388] sm:$0xff] }
 0x1ad   : > { %v2421_v26 = vld [vmem:[#allocation8 + $0x1b80] sm:$0xff]  ;;  %2595 = vmatpush.msra.mxu1 %v2293_v5  ;;  %v2294_v5 = vld [vmem:[#allocation8 + $0x1788] sm:$0xff] }
 0x1ae   : > { %v2549_v6 = vld [vmem:[#allocation8 + $0x1f80] sm:$0xff]  ;;  %2615 = vmatpush.msra.mxu2 %v2421_v26  ;;  %v2422_v26 = vld [vmem:[#allocation8 + $0x1b88] sm:$0xff] }
 0x1af   : > { %v2157_v15 = vld [vmem:[#allocation8 + $0x1340] sm:$0xff]  ;;  %2635 = vmatpush.msra.mxu3 %v2549_v6  ;;  %v2550_v6 = vld [vmem:[#allocation8 + $0x1f88] sm:$0xff] }
 0x1b0   : > { %v2285_v19 = vld [vmem:[#allocation8 + $0x1740] sm:$0xff]  ;;  %2576 = vmatpush.msra.mxu0 %v2157_v15  ;;  %v2158_v15 = vld [vmem:[#allocation8 + $0x1348] sm:$0xff] }
 0x1b1   : > { %v2413_v14 = vld [vmem:[#allocation8 + $0x1b40] sm:$0xff]  ;;  %2596 = vmatpush.msra.mxu1 %v2285_v19  ;;  %v2286_v19 = vld [vmem:[#allocation8 + $0x1748] sm:$0xff] }
 0x1b2   : > { %v2541_v40 = vld [vmem:[#allocation8 + $0x1f40] sm:$0xff]  ;;  %2616 = vmatpush.msra.mxu2 %v2413_v14  ;;  %v2414_v14 = vld [vmem:[#allocation8 + $0x1b48] sm:$0xff] }
 0x1b3   : > { %v2149_v45 = vld [vmem:[#allocation8 + $0x1300] sm:$0xff]  ;;  %2636 = vmatpush.msra.mxu3 %v2541_v40  ;;  %v2542_v40 = vld [vmem:[#allocation8 + $0x1f48] sm:$0xff] }
 0x1b4   : > { %v2277_v37 = vld [vmem:[#allocation8 + $0x1700] sm:$0xff]  ;;  %2577 = vmatpush.msra.mxu0 %v2149_v45  ;;  %v2150_v45 = vld [vmem:[#allocation8 + $0x1308] sm:$0xff] }
 0x1b5   : > { %v2405_v48 = vld [vmem:[#allocation8 + $0x1b00] sm:$0xff]  ;;  %2597 = vmatpush.msra.mxu1 %v2277_v37  ;;  %v2278_v37 = vld [vmem:[#allocation8 + $0x1708] sm:$0xff] }
 0x1b6   : > { %v2533_v50 = vld [vmem:[#allocation8 + $0x1f00] sm:$0xff]  ;;  %2617 = vmatpush.msra.mxu2 %v2405_v48  ;;  %v2406_v48 = vld [vmem:[#allocation8 + $0x1b08] sm:$0xff] }
 0x1b7   : > { %v2141_v53 = vld [vmem:[#allocation8 + $0x12c0] sm:$0xff]  ;;  %2637 = vmatpush.msra.mxu3 %v2533_v50  ;;  %v2534_v50 = vld [vmem:[#allocation8 + $0x1f08] sm:$0xff] }
 0x1b8   : > { %v2269_v59 = vld [vmem:[#allocation8 + $0x16c0] sm:$0xff]  ;;  %2578 = vmatpush.msra.mxu0 %v2141_v53  ;;  %v2142_v53 = vld [vmem:[#allocation8 + $0x12c8] sm:$0xff] }
 0x1b9   : > { %v2397_v49 = vld [vmem:[#allocation8 + $0x1ac0] sm:$0xff]  ;;  %2598 = vmatpush.msra.mxu1 %v2269_v59  ;;  %v2270_v59 = vld [vmem:[#allocation8 + $0x16c8] sm:$0xff] }
 0x1ba   : > { %v2525_v61 = vld [vmem:[#allocation8 + $0x1ec0] sm:$0xff]  ;;  %2618 = vmatpush.msra.mxu2 %v2397_v49  ;;  %v2398_v49 = vld [vmem:[#allocation8 + $0x1ac8] sm:$0xff] }
 0x1bb   : > { %v2133_v32 = vld [vmem:[#allocation8 + $0x1280] sm:$0xff]  ;;  %2638 = vmatpush.msra.mxu3 %v2525_v61  ;;  %v2526_v61 = vld [vmem:[#allocation8 + $0x1ec8] sm:$0xff] }
 0x1bc   : > { %v2261_v27 = vld [vmem:[#allocation8 + $0x1680] sm:$0xff]  ;;  %2579 = vmatpush.msra.mxu0 %v2133_v32  ;;  %v2134_v32 = vld [vmem:[#allocation8 + $0x1288] sm:$0xff] }
 0x1bd   : > { %v2389_v7 = vld [vmem:[#allocation8 + $0x1a80] sm:$0xff]  ;;  %2599 = vmatpush.msra.mxu1 %v2261_v27  ;;  %v2262_v27 = vld [vmem:[#allocation8 + $0x1688] sm:$0xff] }
 0x1be   : > { %v2517_v1 = vld [vmem:[#allocation8 + $0x1e80] sm:$0xff]  ;;  %2619 = vmatpush.msra.mxu2 %v2389_v7  ;;  %v2390_v7 = vld [vmem:[#allocation8 + $0x1a88] sm:$0xff] }
 0x1bf   : > { %v2125_v2 = vld [vmem:[#allocation8 + $0x1240] sm:$0xff]  ;;  %2639 = vmatpush.msra.mxu3 %v2517_v1  ;;  %v2518_v1 = vld [vmem:[#allocation8 + $0x1e88] sm:$0xff] }
 0x1c0   : > { %v2253_v13 = vld [vmem:[#allocation8 + $0x1640] sm:$0xff]  ;;  %2580 = vmatpush.msra.mxu0 %v2125_v2  ;;  %v2126_v2 = vld [vmem:[#allocation8 + $0x1248] sm:$0xff] }
 0x1c1   : > { %v2381_v33 = vld [vmem:[#allocation8 + $0x1a40] sm:$0xff]  ;;  %2600 = vmatpush.msra.mxu1 %v2253_v13  ;;  %v2254_v13 = vld [vmem:[#allocation8 + $0x1648] sm:$0xff] }
 0x1c2   : > { %v2509_v21 = vld [vmem:[#allocation8 + $0x1e40] sm:$0xff]  ;;  %2620 = vmatpush.msra.mxu2 %v2381_v33  ;;  %v2382_v33 = vld [vmem:[#allocation8 + $0x1a48] sm:$0xff] }
 0x1c3   : > { %v2117_v35 = vld [vmem:[#allocation8 + $0x1200] sm:$0xff]  ;;  %2640 = vmatpush.msra.mxu3 %v2509_v21  ;;  %v2510_v21 = vld [vmem:[#allocation8 + $0x1e48] sm:$0xff] }
 0x1c4   : > { %v2245_v52 = vld [vmem:[#allocation8 + $0x1600] sm:$0xff]  ;;  %2581 = vmatpush.msra.mxu0 %v2117_v35  ;;  %v2118_v35 = vld [vmem:[#allocation8 + $0x1208] sm:$0xff] }
 0x1c5   : > { %v2373_v17 = vld [vmem:[#allocation8 + $0x1a00] sm:$0xff]  ;;  %2601 = vmatpush.msra.mxu1 %v2245_v52  ;;  %v2246_v52 = vld [vmem:[#allocation8 + $0x1608] sm:$0xff] }
 0x1c6   : > { %v2501_v29 = vld [vmem:[#allocation8 + $0x1e00] sm:$0xff]  ;;  %2621 = vmatpush.msra.mxu2 %v2373_v17  ;;  %v2374_v17 = vld [vmem:[#allocation8 + $0x1a08] sm:$0xff] }
 0x1c7   : > { %v2109_v22 = vld [vmem:[#allocation8 + $0x11c0] sm:$0xff]  ;;  %2641 = vmatpush.msra.mxu3 %v2501_v29  ;;  %v2502_v29 = vld [vmem:[#allocation8 + $0x1e08] sm:$0xff] }
 0x1c8   : > { %v2237_v58 = vld [vmem:[#allocation8 + $0x15c0] sm:$0xff]  ;;  %2582 = vmatpush.msra.mxu0 %v2109_v22  ;;  %v2110_v22 = vld [vmem:[#allocation8 + $0x11c8] sm:$0xff] }
 0x1c9   : > { %v2365_v11 = vld [vmem:[#allocation8 + $0x19c0] sm:$0xff]  ;;  %2602 = vmatpush.msra.mxu1 %v2237_v58  ;;  %v2238_v58 = vld [vmem:[#allocation8 + $0x15c8] sm:$0xff] }
 0x1ca   : > { %v2493_v47 = vld [vmem:[#allocation8 + $0x1dc0] sm:$0xff]  ;;  %2622 = vmatpush.msra.mxu2 %v2365_v11  ;;  %v2366_v11 = vld [vmem:[#allocation8 + $0x19c8] sm:$0xff] }
 0x1cb   : > { %v2101_v41 = vld [vmem:[#allocation8 + $0x1180] sm:$0xff]  ;;  %2642 = vmatpush.msra.mxu3 %v2493_v47  ;;  %v2494_v47 = vld [vmem:[#allocation8 + $0x1dc8] sm:$0xff] }
 0x1cc   : > { %v2229_v63 = vld [vmem:[#allocation8 + $0x1580] sm:$0xff]  ;;  %2583 = vmatpush.msra.mxu0 %v2101_v41  ;;  %v2102_v41 = vld [vmem:[#allocation8 + $0x1188] sm:$0xff] }
 0x1cd   : > { %v2357_v0 = vld [vmem:[#allocation8 + $0x1980] sm:$0xff]  ;;  %2603 = vmatpush.msra.mxu1 %v2229_v63  ;;  %v2230_v63 = vld [vmem:[#allocation8 + $0x1588] sm:$0xff] }
 0x1ce   : > { %v2485_v62 = vld [vmem:[#allocation8 + $0x1d80] sm:$0xff]  ;;  %2623 = vmatpush.msra.mxu2 %v2357_v0  ;;  %v2358_v0 = vld [vmem:[#allocation8 + $0x1988] sm:$0xff] }
 0x1cf   : > { %v2093_v4 = vld [vmem:[#allocation8 + $0x1140] sm:$0xff]  ;;  %2643 = vmatpush.msra.mxu3 %v2485_v62  ;;  %v2486_v62 = vld [vmem:[#allocation8 + $0x1d88] sm:$0xff] }
 0x1d0   : > { %v2221_v36 = vld [vmem:[#allocation8 + $0x1540] sm:$0xff]  ;;  %2584 = vmatpush.msra.mxu0 %v2093_v4  ;;  %v2094_v4 = vld [vmem:[#allocation8 + $0x1148] sm:$0xff] }
 0x1d1   : > { %v2349_v42 = vld [vmem:[#allocation8 + $0x1940] sm:$0xff]  ;;  %2604 = vmatpush.msra.mxu1 %v2221_v36  ;;  %v2222_v36 = vld [vmem:[#allocation8 + $0x1548] sm:$0xff] }
 0x1d2   : > { %v2477_v16 = vld [vmem:[#allocation8 + $0x1d40] sm:$0xff]  ;;  %2624 = vmatpush.msra.mxu2 %v2349_v42  ;;  %v2350_v42 = vld [vmem:[#allocation8 + $0x1948] sm:$0xff] }
 0x1d3   : > { %v2085_v56 = vld [vmem:[#allocation8 + $0x1100] sm:$0xff]  ;;  %2644 = vmatpush.msra.mxu3 %v2477_v16  ;;  %v2478_v16 = vld [vmem:[#allocation8 + $0x1d48] sm:$0xff] }
 0x1d4   : > { %v2213_v34 = vld [vmem:[#allocation8 + $0x1500] sm:$0xff]  ;;  %2585 = vmatpush.msra.mxu0 %v2085_v56  ;;  %v2086_v56 = vld [vmem:[#allocation8 + $0x1108] sm:$0xff] }
 0x1d5   : > { %v2341_v3 = vld [vmem:[#allocation8 + $0x1900] sm:$0xff]  ;;  %2605 = vmatpush.msra.mxu1 %v2213_v34  ;;  %v2214_v34 = vld [vmem:[#allocation8 + $0x1508] sm:$0xff] }
 0x1d6   : > { %v2469_v12 = vld [vmem:[#allocation8 + $0x1d00] sm:$0xff]  ;;  %2625 = vmatpush.msra.mxu2 %v2341_v3  ;;  %v1539_v3 = vld [vmem:[#allocation3] sm:$0xf] }
 0x1d7   : > { %v2077_v51 = vld [vmem:[#allocation8 + $0x10c0] sm:$0xff]  ;;  %2645 = vmatpush.msra.mxu3 %v2469_v12  ;;  %v2342_v12 = vld [vmem:[#allocation8 + $0x1908] sm:$0xff] }
 0x1d8   : > { %v2205_v24 = vld [vmem:[#allocation8 + $0x14c0] sm:$0xff]  ;;  %2586 = vmatpush.msra.mxu0 %v2077_v51  ;;  %v2470_v51 = vld [vmem:[#allocation8 + $0x1d08] sm:$0xff] }
 0x1d9   : > { %v2333_v18 = vld [vmem:[#allocation8 + $0x18c0] sm:$0xff]  ;;  %2606 = vmatpush.msra.mxu1 %v2205_v24  ;;  %v2078_v24 = vld [vmem:[#allocation8 + $0x10c8] sm:$0xff] }
 0x1da   : > { %v2461_v39 = vld [vmem:[#allocation8 + $0x1cc0] sm:$0xff]  ;;  %2626 = vmatpush.msra.mxu2 %v2333_v18  ;;  %v2206_v18 = vld [vmem:[#allocation8 + $0x14c8] sm:$0xff] }
 0x1db   : > { %v2069_v60 = vld [vmem:[#allocation8 + $0x1080] sm:$0xff]  ;;  %2646 = vmatpush.msra.mxu3 %v2461_v39  ;;  %v2334_v39 = vld [vmem:[#allocation8 + $0x18c8] sm:$0xff] }
 0x1dc   : > { %v2197_v30 = vld [vmem:[#allocation8 + $0x1480] sm:$0xff]  ;;  %2587 = vmatpush.msra.mxu0 %v2069_v60  ;;  %v2462_v60 = vld [vmem:[#allocation8 + $0x1cc8] sm:$0xff] }
 0x1dd   : > { %v2325_v9 = vld [vmem:[#allocation8 + $0x1880] sm:$0xff]  ;;  %2607 = vmatpush.msra.mxu1 %v2197_v30  ;;  %v1540_v30 = vmul.f32 0.00390625, %v1539_v3  ;;  %v2095_v3 = vld [vmem:[#allocation8 + $0x1150] sm:$0xff] }
 0x1de   : > { %v2453_v8 = vld [vmem:[#allocation8 + $0x1c80] sm:$0xff]  ;;  %2627 = vmatpush.msra.mxu2 %v2325_v9  ;;  %v2070_v9 = vld [vmem:[#allocation8 + $0x1088] sm:$0xff] }
 0x1df   : > { %v2061_v28 = vld [vmem:[#allocation8 + $0x1040] sm:$0xff]  ;;  %2647 = vmatpush.msra.mxu3 %v2453_v8  ;;  %v2198_v8 = vld [vmem:[#allocation8 + $0x1488] sm:$0xff] }
 0x1e0   : > { %v2189_v57 = vld [vmem:[#allocation8 + $0x1440] sm:$0xff]  ;;  %2588 = vmatpush.msra.mxu0 %v2061_v28  ;;  %v2326_v28 = vld [vmem:[#allocation8 + $0x1888] sm:$0xff] }
 0x1e1   : > { %v2317_v25 = vld [vmem:[#allocation8 + $0x1840] sm:$0xff]  ;;  %2608 = vmatpush.msra.mxu1 %v2189_v57  ;;  %v2454_v57 = vld [vmem:[#allocation8 + $0x1c88] sm:$0xff] }
 0x1e2   : > { %v2445_v38 = vld [vmem:[#allocation8 + $0x1c40] sm:$0xff]  ;;  %2628 = vmatpush.msra.mxu2 %v2317_v25  ;;  %v2062_v25 = vld [vmem:[#allocation8 + $0x1048] sm:$0xff] }
 0x1e3   : > { %v2053_v46 = vld [vmem:[#allocation8 + $0x1000] sm:$0xff]  ;;  %2648 = vmatpush.msra.mxu3 %v2445_v38  ;;  %v2190_v38 = vld [vmem:[#allocation8 + $0x1448] sm:$0xff] }
 0x1e4   : > { %v2181_v54 = vld [vmem:[#allocation8 + $0x1400] sm:$0xff]  ;;  %2589 = vmatpush.msra.mxu0 %v2053_v46  ;;  %v2318_v46 = vld [vmem:[#allocation8 + $0x1848] sm:$0xff] }
 0x1e5   : > { %v2309_v23 = vld [vmem:[#allocation8 + $0x1800] sm:$0xff]  ;;  %2609 = vmatpush.msra.mxu1 %v2181_v54  ;;  %v2446_v54 = vld [vmem:[#allocation8 + $0x1c48] sm:$0xff] }
 0x1e6   : > { %v2437_v20 = vld [vmem:[#allocation8 + $0x1c00] sm:$0xff]  ;;  %2629 = vmatpush.msra.mxu2 %v2309_v23  ;;  %2654 = vmatpush.msrb.mxu0 %v2174_v43  ;;  %v6147_v23 = vperm.slane %v1540_v30, 2  ;;  %v2182_v43 = vld [vmem:[#allocation8 + $0x1408] sm:$0xff] }
 0x1e7   : > { %2649 = vmatpush.msra.mxu3 %v2437_v20  ;;  %2674 = vmatpush.msrb.mxu1 %v2302_v44  ;;  %v2054_v20 = vld [vmem:[#allocation8 + $0x1008] sm:$0xff] }
 0x1e8   : > { %2694 = vmatpush.msrb.mxu2 %v2430_v55  ;;  %2655 = vmatpush.msrb.mxu0 %v2166_v10  ;;  %v2310_v44 = vld [vmem:[#allocation8 + $0x1808] sm:$0xff]  ;;  %v6149_v55 = vperm.slane %v1540_v30, 0  ;;  %v6151_v10 = vperm.slane %v1540_v30, 1 }
 0x1e9   : > { %2714 = vmatpush.msrb.mxu3 %v2558_v31  ;;  %2675 = vmatpush.msrb.mxu1 %v2294_v5  ;;  %v2438_v31 = vld [vmem:[#allocation8 + $0x1c08] sm:$0xff]  ;;  %v6153_v5 = vperm.slane %v1540_v30, 3  ;;  %v2471_v30 = vld [vmem:[#allocation8 + $0x1d10] sm:$0xff] }
 0x1ea   : > { %2695 = vmatpush.msrb.mxu2 %v2422_v26  ;;  %2656 = vmatpush.msrb.mxu0 %v2158_v15  ;;  %v2175_v26 = vld [vmem:[#allocation8 + $0x13d0] sm:$0xff] }
 0x1eb   : > { %2715 = vmatpush.msrb.mxu3 %v2550_v6  ;;  %2676 = vmatpush.msrb.mxu1 %v2286_v19  ;;  %v2303_v6 = vld [vmem:[#allocation8 + $0x17d0] sm:$0xff] }
 0x1ec   : > { %2696 = vmatpush.msrb.mxu2 %v2414_v14  ;;  %2657 = vmatpush.msrb.mxu0 %v2150_v45  ;;  %v2431_v15 = vld [vmem:[#allocation8 + $0x1bd0] sm:$0xff] }
 0x1ed   : > { %2716 = vmatpush.msrb.mxu3 %v2542_v40  ;;  %2677 = vmatpush.msrb.mxu1 %v2278_v37  ;;  %v2559_v19 = vld [vmem:[#allocation8 + $0x1fd0] sm:$0xff] }
 0x1ee   : > { %2697 = vmatpush.msrb.mxu2 %v2406_v48  ;;  %2658 = vmatpush.msrb.mxu0 %v2142_v53  ;;  %v2167_v14 = vld [vmem:[#allocation8 + $0x1390] sm:$0xff] }
 0x1ef   : > { %2717 = vmatpush.msrb.mxu3 %v2534_v50  ;;  %2678 = vmatpush.msrb.mxu1 %v2270_v59  ;;  %v2295_v40 = vld [vmem:[#allocation8 + $0x1790] sm:$0xff] }
 0x1f0   : > { %2698 = vmatpush.msrb.mxu2 %v2398_v49  ;;  %2659 = vmatpush.msrb.mxu0 %v2134_v32  ;;  %v2423_v45 = vld [vmem:[#allocation8 + $0x1b90] sm:$0xff] }
 0x1f1   : > { %2718 = vmatpush.msrb.mxu3 %v2526_v61  ;;  %2679 = vmatpush.msrb.mxu1 %v2262_v27  ;;  %v2551_v37 = vld [vmem:[#allocation8 + $0x1f90] sm:$0xff] }
 0x1f2   : > { %2699 = vmatpush.msrb.mxu2 %v2390_v7  ;;  %2660 = vmatpush.msrb.mxu0 %v2126_v2  ;;  %v2159_v48 = vld [vmem:[#allocation8 + $0x1350] sm:$0xff] }
 0x1f3   : > { %2719 = vmatpush.msrb.mxu3 %v2518_v1  ;;  %2680 = vmatpush.msrb.mxu1 %v2254_v13  ;;  %v2287_v50 = vld [vmem:[#allocation8 + $0x1750] sm:$0xff] }
 0x1f4   : > { %2700 = vmatpush.msrb.mxu2 %v2382_v33  ;;  %2661 = vmatpush.msrb.mxu0 %v2118_v35  ;;  %v2415_v53 = vld [vmem:[#allocation8 + $0x1b50] sm:$0xff] }
 0x1f5   : > { %2720 = vmatpush.msrb.mxu3 %v2510_v21  ;;  %2681 = vmatpush.msrb.mxu1 %v2246_v52  ;;  %v2543_v59 = vld [vmem:[#allocation8 + $0x1f50] sm:$0xff] }
 0x1f6   : > { %2701 = vmatpush.msrb.mxu2 %v2374_v17  ;;  %2662 = vmatpush.msrb.mxu0 %v2110_v22  ;;  %v2151_v49 = vld [vmem:[#allocation8 + $0x1310] sm:$0xff] }
 0x1f7   : > { %2721 = vmatpush.msrb.mxu3 %v2502_v29  ;;  %2682 = vmatpush.msrb.mxu1 %v2238_v58  ;;  %v2279_v61 = vld [vmem:[#allocation8 + $0x1710] sm:$0xff] }
 0x1f8   : > { %2702 = vmatpush.msrb.mxu2 %v2366_v11  ;;  %2663 = vmatpush.msrb.mxu0 %v2102_v41  ;;  %v2407_v32 = vld [vmem:[#allocation8 + $0x1b10] sm:$0xff] }
 0x1f9   : > { %2722 = vmatpush.msrb.mxu3 %v2494_v47  ;;  %2683 = vmatpush.msrb.mxu1 %v2230_v63  ;;  %v2535_v27 = vld [vmem:[#allocation8 + $0x1f10] sm:$0xff] }
 0x1fa   : > { %2703 = vmatpush.msrb.mxu2 %v2358_v0  ;;  %2664 = vmatpush.msrb.mxu0 %v2094_v4  ;;  %v2143_v7 = vld [vmem:[#allocation8 + $0x12d0] sm:$0xff] }
 0x1fb   : > { %2723 = vmatpush.msrb.mxu3 %v2486_v62  ;;  %2684 = vmatpush.msrb.mxu1 %v2222_v36  ;;  %v2271_v1 = vld [vmem:[#allocation8 + $0x16d0] sm:$0xff] }
 0x1fc   : > { %2704 = vmatpush.msrb.mxu2 %v2350_v42  ;;  %2665 = vmatpush.msrb.mxu0 %v2086_v56  ;;  %v2399_v2 = vld [vmem:[#allocation8 + $0x1ad0] sm:$0xff] }
 0x1fd   : > { %2724 = vmatpush.msrb.mxu3 %v2478_v16  ;;  %2685 = vmatpush.msrb.mxu1 %v2214_v34  ;;  %v2527_v13 = vld [vmem:[#allocation8 + $0x1ed0] sm:$0xff] }
 0x1fe   : > { %2705 = vmatpush.msrb.mxu2 %v2342_v12  ;;  %2666 = vmatpush.msrb.mxu0 %v2078_v24  ;;  %v2135_v33 = vld [vmem:[#allocation8 + $0x1290] sm:$0xff] }
 0x1ff   : > { %2725 = vmatpush.msrb.mxu3 %v2470_v51  ;;  %2686 = vmatpush.msrb.mxu1 %v2206_v18  ;;  %v2263_v21 = vld [vmem:[#allocation8 + $0x1690] sm:$0xff] }
 0x200   : > { %2706 = vmatpush.msrb.mxu2 %v2334_v39  ;;  %2667 = vmatpush.msrb.mxu0 %v2070_v9  ;;  %v2391_v35 = vld [vmem:[#allocation8 + $0x1a90] sm:$0xff] }
 0x201   : > { %2726 = vmatpush.msrb.mxu3 %v2462_v60  ;;  %2687 = vmatpush.msrb.mxu1 %v2198_v8  ;;  %v2519_v52 = vld [vmem:[#allocation8 + $0x1e90] sm:$0xff] }
 0x202   : > { %2707 = vmatpush.msrb.mxu2 %v2326_v28  ;;  %2668 = vmatpush.msrb.mxu0 %v2062_v25  ;;  %v2127_v17 = vld [vmem:[#allocation8 + $0x1250] sm:$0xff] }
 0x203   : > { %2727 = vmatpush.msrb.mxu3 %v2454_v57  ;;  %2688 = vmatpush.msrb.mxu1 %v2190_v38  ;;  %v2255_v29 = vld [vmem:[#allocation8 + $0x1650] sm:$0xff] }
 0x204   : > { %2708 = vmatpush.msrb.mxu2 %v2318_v46  ;;  %2669 = vmatpush.msrb.mxu0 %v2054_v20  ;;  %v2383_v22 = vld [vmem:[#allocation8 + $0x1a50] sm:$0xff] }
 0x205   : > { %2728 = vmatpush.msrb.mxu3 %v2446_v54  ;;  %2630 = vmatmul.f32.vlgmr.msra.gmra.mxu2 %v6147_v23  ;;  %v2511_v58 = vld [vmem:[#allocation8 + $0x1e50] sm:$0xff] }
 0x206   : > { %2689 = vmatpush.msrb.mxu1 %v2182_v43  ;;  %2709 = vmatpush.msrb.mxu2 %v2310_v44  ;;  %v2119_v11 = vld [vmem:[#allocation8 + $0x1210] sm:$0xff] }
 0x207   : > { %2729 = vmatpush.msrb.mxu3 %v2438_v31  ;;  %2590 = vmatmul.f32.vlgmr.msra.gmra.mxu0 %v6149_v55  ;;  %v2247_v47 = vld [vmem:[#allocation8 + $0x1610] sm:$0xff] }
 0x208   : > { %2610 = vmatmul.f32.vlgmr.msra.gmra.mxu1 %v6151_v10  ;;  %2650 = vmatmul.f32.vlgmr.msra.gmra.mxu3 %v6153_v5  ;;  %v2375_v41 = vld [vmem:[#allocation8 + $0x1a10] sm:$0xff] }
 0x209   : > { %2734 = vmatpush.msra.mxu0 %v2175_v26  ;;  %2754 = vmatpush.msra.mxu1 %v2303_v6  ;;  %v2503_v63 = vld [vmem:[#allocation8 + $0x1e10] sm:$0xff] }
 0x20a   : > { %2774 = vmatpush.msra.mxu2 %v2431_v15  ;;  %2794 = vmatpush.msra.mxu3 %v2559_v19  ;;  %v2111_v0 = vld [vmem:[#allocation8 + $0x11d0] sm:$0xff] }
 0x20b   : > { %2735 = vmatpush.msra.mxu0 %v2167_v14  ;;  %2755 = vmatpush.msra.mxu1 %v2295_v40  ;;  %v2239_v62 = vld [vmem:[#allocation8 + $0x15d0] sm:$0xff]  ;;  %v2176_v14 = vld [vmem:[#allocation8 + $0x13d8] sm:$0xff] }
 0x20c   : > { %2775 = vmatpush.msra.mxu2 %v2423_v45  ;;  %2795 = vmatpush.msra.mxu3 %v2551_v37  ;;  %v2367_v4 = vld [vmem:[#allocation8 + $0x19d0] sm:$0xff]  ;;  %v2304_v40 = vld [vmem:[#allocation8 + $0x17d8] sm:$0xff] }
 0x20d   : > { %2736 = vmatpush.msra.mxu0 %v2159_v48  ;;  %2756 = vmatpush.msra.mxu1 %v2287_v50  ;;  %v2495_v36 = vld [vmem:[#allocation8 + $0x1dd0] sm:$0xff]  ;;  %v2432_v45 = vld [vmem:[#allocation8 + $0x1bd8] sm:$0xff] }
 0x20e   : > { %2776 = vmatpush.msra.mxu2 %v2415_v53  ;;  %2796 = vmatpush.msra.mxu3 %v2543_v59  ;;  %v2103_v42 = vld [vmem:[#allocation8 + $0x1190] sm:$0xff]  ;;  %v2560_v37 = vld [vmem:[#allocation8 + $0x1fd8] sm:$0xff] }
 0x20f   : > { %2737 = vmatpush.msra.mxu0 %v2151_v49  ;;  %2757 = vmatpush.msra.mxu1 %v2279_v61  ;;  %v2231_v16 = vld [vmem:[#allocation8 + $0x1590] sm:$0xff]  ;;  %v2168_v48 = vld [vmem:[#allocation8 + $0x1398] sm:$0xff] }
 0x210   : > { %2777 = vmatpush.msra.mxu2 %v2407_v32  ;;  %2797 = vmatpush.msra.mxu3 %v2535_v27  ;;  %v2359_v56 = vld [vmem:[#allocation8 + $0x1990] sm:$0xff]  ;;  %v2296_v50 = vld [vmem:[#allocation8 + $0x1798] sm:$0xff] }
 0x211   : > { %2738 = vmatpush.msra.mxu0 %v2143_v7  ;;  %2758 = vmatpush.msra.mxu1 %v2271_v1  ;;  %v2487_v34 = vld [vmem:[#allocation8 + $0x1d90] sm:$0xff]  ;;  %v2424_v53 = vld [vmem:[#allocation8 + $0x1b98] sm:$0xff] }
 0x212   : > { %2778 = vmatpush.msra.mxu2 %v2399_v2  ;;  %2798 = vmatpush.msra.mxu3 %v2527_v13  ;;  %v2223_v12 = vld [vmem:[#allocation8 + $0x1550] sm:$0xff]  ;;  %v2552_v59 = vld [vmem:[#allocation8 + $0x1f98] sm:$0xff] }
 0x213   : > { %2739 = vmatpush.msra.mxu0 %v2135_v33  ;;  %2759 = vmatpush.msra.mxu1 %v2263_v21  ;;  %v2351_v51 = vld [vmem:[#allocation8 + $0x1950] sm:$0xff]  ;;  %v2160_v49 = vld [vmem:[#allocation8 + $0x1358] sm:$0xff] }
 0x214   : > { %2779 = vmatpush.msra.mxu2 %v2391_v35  ;;  %2799 = vmatpush.msra.mxu3 %v2519_v52  ;;  %v2479_v24 = vld [vmem:[#allocation8 + $0x1d50] sm:$0xff]  ;;  %v2288_v61 = vld [vmem:[#allocation8 + $0x1758] sm:$0xff] }
 0x215   : > { %2740 = vmatpush.msra.mxu0 %v2127_v17  ;;  %2760 = vmatpush.msra.mxu1 %v2255_v29  ;;  %v2087_v18 = vld [vmem:[#allocation8 + $0x1110] sm:$0xff]  ;;  %v2416_v32 = vld [vmem:[#allocation8 + $0x1b58] sm:$0xff] }
 0x216   : > { %2780 = vmatpush.msra.mxu2 %v2383_v22  ;;  %2800 = vmatpush.msra.mxu3 %v2511_v58  ;;  %v2215_v39 = vld [vmem:[#allocation8 + $0x1510] sm:$0xff]  ;;  %v2544_v27 = vld [vmem:[#allocation8 + $0x1f58] sm:$0xff] }
 0x217   : > { %2741 = vmatpush.msra.mxu0 %v2119_v11  ;;  %2761 = vmatpush.msra.mxu1 %v2247_v47  ;;  %v2343_v60 = vld [vmem:[#allocation8 + $0x1910] sm:$0xff]  ;;  %v2152_v7 = vld [vmem:[#allocation8 + $0x1318] sm:$0xff] }
 0x218   : > { %2781 = vmatpush.msra.mxu2 %v2375_v41  ;;  %2801 = vmatpush.msra.mxu3 %v2503_v63  ;;  %v2079_v9 = vld [vmem:[#allocation8 + $0x10d0] sm:$0xff]  ;;  %v2280_v1 = vld [vmem:[#allocation8 + $0x1718] sm:$0xff] }
 0x219   : > { %2742 = vmatpush.msra.mxu0 %v2111_v0  ;;  %2762 = vmatpush.msra.mxu1 %v2239_v62  ;;  %v2207_v8 = vld [vmem:[#allocation8 + $0x14d0] sm:$0xff]  ;;  %v2408_v2 = vld [vmem:[#allocation8 + $0x1b18] sm:$0xff] }
 0x21a   : > { %2782 = vmatpush.msra.mxu2 %v2367_v4  ;;  %2802 = vmatpush.msra.mxu3 %v2495_v36  ;;  %v2335_v28 = vld [vmem:[#allocation8 + $0x18d0] sm:$0xff]  ;;  %v2536_v13 = vld [vmem:[#allocation8 + $0x1f18] sm:$0xff] }
 0x21b   : > { %2743 = vmatpush.msra.mxu0 %v2103_v42  ;;  %2763 = vmatpush.msra.mxu1 %v2231_v16  ;;  %v2463_v57 = vld [vmem:[#allocation8 + $0x1cd0] sm:$0xff]  ;;  %v2144_v33 = vld [vmem:[#allocation8 + $0x12d8] sm:$0xff] }
 0x21c   : > { %2783 = vmatpush.msra.mxu2 %v2359_v56  ;;  %2803 = vmatpush.msra.mxu3 %v2487_v34  ;;  %v2071_v25 = vld [vmem:[#allocation8 + $0x1090] sm:$0xff]  ;;  %v2272_v21 = vld [vmem:[#allocation8 + $0x16d8] sm:$0xff] }
 0x21d   : > { %2744 = vmatpush.msra.mxu0 %v2095_v3  ;;  %2764 = vmatpush.msra.mxu1 %v2223_v12  ;;  %v2199_v38 = vld [vmem:[#allocation8 + $0x1490] sm:$0xff]  ;;  %v2400_v35 = vld [vmem:[#allocation8 + $0x1ad8] sm:$0xff] }
 0x21e   : > { %2784 = vmatpush.msra.mxu2 %v2351_v51  ;;  %2804 = vmatpush.msra.mxu3 %v2479_v24  ;;  %v2327_v46 = vld [vmem:[#allocation8 + $0x1890] sm:$0xff]  ;;  %v2528_v52 = vld [vmem:[#allocation8 + $0x1ed8] sm:$0xff] }
 0x21f   : > { %2745 = vmatpush.msra.mxu0 %v2087_v18  ;;  %2765 = vmatpush.msra.mxu1 %v2215_v39  ;;  %v2455_v54 = vld [vmem:[#allocation8 + $0x1c90] sm:$0xff]  ;;  %v2136_v17 = vld [vmem:[#allocation8 + $0x1298] sm:$0xff] }
 0x220   : > { %2785 = vmatpush.msra.mxu2 %v2343_v60  ;;  %2805 = vmatpush.msra.mxu3 %v2471_v30  ;;  %v2063_v20 = vld [vmem:[#allocation8 + $0x1050] sm:$0xff]  ;;  %v2264_v29 = vld [vmem:[#allocation8 + $0x1698] sm:$0xff] }
 0x221   : > { %2746 = vmatpush.msra.mxu0 %v2079_v9  ;;  %2766 = vmatpush.msra.mxu1 %v2207_v8  ;;  %v2191_v43 = vld [vmem:[#allocation8 + $0x1450] sm:$0xff]  ;;  %v2392_v22 = vld [vmem:[#allocation8 + $0x1a98] sm:$0xff] }
 0x222   : > { %2786 = vmatpush.msra.mxu2 %v2335_v28  ;;  %2806 = vmatpush.msra.mxu3 %v2463_v57  ;;  %v2319_v44 = vld [vmem:[#allocation8 + $0x1850] sm:$0xff]  ;;  %v2520_v58 = vld [vmem:[#allocation8 + $0x1e98] sm:$0xff] }
 0x223   : > { %2747 = vmatpush.msra.mxu0 %v2071_v25  ;;  %2767 = vmatpush.msra.mxu1 %v2199_v38  ;;  %v2447_v31 = vld [vmem:[#allocation8 + $0x1c50] sm:$0xff]  ;;  %v2128_v11 = vld [vmem:[#allocation8 + $0x1258] sm:$0xff] }
 0x224   : > { %2787 = vmatpush.msra.mxu2 %v2327_v46  ;;  %2807 = vmatpush.msra.mxu3 %v2455_v54  ;;  %v2055_v26 = vld [vmem:[#allocation8 + $0x1010] sm:$0xff]  ;;  %v2256_v47 = vld [vmem:[#allocation8 + $0x1658] sm:$0xff] }
 0x225   : > { %2748 = vmatpush.msra.mxu0 %v2063_v20  ;;  %2768 = vmatpush.msra.mxu1 %v2191_v43  ;;  %v2183_v6 = vld [vmem:[#allocation8 + $0x1410] sm:$0xff]  ;;  %v2384_v41 = vld [vmem:[#allocation8 + $0x1a58] sm:$0xff] }
 0x226   : > { %v2311_v15 = vld [vmem:[#allocation8 + $0x1810] sm:$0xff]  ;;  %2788 = vmatpush.msra.mxu2 %v2319_v44  ;;  %2808 = vmatpush.msra.mxu3 %v2447_v31  ;;  %v2512_v63 = vld [vmem:[#allocation8 + $0x1e58] sm:$0xff] }
 0x227   : > { %v2439_v19 = vld [vmem:[#allocation8 + $0x1c10] sm:$0xff]  ;;  %2710 = vmatmul.f32.vlgmr.msrb.gmra.mxu2 %v6147_v23  ;;  %2749 = vmatpush.msra.mxu0 %v2055_v26  ;;  %v2120_v0 = vld [vmem:[#allocation8 + $0x1218] sm:$0xff] }
 0x228   : > { %2769 = vmatpush.msra.mxu1 %v2183_v6  ;;  %2789 = vmatpush.msra.mxu2 %v2311_v15  ;;  %v2248_v62 = vld [vmem:[#allocation8 + $0x1618] sm:$0xff] }
 0x229   : > { %2809 = vmatpush.msra.mxu3 %v2439_v19  ;;  %2670 = vmatmul.f32.vlgmr.msrb.gmra.mxu0 %v6149_v55  ;;  %v2376_v4 = vld [vmem:[#allocation8 + $0x1a18] sm:$0xff] }
 0x22a   : > { %2690 = vmatmul.f32.vlgmr.msrb.gmra.mxu1 %v6151_v10  ;;  %2730 = vmatmul.f32.vlgmr.msrb.gmra.mxu3 %v6153_v5  ;;  %v2504_v36 = vld [vmem:[#allocation8 + $0x1e18] sm:$0xff] }
 0x22b   : > { %2814 = vmatpush.msrb.mxu0 %v2176_v14  ;;  %2834 = vmatpush.msrb.mxu1 %v2304_v40  ;;  %v2112_v42 = vld [vmem:[#allocation8 + $0x11d8] sm:$0xff] }
 0x22c   : > { %2854 = vmatpush.msrb.mxu2 %v2432_v45  ;;  %2874 = vmatpush.msrb.mxu3 %v2560_v37  ;;  %v2240_v16 = vld [vmem:[#allocation8 + $0x15d8] sm:$0xff] }
 0x22d   : > { %2815 = vmatpush.msrb.mxu0 %v2168_v48  ;;  %2835 = vmatpush.msrb.mxu1 %v2296_v50  ;;  %v2368_v56 = vld [vmem:[#allocation8 + $0x19d8] sm:$0xff]  ;;  %v2177_v48 = vld [vmem:[#allocation8 + $0x13e0] sm:$0xff] }
 0x22e   : > { %2855 = vmatpush.msrb.mxu2 %v2424_v53  ;;  %2875 = vmatpush.msrb.mxu3 %v2552_v59  ;;  %v2496_v34 = vld [vmem:[#allocation8 + $0x1dd8] sm:$0xff]  ;;  %v2305_v50 = vld [vmem:[#allocation8 + $0x17e0] sm:$0xff] }
 0x22f   : > { %2816 = vmatpush.msrb.mxu0 %v2160_v49  ;;  %2836 = vmatpush.msrb.mxu1 %v2288_v61  ;;  %v2104_v3 = vld [vmem:[#allocation8 + $0x1198] sm:$0xff]  ;;  %v2433_v53 = vld [vmem:[#allocation8 + $0x1be0] sm:$0xff] }
 0x230   : > { %2856 = vmatpush.msrb.mxu2 %v2416_v32  ;;  %2876 = vmatpush.msrb.mxu3 %v2544_v27  ;;  %v2232_v12 = vld [vmem:[#allocation8 + $0x1598] sm:$0xff]  ;;  %v2561_v59 = vld [vmem:[#allocation8 + $0x1fe0] sm:$0xff] }
 0x231   : > { %2817 = vmatpush.msrb.mxu0 %v2152_v7  ;;  %2837 = vmatpush.msrb.mxu1 %v2280_v1  ;;  %v2360_v51 = vld [vmem:[#allocation8 + $0x1998] sm:$0xff]  ;;  %v2169_v49 = vld [vmem:[#allocation8 + $0x13a0] sm:$0xff] }
 0x232   : > { %2857 = vmatpush.msrb.mxu2 %v2408_v2  ;;  %2877 = vmatpush.msrb.mxu3 %v2536_v13  ;;  %v2488_v24 = vld [vmem:[#allocation8 + $0x1d98] sm:$0xff]  ;;  %v2297_v61 = vld [vmem:[#allocation8 + $0x17a0] sm:$0xff] }
 0x233   : > { %2818 = vmatpush.msrb.mxu0 %v2144_v33  ;;  %2838 = vmatpush.msrb.mxu1 %v2272_v21  ;;  %v2096_v18 = vld [vmem:[#allocation8 + $0x1158] sm:$0xff]  ;;  %v2425_v32 = vld [vmem:[#allocation8 + $0x1ba0] sm:$0xff] }
 0x234   : > { %2858 = vmatpush.msrb.mxu2 %v2400_v35  ;;  %2878 = vmatpush.msrb.mxu3 %v2528_v52  ;;  %v2224_v39 = vld [vmem:[#allocation8 + $0x1558] sm:$0xff]  ;;  %v2553_v27 = vld [vmem:[#allocation8 + $0x1fa0] sm:$0xff] }
 0x235   : > { %2819 = vmatpush.msrb.mxu0 %v2136_v17  ;;  %2839 = vmatpush.msrb.mxu1 %v2264_v29  ;;  %v2352_v60 = vld [vmem:[#allocation8 + $0x1958] sm:$0xff]  ;;  %v2161_v7 = vld [vmem:[#allocation8 + $0x1360] sm:$0xff] }
 0x236   : > { %2859 = vmatpush.msrb.mxu2 %v2392_v22  ;;  %2879 = vmatpush.msrb.mxu3 %v2520_v58  ;;  %v2480_v30 = vld [vmem:[#allocation8 + $0x1d58] sm:$0xff]  ;;  %v2289_v1 = vld [vmem:[#allocation8 + $0x1760] sm:$0xff] }
 0x237   : > { %2820 = vmatpush.msrb.mxu0 %v2128_v11  ;;  %2840 = vmatpush.msrb.mxu1 %v2256_v47  ;;  %v2088_v9 = vld [vmem:[#allocation8 + $0x1118] sm:$0xff]  ;;  %v2417_v2 = vld [vmem:[#allocation8 + $0x1b60] sm:$0xff] }
 0x238   : > { %2860 = vmatpush.msrb.mxu2 %v2384_v41  ;;  %2880 = vmatpush.msrb.mxu3 %v2512_v63  ;;  %v2216_v8 = vld [vmem:[#allocation8 + $0x1518] sm:$0xff]  ;;  %v2545_v13 = vld [vmem:[#allocation8 + $0x1f60] sm:$0xff] }
 0x239   : > { %2821 = vmatpush.msrb.mxu0 %v2120_v0  ;;  %2841 = vmatpush.msrb.mxu1 %v2248_v62  ;;  %v2344_v28 = vld [vmem:[#allocation8 + $0x1918] sm:$0xff]  ;;  %v2153_v33 = vld [vmem:[#allocation8 + $0x1320] sm:$0xff] }
 0x23a   : > { %2861 = vmatpush.msrb.mxu2 %v2376_v4  ;;  %2881 = vmatpush.msrb.mxu3 %v2504_v36  ;;  %v2472_v57 = vld [vmem:[#allocation8 + $0x1d18] sm:$0xff]  ;;  %v2281_v21 = vld [vmem:[#allocation8 + $0x1720] sm:$0xff] }
 0x23b   : > { %2822 = vmatpush.msrb.mxu0 %v2112_v42  ;;  %2842 = vmatpush.msrb.mxu1 %v2240_v16  ;;  %v2080_v25 = vld [vmem:[#allocation8 + $0x10d8] sm:$0xff]  ;;  %v2409_v35 = vld [vmem:[#allocation8 + $0x1b20] sm:$0xff] }
 0x23c   : > { %2862 = vmatpush.msrb.mxu2 %v2368_v56  ;;  %2882 = vmatpush.msrb.mxu3 %v2496_v34  ;;  %v2208_v38 = vld [vmem:[#allocation8 + $0x14d8] sm:$0xff]  ;;  %v2537_v52 = vld [vmem:[#allocation8 + $0x1f20] sm:$0xff] }
 0x23d   : > { %2823 = vmatpush.msrb.mxu0 %v2104_v3  ;;  %2843 = vmatpush.msrb.mxu1 %v2232_v12  ;;  %v2336_v46 = vld [vmem:[#allocation8 + $0x18d8] sm:$0xff]  ;;  %v2145_v17 = vld [vmem:[#allocation8 + $0x12e0] sm:$0xff] }
 0x23e   : > { %2863 = vmatpush.msrb.mxu2 %v2360_v51  ;;  %2883 = vmatpush.msrb.mxu3 %v2488_v24  ;;  %v2464_v54 = vld [vmem:[#allocation8 + $0x1cd8] sm:$0xff]  ;;  %v2273_v29 = vld [vmem:[#allocation8 + $0x16e0] sm:$0xff] }
 0x23f   : > { %2824 = vmatpush.msrb.mxu0 %v2096_v18  ;;  %2844 = vmatpush.msrb.mxu1 %v2224_v39  ;;  %v2072_v20 = vld [vmem:[#allocation8 + $0x1098] sm:$0xff]  ;;  %v2401_v22 = vld [vmem:[#allocation8 + $0x1ae0] sm:$0xff] }
 0x240   : > { %2864 = vmatpush.msrb.mxu2 %v2352_v60  ;;  %2884 = vmatpush.msrb.mxu3 %v2480_v30  ;;  %v2200_v43 = vld [vmem:[#allocation8 + $0x1498] sm:$0xff]  ;;  %v2529_v58 = vld [vmem:[#allocation8 + $0x1ee0] sm:$0xff] }
 0x241   : > { %2825 = vmatpush.msrb.mxu0 %v2088_v9  ;;  %2845 = vmatpush.msrb.mxu1 %v2216_v8  ;;  %v2328_v44 = vld [vmem:[#allocation8 + $0x1898] sm:$0xff]  ;;  %v2137_v11 = vld [vmem:[#allocation8 + $0x12a0] sm:$0xff] }
 0x242   : > { %2865 = vmatpush.msrb.mxu2 %v2344_v28  ;;  %2885 = vmatpush.msrb.mxu3 %v2472_v57  ;;  %v2456_v31 = vld [vmem:[#allocation8 + $0x1c98] sm:$0xff]  ;;  %v2265_v47 = vld [vmem:[#allocation8 + $0x16a0] sm:$0xff] }
 0x243   : > { %2826 = vmatpush.msrb.mxu0 %v2080_v25  ;;  %2846 = vmatpush.msrb.mxu1 %v2208_v38  ;;  %v2064_v26 = vld [vmem:[#allocation8 + $0x1058] sm:$0xff]  ;;  %v2393_v41 = vld [vmem:[#allocation8 + $0x1aa0] sm:$0xff] }
 0x244   : > { %2866 = vmatpush.msrb.mxu2 %v2336_v46  ;;  %2886 = vmatpush.msrb.mxu3 %v2464_v54  ;;  %v2192_v6 = vld [vmem:[#allocation8 + $0x1458] sm:$0xff]  ;;  %v2521_v63 = vld [vmem:[#allocation8 + $0x1ea0] sm:$0xff] }
 0x245   : > { %2827 = vmatpush.msrb.mxu0 %v2072_v20  ;;  %2847 = vmatpush.msrb.mxu1 %v2200_v43  ;;  %v2320_v15 = vld [vmem:[#allocation8 + $0x1858] sm:$0xff]  ;;  %v2129_v0 = vld [vmem:[#allocation8 + $0x1260] sm:$0xff] }
 0x246   : > { %v2448_v19 = vld [vmem:[#allocation8 + $0x1c58] sm:$0xff]  ;;  %2867 = vmatpush.msrb.mxu2 %v2328_v44  ;;  %2887 = vmatpush.msrb.mxu3 %v2456_v31  ;;  %v2257_v62 = vld [vmem:[#allocation8 + $0x1660] sm:$0xff] }
 0x247   : > { %v2056_v14 = vld [vmem:[#allocation8 + $0x1018] sm:$0xff]  ;;  %2828 = vmatpush.msrb.mxu0 %v2064_v26  ;;  %2848 = vmatpush.msrb.mxu1 %v2192_v6  ;;  %v2385_v4 = vld [vmem:[#allocation8 + $0x1a60] sm:$0xff] }
 0x248   : > { %v2184_v40 = vld [vmem:[#allocation8 + $0x1418] sm:$0xff]  ;;  %2868 = vmatpush.msrb.mxu2 %v2320_v15  ;;  %2888 = vmatpush.msrb.mxu3 %v2448_v19  ;;  %v2513_v36 = vld [vmem:[#allocation8 + $0x1e60] sm:$0xff] }
 0x249   : > { %v2312_v45 = vld [vmem:[#allocation8 + $0x1818] sm:$0xff]  ;;  %2790 = vmatmul.f32.vlgmr.msra.gmra.mxu2 %v6147_v23  ;;  %2829 = vmatpush.msrb.mxu0 %v2056_v14  ;;  %v2121_v42 = vld [vmem:[#allocation8 + $0x1220] sm:$0xff] }
 0x24a   : > { %v2440_v37 = vld [vmem:[#allocation8 + $0x1c18] sm:$0xff]  ;;  %2849 = vmatpush.msrb.mxu1 %v2184_v40  ;;  %2869 = vmatpush.msrb.mxu2 %v2312_v45  ;;  %v2249_v16 = vld [vmem:[#allocation8 + $0x1620] sm:$0xff] }
 0x24b   : > { %2889 = vmatpush.msrb.mxu3 %v2440_v37  ;;  %2750 = vmatmul.f32.vlgmr.msra.gmra.mxu0 %v6149_v55  ;;  %v2377_v56 = vld [vmem:[#allocation8 + $0x1a20] sm:$0xff] }
 0x24c   : > { %2770 = vmatmul.f32.vlgmr.msra.gmra.mxu1 %v6151_v10  ;;  %2810 = vmatmul.f32.vlgmr.msra.gmra.mxu3 %v6153_v5  ;;  %v2505_v34 = vld [vmem:[#allocation8 + $0x1e20] sm:$0xff] }
 0x24d   : > { %2894 = vmatpush.msra.mxu0 %v2177_v48  ;;  %2914 = vmatpush.msra.mxu1 %v2305_v50  ;;  %v2113_v3 = vld [vmem:[#allocation8 + $0x11e0] sm:$0xff] }
 0x24e   : > { %2934 = vmatpush.msra.mxu2 %v2433_v53  ;;  %2954 = vmatpush.msra.mxu3 %v2561_v59  ;;  %v2241_v12 = vld [vmem:[#allocation8 + $0x15e0] sm:$0xff] }
 0x24f   : > { %2895 = vmatpush.msra.mxu0 %v2169_v49  ;;  %2915 = vmatpush.msra.mxu1 %v2297_v61  ;;  %v2369_v51 = vld [vmem:[#allocation8 + $0x19e0] sm:$0xff]  ;;  %v2178_v49 = vld [vmem:[#allocation8 + $0x13e8] sm:$0xff] }
 0x250   : > { %2935 = vmatpush.msra.mxu2 %v2425_v32  ;;  %2955 = vmatpush.msra.mxu3 %v2553_v27  ;;  %v2497_v24 = vld [vmem:[#allocation8 + $0x1de0] sm:$0xff]  ;;  %v2306_v61 = vld [vmem:[#allocation8 + $0x17e8] sm:$0xff] }
 0x251   : > { %2896 = vmatpush.msra.mxu0 %v2161_v7  ;;  %2916 = vmatpush.msra.mxu1 %v2289_v1  ;;  %v2105_v18 = vld [vmem:[#allocation8 + $0x11a0] sm:$0xff]  ;;  %v2434_v32 = vld [vmem:[#allocation8 + $0x1be8] sm:$0xff] }
 0x252   : > { %2936 = vmatpush.msra.mxu2 %v2417_v2  ;;  %2956 = vmatpush.msra.mxu3 %v2545_v13  ;;  %v2233_v39 = vld [vmem:[#allocation8 + $0x15a0] sm:$0xff]  ;;  %v2562_v27 = vld [vmem:[#allocation8 + $0x1fe8] sm:$0xff] }
 0x253   : > { %2897 = vmatpush.msra.mxu0 %v2153_v33  ;;  %2917 = vmatpush.msra.mxu1 %v2281_v21  ;;  %v2361_v60 = vld [vmem:[#allocation8 + $0x19a0] sm:$0xff]  ;;  %v2170_v7 = vld [vmem:[#allocation8 + $0x13a8] sm:$0xff] }
 0x254   : > { %2937 = vmatpush.msra.mxu2 %v2409_v35  ;;  %2957 = vmatpush.msra.mxu3 %v2537_v52  ;;  %v2489_v30 = vld [vmem:[#allocation8 + $0x1da0] sm:$0xff]  ;;  %v2298_v1 = vld [vmem:[#allocation8 + $0x17a8] sm:$0xff] }
 0x255   : > { %2898 = vmatpush.msra.mxu0 %v2145_v17  ;;  %2918 = vmatpush.msra.mxu1 %v2273_v29  ;;  %v2097_v9 = vld [vmem:[#allocation8 + $0x1160] sm:$0xff]  ;;  %v2426_v2 = vld [vmem:[#allocation8 + $0x1ba8] sm:$0xff] }
 0x256   : > { %2938 = vmatpush.msra.mxu2 %v2401_v22  ;;  %2958 = vmatpush.msra.mxu3 %v2529_v58  ;;  %v2225_v8 = vld [vmem:[#allocation8 + $0x1560] sm:$0xff]  ;;  %v2554_v13 = vld [vmem:[#allocation8 + $0x1fa8] sm:$0xff] }
 0x257   : > { %2899 = vmatpush.msra.mxu0 %v2137_v11  ;;  %2919 = vmatpush.msra.mxu1 %v2265_v47  ;;  %v2353_v28 = vld [vmem:[#allocation8 + $0x1960] sm:$0xff]  ;;  %v2162_v33 = vld [vmem:[#allocation8 + $0x1368] sm:$0xff] }
 0x258   : > { %2939 = vmatpush.msra.mxu2 %v2393_v41  ;;  %2959 = vmatpush.msra.mxu3 %v2521_v63  ;;  %v2481_v57 = vld [vmem:[#allocation8 + $0x1d60] sm:$0xff]  ;;  %v2290_v21 = vld [vmem:[#allocation8 + $0x1768] sm:$0xff] }
 0x259   : > { %2900 = vmatpush.msra.mxu0 %v2129_v0  ;;  %2920 = vmatpush.msra.mxu1 %v2257_v62  ;;  %v2089_v25 = vld [vmem:[#allocation8 + $0x1120] sm:$0xff]  ;;  %v2418_v35 = vld [vmem:[#allocation8 + $0x1b68] sm:$0xff] }
 0x25a   : > { %2940 = vmatpush.msra.mxu2 %v2385_v4  ;;  %2960 = vmatpush.msra.mxu3 %v2513_v36  ;;  %v2217_v38 = vld [vmem:[#allocation8 + $0x1520] sm:$0xff]  ;;  %v2546_v52 = vld [vmem:[#allocation8 + $0x1f68] sm:$0xff] }
 0x25b   : > { %2901 = vmatpush.msra.mxu0 %v2121_v42  ;;  %2921 = vmatpush.msra.mxu1 %v2249_v16  ;;  %v2345_v46 = vld [vmem:[#allocation8 + $0x1920] sm:$0xff]  ;;  %v2154_v17 = vld [vmem:[#allocation8 + $0x1328] sm:$0xff] }
 0x25c   : > { %2941 = vmatpush.msra.mxu2 %v2377_v56  ;;  %2961 = vmatpush.msra.mxu3 %v2505_v34  ;;  %v2473_v54 = vld [vmem:[#allocation8 + $0x1d20] sm:$0xff]  ;;  %v2282_v29 = vld [vmem:[#allocation8 + $0x1728] sm:$0xff] }
 0x25d   : > { %2902 = vmatpush.msra.mxu0 %v2113_v3  ;;  %2922 = vmatpush.msra.mxu1 %v2241_v12  ;;  %v2081_v20 = vld [vmem:[#allocation8 + $0x10e0] sm:$0xff]  ;;  %v2410_v22 = vld [vmem:[#allocation8 + $0x1b28] sm:$0xff] }
 0x25e   : > { %2942 = vmatpush.msra.mxu2 %v2369_v51  ;;  %2962 = vmatpush.msra.mxu3 %v2497_v24  ;;  %v2209_v43 = vld [vmem:[#allocation8 + $0x14e0] sm:$0xff]  ;;  %v2538_v58 = vld [vmem:[#allocation8 + $0x1f28] sm:$0xff] }
 0x25f   : > { %2903 = vmatpush.msra.mxu0 %v2105_v18  ;;  %2923 = vmatpush.msra.mxu1 %v2233_v39  ;;  %v2337_v44 = vld [vmem:[#allocation8 + $0x18e0] sm:$0xff]  ;;  %v2146_v11 = vld [vmem:[#allocation8 + $0x12e8] sm:$0xff] }
 0x260   : > { %2943 = vmatpush.msra.mxu2 %v2361_v60  ;;  %2963 = vmatpush.msra.mxu3 %v2489_v30  ;;  %v2465_v31 = vld [vmem:[#allocation8 + $0x1ce0] sm:$0xff]  ;;  %v2274_v47 = vld [vmem:[#allocation8 + $0x16e8] sm:$0xff] }
 0x261   : > { %2904 = vmatpush.msra.mxu0 %v2097_v9  ;;  %2924 = vmatpush.msra.mxu1 %v2225_v8  ;;  %v2073_v26 = vld [vmem:[#allocation8 + $0x10a0] sm:$0xff]  ;;  %v2402_v41 = vld [vmem:[#allocation8 + $0x1ae8] sm:$0xff] }
 0x262   : > { %2944 = vmatpush.msra.mxu2 %v2353_v28  ;;  %2964 = vmatpush.msra.mxu3 %v2481_v57  ;;  %v2201_v6 = vld [vmem:[#allocation8 + $0x14a0] sm:$0xff]  ;;  %v2530_v63 = vld [vmem:[#allocation8 + $0x1ee8] sm:$0xff] }
 0x263   : > { %2905 = vmatpush.msra.mxu0 %v2089_v25  ;;  %2925 = vmatpush.msra.mxu1 %v2217_v38  ;;  %v2329_v15 = vld [vmem:[#allocation8 + $0x18a0] sm:$0xff]  ;;  %v2138_v0 = vld [vmem:[#allocation8 + $0x12a8] sm:$0xff] }
 0x264   : > { %2945 = vmatpush.msra.mxu2 %v2345_v46  ;;  %2965 = vmatpush.msra.mxu3 %v2473_v54  ;;  %v2457_v19 = vld [vmem:[#allocation8 + $0x1ca0] sm:$0xff]  ;;  %v2266_v62 = vld [vmem:[#allocation8 + $0x16a8] sm:$0xff] }
 0x265   : > { %2906 = vmatpush.msra.mxu0 %v2081_v20  ;;  %2926 = vmatpush.msra.mxu1 %v2209_v43  ;;  %v2065_v14 = vld [vmem:[#allocation8 + $0x1060] sm:$0xff]  ;;  %v2394_v4 = vld [vmem:[#allocation8 + $0x1aa8] sm:$0xff] }
 0x266   : > { %2946 = vmatpush.msra.mxu2 %v2337_v44  ;;  %2966 = vmatpush.msra.mxu3 %v2465_v31  ;;  %v2193_v40 = vld [vmem:[#allocation8 + $0x1460] sm:$0xff]  ;;  %v2522_v36 = vld [vmem:[#allocation8 + $0x1ea8] sm:$0xff] }
 0x267   : > { %2907 = vmatpush.msra.mxu0 %v2073_v26  ;;  %2927 = vmatpush.msra.mxu1 %v2201_v6  ;;  %v2321_v45 = vld [vmem:[#allocation8 + $0x1860] sm:$0xff]  ;;  %v2130_v42 = vld [vmem:[#allocation8 + $0x1268] sm:$0xff] }
 0x268   : > { %v2449_v37 = vld [vmem:[#allocation8 + $0x1c60] sm:$0xff]  ;;  %2947 = vmatpush.msra.mxu2 %v2329_v15  ;;  %2967 = vmatpush.msra.mxu3 %v2457_v19  ;;  %v2258_v16 = vld [vmem:[#allocation8 + $0x1668] sm:$0xff] }
 0x269   : > { %v2057_v48 = vld [vmem:[#allocation8 + $0x1020] sm:$0xff]  ;;  %2908 = vmatpush.msra.mxu0 %v2065_v14  ;;  %2928 = vmatpush.msra.mxu1 %v2193_v40  ;;  %v2386_v56 = vld [vmem:[#allocation8 + $0x1a68] sm:$0xff] }
 0x26a   : > { %v2185_v50 = vld [vmem:[#allocation8 + $0x1420] sm:$0xff]  ;;  %2948 = vmatpush.msra.mxu2 %v2321_v45  ;;  %2968 = vmatpush.msra.mxu3 %v2449_v37  ;;  %v2514_v34 = vld [vmem:[#allocation8 + $0x1e68] sm:$0xff] }
 0x26b   : > { %v2313_v53 = vld [vmem:[#allocation8 + $0x1820] sm:$0xff]  ;;  %2870 = vmatmul.f32.vlgmr.msrb.gmra.mxu2 %v6147_v23  ;;  %2909 = vmatpush.msra.mxu0 %v2057_v48  ;;  %v2122_v3 = vld [vmem:[#allocation8 + $0x1228] sm:$0xff] }
 0x26c   : > { %v2441_v59 = vld [vmem:[#allocation8 + $0x1c20] sm:$0xff]  ;;  %2929 = vmatpush.msra.mxu1 %v2185_v50  ;;  %2949 = vmatpush.msra.mxu2 %v2313_v53  ;;  %v2250_v12 = vld [vmem:[#allocation8 + $0x1628] sm:$0xff] }
 0x26d   : > { %2969 = vmatpush.msra.mxu3 %v2441_v59  ;;  %2830 = vmatmul.f32.vlgmr.msrb.gmra.mxu0 %v6149_v55  ;;  %v2378_v51 = vld [vmem:[#allocation8 + $0x1a28] sm:$0xff] }
 0x26e   : > { %2850 = vmatmul.f32.vlgmr.msrb.gmra.mxu1 %v6151_v10  ;;  %2890 = vmatmul.f32.vlgmr.msrb.gmra.mxu3 %v6153_v5  ;;  %v2506_v24 = vld [vmem:[#allocation8 + $0x1e28] sm:$0xff] }
 0x26f   : > { %2974 = vmatpush.msrb.mxu0 %v2178_v49  ;;  %2994 = vmatpush.msrb.mxu1 %v2306_v61  ;;  %v2114_v18 = vld [vmem:[#allocation8 + $0x11e8] sm:$0xff] }
 0x270   : > { %3014 = vmatpush.msrb.mxu2 %v2434_v32  ;;  %3034 = vmatpush.msrb.mxu3 %v2562_v27  ;;  %v2242_v39 = vld [vmem:[#allocation8 + $0x15e8] sm:$0xff] }
 0x271   : > { %2975 = vmatpush.msrb.mxu0 %v2170_v7  ;;  %2995 = vmatpush.msrb.mxu1 %v2298_v1  ;;  %v2370_v60 = vld [vmem:[#allocation8 + $0x19e8] sm:$0xff] }
 0x272   : > { %3015 = vmatpush.msrb.mxu2 %v2426_v2  ;;  %3035 = vmatpush.msrb.mxu3 %v2554_v13  ;;  %v2498_v30 = vld [vmem:[#allocation8 + $0x1de8] sm:$0xff] }
 0x273   : > { %2976 = vmatpush.msrb.mxu0 %v2162_v33  ;;  %2996 = vmatpush.msrb.mxu1 %v2290_v21  ;;  %v2106_v9 = vld [vmem:[#allocation8 + $0x11a8] sm:$0xff] }
 0x274   : > { %3016 = vmatpush.msrb.mxu2 %v2418_v35  ;;  %3036 = vmatpush.msrb.mxu3 %v2546_v52  ;;  %v2234_v8 = vld [vmem:[#allocation8 + $0x15a8] sm:$0xff]  ;;  %v2179_v52 = vld [vmem:[#allocation8 + $0x13f0] sm:$0xff] }
 0x275   : > { %2977 = vmatpush.msrb.mxu0 %v2154_v17  ;;  %2997 = vmatpush.msrb.mxu1 %v2282_v29  ;;  %v2362_v28 = vld [vmem:[#allocation8 + $0x19a8] sm:$0xff]  ;;  %v2307_v17 = vld [vmem:[#allocation8 + $0x17f0] sm:$0xff] }
 0x276   : > { %3017 = vmatpush.msrb.mxu2 %v2410_v22  ;;  %3037 = vmatpush.msrb.mxu3 %v2538_v58  ;;  %v2490_v57 = vld [vmem:[#allocation8 + $0x1da8] sm:$0xff]  ;;  %v2435_v29 = vld [vmem:[#allocation8 + $0x1bf0] sm:$0xff] }
 0x277   : > { %2978 = vmatpush.msrb.mxu0 %v2146_v11  ;;  %2998 = vmatpush.msrb.mxu1 %v2274_v47  ;;  %v2098_v25 = vld [vmem:[#allocation8 + $0x1168] sm:$0xff]  ;;  %v2563_v22 = vld [vmem:[#allocation8 + $0x1ff0] sm:$0xff] }
 0x278   : > { %3018 = vmatpush.msrb.mxu2 %v2402_v41  ;;  %3038 = vmatpush.msrb.mxu3 %v2530_v63  ;;  %v2226_v38 = vld [vmem:[#allocation8 + $0x1568] sm:$0xff]  ;;  %v2171_v58 = vld [vmem:[#allocation8 + $0x13b0] sm:$0xff] }
 0x279   : > { %2979 = vmatpush.msrb.mxu0 %v2138_v0  ;;  %2999 = vmatpush.msrb.mxu1 %v2266_v62  ;;  %v2354_v46 = vld [vmem:[#allocation8 + $0x1968] sm:$0xff]  ;;  %v2299_v11 = vld [vmem:[#allocation8 + $0x17b0] sm:$0xff] }
 0x27a   : > { %3019 = vmatpush.msrb.mxu2 %v2394_v4  ;;  %3039 = vmatpush.msrb.mxu3 %v2522_v36  ;;  %v2482_v54 = vld [vmem:[#allocation8 + $0x1d68] sm:$0xff]  ;;  %v2427_v47 = vld [vmem:[#allocation8 + $0x1bb0] sm:$0xff] }
 0x27b   : > { %2980 = vmatpush.msrb.mxu0 %v2130_v42  ;;  %3000 = vmatpush.msrb.mxu1 %v2258_v16  ;;  %v2090_v20 = vld [vmem:[#allocation8 + $0x1128] sm:$0xff]  ;;  %v2555_v41 = vld [vmem:[#allocation8 + $0x1fb0] sm:$0xff] }
 0x27c   : > { %3020 = vmatpush.msrb.mxu2 %v2386_v56  ;;  %3040 = vmatpush.msrb.mxu3 %v2514_v34  ;;  %v2218_v43 = vld [vmem:[#allocation8 + $0x1528] sm:$0xff]  ;;  %v2163_v63 = vld [vmem:[#allocation8 + $0x1370] sm:$0xff] }
 0x27d   : > { %2981 = vmatpush.msrb.mxu0 %v2122_v3  ;;  %3001 = vmatpush.msrb.mxu1 %v2250_v12  ;;  %v2346_v44 = vld [vmem:[#allocation8 + $0x1928] sm:$0xff]  ;;  %v2291_v0 = vld [vmem:[#allocation8 + $0x1770] sm:$0xff] }
 0x27e   : > { %3021 = vmatpush.msrb.mxu2 %v2378_v51  ;;  %3041 = vmatpush.msrb.mxu3 %v2506_v24  ;;  %v2474_v31 = vld [vmem:[#allocation8 + $0x1d28] sm:$0xff]  ;;  %v2419_v62 = vld [vmem:[#allocation8 + $0x1b70] sm:$0xff] }
 0x27f   : > { %2982 = vmatpush.msrb.mxu0 %v2114_v18  ;;  %3002 = vmatpush.msrb.mxu1 %v2242_v39  ;;  %v2082_v26 = vld [vmem:[#allocation8 + $0x10e8] sm:$0xff]  ;;  %v2547_v4 = vld [vmem:[#allocation8 + $0x1f70] sm:$0xff] }
 0x280   : > { %3022 = vmatpush.msrb.mxu2 %v2370_v60  ;;  %3042 = vmatpush.msrb.mxu3 %v2498_v30  ;;  %v2210_v6 = vld [vmem:[#allocation8 + $0x14e8] sm:$0xff]  ;;  %v2155_v36 = vld [vmem:[#allocation8 + $0x1330] sm:$0xff] }
 0x281   : > { %2983 = vmatpush.msrb.mxu0 %v2106_v9  ;;  %3003 = vmatpush.msrb.mxu1 %v2234_v8  ;;  %v2338_v19 = vld [vmem:[#allocation8 + $0x18e8] sm:$0xff]  ;;  %v2283_v42 = vld [vmem:[#allocation8 + $0x1730] sm:$0xff] }
 0x282   : > { %3023 = vmatpush.msrb.mxu2 %v2362_v28  ;;  %3043 = vmatpush.msrb.mxu3 %v2490_v57  ;;  %v2466_v14 = vld [vmem:[#allocation8 + $0x1ce8] sm:$0xff]  ;;  %v2411_v16 = vld [vmem:[#allocation8 + $0x1b30] sm:$0xff] }
 0x283   : > { %2984 = vmatpush.msrb.mxu0 %v2098_v25  ;;  %3004 = vmatpush.msrb.mxu1 %v2226_v38  ;;  %v2074_v45 = vld [vmem:[#allocation8 + $0x10a8] sm:$0xff]  ;;  %v2539_v56 = vld [vmem:[#allocation8 + $0x1f30] sm:$0xff] }
 0x284   : > { %3024 = vmatpush.msrb.mxu2 %v2354_v46  ;;  %3044 = vmatpush.msrb.mxu3 %v2482_v54  ;;  %v2591_v15 = vpop.f32.mrf.mxu0  ;;  %v2202_v37 = vld [vmem:[#allocation8 + $0x14a8] sm:$0xff]  ;;  %v2147_v34 = vld [vmem:[#allocation8 + $0x12f0] sm:$0xff] }
 0x285   : > { %2985 = vmatpush.msrb.mxu0 %v2090_v20  ;;  %3005 = vmatpush.msrb.mxu1 %v2218_v43  ;;  %v2611_v40 = vpop.f32.mrf.mxu1  ;;  %v2330_v50 = vld [vmem:[#allocation8 + $0x18a8] sm:$0xff]  ;;  %v2275_v3 = vld [vmem:[#allocation8 + $0x16f0] sm:$0xff] }
 0x286   : > { %3025 = vmatpush.msrb.mxu2 %v2346_v44  ;;  %3045 = vmatpush.msrb.mxu3 %v2474_v31  ;;  %v2612_v48 = vadd.f32 %v2611_v40, %v2591_v15  ;;  %v2458_v53 = vld [vmem:[#allocation8 + $0x1ca8] sm:$0xff]  ;;  %v2403_v12 = vld [vmem:[#allocation8 + $0x1af0] sm:$0xff] }
 0x287   : > { %2986 = vmatpush.msrb.mxu0 %v2082_v26  ;;  %3006 = vmatpush.msrb.mxu1 %v2210_v6  ;;  %v2066_v59 = vld [vmem:[#allocation8 + $0x1068] sm:$0xff]  ;;  %v2531_v51 = vld [vmem:[#allocation8 + $0x1ef0] sm:$0xff] }
 0x288   : > { %3026 = vmatpush.msrb.mxu2 %v2338_v19  ;;  %3046 = vmatpush.msrb.mxu3 %v2466_v14  ;;  %v2194_v49 = vld [vmem:[#allocation8 + $0x1468] sm:$0xff]  ;;  %v2631_v61 = vpop.f32.mrf.mxu2  ;;  %v2139_v24 = vld [vmem:[#allocation8 + $0x12b0] sm:$0xff] }
 0x289   : > { %2987 = vmatpush.msrb.mxu0 %v2074_v45  ;;  %3007 = vmatpush.msrb.mxu1 %v2202_v37  ;;  %v2322_v32 = vld [vmem:[#allocation8 + $0x1868] sm:$0xff]  ;;  %v2632_v7 = vadd.f32 %v2631_v61, %v2612_v48  ;;  %v2267_v18 = vld [vmem:[#allocation8 + $0x16b0] sm:$0xff] }
 0x28a   : > { %v2450_v27 = vld [vmem:[#allocation8 + $0x1c68] sm:$0xff]  ;;  %3027 = vmatpush.msrb.mxu2 %v2330_v50  ;;  %3047 = vmatpush.msrb.mxu3 %v2458_v53  ;;  %v2395_v39 = vld [vmem:[#allocation8 + $0x1ab0] sm:$0xff] }
 0x28b   : > { %v2058_v1 = vld [vmem:[#allocation8 + $0x1028] sm:$0xff]  ;;  %2988 = vmatpush.msrb.mxu0 %v2066_v59  ;;  %3008 = vmatpush.msrb.mxu1 %v2194_v49  ;;  %v2651_v33 = vpop.f32.mrf.mxu3  ;;  %v2523_v60 = vld [vmem:[#allocation8 + $0x1eb0] sm:$0xff] }
 0x28c   : > { %v2186_v2 = vld [vmem:[#allocation8 + $0x1428] sm:$0xff]  ;;  %3028 = vmatpush.msrb.mxu2 %v2322_v32  ;;  %3048 = vmatpush.msrb.mxu3 %v2450_v27  ;;  %v6171_v35 = vadd.f32 %v2651_v33, %v2632_v7  ;;  %v2131_v30 = vld [vmem:[#allocation8 + $0x1270] sm:$0xff] }
 0x28d   : > { %v2314_v13 = vld [vmem:[#allocation8 + $0x1828] sm:$0xff]  ;;  %2950 = vmatmul.f32.vlgmr.msra.gmra.mxu2 %v6147_v23  ;;  %2989 = vmatpush.msrb.mxu0 %v2058_v1  ;;  %v2259_v9 = vld [vmem:[#allocation8 + $0x1670] sm:$0xff] }
 0x28e   : > { %v2442_v21 = vld [vmem:[#allocation8 + $0x1c28] sm:$0xff]  ;;  %3009 = vmatpush.msrb.mxu1 %v2186_v2  ;;  %3029 = vmatpush.msrb.mxu2 %v2314_v13  ;;  %v2387_v8 = vld [vmem:[#allocation8 + $0x1a70] sm:$0xff] }
 0x28f   : > { %3049 = vmatpush.msrb.mxu3 %v2442_v21  ;;  %2910 = vmatmul.f32.vlgmr.msra.gmra.mxu0 %v6149_v55  ;;  %v2515_v28 = vld [vmem:[#allocation8 + $0x1e70] sm:$0xff] }
 0x290   : > { %2930 = vmatmul.f32.vlgmr.msra.gmra.mxu1 %v6151_v10  ;;  %2970 = vmatmul.f32.vlgmr.msra.gmra.mxu3 %v6153_v5  ;;  %v2123_v57 = vld [vmem:[#allocation8 + $0x1230] sm:$0xff] }
 0x291   : > { %3054 = vmatpush.msra.mxu0 %v2179_v52  ;;  %3074 = vmatpush.msra.mxu1 %v2307_v17  ;;  %v2251_v25 = vld [vmem:[#allocation8 + $0x1630] sm:$0xff] }
 0x292   : > { %3094 = vmatpush.msra.mxu2 %v2435_v29  ;;  %3114 = vmatpush.msra.mxu3 %v2563_v22  ;;  %v2379_v38 = vld [vmem:[#allocation8 + $0x1a30] sm:$0xff] }
 0x293   : > { %3055 = vmatpush.msra.mxu0 %v2171_v58  ;;  %3075 = vmatpush.msra.mxu1 %v2299_v11  ;;  %v2507_v46 = vld [vmem:[#allocation8 + $0x1e30] sm:$0xff] }
 0x294   : > { %3095 = vmatpush.msra.mxu2 %v2427_v47  ;;  %3115 = vmatpush.msra.mxu3 %v2555_v41  ;;  %v2115_v54 = vld [vmem:[#allocation8 + $0x11f0] sm:$0xff] }
 0x295   : > { %3056 = vmatpush.msra.mxu0 %v2163_v63  ;;  %3076 = vmatpush.msra.mxu1 %v2291_v0  ;;  %v2243_v20 = vld [vmem:[#allocation8 + $0x15f0] sm:$0xff] }
 0x296   : > { %3096 = vmatpush.msra.mxu2 %v2419_v62  ;;  %3116 = vmatpush.msra.mxu3 %v2547_v4  ;;  %v2371_v43 = vld [vmem:[#allocation8 + $0x19f0] sm:$0xff] }
 0x297   : > { %3057 = vmatpush.msra.mxu0 %v2155_v36  ;;  %3077 = vmatpush.msra.mxu1 %v2283_v42  ;;  %v2499_v44 = vld [vmem:[#allocation8 + $0x1df0] sm:$0xff]  ;;  %v2180_v36 = vld [vmem:[#allocation8 + $0x13f8] sm:$0xff] }
 0x298   : > { %3097 = vmatpush.msra.mxu2 %v2411_v16  ;;  %3117 = vmatpush.msra.mxu3 %v2539_v56  ;;  %v2107_v31 = vld [vmem:[#allocation8 + $0x11b0] sm:$0xff]  ;;  %v2308_v42 = vld [vmem:[#allocation8 + $0x17f8] sm:$0xff] }
 0x299   : > { %3058 = vmatpush.msra.mxu0 %v2147_v34  ;;  %3078 = vmatpush.msra.mxu1 %v2275_v3  ;;  %v2235_v26 = vld [vmem:[#allocation8 + $0x15b0] sm:$0xff]  ;;  %v2436_v16 = vld [vmem:[#allocation8 + $0x1bf8] sm:$0xff] }
 0x29a   : > { %3098 = vmatpush.msra.mxu2 %v2403_v12  ;;  %3118 = vmatpush.msra.mxu3 %v2531_v51  ;;  %v2363_v6 = vld [vmem:[#allocation8 + $0x19b0] sm:$0xff]  ;;  %v2564_v56 = vld [vmem:[#allocation8 + $0x1ff8] sm:$0xff] }
 0x29b   : > { %3059 = vmatpush.msra.mxu0 %v2139_v24  ;;  %3079 = vmatpush.msra.mxu1 %v2267_v18  ;;  %v2491_v15 = vld [vmem:[#allocation8 + $0x1db0] sm:$0xff]  ;;  %v2172_v34 = vld [vmem:[#allocation8 + $0x13b8] sm:$0xff] }
 0x29c   : > { %3099 = vmatpush.msra.mxu2 %v2395_v39  ;;  %3119 = vmatpush.msra.mxu3 %v2523_v60  ;;  %v2099_v19 = vld [vmem:[#allocation8 + $0x1170] sm:$0xff]  ;;  %v2300_v3 = vld [vmem:[#allocation8 + $0x17b8] sm:$0xff] }
 0x29d   : > { %3060 = vmatpush.msra.mxu0 %v2131_v30  ;;  %3080 = vmatpush.msra.mxu1 %v2259_v9  ;;  %v2227_v14 = vld [vmem:[#allocation8 + $0x1570] sm:$0xff]  ;;  %v2428_v12 = vld [vmem:[#allocation8 + $0x1bb8] sm:$0xff] }
 0x29e   : > { %3100 = vmatpush.msra.mxu2 %v2387_v8  ;;  %3120 = vmatpush.msra.mxu3 %v2515_v28  ;;  %v2355_v40 = vld [vmem:[#allocation8 + $0x1970] sm:$0xff]  ;;  %v2556_v51 = vld [vmem:[#allocation8 + $0x1fb8] sm:$0xff] }
 0x29f   : > { %3061 = vmatpush.msra.mxu0 %v2123_v57  ;;  %3081 = vmatpush.msra.mxu1 %v2251_v25  ;;  %v2483_v45 = vld [vmem:[#allocation8 + $0x1d70] sm:$0xff]  ;;  %v2164_v24 = vld [vmem:[#allocation8 + $0x1378] sm:$0xff] }
 0x2a0   : > { %3101 = vmatpush.msra.mxu2 %v2379_v38  ;;  %3121 = vmatpush.msra.mxu3 %v2507_v46  ;;  %v2091_v37 = vld [vmem:[#allocation8 + $0x1130] sm:$0xff]  ;;  %v2292_v18 = vld [vmem:[#allocation8 + $0x1778] sm:$0xff] }
 0x2a1   : > { %3062 = vmatpush.msra.mxu0 %v2115_v54  ;;  %3082 = vmatpush.msra.mxu1 %v2243_v20  ;;  %v2219_v48 = vld [vmem:[#allocation8 + $0x1530] sm:$0xff]  ;;  %v2420_v39 = vld [vmem:[#allocation8 + $0x1b78] sm:$0xff] }
 0x2a2   : > { %3102 = vmatpush.msra.mxu2 %v2371_v43  ;;  %3122 = vmatpush.msra.mxu3 %v2499_v44  ;;  %v2347_v50 = vld [vmem:[#allocation8 + $0x1930] sm:$0xff]  ;;  %v2548_v60 = vld [vmem:[#allocation8 + $0x1f78] sm:$0xff] }
 0x2a3   : > { %3063 = vmatpush.msra.mxu0 %v2107_v31  ;;  %3083 = vmatpush.msra.mxu1 %v2235_v26  ;;  %v2475_v53 = vld [vmem:[#allocation8 + $0x1d30] sm:$0xff]  ;;  %v2156_v30 = vld [vmem:[#allocation8 + $0x1338] sm:$0xff] }
 0x2a4   : > { %3103 = vmatpush.msra.mxu2 %v2363_v6  ;;  %3123 = vmatpush.msra.mxu3 %v2491_v15  ;;  %v2083_v59 = vld [vmem:[#allocation8 + $0x10f0] sm:$0xff]  ;;  %v2284_v9 = vld [vmem:[#allocation8 + $0x1738] sm:$0xff] }
 0x2a5   : > { %3064 = vmatpush.msra.mxu0 %v2099_v19  ;;  %3084 = vmatpush.msra.mxu1 %v2227_v14  ;;  %v2211_v49 = vld [vmem:[#allocation8 + $0x14f0] sm:$0xff]  ;;  %v2412_v8 = vld [vmem:[#allocation8 + $0x1b38] sm:$0xff] }
 0x2a6   : > { %3104 = vmatpush.msra.mxu2 %v2355_v40  ;;  %3124 = vmatpush.msra.mxu3 %v2483_v45  ;;  %v2671_v61 = vpop.f32.mrf.mxu0  ;;  %v2339_v32 = vld [vmem:[#allocation8 + $0x18f0] sm:$0xff]  ;;  %v2540_v28 = vld [vmem:[#allocation8 + $0x1f38] sm:$0xff] }
 0x2a7   : > { %3065 = vmatpush.msra.mxu0 %v2091_v37  ;;  %3085 = vmatpush.msra.mxu1 %v2219_v48  ;;  %v2467_v27 = vld [vmem:[#allocation8 + $0x1cf0] sm:$0xff]  ;;  %v2691_v7 = vpop.f32.mrf.mxu1  ;;  %v2148_v57 = vld [vmem:[#allocation8 + $0x12f8] sm:$0xff] }
 0x2a8   : > { %3105 = vmatpush.msra.mxu2 %v2347_v50  ;;  %3125 = vmatpush.msra.mxu3 %v2475_v53  ;;  %v2075_v1 = vld [vmem:[#allocation8 + $0x10b0] sm:$0xff]  ;;  %v2692_v13 = vadd.f32 %v2691_v7, %v2671_v61  ;;  %v2276_v25 = vld [vmem:[#allocation8 + $0x16f8] sm:$0xff] }
 0x2a9   : > { %v2203_v2 = vld [vmem:[#allocation8 + $0x14b0] sm:$0xff]  ;;  %3066 = vmatpush.msra.mxu0 %v2083_v59  ;;  %3086 = vmatpush.msra.mxu1 %v2211_v49  ;;  %v2404_v38 = vld [vmem:[#allocation8 + $0x1af8] sm:$0xff] }
 0x2aa   : > { %v2331_v33 = vld [vmem:[#allocation8 + $0x18b0] sm:$0xff]  ;;  %3106 = vmatpush.msra.mxu2 %v2339_v32  ;;  %3126 = vmatpush.msra.mxu3 %v2467_v27  ;;  %v2711_v29 = vpop.f32.mrf.mxu2  ;;  %v2532_v46 = vld [vmem:[#allocation8 + $0x1ef8] sm:$0xff] }
 0x2ab   : > { %v2459_v21 = vld [vmem:[#allocation8 + $0x1cb0] sm:$0xff]  ;;  %3067 = vmatpush.msra.mxu0 %v2075_v1  ;;  %3087 = vmatpush.msra.mxu1 %v2203_v2  ;;  %v2712_v11 = vadd.f32 %v2711_v29, %v2692_v13  ;;  %v2140_v54 = vld [vmem:[#allocation8 + $0x12b8] sm:$0xff] }
 0x2ac   : > { %v2067_v52 = vld [vmem:[#allocation8 + $0x1070] sm:$0xff]  ;;  %3107 = vmatpush.msra.mxu2 %v2331_v33  ;;  %3127 = vmatpush.msra.mxu3 %v2459_v21  ;;  %v2268_v20 = vld [vmem:[#allocation8 + $0x16b8] sm:$0xff] }
 0x2ad   : > { %v2195_v17 = vld [vmem:[#allocation8 + $0x1470] sm:$0xff]  ;;  %3068 = vmatpush.msra.mxu0 %v2067_v52  ;;  %v2731_v0 = vpop.f32.mrf.mxu3  ;;  %3030 = vmatmul.f32.vlgmr.msrb.gmra.mxu2 %v6147_v23  ;;  %v2396_v43 = vld [vmem:[#allocation8 + $0x1ab8] sm:$0xff] }
 0x2ae   : > { %v2323_v22 = vld [vmem:[#allocation8 + $0x1870] sm:$0xff]  ;;  %3088 = vmatpush.msra.mxu1 %v2195_v17  ;;  %v6177_v4 = vadd.f32 %v2731_v0, %v2712_v11  ;;  %2990 = vmatmul.f32.vlgmr.msrb.gmra.mxu0 %v6149_v55  ;;  %v2524_v44 = vld [vmem:[#allocation8 + $0x1eb8] sm:$0xff] }
 0x2af   : > { %v2451_v58 = vld [vmem:[#allocation8 + $0x1c70] sm:$0xff]  ;;  %3108 = vmatpush.msra.mxu2 %v2323_v22  ;;  %3010 = vmatmul.f32.vlgmr.msrb.gmra.mxu1 %v6151_v10  ;;  %v2132_v31 = vld [vmem:[#allocation8 + $0x1278] sm:$0xff] }
 0x2b0   : > { %v2059_v47 = vld [vmem:[#allocation8 + $0x1030] sm:$0xff]  ;;  %3128 = vmatpush.msra.mxu3 %v2451_v58  ;;  %v2260_v26 = vld [vmem:[#allocation8 + $0x1678] sm:$0xff] }
 0x2b1   : > { %v2187_v41 = vld [vmem:[#allocation8 + $0x1430] sm:$0xff]  ;;  %3069 = vmatpush.msra.mxu0 %v2059_v47  ;;  %3050 = vmatmul.f32.vlgmr.msrb.gmra.mxu3 %v6153_v5  ;;  %v2388_v6 = vld [vmem:[#allocation8 + $0x1a78] sm:$0xff] }
 0x2b2   : > { %v2315_v63 = vld [vmem:[#allocation8 + $0x1830] sm:$0xff]  ;;  %3089 = vmatpush.msra.mxu1 %v2187_v41  ;;  %v2516_v15 = vld [vmem:[#allocation8 + $0x1e78] sm:$0xff] }
 0x2b3   : > { %v2443_v62 = vld [vmem:[#allocation8 + $0x1c30] sm:$0xff]  ;;  %3109 = vmatpush.msra.mxu2 %v2315_v63  ;;  %3134 = vmatpush.msrb.mxu0 %v2180_v36  ;;  %v2124_v19 = vld [vmem:[#allocation8 + $0x1238] sm:$0xff] }
 0x2b4   : > { %3129 = vmatpush.msra.mxu3 %v2443_v62  ;;  %3154 = vmatpush.msrb.mxu1 %v2308_v42  ;;  %v2252_v14 = vld [vmem:[#allocation8 + $0x1638] sm:$0xff] }
 0x2b5   : > { %3174 = vmatpush.msrb.mxu2 %v2436_v16  ;;  %3135 = vmatpush.msrb.mxu0 %v2172_v34  ;;  %v2380_v40 = vld [vmem:[#allocation8 + $0x1a38] sm:$0xff] }
 0x2b6   : > { %3194 = vmatpush.msrb.mxu3 %v2564_v56  ;;  %3155 = vmatpush.msrb.mxu1 %v2300_v3  ;;  %v2508_v45 = vld [vmem:[#allocation8 + $0x1e38] sm:$0xff] }
 0x2b7   : > { %3175 = vmatpush.msrb.mxu2 %v2428_v12  ;;  %3136 = vmatpush.msrb.mxu0 %v2164_v24  ;;  %v2116_v37 = vld [vmem:[#allocation8 + $0x11f8] sm:$0xff] }
 0x2b8   : > { %3195 = vmatpush.msrb.mxu3 %v2556_v51  ;;  %3156 = vmatpush.msrb.mxu1 %v2292_v18  ;;  %v2244_v48 = vld [vmem:[#allocation8 + $0x15f8] sm:$0xff] }
 0x2b9   : > { %3176 = vmatpush.msrb.mxu2 %v2420_v39  ;;  %3137 = vmatpush.msrb.mxu0 %v2156_v30  ;;  %v2372_v50 = vld [vmem:[#allocation8 + $0x19f8] sm:$0xff] }
 0x2ba   : > { %3196 = vmatpush.msrb.mxu3 %v2548_v60  ;;  %3157 = vmatpush.msrb.mxu1 %v2284_v9  ;;  %v2500_v53 = vld [vmem:[#allocation8 + $0x1df8] sm:$0xff]  ;;  %v1661_v9 = vld [vmem:[#allocation8 + $0x3c0] sm:$0xff] }
 0x2bb   : > { %3177 = vmatpush.msrb.mxu2 %v2412_v8  ;;  %3138 = vmatpush.msrb.mxu0 %v2148_v57  ;;  %v2108_v59 = vld [vmem:[#allocation8 + $0x11b8] sm:$0xff]  ;;  %v1789_v8 = vld [vmem:[#allocation8 + $0x7c0] sm:$0xff] }
 0x2bc   : > { %3197 = vmatpush.msrb.mxu3 %v2540_v28  ;;  %3158 = vmatpush.msrb.mxu1 %v2276_v25  ;;  %v2236_v49 = vld [vmem:[#allocation8 + $0x15b8] sm:$0xff]  ;;  %v1917_v28 = vld [vmem:[#allocation8 + $0xbc0] sm:$0xff] }
 0x2bd   : > { %3178 = vmatpush.msrb.mxu2 %v2404_v38  ;;  %3139 = vmatpush.msrb.mxu0 %v2140_v54  ;;  %v2364_v61 = vld [vmem:[#allocation8 + $0x19b8] sm:$0xff]  ;;  %v2045_v57 = vld [vmem:[#allocation8 + $0xfc0] sm:$0xff] }
 0x2be   : > { %3198 = vmatpush.msrb.mxu3 %v2532_v46  ;;  %3159 = vmatpush.msrb.mxu1 %v2268_v20  ;;  %v2492_v32 = vld [vmem:[#allocation8 + $0x1db8] sm:$0xff]  ;;  %v1653_v25 = vld [vmem:[#allocation8 + $0x380] sm:$0xff] }
 0x2bf   : > { %3179 = vmatpush.msrb.mxu2 %v2396_v43  ;;  %3140 = vmatpush.msrb.mxu0 %v2132_v31  ;;  %v2100_v27 = vld [vmem:[#allocation8 + $0x1178] sm:$0xff]  ;;  %v1781_v38 = vld [vmem:[#allocation8 + $0x780] sm:$0xff] }
 0x2c0   : > { %3199 = vmatpush.msrb.mxu3 %v2524_v44  ;;  %3160 = vmatpush.msrb.mxu1 %v2260_v26  ;;  %v2228_v7 = vld [vmem:[#allocation8 + $0x1578] sm:$0xff]  ;;  %v1909_v46 = vld [vmem:[#allocation8 + $0xb80] sm:$0xff] }
 0x2c1   : > { %3180 = vmatpush.msrb.mxu2 %v2388_v6  ;;  %3141 = vmatpush.msrb.mxu0 %v2124_v19  ;;  %v2356_v1 = vld [vmem:[#allocation8 + $0x1978] sm:$0xff]  ;;  %v2037_v54 = vld [vmem:[#allocation8 + $0xf80] sm:$0xff] }
 0x2c2   : > { %3200 = vmatpush.msrb.mxu3 %v2516_v15  ;;  %3161 = vmatpush.msrb.mxu1 %v2252_v14  ;;  %v2484_v2 = vld [vmem:[#allocation8 + $0x1d78] sm:$0xff]  ;;  %v1645_v20 = vld [vmem:[#allocation8 + $0x340] sm:$0xff] }
 0x2c3   : > { %3181 = vmatpush.msrb.mxu2 %v2380_v40  ;;  %3142 = vmatpush.msrb.mxu0 %v2116_v37  ;;  %v2092_v13 = vld [vmem:[#allocation8 + $0x1138] sm:$0xff]  ;;  %v1773_v43 = vld [vmem:[#allocation8 + $0x740] sm:$0xff] }
 0x2c4   : > { %3201 = vmatpush.msrb.mxu3 %v2508_v45  ;;  %3162 = vmatpush.msrb.mxu1 %v2244_v48  ;;  %v2220_v33 = vld [vmem:[#allocation8 + $0x1538] sm:$0xff]  ;;  %v1901_v44 = vld [vmem:[#allocation8 + $0xb40] sm:$0xff] }
 0x2c5   : > { %3182 = vmatpush.msrb.mxu2 %v2372_v50  ;;  %3143 = vmatpush.msrb.mxu0 %v2108_v59  ;;  %v2348_v21 = vld [vmem:[#allocation8 + $0x1938] sm:$0xff]  ;;  %v2029_v31 = vld [vmem:[#allocation8 + $0xf40] sm:$0xff] }
 0x2c6   : > { %3202 = vmatpush.msrb.mxu3 %v2500_v53  ;;  %3163 = vmatpush.msrb.mxu1 %v2236_v49  ;;  %v2476_v52 = vld [vmem:[#allocation8 + $0x1d38] sm:$0xff]  ;;  %v1637_v26 = vld [vmem:[#allocation8 + $0x300] sm:$0xff] }
 0x2c7   : > { %3183 = vmatpush.msrb.mxu2 %v2364_v61  ;;  %3144 = vmatpush.msrb.mxu0 %v2100_v27  ;;  %v2084_v17 = vld [vmem:[#allocation8 + $0x10f8] sm:$0xff]  ;;  %v1765_v6 = vld [vmem:[#allocation8 + $0x700] sm:$0xff] }
 0x2c8   : > { %3203 = vmatpush.msrb.mxu3 %v2492_v32  ;;  %3164 = vmatpush.msrb.mxu1 %v2228_v7  ;;  %v2212_v29 = vld [vmem:[#allocation8 + $0x14f8] sm:$0xff]  ;;  %v2751_v22 = vpop.f32.mrf.mxu0  ;;  %v1893_v15 = vld [vmem:[#allocation8 + $0xb00] sm:$0xff] }
 0x2c9   : > { %3184 = vmatpush.msrb.mxu2 %v2356_v1  ;;  %3145 = vmatpush.msrb.mxu0 %v2092_v13  ;;  %v2340_v58 = vld [vmem:[#allocation8 + $0x18f8] sm:$0xff]  ;;  %v2771_v47 = vpop.f32.mrf.mxu1  ;;  %v2021_v19 = vld [vmem:[#allocation8 + $0xf00] sm:$0xff] }
 0x2ca   : > { %3204 = vmatpush.msrb.mxu3 %v2484_v2  ;;  %3165 = vmatpush.msrb.mxu1 %v2220_v33  ;;  %v2468_v11 = vld [vmem:[#allocation8 + $0x1cf8] sm:$0xff]  ;;  %v2772_v0 = vadd.f32 %v2771_v47, %v2751_v22  ;;  %v1629_v14 = vld [vmem:[#allocation8 + $0x2c0] sm:$0xff] }
 0x2cb   : > { %3185 = vmatpush.msrb.mxu2 %v2348_v21  ;;  %v2076_v41 = vld [vmem:[#allocation8 + $0x10b8] sm:$0xff]  ;;  %3146 = vmatpush.msrb.mxu0 %v2084_v17  ;;  %v1757_v40 = vld [vmem:[#allocation8 + $0x6c0] sm:$0xff] }
 0x2cc   : > { %3205 = vmatpush.msrb.mxu3 %v2476_v52  ;;  %v2204_v63 = vld [vmem:[#allocation8 + $0x14b8] sm:$0xff]  ;;  %3166 = vmatpush.msrb.mxu1 %v2212_v29  ;;  %v2791_v56 = vpop.f32.mrf.mxu2  ;;  %v1885_v45 = vld [vmem:[#allocation8 + $0xac0] sm:$0xff] }
 0x2cd   : > { %v2332_v62 = vld [vmem:[#allocation8 + $0x18b8] sm:$0xff]  ;;  %3186 = vmatpush.msrb.mxu2 %v2340_v58  ;;  %3147 = vmatpush.msrb.mxu0 %v2076_v41  ;;  %v2792_v12 = vadd.f32 %v2791_v56, %v2772_v0  ;;  %v2013_v37 = vld [vmem:[#allocation8 + $0xec0] sm:$0xff] }
 0x2ce   : > { %v2460_v36 = vld [vmem:[#allocation8 + $0x1cb8] sm:$0xff]  ;;  %3206 = vmatpush.msrb.mxu3 %v2468_v11  ;;  %3167 = vmatpush.msrb.mxu1 %v2204_v63  ;;  %v1621_v48 = vld [vmem:[#allocation8 + $0x280] sm:$0xff] }
 0x2cf   : > { %v2068_v42 = vld [vmem:[#allocation8 + $0x1078] sm:$0xff]  ;;  %3187 = vmatpush.msrb.mxu2 %v2332_v62  ;;  %v2811_v39 = vpop.f32.mrf.mxu3  ;;  %3070 = vmatmul.f32.vlgmr.msra.gmra.mxu0 %v6149_v55  ;;  %v1749_v50 = vld [vmem:[#allocation8 + $0x680] sm:$0xff] }
 0x2d0   : > { %v2196_v16 = vld [vmem:[#allocation8 + $0x1478] sm:$0xff]  ;;  %3207 = vmatpush.msrb.mxu3 %v2460_v36  ;;  %3148 = vmatpush.msrb.mxu0 %v2068_v42  ;;  %v6183_v30 = vadd.f32 %v2811_v39, %v2792_v12  ;;  %v1877_v53 = vld [vmem:[#allocation8 + $0xa80] sm:$0xff] }
 0x2d1   : > { %v2324_v34 = vld [vmem:[#allocation8 + $0x1878] sm:$0xff]  ;;  %3168 = vmatpush.msrb.mxu1 %v2196_v16  ;;  %3110 = vmatmul.f32.vlgmr.msra.gmra.mxu2 %v6147_v23  ;;  %v2005_v59 = vld [vmem:[#allocation8 + $0xe80] sm:$0xff] }
 0x2d2   : > { %v2452_v3 = vld [vmem:[#allocation8 + $0x1c78] sm:$0xff]  ;;  %3188 = vmatpush.msrb.mxu2 %v2324_v34  ;;  %3090 = vmatmul.f32.vlgmr.msra.gmra.mxu1 %v6151_v10  ;;  %v1613_v49 = vld [vmem:[#allocation8 + $0x240] sm:$0xff] }
 0x2d3   : > { %v2060_v51 = vld [vmem:[#allocation8 + $0x1038] sm:$0xff]  ;;  %3208 = vmatpush.msrb.mxu3 %v2452_v3  ;;  %v1741_v61 = vld [vmem:[#allocation8 + $0x640] sm:$0xff] }
 0x2d4   : > { %v2188_v24 = vld [vmem:[#allocation8 + $0x1438] sm:$0xff]  ;;  %3149 = vmatpush.msrb.mxu0 %v2060_v51  ;;  %3130 = vmatmul.f32.vlgmr.msra.gmra.mxu3 %v6153_v5  ;;  %v1869_v32 = vld [vmem:[#allocation8 + $0xa40] sm:$0xff] }
 0x2d5   : > { %v2316_v18 = vld [vmem:[#allocation8 + $0x1838] sm:$0xff]  ;;  %3169 = vmatpush.msrb.mxu1 %v2188_v24  ;;  %v1997_v27 = vld [vmem:[#allocation8 + $0xe40] sm:$0xff] }
 0x2d6   : > { %v2444_v60 = vld [vmem:[#allocation8 + $0x1c38] sm:$0xff]  ;;  %3189 = vmatpush.msrb.mxu2 %v2316_v18  ;;  %3223 = vmatpush.msra.mxu0 %v1661_v9  ;;  %v1605_v7 = vld [vmem:[#allocation8 + $0x200] sm:$0xff] }
 0x2d7   : > { %3209 = vmatpush.msrb.mxu3 %v2444_v60  ;;  %3243 = vmatpush.msra.mxu1 %v1789_v8  ;;  %v1733_v1 = vld [vmem:[#allocation8 + $0x600] sm:$0xff] }
 0x2d8   : > { %3263 = vmatpush.msra.mxu2 %v1917_v28  ;;  %3224 = vmatpush.msra.mxu0 %v1653_v25  ;;  %v1861_v2 = vld [vmem:[#allocation8 + $0xa00] sm:$0xff] }
 0x2d9   : > { %3283 = vmatpush.msra.mxu3 %v2045_v57  ;;  %3244 = vmatpush.msra.mxu1 %v1781_v38  ;;  %v1989_v13 = vld [vmem:[#allocation8 + $0xe00] sm:$0xff] }
 0x2da   : > { %3264 = vmatpush.msra.mxu2 %v1909_v46  ;;  %3225 = vmatpush.msra.mxu0 %v1645_v20  ;;  %v1597_v33 = vld [vmem:[#allocation8 + $0x1c0] sm:$0xff]  ;;  %v1918_v20 = vld [vmem:[#allocation8 + $0xbc8] sm:$0xff] }
 0x2db   : > { %3284 = vmatpush.msra.mxu3 %v2037_v54  ;;  %3245 = vmatpush.msra.mxu1 %v1773_v43  ;;  %v1725_v21 = vld [vmem:[#allocation8 + $0x5c0] sm:$0xff]  ;;  %v1790_v54 = vld [vmem:[#allocation8 + $0x7c8] sm:$0xff] }
 0x2dc   : > { %3265 = vmatpush.msra.mxu2 %v1901_v44  ;;  %3226 = vmatpush.msra.mxu0 %v1637_v26  ;;  %v1853_v52 = vld [vmem:[#allocation8 + $0x9c0] sm:$0xff]  ;;  %v2046_v43 = vld [vmem:[#allocation8 + $0xfc8] sm:$0xff] }
 0x2dd   : > { %3285 = vmatpush.msra.mxu3 %v2029_v31  ;;  %3246 = vmatpush.msra.mxu1 %v1765_v6  ;;  %v1981_v17 = vld [vmem:[#allocation8 + $0xdc0] sm:$0xff]  ;;  %v1654_v26 = vld [vmem:[#allocation8 + $0x388] sm:$0xff] }
 0x2de   : > { %3266 = vmatpush.msra.mxu2 %v1893_v15  ;;  %3227 = vmatpush.msra.mxu0 %v1629_v14  ;;  %v1589_v29 = vld [vmem:[#allocation8 + $0x180] sm:$0xff]  ;;  %v1782_v6 = vld [vmem:[#allocation8 + $0x788] sm:$0xff] }
 0x2df   : > { %3286 = vmatpush.msra.mxu3 %v2021_v19  ;;  %3247 = vmatpush.msra.mxu1 %v1757_v40  ;;  %v1717_v22 = vld [vmem:[#allocation8 + $0x580] sm:$0xff]  ;;  %v1910_v15 = vld [vmem:[#allocation8 + $0xb88] sm:$0xff] }
 0x2e0   : > { %3267 = vmatpush.msra.mxu2 %v1885_v45  ;;  %3228 = vmatpush.msra.mxu0 %v1621_v48  ;;  %v1845_v58 = vld [vmem:[#allocation8 + $0x980] sm:$0xff]  ;;  %v2038_v19 = vld [vmem:[#allocation8 + $0xf88] sm:$0xff] }
 0x2e1   : > { %3287 = vmatpush.msra.mxu3 %v2013_v37  ;;  %3248 = vmatpush.msra.mxu1 %v1749_v50  ;;  %v1973_v11 = vld [vmem:[#allocation8 + $0xd80] sm:$0xff]  ;;  %v1646_v14 = vld [vmem:[#allocation8 + $0x348] sm:$0xff] }
 0x2e2   : > { %3268 = vmatpush.msra.mxu2 %v1877_v53  ;;  %3229 = vmatpush.msra.mxu0 %v1613_v49  ;;  %v1581_v47 = vld [vmem:[#allocation8 + $0x140] sm:$0xff]  ;;  %v1774_v40 = vld [vmem:[#allocation8 + $0x748] sm:$0xff] }
 0x2e3   : > { %3288 = vmatpush.msra.mxu3 %v2005_v59  ;;  %3249 = vmatpush.msra.mxu1 %v1741_v61  ;;  %v1709_v41 = vld [vmem:[#allocation8 + $0x540] sm:$0xff]  ;;  %v1902_v45 = vld [vmem:[#allocation8 + $0xb48] sm:$0xff] }
 0x2e4   : > { %3269 = vmatpush.msra.mxu2 %v1869_v32  ;;  %3230 = vmatpush.msra.mxu0 %v1605_v7  ;;  %v1837_v63 = vld [vmem:[#allocation8 + $0x940] sm:$0xff]  ;;  %v2030_v37 = vld [vmem:[#allocation8 + $0xf48] sm:$0xff] }
 0x2e5   : > { %3289 = vmatpush.msra.mxu3 %v1997_v27  ;;  %3250 = vmatpush.msra.mxu1 %v1733_v1  ;;  %v1965_v0 = vld [vmem:[#allocation8 + $0xd40] sm:$0xff]  ;;  %v1638_v48 = vld [vmem:[#allocation8 + $0x308] sm:$0xff] }
 0x2e6   : > { %3270 = vmatpush.msra.mxu2 %v1861_v2  ;;  %3231 = vmatpush.msra.mxu0 %v1597_v33  ;;  %v1573_v62 = vld [vmem:[#allocation8 + $0x100] sm:$0xff]  ;;  %v1766_v50 = vld [vmem:[#allocation8 + $0x708] sm:$0xff] }
 0x2e7   : > { %3290 = vmatpush.msra.mxu3 %v1989_v13  ;;  %3251 = vmatpush.msra.mxu1 %v1725_v21  ;;  %v1701_v36 = vld [vmem:[#allocation8 + $0x500] sm:$0xff]  ;;  %v1894_v53 = vld [vmem:[#allocation8 + $0xb08] sm:$0xff] }
 0x2e8   : > { %3271 = vmatpush.msra.mxu2 %v1853_v52  ;;  %3232 = vmatpush.msra.mxu0 %v1589_v29  ;;  %v1829_v42 = vld [vmem:[#allocation8 + $0x900] sm:$0xff]  ;;  %v2022_v59 = vld [vmem:[#allocation8 + $0xf08] sm:$0xff] }
 0x2e9   : > { %3291 = vmatpush.msra.mxu3 %v1981_v17  ;;  %3252 = vmatpush.msra.mxu1 %v1717_v22  ;;  %v1957_v16 = vld [vmem:[#allocation8 + $0xd00] sm:$0xff]  ;;  %v1630_v49 = vld [vmem:[#allocation8 + $0x2c8] sm:$0xff] }
 0x2ea   : > { %3272 = vmatpush.msra.mxu2 %v1845_v58  ;;  %3233 = vmatpush.msra.mxu0 %v1581_v47  ;;  %v1565_v56 = vld [vmem:[#allocation8 + $0xc0] sm:$0xff]  ;;  %v1758_v61 = vld [vmem:[#allocation8 + $0x6c8] sm:$0xff]  ;;  %v6205_v29 = vpop.f32.mrf.mxu0 }
 0x2eb   : > { %3292 = vmatpush.msra.mxu3 %v1973_v11  ;;  %3253 = vmatpush.msra.mxu1 %v1709_v41  ;;  %v1693_v34 = vld [vmem:[#allocation8 + $0x4c0] sm:$0xff]  ;;  %v1886_v32 = vld [vmem:[#allocation8 + $0xac8] sm:$0xff]  ;;  %v6207_v11 = vpop.f32.mrf.mxu1 }
 0x2ec   : > { %3273 = vmatpush.msra.mxu2 %v1837_v63  ;;  %3234 = vmatpush.msra.mxu0 %v1573_v62  ;;  %v1821_v3 = vld [vmem:[#allocation8 + $0x8c0] sm:$0xff]  ;;  %v2014_v27 = vld [vmem:[#allocation8 + $0xec8] sm:$0xff] }
 0x2ed   : > { %3293 = vmatpush.msra.mxu3 %v1965_v0  ;;  %3254 = vmatpush.msra.mxu1 %v1701_v36  ;;  %v1949_v12 = vld [vmem:[#allocation8 + $0xcc0] sm:$0xff]  ;;  %v1622_v7 = vld [vmem:[#allocation8 + $0x288] sm:$0xff] }
 0x2ee   : > { %3274 = vmatpush.msra.mxu2 %v1829_v42  ;;  %3150 = vmatmul.f32.vlgmr.msrb.gmra.mxu0 %v6149_v55  ;;  %v1557_v51 = vld [vmem:[#allocation8 + $0x80] sm:$0xff]  ;;  %v1750_v1 = vld [vmem:[#allocation8 + $0x688] sm:$0xff]  ;;  %v6209_v42 = vpop.f32.mrf.mxu2 }
 0x2ef   : > { %3294 = vmatpush.msra.mxu3 %v1957_v16  ;;  %3190 = vmatmul.f32.vlgmr.msrb.gmra.mxu2 %v6147_v23  ;;  %v1685_v24 = vld [vmem:[#allocation8 + $0x480] sm:$0xff]  ;;  %v1878_v2 = vld [vmem:[#allocation8 + $0xa88] sm:$0xff] }
 0x2f0   : > { %3235 = vmatpush.msra.mxu0 %v1565_v56  ;;  %3255 = vmatpush.msra.mxu1 %v1693_v34  ;;  %v1813_v18 = vld [vmem:[#allocation8 + $0x880] sm:$0xff]  ;;  %v2006_v13 = vld [vmem:[#allocation8 + $0xe88] sm:$0xff] }
 0x2f1   : > { %3275 = vmatpush.msra.mxu2 %v1821_v3  ;;  %3295 = vmatpush.msra.mxu3 %v1949_v12  ;;  %v1941_v39 = vld [vmem:[#allocation8 + $0xc80] sm:$0xff]  ;;  %v1614_v33 = vld [vmem:[#allocation8 + $0x248] sm:$0xff] }
 0x2f2   : > { %3170 = vmatmul.f32.vlgmr.msrb.gmra.mxu1 %v6151_v10  ;;  %3210 = vmatmul.f32.vlgmr.msrb.gmra.mxu3 %v6153_v5  ;;  %v1549_v60 = vld [vmem:[#allocation8 + $0x40] sm:$0xff]  ;;  %v1662_v5 = vld [vmem:[#allocation8 + $0x3c8] sm:$0xff] }
 0x2f3   : > { %v1677_v9 = vld [vmem:[#allocation8 + $0x440] sm:$0xff]  ;;  %3236 = vmatpush.msra.mxu0 %v1557_v51  ;;  %3256 = vmatpush.msra.mxu1 %v1685_v24  ;;  %v1742_v21 = vld [vmem:[#allocation8 + $0x648] sm:$0xff]  ;;  %v6211_v24 = vpop.f32.mrf.mxu3 }
 0x2f4   : > { %v1538_v8 = vld [vmem:[#allocation2] sm:$0xf]  ;;  %3276 = vmatpush.msra.mxu2 %v1813_v18  ;;  %3296 = vmatpush.msra.mxu3 %v1941_v39  ;;  %v1870_v52 = vld [vmem:[#allocation8 + $0xa48] sm:$0xff] }
 0x2f5   : > { %v1805_v55 = vld [vmem:[#allocation8 + $0x840] sm:$0xff]  ;;  %3237 = vmatpush.msra.mxu0 %v1549_v60  ;;  %3257 = vmatpush.msra.mxu1 %v1677_v9  ;;  %v6193_v46 = vperm.slane %v1538_v8, 0  ;;  %v6195_v10 = vperm.slane %v1538_v8, 2  ;;  %v6197_v44 = vperm.slane %v1538_v8, 1  ;;  %v6199_v31 = vperm.slane %v1538_v8, 3  ;;  %v1998_v17 = vld [vmem:[#allocation8 + $0xe48] sm:$0xff] }
 0x2f6   : > { %v1933_v28 = vld [vmem:[#allocation8 + $0xc40] sm:$0xff]  ;;  %3277 = vmatpush.msra.mxu2 %v1805_v55  ;;  %v1606_v22 = vld [vmem:[#allocation8 + $0x208] sm:$0xff] }
 0x2f7   : > { %v1541_v23 = vld [vmem:[#allocation8] sm:$0xff]  ;;  %3297 = vmatpush.msra.mxu3 %v1933_v28  ;;  %v1734_v58 = vld [vmem:[#allocation8 + $0x608] sm:$0xff] }
 0x2f8   : > { %v1669_v57 = vld [vmem:[#allocation8 + $0x400] sm:$0xff]  ;;  %3238 = vmatpush.msra.mxu0 %v1541_v23  ;;  %v1862_v47 = vld [vmem:[#allocation8 + $0xa08] sm:$0xff] }
 0x2f9   : > { %v1797_v25 = vld [vmem:[#allocation8 + $0x800] sm:$0xff]  ;;  %3258 = vmatpush.msra.mxu1 %v1669_v57  ;;  %3239 = vmatmul.f32.vlgmr.msra.gmra.mxu0 %v6193_v46  ;;  %v1990_v41 = vld [vmem:[#allocation8 + $0xe08] sm:$0xff] }
 0x2fa   : > { %v1925_v38 = vld [vmem:[#allocation8 + $0xc00] sm:$0xff]  ;;  %3278 = vmatpush.msra.mxu2 %v1797_v25  ;;  %3303 = vmatpush.msrb.mxu0 %v1662_v5  ;;  %v1598_v63 = vld [vmem:[#allocation8 + $0x1c8] sm:$0xff] }
 0x2fb   : > { %3298 = vmatpush.msra.mxu3 %v1925_v38  ;;  %3279 = vmatmul.f32.vlgmr.msra.gmra.mxu2 %v6195_v10  ;;  %v1726_v0 = vld [vmem:[#allocation8 + $0x5c8] sm:$0xff] }
 0x2fc   : > { %3323 = vmatpush.msrb.mxu1 %v1790_v54  ;;  %3343 = vmatpush.msrb.mxu2 %v1918_v20  ;;  %v1854_v62 = vld [vmem:[#allocation8 + $0x9c8] sm:$0xff] }
 0x2fd   : > { %3363 = vmatpush.msrb.mxu3 %v2046_v43  ;;  %3259 = vmatmul.f32.vlgmr.msra.gmra.mxu1 %v6197_v44  ;;  %v1982_v36 = vld [vmem:[#allocation8 + $0xdc8] sm:$0xff] }
 0x2fe   : > { %3299 = vmatmul.f32.vlgmr.msra.gmra.mxu3 %v6199_v31  ;;  %3304 = vmatpush.msrb.mxu0 %v1654_v26  ;;  %v1590_v16 = vld [vmem:[#allocation8 + $0x188] sm:$0xff] }
 0x2ff   : > { %3324 = vmatpush.msrb.mxu1 %v1782_v6  ;;  %3344 = vmatpush.msrb.mxu2 %v1910_v15  ;;  %v1718_v56 = vld [vmem:[#allocation8 + $0x588] sm:$0xff] }
 0x300   : > { %3364 = vmatpush.msrb.mxu3 %v2038_v19  ;;  %3305 = vmatpush.msrb.mxu0 %v1646_v14  ;;  %v1846_v34 = vld [vmem:[#allocation8 + $0x988] sm:$0xff] }
 0x301   : > { %3325 = vmatpush.msrb.mxu1 %v1774_v40  ;;  %3345 = vmatpush.msrb.mxu2 %v1902_v45  ;;  %v1974_v3 = vld [vmem:[#allocation8 + $0xd88] sm:$0xff] }
 0x302   : > { %3365 = vmatpush.msrb.mxu3 %v2030_v37  ;;  %3306 = vmatpush.msrb.mxu0 %v1638_v48  ;;  %v1582_v12 = vld [vmem:[#allocation8 + $0x148] sm:$0xff] }
 0x303   : > { %3326 = vmatpush.msrb.mxu1 %v1766_v50  ;;  %3346 = vmatpush.msrb.mxu2 %v1894_v53  ;;  %v1710_v51 = vld [vmem:[#allocation8 + $0x548] sm:$0xff] }
 0x304   : > { %3366 = vmatpush.msrb.mxu3 %v2022_v59  ;;  %3307 = vmatpush.msrb.mxu0 %v1630_v49  ;;  %v1838_v18 = vld [vmem:[#allocation8 + $0x948] sm:$0xff] }
 0x305   : > { %3327 = vmatpush.msrb.mxu1 %v1758_v61  ;;  %3347 = vmatpush.msrb.mxu2 %v1886_v32  ;;  %v1966_v39 = vld [vmem:[#allocation8 + $0xd48] sm:$0xff]  ;;  %v1663_v32 = vld [vmem:[#allocation8 + $0x3d0] sm:$0xff] }
 0x306   : > { %3367 = vmatpush.msrb.mxu3 %v2014_v27  ;;  %3308 = vmatpush.msrb.mxu0 %v1622_v7  ;;  %v1574_v60 = vld [vmem:[#allocation8 + $0x108] sm:$0xff]  ;;  %v1791_v27 = vld [vmem:[#allocation8 + $0x7d0] sm:$0xff] }
 0x307   : > { %3328 = vmatpush.msrb.mxu1 %v1750_v1  ;;  %3348 = vmatpush.msrb.mxu2 %v1878_v2  ;;  %v1702_v9 = vld [vmem:[#allocation8 + $0x508] sm:$0xff]  ;;  %v1919_v7 = vld [vmem:[#allocation8 + $0xbd0] sm:$0xff] }
 0x308   : > { %3368 = vmatpush.msrb.mxu3 %v2006_v13  ;;  %3309 = vmatpush.msrb.mxu0 %v1614_v33  ;;  %v1830_v55 = vld [vmem:[#allocation8 + $0x908] sm:$0xff]  ;;  %v2047_v1 = vld [vmem:[#allocation8 + $0xfd0] sm:$0xff] }
 0x309   : > { %3329 = vmatpush.msrb.mxu1 %v1742_v21  ;;  %3349 = vmatpush.msrb.mxu2 %v1870_v52  ;;  %v1958_v28 = vld [vmem:[#allocation8 + $0xd08] sm:$0xff]  ;;  %v1655_v2 = vld [vmem:[#allocation8 + $0x390] sm:$0xff] }
 0x30a   : > { %3369 = vmatpush.msrb.mxu3 %v1998_v17  ;;  %3310 = vmatpush.msrb.mxu0 %v1606_v22  ;;  %v1566_v57 = vld [vmem:[#allocation8 + $0xc8] sm:$0xff]  ;;  %v1783_v13 = vld [vmem:[#allocation8 + $0x790] sm:$0xff] }
 0x30b   : > { %3330 = vmatpush.msrb.mxu1 %v1734_v58  ;;  %3350 = vmatpush.msrb.mxu2 %v1862_v47  ;;  %v1694_v25 = vld [vmem:[#allocation8 + $0x4c8] sm:$0xff]  ;;  %v1911_v33 = vld [vmem:[#allocation8 + $0xb90] sm:$0xff] }
 0x30c   : > { %3370 = vmatpush.msrb.mxu3 %v1990_v41  ;;  %3311 = vmatpush.msrb.mxu0 %v1598_v63  ;;  %v2911_v8 = vpop.f32.mrf.mxu0  ;;  %v1822_v5 = vld [vmem:[#allocation8 + $0x8c8] sm:$0xff]  ;;  %v2039_v21 = vld [vmem:[#allocation8 + $0xf90] sm:$0xff] }
 0x30d   : > { %3331 = vmatpush.msrb.mxu1 %v1726_v0  ;;  %3351 = vmatpush.msrb.mxu2 %v1854_v62  ;;  %v2931_v23 = vpop.f32.mrf.mxu1  ;;  %v1950_v54 = vld [vmem:[#allocation8 + $0xcc8] sm:$0xff]  ;;  %v1647_v52 = vld [vmem:[#allocation8 + $0x350] sm:$0xff] }
 0x30e   : > { %3371 = vmatpush.msrb.mxu3 %v1982_v36  ;;  %3312 = vmatpush.msrb.mxu0 %v1590_v16  ;;  %v2932_v38 = vadd.f32 %v2931_v23, %v2911_v8  ;;  %v1558_v20 = vld [vmem:[#allocation8 + $0x88] sm:$0xff]  ;;  %v1775_v17 = vld [vmem:[#allocation8 + $0x750] sm:$0xff] }
 0x30f   : > { %3332 = vmatpush.msrb.mxu1 %v1718_v56  ;;  %3352 = vmatpush.msrb.mxu2 %v1846_v34  ;;  %v1686_v43 = vld [vmem:[#allocation8 + $0x488] sm:$0xff]  ;;  %v1903_v22 = vld [vmem:[#allocation8 + $0xb50] sm:$0xff] }
 0x310   : > { %3372 = vmatpush.msrb.mxu3 %v1974_v3  ;;  %3313 = vmatpush.msrb.mxu0 %v1582_v12  ;;  %v2951_v26 = vpop.f32.mrf.mxu2  ;;  %v1814_v6 = vld [vmem:[#allocation8 + $0x888] sm:$0xff]  ;;  %v2031_v58 = vld [vmem:[#allocation8 + $0xf50] sm:$0xff] }
 0x311   : > { %3333 = vmatpush.msrb.mxu1 %v1710_v51  ;;  %3353 = vmatpush.msrb.mxu2 %v1838_v18  ;;  %v1942_v15 = vld [vmem:[#allocation8 + $0xc88] sm:$0xff]  ;;  %v2952_v19 = vadd.f32 %v2951_v26, %v2932_v38  ;;  %v1639_v47 = vld [vmem:[#allocation8 + $0x310] sm:$0xff] }
 0x312   : > { %3373 = vmatpush.msrb.mxu3 %v1966_v39  ;;  %3314 = vmatpush.msrb.mxu0 %v1574_v60  ;;  %v1550_v14 = vld [vmem:[#allocation8 + $0x48] sm:$0xff]  ;;  %v1767_v41 = vld [vmem:[#allocation8 + $0x710] sm:$0xff] }
 0x313   : > { %3334 = vmatpush.msrb.mxu1 %v1702_v9  ;;  %3354 = vmatpush.msrb.mxu2 %v1830_v55  ;;  %v1678_v40 = vld [vmem:[#allocation8 + $0x448] sm:$0xff]  ;;  %v2971_v48 = vpop.f32.mrf.mxu3  ;;  %v1895_v63 = vld [vmem:[#allocation8 + $0xb10] sm:$0xff] }
 0x314   : > { %3374 = vmatpush.msrb.mxu3 %v1958_v28  ;;  %3315 = vmatpush.msrb.mxu0 %v1566_v57  ;;  %v1806_v45 = vld [vmem:[#allocation8 + $0x848] sm:$0xff]  ;;  %v6213_v59 = vadd.f32 %v2971_v48, %v2952_v19  ;;  %v2023_v0 = vld [vmem:[#allocation8 + $0xf10] sm:$0xff] }
 0x315   : > { %3335 = vmatpush.msrb.mxu1 %v1694_v25  ;;  %3355 = vmatpush.msrb.mxu2 %v1822_v5  ;;  %v1934_v37 = vld [vmem:[#allocation8 + $0xc48] sm:$0xff]  ;;  %v1631_v62 = vld [vmem:[#allocation8 + $0x2d0] sm:$0xff] }
 0x316   : > { %3375 = vmatpush.msrb.mxu3 %v1950_v54  ;;  %3316 = vmatpush.msrb.mxu0 %v1558_v20  ;;  %v1542_v50 = vld [vmem:[#allocation8 + $0x8] sm:$0xff]  ;;  %v1759_v36 = vld [vmem:[#allocation8 + $0x6d0] sm:$0xff] }
 0x317   : > { %3336 = vmatpush.msrb.mxu1 %v1686_v43  ;;  %3356 = vmatpush.msrb.mxu2 %v1814_v6  ;;  %v1670_v53 = vld [vmem:[#allocation8 + $0x408] sm:$0xff]  ;;  %v1887_v16 = vld [vmem:[#allocation8 + $0xad0] sm:$0xff] }
 0x318   : > { %3376 = vmatpush.msrb.mxu3 %v1942_v15  ;;  %3317 = vmatpush.msrb.mxu0 %v1550_v14  ;;  %v1798_v49 = vld [vmem:[#allocation8 + $0x808] sm:$0xff]  ;;  %v2015_v56 = vld [vmem:[#allocation8 + $0xed0] sm:$0xff] }
 0x319   : > { %3337 = vmatpush.msrb.mxu1 %v1678_v40  ;;  %v1926_v61 = vld [vmem:[#allocation8 + $0xc08] sm:$0xff]  ;;  %3357 = vmatpush.msrb.mxu2 %v1806_v45  ;;  %v1623_v34 = vld [vmem:[#allocation8 + $0x290] sm:$0xff] }
 0x31a   : > { %3377 = vmatpush.msrb.mxu3 %v1934_v37  ;;  %3318 = vmatpush.msrb.mxu0 %v1542_v50  ;;  %v1751_v3 = vld [vmem:[#allocation8 + $0x690] sm:$0xff] }
 0x31b   : > { %3338 = vmatpush.msrb.mxu1 %v1670_v53  ;;  %3358 = vmatpush.msrb.mxu2 %v1798_v49  ;;  %v1879_v12 = vld [vmem:[#allocation8 + $0xa90] sm:$0xff] }
 0x31c   : > { %3378 = vmatpush.msrb.mxu3 %v1926_v61  ;;  %3319 = vmatmul.f32.vlgmr.msrb.gmra.mxu0 %v6193_v46  ;;  %v2007_v51 = vld [vmem:[#allocation8 + $0xe90] sm:$0xff] }
 0x31d   : > { %3359 = vmatmul.f32.vlgmr.msrb.gmra.mxu2 %v6195_v10  ;;  %3383 = vmatpush.msra.mxu0 %v1663_v32  ;;  %v1615_v18 = vld [vmem:[#allocation8 + $0x250] sm:$0xff] }
 0x31e   : > { %3403 = vmatpush.msra.mxu1 %v1791_v27  ;;  %3423 = vmatpush.msra.mxu2 %v1919_v7  ;;  %v1743_v39 = vld [vmem:[#allocation8 + $0x650] sm:$0xff] }
 0x31f   : > { %3443 = vmatpush.msra.mxu3 %v2047_v1  ;;  %3339 = vmatmul.f32.vlgmr.msrb.gmra.mxu1 %v6197_v44  ;;  %v1871_v60 = vld [vmem:[#allocation8 + $0xa50] sm:$0xff] }
 0x320   : > { %3379 = vmatmul.f32.vlgmr.msrb.gmra.mxu3 %v6199_v31  ;;  %3384 = vmatpush.msra.mxu0 %v1655_v2  ;;  %v1999_v9 = vld [vmem:[#allocation8 + $0xe50] sm:$0xff] }
 0x321   : > { %3404 = vmatpush.msra.mxu1 %v1783_v13  ;;  %3424 = vmatpush.msra.mxu2 %v1911_v33  ;;  %v1607_v8 = vld [vmem:[#allocation8 + $0x210] sm:$0xff] }
 0x322   : > { %3444 = vmatpush.msra.mxu3 %v2039_v21  ;;  %3385 = vmatpush.msra.mxu0 %v1647_v52  ;;  %v1735_v55 = vld [vmem:[#allocation8 + $0x610] sm:$0xff] }
 0x323   : > { %3405 = vmatpush.msra.mxu1 %v1775_v17  ;;  %3425 = vmatpush.msra.mxu2 %v1903_v22  ;;  %v1863_v28 = vld [vmem:[#allocation8 + $0xa10] sm:$0xff] }
 0x324   : > { %3445 = vmatpush.msra.mxu3 %v2031_v58  ;;  %3386 = vmatpush.msra.mxu0 %v1639_v47  ;;  %v1991_v23 = vld [vmem:[#allocation8 + $0xe10] sm:$0xff] }
 0x325   : > { %3406 = vmatpush.msra.mxu1 %v1767_v41  ;;  %3426 = vmatpush.msra.mxu2 %v1895_v63  ;;  %v1599_v57 = vld [vmem:[#allocation8 + $0x1d0] sm:$0xff] }
 0x326   : > { %3446 = vmatpush.msra.mxu3 %v2023_v0  ;;  %3387 = vmatpush.msra.mxu0 %v1631_v62  ;;  %v1727_v25 = vld [vmem:[#allocation8 + $0x5d0] sm:$0xff] }
 0x327   : > { %3407 = vmatpush.msra.mxu1 %v1759_v36  ;;  %3427 = vmatpush.msra.mxu2 %v1887_v16  ;;  %v1855_v38 = vld [vmem:[#allocation8 + $0x9d0] sm:$0xff] }
 0x328   : > { %3447 = vmatpush.msra.mxu3 %v2015_v56  ;;  %3388 = vmatpush.msra.mxu0 %v1623_v34  ;;  %v1983_v5 = vld [vmem:[#allocation8 + $0xdd0] sm:$0xff]  ;;  %v1664_v56 = vld [vmem:[#allocation8 + $0x3d8] sm:$0xff] }
 0x329   : > { %3408 = vmatpush.msra.mxu1 %v1751_v3  ;;  %3428 = vmatpush.msra.mxu2 %v1879_v12  ;;  %v1591_v54 = vld [vmem:[#allocation8 + $0x190] sm:$0xff]  ;;  %v1792_v34 = vld [vmem:[#allocation8 + $0x7d8] sm:$0xff] }
 0x32a   : > { %3448 = vmatpush.msra.mxu3 %v2007_v51  ;;  %3389 = vmatpush.msra.mxu0 %v1615_v18  ;;  %v1719_v20 = vld [vmem:[#allocation8 + $0x590] sm:$0xff]  ;;  %v1920_v3 = vld [vmem:[#allocation8 + $0xbd8] sm:$0xff] }
 0x32b   : > { %3409 = vmatpush.msra.mxu1 %v1743_v39  ;;  %3429 = vmatpush.msra.mxu2 %v1871_v60  ;;  %v1847_v43 = vld [vmem:[#allocation8 + $0x990] sm:$0xff]  ;;  %v2991_v37 = vpop.f32.mrf.mxu0  ;;  %v2048_v12 = vld [vmem:[#allocation8 + $0xfd8] sm:$0xff] }
 0x32c   : > { %3449 = vmatpush.msra.mxu3 %v1999_v9  ;;  %3390 = vmatpush.msra.mxu0 %v1607_v8  ;;  %v1975_v26 = vld [vmem:[#allocation8 + $0xd90] sm:$0xff]  ;;  %v3011_v53 = vpop.f32.mrf.mxu1  ;;  %v1656_v51 = vld [vmem:[#allocation8 + $0x398] sm:$0xff] }
 0x32d   : > { %3410 = vmatpush.msra.mxu1 %v1735_v55  ;;  %3430 = vmatpush.msra.mxu2 %v1863_v28  ;;  %v1583_v6 = vld [vmem:[#allocation8 + $0x150] sm:$0xff]  ;;  %v3012_v32 = vadd.f32 %v3011_v53, %v2991_v37  ;;  %v1784_v18 = vld [vmem:[#allocation8 + $0x798] sm:$0xff] }
 0x32e   : > { %3450 = vmatpush.msra.mxu3 %v1991_v23  ;;  %3391 = vmatpush.msra.mxu0 %v1599_v57  ;;  %v1711_v15 = vld [vmem:[#allocation8 + $0x550] sm:$0xff]  ;;  %v1912_v39 = vld [vmem:[#allocation8 + $0xb98] sm:$0xff] }
 0x32f   : > { %3411 = vmatpush.msra.mxu1 %v1727_v25  ;;  %3431 = vmatpush.msra.mxu2 %v1855_v38  ;;  %v1839_v19 = vld [vmem:[#allocation8 + $0x950] sm:$0xff]  ;;  %v2040_v60 = vld [vmem:[#allocation8 + $0xf98] sm:$0xff] }
 0x330   : > { %3451 = vmatpush.msra.mxu3 %v1983_v5  ;;  %3392 = vmatpush.msra.mxu0 %v1591_v54  ;;  %v1967_v14 = vld [vmem:[#allocation8 + $0xd50] sm:$0xff]  ;;  %v3031_v13 = vpop.f32.mrf.mxu2  ;;  %v1648_v9 = vld [vmem:[#allocation8 + $0x358] sm:$0xff] }
 0x331   : > { %3412 = vmatpush.msra.mxu1 %v1719_v20  ;;  %3432 = vmatpush.msra.mxu2 %v1847_v43  ;;  %v1575_v40 = vld [vmem:[#allocation8 + $0x110] sm:$0xff]  ;;  %v3032_v52 = vadd.f32 %v3031_v13, %v3012_v32  ;;  %v1776_v8 = vld [vmem:[#allocation8 + $0x758] sm:$0xff] }
 0x332   : > { %3452 = vmatpush.msra.mxu3 %v1975_v26  ;;  %v1703_v45 = vld [vmem:[#allocation8 + $0x510] sm:$0xff]  ;;  %3393 = vmatpush.msra.mxu0 %v1583_v6  ;;  %v1904_v55 = vld [vmem:[#allocation8 + $0xb58] sm:$0xff] }
 0x333   : > { %3413 = vmatpush.msra.mxu1 %v1711_v15  ;;  %v1831_v48 = vld [vmem:[#allocation8 + $0x910] sm:$0xff]  ;;  %3433 = vmatpush.msra.mxu2 %v1839_v19  ;;  %v2032_v28 = vld [vmem:[#allocation8 + $0xf58] sm:$0xff] }
 0x334   : > { %v1959_v50 = vld [vmem:[#allocation8 + $0xd10] sm:$0xff]  ;;  %3453 = vmatpush.msra.mxu3 %v1967_v14  ;;  %3394 = vmatpush.msra.mxu0 %v1575_v40  ;;  %v3051_v41 = vpop.f32.mrf.mxu3  ;;  %v1640_v23 = vld [vmem:[#allocation8 + $0x318] sm:$0xff] }
 0x335   : > { %v1567_v49 = vld [vmem:[#allocation8 + $0xd0] sm:$0xff]  ;;  %3414 = vmatpush.msra.mxu1 %v1703_v45  ;;  %3434 = vmatpush.msra.mxu2 %v1831_v48  ;;  %v6219_v62 = vadd.f32 %v3051_v41, %v3032_v52  ;;  %v1768_v57 = vld [vmem:[#allocation8 + $0x718] sm:$0xff] }
 0x336   : > { %v1695_v61 = vld [vmem:[#allocation8 + $0x4d0] sm:$0xff]  ;;  %3454 = vmatpush.msra.mxu3 %v1959_v50  ;;  %3395 = vmatpush.msra.mxu0 %v1567_v49  ;;  %v1896_v25 = vld [vmem:[#allocation8 + $0xb18] sm:$0xff] }
 0x337   : > { %v1823_v27 = vld [vmem:[#allocation8 + $0x8d0] sm:$0xff]  ;;  %3415 = vmatpush.msra.mxu1 %v1695_v61  ;;  %v2024_v38 = vld [vmem:[#allocation8 + $0xf18] sm:$0xff] }
 0x338   : > { %v1951_v7 = vld [vmem:[#allocation8 + $0xcd0] sm:$0xff]  ;;  %3435 = vmatpush.msra.mxu2 %v1823_v27  ;;  %v1632_v5 = vld [vmem:[#allocation8 + $0x2d8] sm:$0xff] }
 0x339   : > { %v1559_v1 = vld [vmem:[#allocation8 + $0x90] sm:$0xff]  ;;  %3455 = vmatpush.msra.mxu3 %v1951_v7  ;;  %v1760_v54 = vld [vmem:[#allocation8 + $0x6d8] sm:$0xff] }
 0x33a   : > { %v1687_v2 = vld [vmem:[#allocation8 + $0x490] sm:$0xff]  ;;  %3396 = vmatpush.msra.mxu0 %v1559_v1  ;;  %v1888_v20 = vld [vmem:[#allocation8 + $0xad8] sm:$0xff] }
 0x33b   : > { %v1815_v33 = vld [vmem:[#allocation8 + $0x890] sm:$0xff]  ;;  %3416 = vmatpush.msra.mxu1 %v1687_v2  ;;  %v2016_v43 = vld [vmem:[#allocation8 + $0xed8] sm:$0xff] }
 0x33c   : > { %v1943_v21 = vld [vmem:[#allocation8 + $0xc90] sm:$0xff]  ;;  %3436 = vmatpush.msra.mxu2 %v1815_v33  ;;  %v1624_v26 = vld [vmem:[#allocation8 + $0x298] sm:$0xff] }
 0x33d   : > { %v1551_v17 = vld [vmem:[#allocation8 + $0x50] sm:$0xff]  ;;  %3456 = vmatpush.msra.mxu3 %v1943_v21  ;;  %v1752_v6 = vld [vmem:[#allocation8 + $0x698] sm:$0xff] }
 0x33e   : > { %v1679_v22 = vld [vmem:[#allocation8 + $0x450] sm:$0xff]  ;;  %3397 = vmatpush.msra.mxu0 %v1551_v17  ;;  %v1880_v15 = vld [vmem:[#allocation8 + $0xa98] sm:$0xff] }
 0x33f   : > { %v1807_v58 = vld [vmem:[#allocation8 + $0x850] sm:$0xff]  ;;  %3417 = vmatpush.msra.mxu1 %v1679_v22  ;;  %v2008_v19 = vld [vmem:[#allocation8 + $0xe98] sm:$0xff] }
 0x340   : > { %v1935_v47 = vld [vmem:[#allocation8 + $0xc50] sm:$0xff]  ;;  %3437 = vmatpush.msra.mxu2 %v1807_v58  ;;  %v1616_v14 = vld [vmem:[#allocation8 + $0x258] sm:$0xff] }
 0x341   : > { %v1543_v63 = vld [vmem:[#allocation8 + $0x10] sm:$0xff]  ;;  %3457 = vmatpush.msra.mxu3 %v1935_v47  ;;  %v1744_v40 = vld [vmem:[#allocation8 + $0x658] sm:$0xff] }
 0x342   : > { %v1671_v0 = vld [vmem:[#allocation8 + $0x410] sm:$0xff]  ;;  %3398 = vmatpush.msra.mxu0 %v1543_v63  ;;  %v1872_v45 = vld [vmem:[#allocation8 + $0xa58] sm:$0xff] }
 0x343   : > { %v1799_v36 = vld [vmem:[#allocation8 + $0x810] sm:$0xff]  ;;  %3418 = vmatpush.msra.mxu1 %v1671_v0  ;;  %3399 = vmatmul.f32.vlgmr.msra.gmra.mxu0 %v6193_v46  ;;  %v2000_v37 = vld [vmem:[#allocation8 + $0xe58] sm:$0xff] }
 0x344   : > { %v1927_v16 = vld [vmem:[#allocation8 + $0xc10] sm:$0xff]  ;;  %3438 = vmatpush.msra.mxu2 %v1799_v36  ;;  %3463 = vmatpush.msrb.mxu0 %v1664_v56  ;;  %v1608_v48 = vld [vmem:[#allocation8 + $0x218] sm:$0xff] }
 0x345   : > { %3458 = vmatpush.msra.mxu3 %v1927_v16  ;;  %3439 = vmatmul.f32.vlgmr.msra.gmra.mxu2 %v6195_v10  ;;  %v1736_v50 = vld [vmem:[#allocation8 + $0x618] sm:$0xff] }
 0x346   : > { %3483 = vmatpush.msrb.mxu1 %v1792_v34  ;;  %3503 = vmatpush.msrb.mxu2 %v1920_v3  ;;  %v1864_v53 = vld [vmem:[#allocation8 + $0xa18] sm:$0xff] }
 0x347   : > { %3523 = vmatpush.msrb.mxu3 %v2048_v12  ;;  %3419 = vmatmul.f32.vlgmr.msra.gmra.mxu1 %v6197_v44  ;;  %v1992_v49 = vld [vmem:[#allocation8 + $0xe18] sm:$0xff] }
 0x348   : > { %3459 = vmatmul.f32.vlgmr.msra.gmra.mxu3 %v6199_v31  ;;  %3464 = vmatpush.msrb.mxu0 %v1656_v51  ;;  %v1600_v61 = vld [vmem:[#allocation8 + $0x1d8] sm:$0xff] }
 0x349   : > { %3484 = vmatpush.msrb.mxu1 %v1784_v18  ;;  %3504 = vmatpush.msrb.mxu2 %v1912_v39  ;;  %v1728_v32 = vld [vmem:[#allocation8 + $0x5d8] sm:$0xff] }
 0x34a   : > { %3524 = vmatpush.msrb.mxu3 %v2040_v60  ;;  %3465 = vmatpush.msrb.mxu0 %v1648_v9  ;;  %v1856_v27 = vld [vmem:[#allocation8 + $0x9d8] sm:$0xff] }
 0x34b   : > { %3485 = vmatpush.msrb.mxu1 %v1776_v8  ;;  %3505 = vmatpush.msrb.mxu2 %v1904_v55  ;;  %v1984_v7 = vld [vmem:[#allocation8 + $0xdd8] sm:$0xff] }
 0x34c   : > { %3525 = vmatpush.msrb.mxu3 %v2032_v28  ;;  %3466 = vmatpush.msrb.mxu0 %v1640_v23  ;;  %v1592_v1 = vld [vmem:[#allocation8 + $0x198] sm:$0xff]  ;;  %v3071_v41 = vpop.f32.mrf.mxu0 }
 0x34d   : > { %3486 = vmatpush.msrb.mxu1 %v1768_v57  ;;  %3506 = vmatpush.msrb.mxu2 %v1896_v25  ;;  %v1720_v2 = vld [vmem:[#allocation8 + $0x598] sm:$0xff] }
 0x34e   : > { %3526 = vmatpush.msrb.mxu3 %v2024_v38  ;;  %3467 = vmatpush.msrb.mxu0 %v1632_v5  ;;  %v1848_v13 = vld [vmem:[#allocation8 + $0x998] sm:$0xff] }
 0x34f   : > { %3487 = vmatpush.msrb.mxu1 %v1760_v54  ;;  %3507 = vmatpush.msrb.mxu2 %v1888_v20  ;;  %v1976_v33 = vld [vmem:[#allocation8 + $0xd98] sm:$0xff]  ;;  %v3091_v36 = vpop.f32.mrf.mxu1 }
 0x350   : > { %3527 = vmatpush.msrb.mxu3 %v2016_v43  ;;  %3468 = vmatpush.msrb.mxu0 %v1624_v26  ;;  %v1584_v21 = vld [vmem:[#allocation8 + $0x158] sm:$0xff]  ;;  %v3092_v34 = vadd.f32 %v3091_v36, %v3071_v41  ;;  %v1665_v26 = vld [vmem:[#allocation8 + $0x3e0] sm:$0xff] }
 0x351   : > { %3488 = vmatpush.msrb.mxu1 %v1752_v6  ;;  %3508 = vmatpush.msrb.mxu2 %v1880_v15  ;;  %v1712_v52 = vld [vmem:[#allocation8 + $0x558] sm:$0xff]  ;;  %v1793_v6 = vld [vmem:[#allocation8 + $0x7e0] sm:$0xff] }
 0x352   : > { %3528 = vmatpush.msrb.mxu3 %v2008_v19  ;;  %3469 = vmatpush.msrb.mxu0 %v1616_v14  ;;  %v1840_v17 = vld [vmem:[#allocation8 + $0x958] sm:$0xff]  ;;  %v1921_v15 = vld [vmem:[#allocation8 + $0xbe0] sm:$0xff] }
 0x353   : > { %3489 = vmatpush.msrb.mxu1 %v1744_v40  ;;  %3509 = vmatpush.msrb.mxu2 %v1872_v45  ;;  %v1968_v22 = vld [vmem:[#allocation8 + $0xd58] sm:$0xff]  ;;  %v2049_v19 = vld [vmem:[#allocation8 + $0xfe0] sm:$0xff] }
 0x354   : > { %3529 = vmatpush.msrb.mxu3 %v2000_v37  ;;  %3470 = vmatpush.msrb.mxu0 %v1608_v48  ;;  %v1576_v58 = vld [vmem:[#allocation8 + $0x118] sm:$0xff]  ;;  %v3111_v39 = vpop.f32.mrf.mxu2  ;;  %v1657_v14 = vld [vmem:[#allocation8 + $0x3a0] sm:$0xff] }
 0x355   : > { %3490 = vmatpush.msrb.mxu1 %v1736_v50  ;;  %3510 = vmatpush.msrb.mxu2 %v1864_v53  ;;  %v1704_v47 = vld [vmem:[#allocation8 + $0x518] sm:$0xff]  ;;  %v3112_v8 = vadd.f32 %v3111_v39, %v3092_v34  ;;  %v1785_v40 = vld [vmem:[#allocation8 + $0x7a0] sm:$0xff] }
 0x356   : > { %3530 = vmatpush.msrb.mxu3 %v1992_v49  ;;  %3471 = vmatpush.msrb.mxu0 %v1600_v61  ;;  %v1832_v63 = vld [vmem:[#allocation8 + $0x918] sm:$0xff]  ;;  %v1913_v45 = vld [vmem:[#allocation8 + $0xba0] sm:$0xff] }
 0x357   : > { %3491 = vmatpush.msrb.mxu1 %v1728_v32  ;;  %3511 = vmatpush.msrb.mxu2 %v1856_v27  ;;  %v1960_v0 = vld [vmem:[#allocation8 + $0xd18] sm:$0xff]  ;;  %v3131_v25 = vpop.f32.mrf.mxu3  ;;  %v2041_v37 = vld [vmem:[#allocation8 + $0xfa0] sm:$0xff] }
 0x358   : > { %3531 = vmatpush.msrb.mxu3 %v1984_v7  ;;  %3472 = vmatpush.msrb.mxu0 %v1592_v1  ;;  %v1568_v16 = vld [vmem:[#allocation8 + $0xd8] sm:$0xff]  ;;  %v6225_v54 = vadd.f32 %v3131_v25, %v3112_v8  ;;  %v1649_v48 = vld [vmem:[#allocation8 + $0x360] sm:$0xff] }
 0x359   : > { %3492 = vmatpush.msrb.mxu1 %v1720_v2  ;;  %3512 = vmatpush.msrb.mxu2 %v1848_v13  ;;  %v1696_v56 = vld [vmem:[#allocation8 + $0x4d8] sm:$0xff]  ;;  %v1777_v50 = vld [vmem:[#allocation8 + $0x760] sm:$0xff] }
 0x35a   : > { %3532 = vmatpush.msrb.mxu3 %v1976_v33  ;;  %3473 = vmatpush.msrb.mxu0 %v1584_v21  ;;  %v1824_v3 = vld [vmem:[#allocation8 + $0x8d8] sm:$0xff]  ;;  %v1905_v53 = vld [vmem:[#allocation8 + $0xb60] sm:$0xff] }
 0x35b   : > { %3493 = vmatpush.msrb.mxu1 %v1712_v52  ;;  %3513 = vmatpush.msrb.mxu2 %v1840_v17  ;;  %v1952_v12 = vld [vmem:[#allocation8 + $0xcd8] sm:$0xff]  ;;  %v2033_v49 = vld [vmem:[#allocation8 + $0xf60] sm:$0xff] }
 0x35c   : > { %3533 = vmatpush.msrb.mxu3 %v1968_v22  ;;  %3474 = vmatpush.msrb.mxu0 %v1576_v58  ;;  %v1560_v51 = vld [vmem:[#allocation8 + $0x98] sm:$0xff]  ;;  %v1641_v61 = vld [vmem:[#allocation8 + $0x320] sm:$0xff] }
 0x35d   : > { %3494 = vmatpush.msrb.mxu1 %v1704_v47  ;;  %3514 = vmatpush.msrb.mxu2 %v1832_v63  ;;  %v1688_v18 = vld [vmem:[#allocation8 + $0x498] sm:$0xff]  ;;  %v1769_v32 = vld [vmem:[#allocation8 + $0x720] sm:$0xff] }
 0x35e   : > { %3534 = vmatpush.msrb.mxu3 %v1960_v0  ;;  %3475 = vmatpush.msrb.mxu0 %v1568_v16  ;;  %v1816_v60 = vld [vmem:[#allocation8 + $0x898] sm:$0xff]  ;;  %v1897_v27 = vld [vmem:[#allocation8 + $0xb20] sm:$0xff] }
 0x35f   : > { %3495 = vmatpush.msrb.mxu1 %v1696_v56  ;;  %v1944_v9 = vld [vmem:[#allocation8 + $0xc98] sm:$0xff]  ;;  %3515 = vmatpush.msrb.mxu2 %v1824_v3  ;;  %v2025_v7 = vld [vmem:[#allocation8 + $0xf20] sm:$0xff] }
 0x360   : > { %3535 = vmatpush.msrb.mxu3 %v1952_v12  ;;  %v1552_v55 = vld [vmem:[#allocation8 + $0x58] sm:$0xff]  ;;  %3476 = vmatpush.msrb.mxu0 %v1560_v51  ;;  %v1633_v1 = vld [vmem:[#allocation8 + $0x2e0] sm:$0xff] }
 0x361   : > { %v1680_v28 = vld [vmem:[#allocation8 + $0x458] sm:$0xff]  ;;  %3496 = vmatpush.msrb.mxu1 %v1688_v18  ;;  %3516 = vmatpush.msrb.mxu2 %v1816_v60  ;;  %v1761_v2 = vld [vmem:[#allocation8 + $0x6e0] sm:$0xff] }
 0x362   : > { %v1808_v23 = vld [vmem:[#allocation8 + $0x858] sm:$0xff]  ;;  %3536 = vmatpush.msrb.mxu3 %v1944_v9  ;;  %3477 = vmatpush.msrb.mxu0 %v1552_v55  ;;  %v1889_v13 = vld [vmem:[#allocation8 + $0xae0] sm:$0xff] }
 0x363   : > { %v1936_v57 = vld [vmem:[#allocation8 + $0xc58] sm:$0xff]  ;;  %3497 = vmatpush.msrb.mxu1 %v1680_v28  ;;  %3517 = vmatpush.msrb.mxu2 %v1808_v23  ;;  %v2017_v33 = vld [vmem:[#allocation8 + $0xee0] sm:$0xff] }
 0x364   : > { %v1544_v38 = vld [vmem:[#allocation8 + $0x18] sm:$0xff]  ;;  %3537 = vmatpush.msrb.mxu3 %v1936_v57  ;;  %v1625_v21 = vld [vmem:[#allocation8 + $0x2a0] sm:$0xff] }
 0x365   : > { %v1672_v5 = vld [vmem:[#allocation8 + $0x418] sm:$0xff]  ;;  %3478 = vmatpush.msrb.mxu0 %v1544_v38  ;;  %v1753_v52 = vld [vmem:[#allocation8 + $0x6a0] sm:$0xff] }
 0x366   : > { %v1800_v20 = vld [vmem:[#allocation8 + $0x818] sm:$0xff]  ;;  %3498 = vmatpush.msrb.mxu1 %v1672_v5  ;;  %3479 = vmatmul.f32.vlgmr.msrb.gmra.mxu0 %v6193_v46  ;;  %v1881_v17 = vld [vmem:[#allocation8 + $0xaa0] sm:$0xff] }
 0x367   : > { %v1928_v43 = vld [vmem:[#allocation8 + $0xc18] sm:$0xff]  ;;  %3518 = vmatpush.msrb.mxu2 %v1800_v20  ;;  %3543 = vmatpush.msra.mxu0 %v1665_v26  ;;  %v2009_v22 = vld [vmem:[#allocation8 + $0xea0] sm:$0xff] }
 0x368   : > { %3538 = vmatpush.msrb.mxu3 %v1928_v43  ;;  %3519 = vmatmul.f32.vlgmr.msrb.gmra.mxu2 %v6195_v10  ;;  %v1617_v58 = vld [vmem:[#allocation8 + $0x260] sm:$0xff] }
 0x369   : > { %3563 = vmatpush.msra.mxu1 %v1793_v6  ;;  %3583 = vmatpush.msra.mxu2 %v1921_v15  ;;  %v1745_v47 = vld [vmem:[#allocation8 + $0x660] sm:$0xff] }
 0x36a   : > { %3603 = vmatpush.msra.mxu3 %v2049_v19  ;;  %3499 = vmatmul.f32.vlgmr.msrb.gmra.mxu1 %v6197_v44  ;;  %v1873_v41 = vld [vmem:[#allocation8 + $0xa60] sm:$0xff] }
 0x36b   : > { %3539 = vmatmul.f32.vlgmr.msrb.gmra.mxu3 %v6199_v31  ;;  %3544 = vmatpush.msra.mxu0 %v1657_v14  ;;  %v2001_v63 = vld [vmem:[#allocation8 + $0xe60] sm:$0xff]  ;;  %v3151_v18 = vpop.f32.mrf.mxu0 }
 0x36c   : > { %3564 = vmatpush.msra.mxu1 %v1785_v40  ;;  %3584 = vmatpush.msra.mxu2 %v1913_v45  ;;  %v1609_v0 = vld [vmem:[#allocation8 + $0x220] sm:$0xff] }
 0x36d   : > { %3604 = vmatpush.msra.mxu3 %v2041_v37  ;;  %3545 = vmatpush.msra.mxu0 %v1649_v48  ;;  %v1737_v36 = vld [vmem:[#allocation8 + $0x620] sm:$0xff] }
 0x36e   : > { %3565 = vmatpush.msra.mxu1 %v1777_v50  ;;  %3585 = vmatpush.msra.mxu2 %v1905_v53  ;;  %v1865_v16 = vld [vmem:[#allocation8 + $0xa20] sm:$0xff] }
 0x36f   : > { %3605 = vmatpush.msra.mxu3 %v2033_v49  ;;  %3546 = vmatpush.msra.mxu0 %v1641_v61  ;;  %v1993_v56 = vld [vmem:[#allocation8 + $0xe20] sm:$0xff]  ;;  %v3171_v39 = vpop.f32.mrf.mxu1 }
 0x370   : > { %3566 = vmatpush.msra.mxu1 %v1769_v32  ;;  %3586 = vmatpush.msra.mxu2 %v1897_v27  ;;  %v1601_v34 = vld [vmem:[#allocation8 + $0x1e0] sm:$0xff]  ;;  %v3172_v8 = vadd.f32 %v3171_v39, %v3151_v18  ;;  %v2026_v18 = vld [vmem:[#allocation8 + $0xf28] sm:$0xff] }
 0x371   : > { %3606 = vmatpush.msra.mxu3 %v2025_v7  ;;  %3547 = vmatpush.msra.mxu0 %v1633_v1  ;;  %v1729_v3 = vld [vmem:[#allocation8 + $0x5e0] sm:$0xff]  ;;  %v1634_v39 = vld [vmem:[#allocation8 + $0x2e8] sm:$0xff] }
 0x372   : > { %3567 = vmatpush.msra.mxu1 %v1761_v2  ;;  %3587 = vmatpush.msra.mxu2 %v1889_v13  ;;  %v1857_v12 = vld [vmem:[#allocation8 + $0x9e0] sm:$0xff]  ;;  %v3191_v25 = vpop.f32.mrf.mxu2 }
 0x373   : > { %3607 = vmatpush.msra.mxu3 %v2017_v33  ;;  %3548 = vmatpush.msra.mxu0 %v1625_v21  ;;  %v1985_v51 = vld [vmem:[#allocation8 + $0xde0] sm:$0xff]  ;;  %v3192_v20 = vadd.f32 %v3191_v25, %v3172_v8  ;;  %v2018_v8 = vld [vmem:[#allocation8 + $0xee8] sm:$0xff] }
 0x374   : > { %3568 = vmatpush.msra.mxu1 %v1753_v52  ;;  %3588 = vmatpush.msra.mxu2 %v1881_v17  ;;  %v1593_v60 = vld [vmem:[#allocation8 + $0x1a0] sm:$0xff]  ;;  %v1666_v52 = vld [vmem:[#allocation8 + $0x3e8] sm:$0xff] }
 0x375   : > { %3608 = vmatpush.msra.mxu3 %v2009_v22  ;;  %3549 = vmatpush.msra.mxu0 %v1617_v58  ;;  %v1721_v9 = vld [vmem:[#allocation8 + $0x5a0] sm:$0xff]  ;;  %v3211_v19 = vpop.f32.mrf.mxu3  ;;  %v1794_v17 = vld [vmem:[#allocation8 + $0x7e8] sm:$0xff] }
 0x376   : > { %3569 = vmatpush.msra.mxu1 %v1745_v47  ;;  %3589 = vmatpush.msra.mxu2 %v1873_v41  ;;  %v1849_v55 = vld [vmem:[#allocation8 + $0x9a0] sm:$0xff]  ;;  %v6231_v45 = vadd.f32 %v3211_v19, %v3192_v20  ;;  %v1922_v22 = vld [vmem:[#allocation8 + $0xbe8] sm:$0xff] }
 0x377   : > { %3609 = vmatpush.msra.mxu3 %v2001_v63  ;;  %3550 = vmatpush.msra.mxu0 %v1609_v0  ;;  %v1977_v28 = vld [vmem:[#allocation8 + $0xda0] sm:$0xff]  ;;  %v2050_v58 = vld [vmem:[#allocation8 + $0xfe8] sm:$0xff] }
 0x378   : > { %3570 = vmatpush.msra.mxu1 %v1737_v36  ;;  %3590 = vmatpush.msra.mxu2 %v1865_v16  ;;  %v1585_v23 = vld [vmem:[#allocation8 + $0x160] sm:$0xff]  ;;  %v1658_v47 = vld [vmem:[#allocation8 + $0x3a8] sm:$0xff] }
 0x379   : > { %3610 = vmatpush.msra.mxu3 %v1993_v56  ;;  %3551 = vmatpush.msra.mxu0 %v1601_v34  ;;  %v1713_v57 = vld [vmem:[#allocation8 + $0x560] sm:$0xff]  ;;  %v1786_v41 = vld [vmem:[#allocation8 + $0x7a8] sm:$0xff] }
 0x37a   : > { %3571 = vmatpush.msra.mxu1 %v1729_v3  ;;  %3591 = vmatpush.msra.mxu2 %v1857_v12  ;;  %v1841_v38 = vld [vmem:[#allocation8 + $0x960] sm:$0xff]  ;;  %v1914_v63 = vld [vmem:[#allocation8 + $0xba8] sm:$0xff] }
 0x37b   : > { %3611 = vmatpush.msra.mxu3 %v1985_v51  ;;  %3552 = vmatpush.msra.mxu0 %v1593_v60  ;;  %v1969_v5 = vld [vmem:[#allocation8 + $0xd60] sm:$0xff]  ;;  %v2042_v0 = vld [vmem:[#allocation8 + $0xfa8] sm:$0xff] }
 0x37c   : > { %3572 = vmatpush.msra.mxu1 %v1721_v9  ;;  %3592 = vmatpush.msra.mxu2 %v1849_v55  ;;  %v1577_v43 = vld [vmem:[#allocation8 + $0x120] sm:$0xff]  ;;  %v1650_v36 = vld [vmem:[#allocation8 + $0x368] sm:$0xff] }
 0x37d   : > { %3612 = vmatpush.msra.mxu3 %v1977_v28  ;;  %v1705_v26 = vld [vmem:[#allocation8 + $0x520] sm:$0xff]  ;;  %3553 = vmatpush.msra.mxu0 %v1585_v23  ;;  %v1778_v16 = vld [vmem:[#allocation8 + $0x768] sm:$0xff] }
 0x37e   : > { %3573 = vmatpush.msra.mxu1 %v1713_v57  ;;  %v1833_v6 = vld [vmem:[#allocation8 + $0x920] sm:$0xff]  ;;  %3593 = vmatpush.msra.mxu2 %v1841_v38  ;;  %v1906_v56 = vld [vmem:[#allocation8 + $0xb68] sm:$0xff] }
 0x37f   : > { %v1961_v15 = vld [vmem:[#allocation8 + $0xd20] sm:$0xff]  ;;  %3613 = vmatpush.msra.mxu3 %v1969_v5  ;;  %3554 = vmatpush.msra.mxu0 %v1577_v43  ;;  %v2034_v34 = vld [vmem:[#allocation8 + $0xf68] sm:$0xff] }
 0x380   : > { %v1569_v14 = vld [vmem:[#allocation8 + $0xe0] sm:$0xff]  ;;  %3574 = vmatpush.msra.mxu1 %v1705_v26  ;;  %3594 = vmatpush.msra.mxu2 %v1833_v6  ;;  %v1642_v3 = vld [vmem:[#allocation8 + $0x328] sm:$0xff] }
 0x381   : > { %v1697_v40 = vld [vmem:[#allocation8 + $0x4e0] sm:$0xff]  ;;  %3614 = vmatpush.msra.mxu3 %v1961_v15  ;;  %3555 = vmatpush.msra.mxu0 %v1569_v14  ;;  %v1770_v12 = vld [vmem:[#allocation8 + $0x728] sm:$0xff] }
 0x382   : > { %v1825_v37 = vld [vmem:[#allocation8 + $0x8e0] sm:$0xff]  ;;  %3575 = vmatpush.msra.mxu1 %v1697_v40  ;;  %v1898_v51 = vld [vmem:[#allocation8 + $0xb28] sm:$0xff] }
 0x383   : > { %v1953_v48 = vld [vmem:[#allocation8 + $0xce0] sm:$0xff]  ;;  %3595 = vmatpush.msra.mxu2 %v1825_v37  ;;  %v1762_v60 = vld [vmem:[#allocation8 + $0x6e8] sm:$0xff] }
 0x384   : > { %v1561_v50 = vld [vmem:[#allocation8 + $0xa0] sm:$0xff]  ;;  %3615 = vmatpush.msra.mxu3 %v1953_v48  ;;  %v1890_v9 = vld [vmem:[#allocation8 + $0xae8] sm:$0xff] }
 0x385   : > { %v1689_v53 = vld [vmem:[#allocation8 + $0x4a0] sm:$0xff]  ;;  %3556 = vmatpush.msra.mxu0 %v1561_v50  ;;  %v1626_v55 = vld [vmem:[#allocation8 + $0x2a8] sm:$0xff] }
 0x386   : > { %v1817_v49 = vld [vmem:[#allocation8 + $0x8a0] sm:$0xff]  ;;  %3576 = vmatpush.msra.mxu1 %v1689_v53  ;;  %v1754_v28 = vld [vmem:[#allocation8 + $0x6a8] sm:$0xff] }
 0x387   : > { %v1945_v61 = vld [vmem:[#allocation8 + $0xca0] sm:$0xff]  ;;  %3596 = vmatpush.msra.mxu2 %v1817_v49  ;;  %v1882_v23 = vld [vmem:[#allocation8 + $0xaa8] sm:$0xff] }
 0x388   : > { %v1553_v32 = vld [vmem:[#allocation8 + $0x60] sm:$0xff]  ;;  %3616 = vmatpush.msra.mxu3 %v1945_v61  ;;  %v2010_v57 = vld [vmem:[#allocation8 + $0xea8] sm:$0xff] }
 0x389   : > { %v1681_v27 = vld [vmem:[#allocation8 + $0x460] sm:$0xff]  ;;  %3557 = vmatpush.msra.mxu0 %v1553_v32  ;;  %v1618_v25 = vld [vmem:[#allocation8 + $0x268] sm:$0xff] }
 0x38a   : > { %v1809_v7 = vld [vmem:[#allocation8 + $0x860] sm:$0xff]  ;;  %3577 = vmatpush.msra.mxu1 %v1681_v27  ;;  %v1746_v38 = vld [vmem:[#allocation8 + $0x668] sm:$0xff] }
 0x38b   : > { %v1937_v1 = vld [vmem:[#allocation8 + $0xc60] sm:$0xff]  ;;  %3597 = vmatpush.msra.mxu2 %v1809_v7  ;;  %v1874_v5 = vld [vmem:[#allocation8 + $0xa68] sm:$0xff] }
 0x38c   : > { %v1545_v2 = vld [vmem:[#allocation8 + $0x20] sm:$0xff]  ;;  %3617 = vmatpush.msra.mxu3 %v1937_v1  ;;  %v2002_v20 = vld [vmem:[#allocation8 + $0xe68] sm:$0xff] }
 0x38d   : > { %v1673_v13 = vld [vmem:[#allocation8 + $0x420] sm:$0xff]  ;;  %3558 = vmatpush.msra.mxu0 %v1545_v2  ;;  %v1610_v43 = vld [vmem:[#allocation8 + $0x228] sm:$0xff] }
 0x38e   : > { %v1801_v33 = vld [vmem:[#allocation8 + $0x820] sm:$0xff]  ;;  %3578 = vmatpush.msra.mxu1 %v1673_v13  ;;  %3559 = vmatmul.f32.vlgmr.msra.gmra.mxu0 %v6193_v46  ;;  %v1738_v26 = vld [vmem:[#allocation8 + $0x628] sm:$0xff] }
 0x38f   : > { %v1929_v21 = vld [vmem:[#allocation8 + $0xc20] sm:$0xff]  ;;  %3598 = vmatpush.msra.mxu2 %v1801_v33  ;;  %3623 = vmatpush.msrb.mxu0 %v1666_v52  ;;  %v1866_v6 = vld [vmem:[#allocation8 + $0xa28] sm:$0xff] }
 0x390   : > { %3618 = vmatpush.msra.mxu3 %v1929_v21  ;;  %3599 = vmatmul.f32.vlgmr.msra.gmra.mxu2 %v6195_v10  ;;  %v1994_v15 = vld [vmem:[#allocation8 + $0xe28] sm:$0xff] }
 0x391   : > { %3643 = vmatpush.msrb.mxu1 %v1794_v17  ;;  %3663 = vmatpush.msrb.mxu2 %v1922_v22  ;;  %v1602_v19 = vld [vmem:[#allocation8 + $0x1e8] sm:$0xff] }
 0x392   : > { %3683 = vmatpush.msrb.mxu3 %v2050_v58  ;;  %3579 = vmatmul.f32.vlgmr.msra.gmra.mxu1 %v6197_v44  ;;  %v1730_v14 = vld [vmem:[#allocation8 + $0x5e8] sm:$0xff] }
 0x393   : > { %3619 = vmatmul.f32.vlgmr.msra.gmra.mxu3 %v6199_v31  ;;  %3624 = vmatpush.msrb.mxu0 %v1658_v47  ;;  %v1858_v40 = vld [vmem:[#allocation8 + $0x9e8] sm:$0xff] }
 0x394   : > { %3644 = vmatpush.msrb.mxu1 %v1786_v41  ;;  %3664 = vmatpush.msrb.mxu2 %v1914_v63  ;;  %v1986_v37 = vld [vmem:[#allocation8 + $0xde8] sm:$0xff] }
 0x395   : > { %3684 = vmatpush.msrb.mxu3 %v2042_v0  ;;  %3625 = vmatpush.msrb.mxu0 %v1650_v36  ;;  %v1594_v48 = vld [vmem:[#allocation8 + $0x1a8] sm:$0xff] }
 0x396   : > { %3645 = vmatpush.msrb.mxu1 %v1778_v16  ;;  %3665 = vmatpush.msrb.mxu2 %v1906_v56  ;;  %v1722_v50 = vld [vmem:[#allocation8 + $0x5a8] sm:$0xff] }
 0x397   : > { %3685 = vmatpush.msrb.mxu3 %v2034_v34  ;;  %3626 = vmatpush.msrb.mxu0 %v1642_v3  ;;  %v1850_v53 = vld [vmem:[#allocation8 + $0x9a8] sm:$0xff] }
 0x398   : > { %3646 = vmatpush.msrb.mxu1 %v1770_v12  ;;  %3666 = vmatpush.msrb.mxu2 %v1898_v51  ;;  %v1978_v49 = vld [vmem:[#allocation8 + $0xda8] sm:$0xff] }
 0x399   : > { %3686 = vmatpush.msrb.mxu3 %v2026_v18  ;;  %3627 = vmatpush.msrb.mxu0 %v1634_v39  ;;  %v1586_v61 = vld [vmem:[#allocation8 + $0x168] sm:$0xff]  ;;  %v1667_v18 = vld [vmem:[#allocation8 + $0x3f0] sm:$0xff] }
 0x39a   : > { %3647 = vmatpush.msrb.mxu1 %v1762_v60  ;;  %3667 = vmatpush.msrb.mxu2 %v1890_v9  ;;  %v1714_v32 = vld [vmem:[#allocation8 + $0x568] sm:$0xff]  ;;  %v1795_v39 = vld [vmem:[#allocation8 + $0x7f0] sm:$0xff] }
 0x39b   : > { %3687 = vmatpush.msrb.mxu3 %v2018_v8  ;;  %3628 = vmatpush.msrb.mxu0 %v1626_v55  ;;  %v1842_v27 = vld [vmem:[#allocation8 + $0x968] sm:$0xff]  ;;  %v1923_v60 = vld [vmem:[#allocation8 + $0xbf0] sm:$0xff] }
 0x39c   : > { %3648 = vmatpush.msrb.mxu1 %v1754_v28  ;;  %3668 = vmatpush.msrb.mxu2 %v1882_v23  ;;  %v1970_v7 = vld [vmem:[#allocation8 + $0xd68] sm:$0xff]  ;;  %v2051_v9 = vld [vmem:[#allocation8 + $0xff0] sm:$0xff] }
 0x39d   : > { %3688 = vmatpush.msrb.mxu3 %v2010_v57  ;;  %3629 = vmatpush.msrb.mxu0 %v1618_v25  ;;  %v1578_v1 = vld [vmem:[#allocation8 + $0x128] sm:$0xff]  ;;  %v1659_v8 = vld [vmem:[#allocation8 + $0x3b0] sm:$0xff] }
 0x39e   : > { %3649 = vmatpush.msrb.mxu1 %v1746_v38  ;;  %3669 = vmatpush.msrb.mxu2 %v1874_v5  ;;  %v1706_v2 = vld [vmem:[#allocation8 + $0x528] sm:$0xff]  ;;  %v1787_v55 = vld [vmem:[#allocation8 + $0x7b0] sm:$0xff] }
 0x39f   : > { %3689 = vmatpush.msrb.mxu3 %v2002_v20  ;;  %3630 = vmatpush.msrb.mxu0 %v1610_v43  ;;  %v1834_v13 = vld [vmem:[#allocation8 + $0x928] sm:$0xff]  ;;  %v1915_v28 = vld [vmem:[#allocation8 + $0xbb0] sm:$0xff] }
 0x3a0   : > { %3650 = vmatpush.msrb.mxu1 %v1738_v26  ;;  %3670 = vmatpush.msrb.mxu2 %v1866_v6  ;;  %v1962_v33 = vld [vmem:[#allocation8 + $0xd28] sm:$0xff]  ;;  %v2043_v23 = vld [vmem:[#allocation8 + $0xfb0] sm:$0xff] }
 0x3a1   : > { %3690 = vmatpush.msrb.mxu3 %v1994_v15  ;;  %3631 = vmatpush.msrb.mxu0 %v1602_v19  ;;  %v1570_v21 = vld [vmem:[#allocation8 + $0xe8] sm:$0xff]  ;;  %v1651_v57 = vld [vmem:[#allocation8 + $0x370] sm:$0xff] }
 0x3a2   : > { %3651 = vmatpush.msrb.mxu1 %v1730_v14  ;;  %3671 = vmatpush.msrb.mxu2 %v1858_v40  ;;  %v1698_v52 = vld [vmem:[#allocation8 + $0x4e8] sm:$0xff]  ;;  %v1779_v25 = vld [vmem:[#allocation8 + $0x770] sm:$0xff] }
 0x3a3   : > { %3691 = vmatpush.msrb.mxu3 %v1986_v37  ;;  %3632 = vmatpush.msrb.mxu0 %v1594_v48  ;;  %v1826_v17 = vld [vmem:[#allocation8 + $0x8e8] sm:$0xff]  ;;  %v1907_v38 = vld [vmem:[#allocation8 + $0xb70] sm:$0xff] }
 0x3a4   : > { %3652 = vmatpush.msrb.mxu1 %v1722_v50  ;;  %3672 = vmatpush.msrb.mxu2 %v1850_v53  ;;  %v1954_v22 = vld [vmem:[#allocation8 + $0xce8] sm:$0xff]  ;;  %v2035_v5 = vld [vmem:[#allocation8 + $0xf70] sm:$0xff] }
 0x3a5   : > { %3692 = vmatpush.msrb.mxu3 %v1978_v49  ;;  %3633 = vmatpush.msrb.mxu0 %v1586_v61  ;;  %v1562_v58 = vld [vmem:[#allocation8 + $0xa8] sm:$0xff]  ;;  %v1643_v20 = vld [vmem:[#allocation8 + $0x330] sm:$0xff] }
 0x3a6   : > { %3653 = vmatpush.msrb.mxu1 %v1714_v32  ;;  %3673 = vmatpush.msrb.mxu2 %v1842_v27  ;;  %v1690_v47 = vld [vmem:[#allocation8 + $0x4a8] sm:$0xff]  ;;  %v1771_v43 = vld [vmem:[#allocation8 + $0x730] sm:$0xff] }
 0x3a7   : > { %3693 = vmatpush.msrb.mxu3 %v1970_v7  ;;  %3634 = vmatpush.msrb.mxu0 %v1578_v1  ;;  %v1818_v41 = vld [vmem:[#allocation8 + $0x8a8] sm:$0xff]  ;;  %v1899_v26 = vld [vmem:[#allocation8 + $0xb30] sm:$0xff] }
 0x3a8   : > { %3654 = vmatpush.msrb.mxu1 %v1706_v2  ;;  %3674 = vmatpush.msrb.mxu2 %v1834_v13  ;;  %v1946_v63 = vld [vmem:[#allocation8 + $0xca8] sm:$0xff]  ;;  %v2027_v6 = vld [vmem:[#allocation8 + $0xf30] sm:$0xff] }
 0x3a9   : > { %3694 = vmatpush.msrb.mxu3 %v1962_v33  ;;  %3635 = vmatpush.msrb.mxu0 %v1570_v21  ;;  %v1554_v0 = vld [vmem:[#allocation8 + $0x68] sm:$0xff]  ;;  %v1635_v15 = vld [vmem:[#allocation8 + $0x2f0] sm:$0xff] }
 0x3aa   : > { %3655 = vmatpush.msrb.mxu1 %v1698_v52  ;;  %3675 = vmatpush.msrb.mxu2 %v1826_v17  ;;  %v1682_v36 = vld [vmem:[#allocation8 + $0x468] sm:$0xff]  ;;  %v1763_v19 = vld [vmem:[#allocation8 + $0x6f0] sm:$0xff] }
 0x3ab   : > { %3695 = vmatpush.msrb.mxu3 %v1954_v22  ;;  %3636 = vmatpush.msrb.mxu0 %v1562_v58  ;;  %v1810_v16 = vld [vmem:[#allocation8 + $0x868] sm:$0xff]  ;;  %v1891_v14 = vld [vmem:[#allocation8 + $0xaf0] sm:$0xff] }
 0x3ac   : > { %3656 = vmatpush.msrb.mxu1 %v1690_v47  ;;  %v1938_v56 = vld [vmem:[#allocation8 + $0xc68] sm:$0xff]  ;;  %3676 = vmatpush.msrb.mxu2 %v1818_v41  ;;  %v2019_v40 = vld [vmem:[#allocation8 + $0xef0] sm:$0xff] }
 0x3ad   : > { %3696 = vmatpush.msrb.mxu3 %v1946_v63  ;;  %v1546_v34 = vld [vmem:[#allocation8 + $0x28] sm:$0xff]  ;;  %3637 = vmatpush.msrb.mxu0 %v1554_v0  ;;  %v1627_v37 = vld [vmem:[#allocation8 + $0x2b0] sm:$0xff] }
 0x3ae   : > { %v1674_v3 = vld [vmem:[#allocation8 + $0x428] sm:$0xff]  ;;  %3657 = vmatpush.msrb.mxu1 %v1682_v36  ;;  %3677 = vmatpush.msrb.mxu2 %v1810_v16  ;;  %v1755_v48 = vld [vmem:[#allocation8 + $0x6b0] sm:$0xff] }
 0x3af   : > { %v1802_v12 = vld [vmem:[#allocation8 + $0x828] sm:$0xff]  ;;  %3697 = vmatpush.msrb.mxu3 %v1938_v56  ;;  %3638 = vmatpush.msrb.mxu0 %v1546_v34  ;;  %v1883_v50 = vld [vmem:[#allocation8 + $0xab0] sm:$0xff] }
 0x3b0   : > { %v1930_v51 = vld [vmem:[#allocation8 + $0xc28] sm:$0xff]  ;;  %3658 = vmatpush.msrb.mxu1 %v1674_v3  ;;  %3678 = vmatpush.msrb.mxu2 %v1802_v12  ;;  %v2011_v53 = vld [vmem:[#allocation8 + $0xeb0] sm:$0xff] }
 0x3b1   : > { %3698 = vmatpush.msrb.mxu3 %v1930_v51  ;;  %3639 = vmatmul.f32.vlgmr.msrb.gmra.mxu0 %v6193_v46  ;;  %v1619_v49 = vld [vmem:[#allocation8 + $0x270] sm:$0xff] }
 0x3b2   : > { %3679 = vmatmul.f32.vlgmr.msrb.gmra.mxu2 %v6195_v10  ;;  %3703 = vmatpush.msra.mxu0 %v1667_v18  ;;  %v1747_v61 = vld [vmem:[#allocation8 + $0x670] sm:$0xff] }
 0x3b3   : > { %3723 = vmatpush.msra.mxu1 %v1795_v39  ;;  %3743 = vmatpush.msra.mxu2 %v1923_v60  ;;  %v1875_v32 = vld [vmem:[#allocation8 + $0xa70] sm:$0xff] }
 0x3b4   : > { %3763 = vmatpush.msra.mxu3 %v2051_v9  ;;  %3659 = vmatmul.f32.vlgmr.msrb.gmra.mxu1 %v6197_v44  ;;  %v2003_v27 = vld [vmem:[#allocation8 + $0xe70] sm:$0xff] }
 0x3b5   : > { %3699 = vmatmul.f32.vlgmr.msrb.gmra.mxu3 %v6199_v31  ;;  %3704 = vmatpush.msra.mxu0 %v1659_v8  ;;  %v1611_v7 = vld [vmem:[#allocation8 + $0x230] sm:$0xff] }
 0x3b6   : > { %3724 = vmatpush.msra.mxu1 %v1787_v55  ;;  %3744 = vmatpush.msra.mxu2 %v1915_v28  ;;  %v1739_v1 = vld [vmem:[#allocation8 + $0x630] sm:$0xff] }
 0x3b7   : > { %3764 = vmatpush.msra.mxu3 %v2043_v23  ;;  %3705 = vmatpush.msra.mxu0 %v1651_v57  ;;  %v1867_v2 = vld [vmem:[#allocation8 + $0xa30] sm:$0xff] }
 0x3b8   : > { %3725 = vmatpush.msra.mxu1 %v1779_v25  ;;  %3745 = vmatpush.msra.mxu2 %v1907_v38  ;;  %v1995_v13 = vld [vmem:[#allocation8 + $0xe30] sm:$0xff] }
 0x3b9   : > { %3765 = vmatpush.msra.mxu3 %v2035_v5  ;;  %3706 = vmatpush.msra.mxu0 %v1643_v20  ;;  %v1603_v33 = vld [vmem:[#allocation8 + $0x1f0] sm:$0xff] }
 0x3ba   : > { %3726 = vmatpush.msra.mxu1 %v1771_v43  ;;  %3746 = vmatpush.msra.mxu2 %v1899_v26  ;;  %v1731_v21 = vld [vmem:[#allocation8 + $0x5f0] sm:$0xff] }
 0x3bb   : > { %3766 = vmatpush.msra.mxu3 %v2027_v6  ;;  %3707 = vmatpush.msra.mxu0 %v1635_v15  ;;  %v1859_v52 = vld [vmem:[#allocation8 + $0x9f0] sm:$0xff]  ;;  %v1668_v6 = vld [vmem:[#allocation8 + $0x3f8] sm:$0xff] }
 0x3bc   : > { %3727 = vmatpush.msra.mxu1 %v1763_v19  ;;  %3747 = vmatpush.msra.mxu2 %v1891_v14  ;;  %v1987_v17 = vld [vmem:[#allocation8 + $0xdf0] sm:$0xff]  ;;  %v1796_v15 = vld [vmem:[#allocation8 + $0x7f8] sm:$0xff] }
 0x3bd   : > { %3767 = vmatpush.msra.mxu3 %v2019_v40  ;;  %3708 = vmatpush.msra.mxu0 %v1627_v37  ;;  %v1595_v22 = vld [vmem:[#allocation8 + $0x1b0] sm:$0xff]  ;;  %v1924_v19 = vld [vmem:[#allocation8 + $0xbf8] sm:$0xff] }
 0x3be   : > { %3728 = vmatpush.msra.mxu1 %v1755_v48  ;;  %3748 = vmatpush.msra.mxu2 %v1883_v50  ;;  %v1723_v58 = vld [vmem:[#allocation8 + $0x5b0] sm:$0xff]  ;;  %v2052_v14 = vld [vmem:[#allocation8 + $0xff8] sm:$0xff] }
 0x3bf   : > { %3768 = vmatpush.msra.mxu3 %v2011_v53  ;;  %3709 = vmatpush.msra.mxu0 %v1619_v49  ;;  %v1851_v47 = vld [vmem:[#allocation8 + $0x9b0] sm:$0xff]  ;;  %v1660_v40 = vld [vmem:[#allocation8 + $0x3b8] sm:$0xff] }
 0x3c0   : > { %3729 = vmatpush.msra.mxu1 %v1747_v61  ;;  %3749 = vmatpush.msra.mxu2 %v1875_v32  ;;  %v1979_v41 = vld [vmem:[#allocation8 + $0xdb0] sm:$0xff]  ;;  %v1788_v37 = vld [vmem:[#allocation8 + $0x7b8] sm:$0xff] }
 0x3c1   : > { %3769 = vmatpush.msra.mxu3 %v2003_v27  ;;  %3710 = vmatpush.msra.mxu0 %v1611_v7  ;;  %v1587_v63 = vld [vmem:[#allocation8 + $0x170] sm:$0xff]  ;;  %v1916_v48 = vld [vmem:[#allocation8 + $0xbb8] sm:$0xff] }
 0x3c2   : > { %3730 = vmatpush.msra.mxu1 %v1739_v1  ;;  %3750 = vmatpush.msra.mxu2 %v1867_v2  ;;  %v1715_v0 = vld [vmem:[#allocation8 + $0x570] sm:$0xff]  ;;  %v2044_v50 = vld [vmem:[#allocation8 + $0xfb8] sm:$0xff] }
 0x3c3   : > { %3770 = vmatpush.msra.mxu3 %v1995_v13  ;;  %3711 = vmatpush.msra.mxu0 %v1603_v33  ;;  %v1843_v36 = vld [vmem:[#allocation8 + $0x970] sm:$0xff]  ;;  %v1652_v53 = vld [vmem:[#allocation8 + $0x378] sm:$0xff] }
 0x3c4   : > { %3731 = vmatpush.msra.mxu1 %v1731_v21  ;;  %3751 = vmatpush.msra.mxu2 %v1859_v52  ;;  %v1971_v16 = vld [vmem:[#allocation8 + $0xd70] sm:$0xff]  ;;  %v1780_v49 = vld [vmem:[#allocation8 + $0x778] sm:$0xff] }
 0x3c5   : > { %3771 = vmatpush.msra.mxu3 %v1987_v17  ;;  %3712 = vmatpush.msra.mxu0 %v1595_v22  ;;  %v1579_v56 = vld [vmem:[#allocation8 + $0x130] sm:$0xff]  ;;  %v1908_v61 = vld [vmem:[#allocation8 + $0xb78] sm:$0xff] }
 0x3c6   : > { %3732 = vmatpush.msra.mxu1 %v1723_v58  ;;  %3752 = vmatpush.msra.mxu2 %v1851_v47  ;;  %v1707_v34 = vld [vmem:[#allocation8 + $0x530] sm:$0xff]  ;;  %v2036_v32 = vld [vmem:[#allocation8 + $0xf78] sm:$0xff] }
 0x3c7   : > { %3772 = vmatpush.msra.mxu3 %v1979_v41  ;;  %3713 = vmatpush.msra.mxu0 %v1587_v63  ;;  %v1835_v3 = vld [vmem:[#allocation8 + $0x930] sm:$0xff]  ;;  %v1644_v27 = vld [vmem:[#allocation8 + $0x338] sm:$0xff] }
 0x3c8   : > { %3733 = vmatpush.msra.mxu1 %v1715_v0  ;;  %v1963_v12 = vld [vmem:[#allocation8 + $0xd30] sm:$0xff]  ;;  %3753 = vmatpush.msra.mxu2 %v1843_v36  ;;  %v1772_v7 = vld [vmem:[#allocation8 + $0x738] sm:$0xff] }
 0x3c9   : > { %3773 = vmatpush.msra.mxu3 %v1971_v16  ;;  %v1571_v51 = vld [vmem:[#allocation8 + $0xf0] sm:$0xff]  ;;  %3714 = vmatpush.msra.mxu0 %v1579_v56  ;;  %v1900_v1 = vld [vmem:[#allocation8 + $0xb38] sm:$0xff] }
 0x3ca   : > { %v1699_v18 = vld [vmem:[#allocation8 + $0x4f0] sm:$0xff]  ;;  %3734 = vmatpush.msra.mxu1 %v1707_v34  ;;  %3754 = vmatpush.msra.mxu2 %v1835_v3  ;;  %v2028_v2 = vld [vmem:[#allocation8 + $0xf38] sm:$0xff] }
 0x3cb   : > { %v1827_v39 = vld [vmem:[#allocation8 + $0x8f0] sm:$0xff]  ;;  %3774 = vmatpush.msra.mxu3 %v1963_v12  ;;  %3715 = vmatpush.msra.mxu0 %v1571_v51  ;;  %v1636_v13 = vld [vmem:[#allocation8 + $0x2f8] sm:$0xff] }
 0x3cc   : > { %v1955_v60 = vld [vmem:[#allocation8 + $0xcf0] sm:$0xff]  ;;  %3735 = vmatpush.msra.mxu1 %v1699_v18  ;;  %3755 = vmatpush.msra.mxu2 %v1827_v39  ;;  %v1764_v33 = vld [vmem:[#allocation8 + $0x6f8] sm:$0xff] }
 0x3cd   : > { %v1563_v9 = vld [vmem:[#allocation8 + $0xb0] sm:$0xff]  ;;  %3775 = vmatpush.msra.mxu3 %v1955_v60  ;;  %v1892_v21 = vld [vmem:[#allocation8 + $0xaf8] sm:$0xff] }
 0x3ce   : > { %v1691_v8 = vld [vmem:[#allocation8 + $0x4b0] sm:$0xff]  ;;  %3716 = vmatpush.msra.mxu0 %v1563_v9  ;;  %v2020_v52 = vld [vmem:[#allocation8 + $0xef8] sm:$0xff] }
 0x3cf   : > { %v1819_v55 = vld [vmem:[#allocation8 + $0x8b0] sm:$0xff]  ;;  %3736 = vmatpush.msra.mxu1 %v1691_v8  ;;  %v1628_v17 = vld [vmem:[#allocation8 + $0x2b8] sm:$0xff] }
 0x3d0   : > { %v1947_v28 = vld [vmem:[#allocation8 + $0xcb0] sm:$0xff]  ;;  %3756 = vmatpush.msra.mxu2 %v1819_v55  ;;  %v1756_v22 = vld [vmem:[#allocation8 + $0x6b8] sm:$0xff] }
 0x3d1   : > { %v1555_v23 = vld [vmem:[#allocation8 + $0x70] sm:$0xff]  ;;  %3776 = vmatpush.msra.mxu3 %v1947_v28  ;;  %v1884_v58 = vld [vmem:[#allocation8 + $0xab8] sm:$0xff] }
 0x3d2   : > { %v1683_v57 = vld [vmem:[#allocation8 + $0x470] sm:$0xff]  ;;  %3717 = vmatpush.msra.mxu0 %v1555_v23  ;;  %v2012_v47 = vld [vmem:[#allocation8 + $0xeb8] sm:$0xff] }
 0x3d3   : > { %v1811_v25 = vld [vmem:[#allocation8 + $0x870] sm:$0xff]  ;;  %3737 = vmatpush.msra.mxu1 %v1683_v57  ;;  %v1620_v41 = vld [vmem:[#allocation8 + $0x278] sm:$0xff] }
 0x3d4   : > { %v1939_v38 = vld [vmem:[#allocation8 + $0xc70] sm:$0xff]  ;;  %3757 = vmatpush.msra.mxu2 %v1811_v25  ;;  %v1748_v63 = vld [vmem:[#allocation8 + $0x678] sm:$0xff] }
 0x3d5   : > { %v1547_v5 = vld [vmem:[#allocation8 + $0x30] sm:$0xff]  ;;  %3777 = vmatpush.msra.mxu3 %v1939_v38  ;;  %v1876_v0 = vld [vmem:[#allocation8 + $0xa78] sm:$0xff] }
 0x3d6   : > { %v1675_v20 = vld [vmem:[#allocation8 + $0x430] sm:$0xff]  ;;  %3718 = vmatpush.msra.mxu0 %v1547_v5  ;;  %v2004_v36 = vld [vmem:[#allocation8 + $0xe78] sm:$0xff] }
 0x3d7   : > { %v1803_v43 = vld [vmem:[#allocation8 + $0x830] sm:$0xff]  ;;  %3738 = vmatpush.msra.mxu1 %v1675_v20  ;;  %3719 = vmatmul.f32.vlgmr.msra.gmra.mxu0 %v6193_v46  ;;  %v1612_v16 = vld [vmem:[#allocation8 + $0x238] sm:$0xff]  ;;  %v6245_v20 = vpop.f32.mrf.mxu0 }
 0x3d8   : > { %v1931_v26 = vld [vmem:[#allocation8 + $0xc30] sm:$0xff]  ;;  %3758 = vmatpush.msra.mxu2 %v1803_v43  ;;  %3783 = vmatpush.msrb.mxu0 %v1668_v6  ;;  %v1740_v56 = vld [vmem:[#allocation8 + $0x638] sm:$0xff] }
 0x3d9   : > { %3778 = vmatpush.msra.mxu3 %v1931_v26  ;;  %3759 = vmatmul.f32.vlgmr.msra.gmra.mxu2 %v6195_v10  ;;  %v1868_v34 = vld [vmem:[#allocation8 + $0xa38] sm:$0xff] }
 0x3da   : > { %3803 = vmatpush.msrb.mxu1 %v1796_v15  ;;  %3823 = vmatpush.msrb.mxu2 %v1924_v19  ;;  %v1996_v3 = vld [vmem:[#allocation8 + $0xe38] sm:$0xff] }
 0x3db   : > { %3843 = vmatpush.msrb.mxu3 %v2052_v14  ;;  %3739 = vmatmul.f32.vlgmr.msra.gmra.mxu1 %v6197_v44  ;;  %v1604_v12 = vld [vmem:[#allocation8 + $0x1f8] sm:$0xff] }
 0x3dc   : > { %3779 = vmatmul.f32.vlgmr.msra.gmra.mxu3 %v6199_v31  ;;  %3784 = vmatpush.msrb.mxu0 %v1660_v40  ;;  %v1732_v51 = vld [vmem:[#allocation8 + $0x5f8] sm:$0xff] }
 0x3dd   : > { %3804 = vmatpush.msrb.mxu1 %v1788_v37  ;;  %3824 = vmatpush.msrb.mxu2 %v1916_v48  ;;  %v1860_v18 = vld [vmem:[#allocation8 + $0x9f8] sm:$0xff]  ;;  %v6247_v48 = vpop.f32.mrf.mxu1 }
 0x3de   : > { %3844 = vmatpush.msrb.mxu3 %v2044_v50  ;;  %3785 = vmatpush.msrb.mxu0 %v1652_v53  ;;  %v1988_v39 = vld [vmem:[#allocation8 + $0xdf8] sm:$0xff] }
 0x3df   : > { %3805 = vmatpush.msrb.mxu1 %v1780_v49  ;;  %3825 = vmatpush.msrb.mxu2 %v1908_v61  ;;  %v1596_v60 = vld [vmem:[#allocation8 + $0x1b8] sm:$0xff] }
 0x3e0   : > { %3845 = vmatpush.msrb.mxu3 %v2036_v32  ;;  %3786 = vmatpush.msrb.mxu0 %v1644_v27  ;;  %v1724_v9 = vld [vmem:[#allocation8 + $0x5b8] sm:$0xff]  ;;  %v6249_v32 = vpop.f32.mrf.mxu2 }
 0x3e1   : > { %3806 = vmatpush.msrb.mxu1 %v1772_v7  ;;  %3826 = vmatpush.msrb.mxu2 %v1900_v1  ;;  %v1852_v8 = vld [vmem:[#allocation8 + $0x9b8] sm:$0xff] }
 0x3e2   : > { %3846 = vmatpush.msrb.mxu3 %v2028_v2  ;;  %3787 = vmatpush.msrb.mxu0 %v1636_v13  ;;  %v1980_v55 = vld [vmem:[#allocation8 + $0xdb8] sm:$0xff]  ;;  %v6251_v13 = vpop.f32.mrf.mxu0 }
 0x3e3   : > { %3807 = vmatpush.msrb.mxu1 %v1764_v33  ;;  %3827 = vmatpush.msrb.mxu2 %v1892_v21  ;;  %v1588_v28 = vld [vmem:[#allocation8 + $0x178] sm:$0xff] }
 0x3e4   : > { %3847 = vmatpush.msrb.mxu3 %v2020_v52  ;;  %3788 = vmatpush.msrb.mxu0 %v1628_v17  ;;  %v1716_v23 = vld [vmem:[#allocation8 + $0x578] sm:$0xff]  ;;  %v6253_v52 = vpop.f32.mrf.mxu3  ;;  %v3912_v17 = vld [vmem:[#allocation11 + $0x78] sm:$0xff] }
 0x3e5   : > { %3808 = vmatpush.msrb.mxu1 %v1756_v22  ;;  %3828 = vmatpush.msrb.mxu2 %v1884_v58  ;;  %v1844_v57 = vld [vmem:[#allocation8 + $0x978] sm:$0xff]  ;;  %v3928_v22 = vld [vmem:[#allocation11 + $0xf8] sm:$0xff] }
 0x3e6   : > { %3848 = vmatpush.msrb.mxu3 %v2012_v47  ;;  %3789 = vmatpush.msrb.mxu0 %v1620_v41  ;;  %v1972_v25 = vld [vmem:[#allocation8 + $0xd78] sm:$0xff]  ;;  %v3944_v58 = vld [vmem:[#allocation11 + $0x178] sm:$0xff]  ;;  %v6255_v41 = vpop.f32.mrf.mxu1 }
 0x3e7   : > { %3809 = vmatpush.msrb.mxu1 %v1748_v63  ;;  %3829 = vmatpush.msrb.mxu2 %v1876_v0  ;;  %v1580_v38 = vld [vmem:[#allocation8 + $0x138] sm:$0xff]  ;;  %v3960_v47 = vld [vmem:[#allocation11 + $0x1f8] sm:$0xff] }
 0x3e8   : > { %3849 = vmatpush.msrb.mxu3 %v2004_v36  ;;  %3790 = vmatpush.msrb.mxu0 %v1612_v16  ;;  %v1708_v5 = vld [vmem:[#allocation8 + $0x538] sm:$0xff]  ;;  %v6259_v36 = vpop.f32.mrf.mxu2 }
 0x3e9   : > { %3810 = vmatpush.msrb.mxu1 %v1740_v56  ;;  %3830 = vmatpush.msrb.mxu2 %v1868_v34  ;;  %v1836_v43 = vld [vmem:[#allocation8 + $0x938] sm:$0xff]  ;;  %v3910_v34 = vld [vmem:[#allocation11 + $0x68] sm:$0xff] }
 0x3ea   : > { %3850 = vmatpush.msrb.mxu3 %v1996_v3  ;;  %3791 = vmatpush.msrb.mxu0 %v1604_v12  ;;  %v1964_v26 = vld [vmem:[#allocation8 + $0xd38] sm:$0xff]  ;;  %v3926_v3 = vld [vmem:[#allocation11 + $0xe8] sm:$0xff]  ;;  %v3400_v12 = vpop.f32.mrf.mxu0 }
 0x3eb   : > { %3811 = vmatpush.msrb.mxu1 %v1732_v51  ;;  %3831 = vmatpush.msrb.mxu2 %v1860_v18  ;;  %v1572_v6 = vld [vmem:[#allocation8 + $0xf8] sm:$0xff]  ;;  %v2852_v51 = vadd.f32 %v6207_v11, %v6205_v29  ;;  %v3909_v18 = vld [vmem:[#allocation11 + $0x60] sm:$0xff] }
 0x3ec   : > { %3851 = vmatpush.msrb.mxu3 %v1988_v39  ;;  %3792 = vmatpush.msrb.mxu0 %v1596_v60  ;;  %v1700_v15 = vld [vmem:[#allocation8 + $0x4f8] sm:$0xff]  ;;  %v3925_v39 = vld [vmem:[#allocation11 + $0xe0] sm:$0xff]  ;;  %v6265_v60 = vpop.f32.mrf.mxu3 }
 0x3ed   : > { %3812 = vmatpush.msrb.mxu1 %v1724_v9  ;;  %3832 = vmatpush.msrb.mxu2 %v1852_v8  ;;  %v1828_v19 = vld [vmem:[#allocation8 + $0x8f8] sm:$0xff]  ;;  %v3908_v9 = vld [vmem:[#allocation11 + $0x58] sm:$0xff]  ;;  %v2872_v29 = vadd.f32 %v6209_v42, %v2852_v51 }
 0x3ee   : > { %3852 = vmatpush.msrb.mxu3 %v1980_v55  ;;  %3793 = vmatpush.msrb.mxu0 %v1588_v28  ;;  %v1956_v14 = vld [vmem:[#allocation8 + $0xcf8] sm:$0xff]  ;;  %v3924_v8 = vld [vmem:[#allocation11 + $0xd8] sm:$0xff]  ;;  %v3420_v55 = vpop.f32.mrf.mxu1 }
 0x3ef   : > { %3813 = vmatpush.msrb.mxu1 %v1716_v23  ;;  %3833 = vmatpush.msrb.mxu2 %v1844_v57  ;;  %v1564_v40 = vld [vmem:[#allocation8 + $0xb8] sm:$0xff]  ;;  %v3940_v28 = vld [vmem:[#allocation11 + $0x158] sm:$0xff]  ;;  %v2892_v42 = vadd.f32 %v6211_v24, %v2872_v29 }
 0x3f0   : > { %3853 = vmatpush.msrb.mxu3 %v1972_v25  ;;  %3794 = vmatpush.msrb.mxu0 %v1580_v38  ;;  %v1692_v37 = vld [vmem:[#allocation8 + $0x4b8] sm:$0xff]  ;;  %v3956_v23 = vld [vmem:[#allocation11 + $0x1d8] sm:$0xff]  ;;  %v3440_v25 = vpop.f32.mrf.mxu2 }
 0x3f1   : > { %3814 = vmatpush.msrb.mxu1 %v1708_v5  ;;  %3834 = vmatpush.msrb.mxu2 %v1836_v43  ;;  %v1820_v50 = vld [vmem:[#allocation8 + $0x8b8] sm:$0xff]  ;;  %v3906_v43 = vld [vmem:[#allocation11 + $0x48] sm:$0xff]  ;;  %v3904_v24 = vld [vmem:[#allocation11 + $0x38] sm:$0xff] }
 0x3f2   : > { %3854 = vmatpush.msrb.mxu3 %v1964_v26  ;;  %3795 = vmatpush.msrb.mxu0 %v1572_v6  ;;  %v1948_v53 = vld [vmem:[#allocation8 + $0xcb8] sm:$0xff]  ;;  %v3922_v26 = vld [vmem:[#allocation11 + $0xc8] sm:$0xff]  ;;  %v3480_v6 = vpop.f32.mrf.mxu0 }
 0x3f3   : > { %3815 = vmatpush.msrb.mxu1 %v1700_v15  ;;  %3835 = vmatpush.msrb.mxu2 %v1828_v19  ;;  %v1556_v49 = vld [vmem:[#allocation8 + $0x78] sm:$0xff]  ;;  %v3938_v15 = vld [vmem:[#allocation11 + $0x148] sm:$0xff] }
 0x3f4   : > { %3855 = vmatpush.msrb.mxu3 %v1956_v14  ;;  %v1684_v61 = vld [vmem:[#allocation8 + $0x478] sm:$0xff]  ;;  %3796 = vmatpush.msrb.mxu0 %v1564_v40  ;;  %v3954_v19 = vld [vmem:[#allocation11 + $0x1c8] sm:$0xff]  ;;  %v3905_v14 = vld [vmem:[#allocation11 + $0x40] sm:$0xff] }
 0x3f5   : > { %3816 = vmatpush.msrb.mxu1 %v1692_v37  ;;  %v1812_v27 = vld [vmem:[#allocation8 + $0x878] sm:$0xff]  ;;  %3836 = vmatpush.msrb.mxu2 %v1820_v50  ;;  %v3921_v40 = vld [vmem:[#allocation11 + $0xc0] sm:$0xff]  ;;  %v3241_v37 = vadd.f32 %v6245_v20, %v6171_v35  ;;  %v3321_v50 = vadd.f32 %v6251_v13, %v6177_v4  ;;  %v3936_v35 = vld [vmem:[#allocation11 + $0x138] sm:$0xff] }
 0x3f6   : > { %v1940_v7 = vld [vmem:[#allocation8 + $0xc78] sm:$0xff]  ;;  %3856 = vmatpush.msrb.mxu3 %v1948_v53  ;;  %3797 = vmatpush.msrb.mxu0 %v1556_v49  ;;  %v6273_v53 = vpop.f32.mrf.mxu3  ;;  %v3937_v49 = vld [vmem:[#allocation11 + $0x140] sm:$0xff]  ;;  %v3952_v20 = vld [vmem:[#allocation11 + $0x1b8] sm:$0xff] }
 0x3f7   : > { %v1548_v1 = vld [vmem:[#allocation8 + $0x38] sm:$0xff]  ;;  %3817 = vmatpush.msrb.mxu1 %v1684_v61  ;;  %3837 = vmatpush.msrb.mxu2 %v1812_v27  ;;  %v3953_v61 = vld [vmem:[#allocation11 + $0x1c0] sm:$0xff]  ;;  %v3401_v27 = vadd.f32 %v3400_v12, %v6183_v30 }
 0x3f8   : > { %v1676_v2 = vld [vmem:[#allocation8 + $0x438] sm:$0xff]  ;;  %3857 = vmatpush.msrb.mxu3 %v1940_v7  ;;  %3798 = vmatpush.msrb.mxu0 %v1548_v1  ;;  %v3481_v7 = vadd.f32 %v3480_v6, %v2892_v42  ;;  %v3920_v1 = vld [vmem:[#allocation11 + $0xb8] sm:$0xff] }
 0x3f9   : > { %v1804_v33 = vld [vmem:[#allocation8 + $0x838] sm:$0xff]  ;;  %3818 = vmatpush.msrb.mxu1 %v1676_v2  ;;  %3799 = vmatmul.f32.vlgmr.msrb.gmra.mxu0 %v6193_v46  ;;  %v3942_v46 = vld [vmem:[#allocation11 + $0x168] sm:$0xff]  ;;  %v3500_v2 = vpop.f32.mrf.mxu1 }
 0x3fa   : > { %v1932_v21 = vld [vmem:[#allocation8 + $0xc38] sm:$0xff]  ;;  %3838 = vmatpush.msrb.mxu2 %v1804_v33  ;;  %4026 = vmatpush.msra.mxu0 %v3912_v17  ;;  %v3261_v33 = vadd.f32 %v6247_v48, %v3241_v37  ;;  %v3520_v17 = vpop.f32.mrf.mxu2  ;;  %v3934_v48 = vld [vmem:[#allocation11 + $0x128] sm:$0xff]  ;;  %v3913_v37 = vld [vmem:[#allocation11 + $0x80] sm:$0xff] }
 0x3fb   : > { %3858 = vmatpush.msrb.mxu3 %v1932_v21  ;;  %3839 = vmatmul.f32.vlgmr.msrb.gmra.mxu2 %v6195_v10  ;;  %v3911_v63 = vld [vmem:[#allocation11 + $0x70] sm:$0xff]  ;;  %v3958_v10 = vld [vmem:[#allocation11 + $0x1e8] sm:$0xff]  ;;  %v3341_v21 = vadd.f32 %v6255_v41, %v3321_v50  ;;  %v6280_v41 = vld [vmem:[#allocation9] sm:$0xff] }
 0x3fc   : > { %4046 = vmatpush.msra.mxu1 %v3928_v22  ;;  %v3927_v0 = vld [vmem:[#allocation11 + $0xf0] sm:$0xff]  ;;  %4066 = vmatpush.msra.mxu2 %v3944_v58  ;;  %v3421_v58 = vadd.f32 %v3420_v55, %v3401_v27  ;;  %v3932_v55 = vld [vmem:[#allocation11 + $0x118] sm:$0xff]  ;;  %v3867_v29 = vperm.slane %v6280_v41, 2  ;;  %v3929_v50 = vld [vmem:[#allocation11 + $0x100] sm:$0xff] }
 0x3fd   : > { %4086 = vmatpush.msra.mxu3 %v3960_v47  ;;  %v3943_v16 = vld [vmem:[#allocation11 + $0x170] sm:$0xff]  ;;  %3819 = vmatmul.f32.vlgmr.msrb.gmra.mxu1 %v6197_v44  ;;  %v3941_v44 = vld [vmem:[#allocation11 + $0x160] sm:$0xff]  ;;  %v3501_v47 = vadd.f32 %v3500_v2, %v3481_v7 }
 0x3fe   : > { %v3959_v56 = vld [vmem:[#allocation11 + $0x1f0] sm:$0xff]  ;;  %3859 = vmatmul.f32.vlgmr.msrb.gmra.mxu3 %v6199_v31  ;;  %4027 = vmatpush.msra.mxu0 %v3911_v63  ;;  %v3957_v31 = vld [vmem:[#allocation11 + $0x1e0] sm:$0xff]  ;;  %v3902_v63 = vld [vmem:[#allocation11 + $0x28] sm:$0xff]  ;;  %v3540_v51 = vpop.f32.mrf.mxu3 }
 0x3ff   : > { %4047 = vmatpush.msra.mxu1 %v3927_v0  ;;  %4067 = vmatpush.msra.mxu2 %v3943_v16  ;;  %v3907_v11 = vld [vmem:[#allocation11 + $0x50] sm:$0xff]  ;;  %v3918_v0 = vld [vmem:[#allocation11 + $0xa8] sm:$0xff]  ;;  %v3281_v16 = vadd.f32 %v6249_v32, %v3261_v33  ;;  %v3521_v12 = vadd.f32 %v3520_v17, %v3501_v47  ;;  %v3900_v32 = vld [vmem:[#allocation11 + $0x18] sm:$0xff] }
 0x400   : > { %4087 = vmatpush.msra.mxu3 %v3959_v56  ;;  %4028 = vmatpush.msra.mxu0 %v3910_v34  ;;  %v3923_v57 = vld [vmem:[#allocation11 + $0xd0] sm:$0xff]  ;;  %v3361_v56 = vadd.f32 %v6259_v36, %v3341_v21  ;;  %v3950_v34 = vld [vmem:[#allocation11 + $0x1a8] sm:$0xff]  ;;  %v3916_v36 = vld [vmem:[#allocation11 + $0x98] sm:$0xff] }
 0x401   : > { %4048 = vmatpush.msra.mxu1 %v3926_v3  ;;  %4068 = vmatpush.msra.mxu2 %v3942_v46  ;;  %v3939_v38 = vld [vmem:[#allocation11 + $0x150] sm:$0xff]  ;;  %v3441_v3 = vadd.f32 %v3440_v25, %v3421_v58  ;;  %v3901_v46 = vld [vmem:[#allocation11 + $0x20] sm:$0xff]  ;;  %v3972_v21 = vld [vmem:[#allocation11 + $0x258] sm:$0xff] }
 0x402   : > { %4088 = vmatpush.msra.mxu3 %v3958_v10  ;;  %4029 = vmatpush.msra.mxu0 %v3909_v18  ;;  %v3955_v5 = vld [vmem:[#allocation11 + $0x1d0] sm:$0xff]  ;;  %v3917_v10 = vld [vmem:[#allocation11 + $0xa0] sm:$0xff]  ;;  %v3988_v17 = vld [vmem:[#allocation11 + $0x2d8] sm:$0xff] }
 0x403   : > { %4049 = vmatpush.msra.mxu1 %v3925_v39  ;;  %4069 = vmatpush.msra.mxu2 %v3941_v44  ;;  %v3903_v4 = vld [vmem:[#allocation11 + $0x30] sm:$0xff]  ;;  %v3933_v18 = vld [vmem:[#allocation11 + $0x120] sm:$0xff]  ;;  %v3301_v44 = vadd.f32 %v6253_v52, %v3281_v16  ;;  %v3970_v16 = vld [vmem:[#allocation11 + $0x248] sm:$0xff] }
 0x404   : > { %4089 = vmatpush.msra.mxu3 %v3957_v31  ;;  %4030 = vmatpush.msra.mxu0 %v3908_v9  ;;  %v3919_v13 = vld [vmem:[#allocation11 + $0xb0] sm:$0xff]  ;;  %v3949_v39 = vld [vmem:[#allocation11 + $0x1a0] sm:$0xff]  ;;  %v3865_v31 = vperm.slane %v6280_v41, 0  ;;  %v3381_v9 = vadd.f32 %v6265_v60, %v3361_v56  ;;  %v3986_v56 = vld [vmem:[#allocation11 + $0x2c8] sm:$0xff] }
 0x405   : > { %4050 = vmatpush.msra.mxu1 %v3924_v8  ;;  %4070 = vmatpush.msra.mxu2 %v3940_v28  ;;  %v3935_v30 = vld [vmem:[#allocation11 + $0x130] sm:$0xff]  ;;  %v3866_v8 = vperm.slane %v6280_v41, 1  ;;  %v3948_v28 = vld [vmem:[#allocation11 + $0x198] sm:$0xff]  ;;  %v3989_v33 = vld [vmem:[#allocation11 + $0x2e0] sm:$0xff] }
 0x406   : > { %4090 = vmatpush.msra.mxu3 %v3956_v23  ;;  %4031 = vmatpush.msra.mxu0 %v3907_v11  ;;  %v3951_v22 = vld [vmem:[#allocation11 + $0x1b0] sm:$0xff]  ;;  %v3461_v23 = vadd.f32 %v6273_v53, %v3441_v3  ;;  %v3541_v11 = vadd.f32 %v3540_v51, %v3521_v12  ;;  %v3945_v53 = vld [vmem:[#allocation11 + $0x180] sm:$0xff]  ;;  %v3968_v51 = vld [vmem:[#allocation11 + $0x238] sm:$0xff] }
 0x407   : > { %4051 = vmatpush.msra.mxu1 %v3923_v57  ;;  %4071 = vmatpush.msra.mxu2 %v3939_v38  ;;  %v3868_v57 = vperm.slane %v6280_v41, 3  ;;  %v3899_v52 = vld [vmem:[#allocation11 + $0x10] sm:$0xff]  ;;  %v3882_v6 = vadd.f32 %v3866_v8, %v3381_v9  ;;  %v3969_v3 = vld [vmem:[#allocation11 + $0x240] sm:$0xff]  ;;  %v3966_v8 = vld [vmem:[#allocation11 + $0x228] sm:$0xff] }
 0x408   : > { %4091 = vmatpush.msra.mxu3 %v3955_v5  ;;  %4032 = vmatpush.msra.mxu0 %v3906_v43  ;;  %v3915_v25 = vld [vmem:[#allocation11 + $0x90] sm:$0xff]  ;;  %v3898_v5 = vld [vmem:[#allocation11 + $0x8] sm:$0xff]  ;;  %v3883_v42 = vadd.f32 %v3867_v29, %v3461_v23  ;;  %v3985_v12 = vld [vmem:[#allocation11 + $0x2c0] sm:$0xff] }
 0x409   : > { %4052 = vmatpush.msra.mxu1 %v3922_v26  ;;  %4072 = vmatpush.msra.mxu2 %v3938_v15  ;;  %v3931_v60 = vld [vmem:[#allocation11 + $0x110] sm:$0xff]  ;;  %v3914_v43 = vld [vmem:[#allocation11 + $0x88] sm:$0xff]  ;;  %v3881_v26 = vadd.f32 %v3865_v31, %v3301_v44  ;;  %v4001_v23 = vld [vmem:[#allocation11 + $0x340] sm:$0xff] }
 0x40a   : > { %4092 = vmatpush.msra.mxu3 %v3954_v19  ;;  %4033 = vmatpush.msra.mxu0 %v3905_v14  ;;  %v3947_v38 = vld [vmem:[#allocation11 + $0x190] sm:$0xff]  ;;  %v3930_v15 = vld [vmem:[#allocation11 + $0x108] sm:$0xff]  ;;  %v3884_v14 = vadd.f32 %v3868_v57, %v3541_v11  ;;  %v3891_v27 = vmax.f32 %v3883_v42, 0.0  ;;  %v3965_v29 = vld [vmem:[#allocation11 + $0x220] sm:$0xff] }
 0x40b   : > { %4053 = vmatpush.msra.mxu1 %v3921_v40  ;;  %4073 = vmatpush.msra.mxu2 %v3937_v49  ;;  %v3946_v19 = vld [vmem:[#allocation11 + $0x188] sm:$0xff]  ;;  %v3897_v40 = vld [vmem:[#allocation11] sm:$0xff]  ;;  %v3889_v49 = vmax.f32 %v3881_v26, 0.0  ;;  %v3975_v2 = vld [vmem:[#allocation11 + $0x270] sm:$0xff] }
 0x40c   : > { %4093 = vmatpush.msra.mxu3 %v3953_v61  ;;  %4034 = vmatpush.msra.mxu0 %v3904_v24  ;;  %v3890_v61 = vmax.f32 %v3882_v6, 0.0  ;;  %v3892_v7 = vmax.f32 %v3884_v14, 0.0  ;;  %v3976_v24 = vld [vmem:[#allocation11 + $0x278] sm:$0xff]  ;;  %v3971_v58 = vld [vmem:[#allocation11 + $0x250] sm:$0xff]  ;;  %v3981_v11 = vld [vmem:[#allocation11 + $0x2a0] sm:$0xff] }
 0x40d   : > { %4054 = vmatpush.msra.mxu1 %v3920_v1  ;;  %4074 = vmatpush.msra.mxu2 %v3936_v35  ;;  %v3992_v1 = vld [vmem:[#allocation11 + $0x2f8] sm:$0xff]  ;;  %v3991_v35 = vld [vmem:[#allocation11 + $0x2f0] sm:$0xff]  ;;  %v3962_v42 = vld [vmem:[#allocation11 + $0x208] sm:$0xff] }
 0x40e   : > { %4094 = vmatpush.msra.mxu3 %v3952_v20  ;;  %4035 = vmatpush.msra.mxu0 %v3903_v4  ;;  %v3974_v20 = vld [vmem:[#allocation11 + $0x268] sm:$0xff]  ;;  %v3987_v47 = vld [vmem:[#allocation11 + $0x2d0] sm:$0xff] }
 0x40f   : > { %4055 = vmatpush.msra.mxu1 %v3919_v13  ;;  %4075 = vmatpush.msra.mxu2 %v3935_v30  ;;  %v3990_v4 = vld [vmem:[#allocation11 + $0x2e8] sm:$0xff]  ;;  %v3973_v13 = vld [vmem:[#allocation11 + $0x260] sm:$0xff]  ;;  %v4008_v30 = vld [vmem:[#allocation11 + $0x378] sm:$0xff] }
 0x410   : > { %4095 = vmatpush.msra.mxu3 %v3951_v22  ;;  %4036 = vmatpush.msra.mxu0 %v3902_v63  ;;  %v4007_v22 = vld [vmem:[#allocation11 + $0x370] sm:$0xff]  ;;  %v3560_v63 = vpop.f32.mrf.mxu0  ;;  %v3978_v14 = vld [vmem:[#allocation11 + $0x288] sm:$0xff] }
 0x411   : > { %4056 = vmatpush.msra.mxu1 %v3918_v0  ;;  %4076 = vmatpush.msra.mxu2 %v3934_v48  ;;  %v4006_v0 = vld [vmem:[#allocation11 + $0x368] sm:$0xff]  ;;  %v4005_v48 = vld [vmem:[#allocation11 + $0x360] sm:$0xff]  ;;  %v3967_v44 = vld [vmem:[#allocation11 + $0x230] sm:$0xff] }
 0x412   : > { %4096 = vmatpush.msra.mxu3 %v3950_v34  ;;  %4037 = vmatpush.msra.mxu0 %v3901_v46  ;;  %v3561_v34 = vadd.f32 %v3560_v63, %v6213_v59  ;;  %v3580_v46 = vpop.f32.mrf.mxu1  ;;  %v3983_v31 = vld [vmem:[#allocation11 + $0x2b0] sm:$0xff]  ;;  %v4002_v59 = vld [vmem:[#allocation11 + $0x348] sm:$0xff] }
 0x413   : > { %4057 = vmatpush.msra.mxu1 %v3917_v10  ;;  %4077 = vmatpush.msra.mxu2 %v3933_v18  ;;  %v4004_v10 = vld [vmem:[#allocation11 + $0x358] sm:$0xff]  ;;  %v3979_v26 = vld [vmem:[#allocation11 + $0x290] sm:$0xff] }
 0x414   : > { %4097 = vmatpush.msra.mxu3 %v3949_v39  ;;  %4038 = vmatpush.msra.mxu0 %v3900_v32  ;;  %v3984_v18 = vld [vmem:[#allocation11 + $0x2b8] sm:$0xff]  ;;  %v3600_v39 = vpop.f32.mrf.mxu2  ;;  %v4003_v32 = vld [vmem:[#allocation11 + $0x350] sm:$0xff] }
 0x415   : > { %4058 = vmatpush.msra.mxu1 %v3916_v36  ;;  %4078 = vmatpush.msra.mxu2 %v3932_v55  ;;  %v3581_v36 = vadd.f32 %v3580_v46, %v3561_v34  ;;  %v3982_v55 = vld [vmem:[#allocation11 + $0x2a8] sm:$0xff]  ;;  %v4019_v63 = vld [vmem:[#allocation11 + $0x3d0] sm:$0xff] }
 0x416   : > { %4098 = vmatpush.msra.mxu3 %v3948_v28  ;;  %4039 = vmatpush.msra.mxu0 %v3899_v52  ;;  %v3620_v28 = vpop.f32.mrf.mxu3  ;;  %v3869_v52 = vperm.slane %v6280_v41, 4 }
 0x417   : > { %4059 = vmatpush.msra.mxu1 %v3915_v25  ;;  %4079 = vmatpush.msra.mxu2 %v3931_v60  ;;  %v3601_v9 = vadd.f32 %v3600_v39, %v3581_v36  ;;  %v3964_v25 = vld [vmem:[#allocation11 + $0x218] sm:$0xff]  ;;  %v3871_v39 = vperm.slane %v6280_v41, 6  ;;  %v4013_v36 = vld [vmem:[#allocation11 + $0x3a0] sm:$0xff] }
 0x418   : > { %4099 = vmatpush.msra.mxu3 %v3947_v38  ;;  %4040 = vmatpush.msra.mxu0 %v3898_v5  ;;  %v3980_v38 = vld [vmem:[#allocation11 + $0x298] sm:$0xff] }
 0x419   : > { %4060 = vmatpush.msra.mxu1 %v3914_v43  ;;  %4080 = vmatpush.msra.mxu2 %v3930_v15  ;;  %v3621_v57 = vadd.f32 %v3620_v28, %v3601_v9  ;;  %v3963_v43 = vld [vmem:[#allocation11 + $0x210] sm:$0xff]  ;;  %v4000_v15 = vld [vmem:[#allocation11 + $0x338] sm:$0xff] }
 0x41a   : > { %4100 = vmatpush.msra.mxu3 %v3946_v19  ;;  %4041 = vmatpush.msra.mxu0 %v3897_v40  ;;  %v4012_v9 = vld [vmem:[#allocation11 + $0x398] sm:$0xff] }
 0x41b   : > { %4061 = vmatpush.msra.mxu1 %v3913_v37  ;;  %4081 = vmatpush.msra.mxu2 %v3929_v50  ;;  %v3885_v19 = vadd.f32 %v3869_v52, %v3621_v57  ;;  %v3961_v37 = vld [vmem:[#allocation11 + $0x200] sm:$0xff] }
 0x41c   : > { %4101 = vmatpush.msra.mxu3 %v3945_v53  ;;  %4042 = vmatmul.f32.vlgmr.msra.gmra.mxu0 %v3889_v49  ;;  %v3977_v53 = vld [vmem:[#allocation11 + $0x280] sm:$0xff]  ;;  %v3999_v49 = vld [vmem:[#allocation11 + $0x330] sm:$0xff] }
 0x41d   : > { %4062 = vmatmul.f32.vlgmr.msra.gmra.mxu1 %v3890_v61  ;;  %4082 = vmatmul.f32.vlgmr.msra.gmra.mxu2 %v3891_v27  ;;  %v3998_v61 = vld [vmem:[#allocation11 + $0x328] sm:$0xff]  ;;  %v3893_v27 = vmax.f32 %v3885_v19, 0.0 }
 0x41e   : > { %4102 = vmatmul.f32.vlgmr.msra.gmra.mxu3 %v3892_v7  ;;  %4106 = vmatpush.msrb.mxu0 %v3976_v24  ;;  %v3870_v7 = vperm.slane %v6280_v41, 5 }
 0x41f   : > { %4126 = vmatpush.msrb.mxu1 %v3992_v1  ;;  %4146 = vmatpush.msrb.mxu2 %v4008_v30  ;;  %v3997_v1 = vld [vmem:[#allocation11 + $0x320] sm:$0xff] }
 0x420   : > { %4107 = vmatpush.msrb.mxu0 %v3975_v2  ;;  %v3993_v30 = vld [vmem:[#allocation11 + $0x300] sm:$0xff] }
 0x421   : > { %4127 = vmatpush.msrb.mxu1 %v3991_v35  ;;  %4147 = vmatpush.msrb.mxu2 %v4007_v22  ;;  %v4022_v22 = vld [vmem:[#allocation11 + $0x3e8] sm:$0xff] }
 0x422   : > { %4108 = vmatpush.msrb.mxu0 %v3974_v20 }
 0x423   : > { %4128 = vmatpush.msrb.mxu1 %v3990_v4  ;;  %4148 = vmatpush.msrb.mxu2 %v4006_v0  ;;  %v3996_v4 = vld [vmem:[#allocation11 + $0x318] sm:$0xff]  ;;  %v4018_v0 = vld [vmem:[#allocation11 + $0x3c8] sm:$0xff] }
 0x424   : > { %4109 = vmatpush.msrb.mxu0 %v3973_v13  ;;  %v3995_v13 = vld [vmem:[#allocation11 + $0x310] sm:$0xff] }
 0x425   : > { %4129 = vmatpush.msrb.mxu1 %v3989_v33  ;;  %4149 = vmatpush.msrb.mxu2 %v4005_v48  ;;  %v3994_v33 = vld [vmem:[#allocation11 + $0x308] sm:$0xff] }
 0x426   : > { %4110 = vmatpush.msrb.mxu0 %v3972_v21  ;;  %v4024_v21 = vld [vmem:[#allocation11 + $0x3f8] sm:$0xff] }
 0x427   : > { %4130 = vmatpush.msrb.mxu1 %v3988_v17  ;;  %4150 = vmatpush.msrb.mxu2 %v4004_v10  ;;  %v4023_v17 = vld [vmem:[#allocation11 + $0x3f0] sm:$0xff] }
 0x428   : > { %4111 = vmatpush.msrb.mxu0 %v3971_v58  ;;  %4166 = vmatpush.msrb.mxu3 %v4024_v21  ;;  %v4021_v58 = vld [vmem:[#allocation11 + $0x3e0] sm:$0xff]  ;;  %v4015_v10 = vld [vmem:[#allocation11 + $0x3b0] sm:$0xff] }
 0x429   : > { %4131 = vmatpush.msrb.mxu1 %v3987_v47  ;;  %4151 = vmatpush.msrb.mxu2 %v4003_v32  ;;  %v4020_v47 = vld [vmem:[#allocation11 + $0x3d8] sm:$0xff] }
 0x42a   : > { %4112 = vmatpush.msrb.mxu0 %v3970_v16  ;;  %4167 = vmatpush.msrb.mxu3 %v4023_v17  ;;  %v4017_v16 = vld [vmem:[#allocation11 + $0x3c0] sm:$0xff] }
 0x42b   : > { %4132 = vmatpush.msrb.mxu1 %v3986_v56  ;;  %4152 = vmatpush.msrb.mxu2 %v4002_v59 }
 0x42c   : > { %4113 = vmatpush.msrb.mxu0 %v3969_v3  ;;  %4168 = vmatpush.msrb.mxu3 %v4022_v22  ;;  %v4016_v3 = vld [vmem:[#allocation11 + $0x3b8] sm:$0xff] }
 0x42d   : > { %4133 = vmatpush.msrb.mxu1 %v3985_v12  ;;  %4153 = vmatpush.msrb.mxu2 %v4001_v23 }
 0x42e   : > { %4114 = vmatpush.msrb.mxu0 %v3968_v51  ;;  %v3640_v60 = vpop.f32.mrf.mxu0  ;;  %4169 = vmatpush.msrb.mxu3 %v4021_v58  ;;  %v4014_v51 = vld [vmem:[#allocation11 + $0x3a8] sm:$0xff] }
 0x42f   : > { %4134 = vmatpush.msrb.mxu1 %v3984_v18  ;;  %v3641_v5 = vadd.f32 %v3640_v60, %v6219_v62  ;;  %4154 = vmatpush.msrb.mxu2 %v4000_v15 }
 0x430   : > { %4115 = vmatpush.msrb.mxu0 %v3967_v44  ;;  %4170 = vmatpush.msrb.mxu3 %v4020_v47 }
 0x431   : > { %4135 = vmatpush.msrb.mxu1 %v3983_v31  ;;  %v3660_v6 = vpop.f32.mrf.mxu1  ;;  %4155 = vmatpush.msrb.mxu2 %v3999_v49 }
 0x432   : > { %4116 = vmatpush.msrb.mxu0 %v3966_v8  ;;  %v3661_v40 = vadd.f32 %v3660_v6, %v3641_v5  ;;  %4171 = vmatpush.msrb.mxu3 %v4019_v63  ;;  %v4010_v8 = vld [vmem:[#allocation11 + $0x388] sm:$0xff] }
 0x433   : > { %4136 = vmatpush.msrb.mxu1 %v3982_v55  ;;  %4156 = vmatpush.msrb.mxu2 %v3998_v61  ;;  %v4009_v55 = vld [vmem:[#allocation11 + $0x380] sm:$0xff] }
 0x434   : > { %4117 = vmatpush.msrb.mxu0 %v3965_v29  ;;  %4172 = vmatpush.msrb.mxu3 %v4018_v0 }
 0x435   : > { %4137 = vmatpush.msrb.mxu1 %v3981_v11  ;;  %v3680_v50 = vpop.f32.mrf.mxu2  ;;  %4157 = vmatpush.msrb.mxu2 %v3997_v1 }
 0x436   : > { %4118 = vmatpush.msrb.mxu0 %v3964_v25  ;;  %v3681_v62 = vadd.f32 %v3680_v50, %v3661_v40  ;;  %4173 = vmatpush.msrb.mxu3 %v4017_v16  ;;  %v3872_v25 = vperm.slane %v6280_v41, 7 }
 0x437   : > { %4138 = vmatpush.msrb.mxu1 %v3980_v38  ;;  %4158 = vmatpush.msrb.mxu2 %v3996_v4 }
 0x438   : > { %4119 = vmatpush.msrb.mxu0 %v3963_v43  ;;  %v3700_v24 = vpop.f32.mrf.mxu3  ;;  %4174 = vmatpush.msrb.mxu3 %v4016_v3 }
 0x439   : > { %4139 = vmatpush.msrb.mxu1 %v3979_v26  ;;  %v3701_v2 = vadd.f32 %v3700_v24, %v3681_v62  ;;  %4159 = vmatpush.msrb.mxu2 %v3995_v13  ;;  %v4025_v26 = vld [vmem:[#allocation12] sm:$0x1] }
 0x43a   : > { %4120 = vmatpush.msrb.mxu0 %v3962_v42  ;;  %4175 = vmatpush.msrb.mxu3 %v4015_v10 }
 0x43b   : > { %4140 = vmatpush.msrb.mxu1 %v3978_v14  ;;  %v3886_v35 = vadd.f32 %v3870_v7, %v3701_v2  ;;  %4160 = vmatpush.msrb.mxu2 %v3994_v33 }
 0x43c   : > { %4121 = vmatpush.msrb.mxu0 %v3961_v37  ;;  %4176 = vmatpush.msrb.mxu3 %v4014_v51 }
 0x43d   : > { %4141 = vmatpush.msrb.mxu1 %v3977_v53  ;;  %4122 = vmatmul.f32.vlgmr.msrb.gmra.mxu0 %v3893_v27  ;;  %v3894_v20 = vmax.f32 %v3886_v35, 0.0 }
 0x43e   : > { %4161 = vmatpush.msrb.mxu2 %v3993_v30  ;;  %4177 = vmatpush.msrb.mxu3 %v4013_v36 }
 0x43f   : > { %4142 = vmatmul.f32.vlgmr.msrb.gmra.mxu1 %v3894_v20 }
 0x440   : > { %4178 = vmatpush.msrb.mxu3 %v4012_v9 }
 0x454   : > { %v3720_v56 = vpop.f32.mrf.mxu0 }
 0x455   : > { %v3721_v48 = vadd.f32 %v3720_v56, %v6225_v54  ;;  %v4011_v54 = vld [vmem:[#allocation11 + $0x390] sm:$0xff] }
 0x456   : > { %4179 = vmatpush.msrb.mxu3 %v4011_v54 }
 0x458   : > { %v3740_v34 = vpop.f32.mrf.mxu1  ;;  %4180 = vmatpush.msrb.mxu3 %v4010_v8 }
 0x459   : > { %v3741_v12 = vadd.f32 %v3740_v34, %v3721_v48 }
 0x45a   : > { %4181 = vmatpush.msrb.mxu3 %v4009_v55 }
 0x45c   : > { %v3760_v46 = vpop.f32.mrf.mxu2 }
 0x45d   : > { %v3761_v18 = vadd.f32 %v3760_v46, %v3741_v12 }
 0x45f   : > { %v3780_v32 = vpop.f32.mrf.mxu3 }
 0x460   : > { %v3781_v44 = vadd.f32 %v3780_v32, %v3761_v18 }
 0x462   : > { %v3887_v31 = vadd.f32 %v3871_v39, %v3781_v44 }
 0x464   : > { %v3895_v59 = vmax.f32 %v3887_v31, 0.0 }
 0x466   : > { %4162 = vmatmul.f32.vlgmr.msrb.gmra.mxu2 %v3895_v59 }
 0x476   : > { %v3800_v28 = vpop.f32.mrf.mxu0 }
 0x477   : > { %v3801_v23 = vadd.f32 %v3800_v28, %v6231_v45 }
 0x47a   : > { %v3820_v29 = vpop.f32.mrf.mxu1 }
 0x47b   : > { %v3821_v11 = vadd.f32 %v3820_v29, %v3801_v23 }
 0x47e   : > { %v3840_v57 = vpop.f32.mrf.mxu2 }
 0x47f   : > { %v3841_v52 = vadd.f32 %v3840_v57, %v3821_v11 }
 0x481   : > { %v3860_v60 = vpop.f32.mrf.mxu3 }
 0x482   : > { %v3861_v38 = vadd.f32 %v3860_v60, %v3841_v52 }
 0x484   : > { %v3888_v5 = vadd.f32 %v3872_v25, %v3861_v38 }
 0x486   : > { %v3896_v43 = vmax.f32 %v3888_v5, 0.0 }
 0x488   : > { %4182 = vmatmul.f32.vlgmr.msrb.gmra.mxu3 %v3896_v43 }
 0x499   : > { %v4043_v6 = vpop.f32.mrf.mxu0 }
 0x49a   : > { %v4044_v15 = vadd.f32 %v4043_v6, %v4025_v26  ;;  %v4063_v19 = vpop.f32.mrf.mxu1 }
 0x49c   : > { %v4064_v14 = vadd.f32 %v4063_v19, %v4044_v15 }
 0x4a0   : > { %v4083_v42 = vpop.f32.mrf.mxu2 }
 0x4a1   : > { %v4084_v40 = vadd.f32 %v4083_v42, %v4064_v14  ;;  %v4103_v45 = vpop.f32.mrf.mxu3 }
 0x4a3   : > { %v4104_v50 = vadd.f32 %v4103_v45, %v4084_v40 }
 0x4ba   : > { %v4123_v37 = vpop.f32.mrf.mxu0 }
 0x4bb   : > { %v4124_v49 = vadd.f32 %v4123_v37, %v4104_v50 }
 0x4bc   : > { %v4143_v53 = vpop.f32.mrf.mxu1 }
 0x4bd   : > { %v4144_v41 = vadd.f32 %v4143_v53, %v4124_v49 }
 0x4e9   : > { %v4163_v62 = vpop.f32.mrf.mxu2 }
 0x4ea   : > { %v4164_v61 = vadd.f32 %v4163_v62, %v4144_v41 }
 0x50b   : > { %v4183_v27 = vpop.f32.mrf.mxu3 }
 0x50c   : > { %v4184_v7 = vadd.f32 %v4183_v27, %v4164_v61 }
 0x50e   : > { %4187 = vst.msk [vmem:[%s394_s15] sm:$0x1] %vm4186_vm5, %v4184_v7 }
 0x50f PF: > { %s21_s28 = sadd.s32 1, %s4694_s28   ;;  %s6540_s24 = smov %s4686_s26 }
 0x510   : > { %p18_p12 = scmp.ge.s32.totalorder %s21_s28, 6   ;;  %s6541_s25 = smov %s4690_s27 }
 0x511   : > { %s6542_s26 = smov %s6545_s20  ;;  %s6543_s27 = smov %s6549_s21 }
 0x512   :  { %20 = sbr.rel (!%p18_p12) target bundleno = 8 (0x8), region = 111 }
 0x517   :  { %4205 = vsyncpa [#allocation5], 1 }
 0x518   :  { %4207 = vsyncpa [#allocation5 + $0x1], 1 }
 0x519   :  { %4208 = vsyncpa [#allocation7], 1 }
 0x51a   :  { %4209 = vsyncpa [#allocation10], 1 }
 0x51b   :  { %4210 = vsyncpa [#allocation13], 1 }

</bundles_post_ra>
